<compile_context>
chip_gen: v5e
topology: v5e:2x2
jax: 0.10.0
libtpu: 0.0.40
codegen_flags: <defaults>
</compile_context>

<pallas_src>
import functools

import numpy as np
import jax
import jax.numpy as jnp
from jax.experimental import pallas as pl
from jax.experimental.pallas import tpu as pltpu

EPS = 1e-5  # PyTorch BatchNorm default eps

# enc_list of the PyTorch reference:
#   [('conv', (4,  8, 4, 2, 1, 'bn', LeakyReLU(0.2))),
#    ('conv', (8, 16, 4, 2, 1, 'bn', LeakyReLU(0.2))),
#    ('fc',   (16*4*4, 32, 'bn', ReLU()))]
CONV1 = (4, 8, 4, 2, 1)      # c_in, c_out, k, s, p
CONV2 = (8, 16, 4, 2, 1)
FC = (16 * 4 * 4, 32)


def _out_hw(ih, iw, k, s, p):
    return (ih + 2 * p - k) // s + 1, (iw + 2 * p - k) // s + 1


# ------------------------------ Pallas kernel ------------------------------- #
def _bn_lanes(y, s_ref, b_ref):
    """Training-mode BatchNorm: per-sublane-channel stats over the lane (batch*spatial) axis."""
    cnt = y.shape[1]
    mean = jnp.sum(y, axis=1, keepdims=True) * (1.0 / cnt)
    d = y - mean
    var = jnp.sum(d * d, axis=1, keepdims=True) * (1.0 / cnt)      # biased variance
    return d * (s_ref[...] * jax.lax.rsqrt(var + EPS)) + b_ref[...]


def _encoder_kernel(xT_ref, g1_ref, w1_ref, s1_ref, b1_ref,
                    g2_ref, w2_ref, s2_ref, b2_ref,
                    wfc_ref, sfc_ref, bfc_ref,
                    out_ref, p1_ref, p2_ref, fcin_ref, *, nb, ohw2):
    f32 = jnp.float32
    lrelu = lambda v: jnp.where(v >= 0.0, v, 0.2 * v)

    c1_in, _, k1, _, _ = CONV1
    c2_in, c2_out, k2, _, _ = CONV2

    # ---- conv1 + BN + LeakyReLU(0.2) --------------------------------------- #
    # im2col patches: p1[tap*c_in + ci, d] = x[ci, src(tap, d)] (zero-padded),
    # built with precomputed one-hot gather matmuls, written as contiguous
    # sublane blocks of the patch scratch.
    x = xT_ref[...]                                                # (c1_in, nb*ih*iw)
    for tap in range(k1 * k1):
        p1_ref[tap * c1_in:(tap + 1) * c1_in, :] = jnp.dot(
            x, g1_ref[tap], preferred_element_type=f32)            # (c1_in, n_dst1)
    a1 = lrelu(_bn_lanes(
        jnp.dot(w1_ref[...], p1_ref[...], preferred_element_type=f32),   # (c1_out, n_dst1), K=64
        s1_ref, b1_ref))

    # ---- conv2 + BN + LeakyReLU(0.2) --------------------------------------- #
    for tap in range(k2 * k2):
        p2_ref[tap * c2_in:(tap + 1) * c2_in, :] = jnp.dot(
            a1, g2_ref[tap], preferred_element_type=f32)           # (c2_in, n_dst2)
    a2 = lrelu(_bn_lanes(
        jnp.dot(w2_ref[...], p2_ref[...], preferred_element_type=f32),   # (c2_out, n_dst2), K=128
        s2_ref, b2_ref))

    # ---- fc + BatchNorm1d(batch) + ReLU ------------------------------------ #
    # PyTorch's NCHW flatten: fc_in[n, c*ohw + hw] = a2[c, n*ohw + hw].  Assembled
    # with static slice copies into a (nb, c2_out*ohw) scratch, then ONE matmul.
    for c in range(c2_out):
        for n in range(nb):
            fcin_ref[n:n + 1, c * ohw2:(c + 1) * ohw2] = \
                a2[c:c + 1, n * ohw2:(n + 1) * ohw2]

    y = jnp.dot(fcin_ref[...], wfc_ref[...], preferred_element_type=f32)  # (nb, fc_out)
    mean = jnp.sum(y, axis=0, keepdims=True) * (1.0 / nb)
    d = y - mean
    var = jnp.sum(d * d, axis=0, keepdims=True) * (1.0 / nb)
    yn = d * (sfc_ref[...] * jax.lax.rsqrt(var + EPS)) + bfc_ref[...]
    out_ref[...] = jnp.maximum(yn, 0.0)                            # single lane-dense store


# ------------------------------- host packing -------------------------------- #
def build_gather_constants(nb, ih, iw):
    """Per-tap one-hot gather operators (pure functions of the static shapes):
    G[tap, s, d] = 1 iff input position s feeds tap (kh, kw) of output position d.
    Position index convention everywhere: n*(H*W) + h*W + w (batch-major)."""
    def one_conv(h_in, w_in, k, stride, pad):
        oh, ow = _out_hw(h_in, w_in, k, stride, pad)
        n_src, n_dst = nb * h_in * w_in, nb * oh * ow
        d = np.arange(n_dst)
        bi, r, c = d // (oh * ow), (d // ow) % oh, d % ow
        h0, w0 = stride * r - pad, stride * c - pad
        g = np.zeros((k * k, n_src, n_dst), np.float32)
        for kh in range(k):
            for kw in range(k):
                hh, ww = h0 + kh, w0 + kw
                ok = (hh >= 0) & (hh < h_in) & (ww >= 0) & (ww < w_in)
                src = bi * (h_in * w_in) + hh * w_in + ww
                dd = np.nonzero(ok)[0]
                g[kh * k + kw, src[dd], dd] = 1.0
        return jnp.asarray(g), oh, ow

    _, _, k1, s1, p1 = CONV1
    _, _, k2, s2, p2 = CONV2
    g1, oh1, ow1 = one_conv(ih, iw, k1, s1, p1)
    g2, _, _ = one_conv(oh1, ow1, k2, s2, p2)
    return g1, g2


def pack_params(params):
    """One-time offline packing into kernel layouts (im2col conv weights with
    column order tap*c_in + ci, column/row BN params, transposed fc weight).
    Biases are dropped: exactly cancelled by training-mode BatchNorm."""
    p1, p2, p3 = params

    def conv_w(w):  # (c_out, c_in, kh, kw) -> (c_out, k*k*c_in), col = (kh*k+kw)*c_in + ci
        co, ci, kh, kw = w.shape
        return jnp.transpose(w, (0, 2, 3, 1)).reshape(co, kh * kw * ci).astype(jnp.float32)

    col = lambda v: v.reshape(-1, 1).astype(jnp.float32)
    row = lambda v: v.reshape(1, -1).astype(jnp.float32)
    return (conv_w(p1["w"]), col(p1["gamma"]), col(p1["beta"]),
            conv_w(p2["w"]), col(p2["gamma"]), col(p2["beta"]),
            jnp.transpose(p3["w"]).astype(jnp.float32), row(p3["gamma"]), row(p3["beta"]))


@jax.jit
def encoder_forward(x_nchw, g1, g2, packed):
    nb, ci, ih, iw = x_nchw.shape
    w1, s1, b1, w2, s2, b2, wfc, sfc, bfc = packed
    _, c1_out, k1, st1, pd1 = CONV1
    c2_in, c2_out, k2, st2, pd2 = CONV2
    oh1, ow1 = _out_hw(ih, iw, k1, st1, pd1)
    oh2, ow2 = _out_hw(oh1, ow1, k2, st2, pd2)

    # Only host-side op: NCHW -> (channels, n*h*w) layout at the module boundary.
    xT = jnp.transpose(x_nchw, (1, 0, 2, 3)).reshape(ci, nb * ih * iw).astype(jnp.float32)

    vmem = pl.BlockSpec(memory_space=pltpu.MemorySpace.VMEM)
    return pl.pallas_call(
        functools.partial(_encoder_kernel, nb=nb, ohw2=oh2 * ow2),
        out_shape=jax.ShapeDtypeStruct((nb, FC[1]), jnp.float32),
        in_specs=[vmem] * 12,
        out_specs=vmem,
        scratch_shapes=[
            pltpu.VMEM((k1 * k1 * ci, nb * oh1 * ow1), jnp.float32),     # conv1 im2col patches
            pltpu.VMEM((k2 * k2 * c2_in, nb * oh2 * ow2), jnp.float32),  # conv2 im2col patches
            pltpu.VMEM((nb, c2_out * oh2 * ow2), jnp.float32),           # flattened fc input
        ],
        compiler_params=pltpu.CompilerParams(vmem_limit_bytes=32 * 1024 * 1024),
    )(xT, g1, w1, s1, b1, g2, w2, s2, b2, wfc, sfc, bfc)


# ------------------------- params + XLA reference ---------------------------- #
def init_params(key):
    """PyTorch-layout parameters.  weights_init: Conv*/BatchNorm* weight ~ N(0, 0.02),
    BatchNorm bias = 0.  Conv/Linear biases are kept (used by the reference) even
    though the fused kernel drops them (BN-cancelled)."""
    normal = lambda k, shape, std: std * jax.random.normal(k, shape, jnp.float32)
    ks = jax.random.split(key, 9)
    c1i, c1o, k1, _, _ = CONV1
    c2i, c2o, k2, _, _ = CONV2
    fin, fout = FC
    p1 = dict(w=normal(ks[0], (c1o, c1i, k1, k1), 0.02), b=normal(ks[1], (c1o,), 0.01),
              gamma=normal(ks[2], (c1o,), 0.02), beta=jnp.zeros((c1o,), jnp.float32))
    p2 = dict(w=normal(ks[3], (c2o, c2i, k2, k2), 0.02), b=normal(ks[4], (c2o,), 0.01),
              gamma=normal(ks[5], (c2o,), 0.02), beta=jnp.zeros((c2o,), jnp.float32))
    p3 = dict(w=normal(ks[6], (fout, fin), 0.02), b=normal(ks[7], (fout,), 0.01),
              gamma=normal(ks[8], (fout,), 0.02), beta=jnp.zeros((fout,), jnp.float32))
    return p1, p2, p3


def reference_forward(x, params):
    """Pure-XLA reference with PyTorch training-mode semantics (biases included)."""
    p1, p2, p3 = params

    def bn(y, g, b, axes):
        m = jnp.mean(y, axis=axes, keepdims=True)
        v = jnp.mean((y - m) ** 2, axis=axes, keepdims=True)
        shp = [1] * y.ndim
        shp[1] = -1
        return (y - m) * jax.lax.rsqrt(v + EPS) * g.reshape(shp) + b.reshape(shp)

    def conv_block(y, p, stride, pad):
        y = jax.lax.conv_general_dilated(
            y, p["w"], (stride, stride), ((pad, pad), (pad, pad)),
            dimension_numbers=("NCHW", "OIHW", "NCHW"),
            precision=jax.lax.Precision.HIGHEST)
        y = y + p["b"].reshape(1, -1, 1, 1)
        y = bn(y, p["gamma"], p["beta"], (0, 2, 3))
        return jnp.where(y >= 0, y, 0.2 * y)

    y = conv_block(x, p1, CONV1[3], CONV1[4])
    y = conv_block(y, p2, CONV2[3], CONV2[4])
    y = y.reshape(y.shape[0], -1)                                   # NCHW flatten
    y = jnp.dot(y, p3["w"].T, precision=jax.lax.Precision.HIGHEST) + p3["b"]
    y = bn(y, p3["gamma"], p3["beta"], (0,))
    return jnp.maximum(y, 0.0)


# ---------------------------------- main ------------------------------------- #
if __name__ == "__main__":
    key = jax.random.PRNGKey(0)
    kx, kp = jax.random.split(key)
    x = jax.random.normal(kx, (2, 4, 16, 16), jnp.float32)   # NCHW, like the PyTorch module
    params = init_params(kp)
    packed = pack_params(params)                             # offline, once
    nb, _, ih, iw = x.shape
    g1, g2 = build_gather_constants(nb, ih, iw)              # offline, shape-only constants

    out = jax.block_until_ready(encoder_forward(x, g1, g2, packed))
    assert out.shape == (2, 32), out.shape
    assert bool(jnp.all(jnp.isfinite(out)))

    ref = reference_forward(x, params)
    max_err = float(jnp.max(jnp.abs(out - ref)))
    assert max_err < 1e-3, f"mismatch vs XLA reference: {max_err}"
    print("KERNEL_OK")
</pallas_src>

<mosaic_0001>
module attributes {stable_mosaic.version = 11 : i64} {
  func.func @_encoder_kernel(%arg0: memref<4x512xf32, #tpu.memory_space<vmem>>, %arg1: memref<16x512x128xf32, #tpu.memory_space<vmem>>, %arg2: memref<8x64xf32, #tpu.memory_space<vmem>>, %arg3: memref<8x1xf32, #tpu.memory_space<vmem>>, %arg4: memref<8x1xf32, #tpu.memory_space<vmem>>, %arg5: memref<16x128x32xf32, #tpu.memory_space<vmem>>, %arg6: memref<16x128xf32, #tpu.memory_space<vmem>>, %arg7: memref<16x1xf32, #tpu.memory_space<vmem>>, %arg8: memref<16x1xf32, #tpu.memory_space<vmem>>, %arg9: memref<256x32xf32, #tpu.memory_space<vmem>>, %arg10: memref<1x32xf32, #tpu.memory_space<vmem>>, %arg11: memref<1x32xf32, #tpu.memory_space<vmem>>, %arg12: memref<2x32xf32, #tpu.memory_space<vmem>>, %arg13: memref<64x128xf32, #tpu.memory_space<vmem>>, %arg14: memref<128x32xf32, #tpu.memory_space<vmem>>, %arg15: memref<2x256xf32, #tpu.memory_space<vmem>>) attributes {dimension_semantics = [], scalar_prefetch = 0 : i64, scratch_operands = 3 : i64, tpu.core_type = #tpu.core_type<tc>} {
    %c0 = arith.constant 0 : index
    %c0_0 = arith.constant 0 : index
    %0 = vector.load %arg0[%c0, %c0_0] : memref<4x512xf32, #tpu.memory_space<vmem>>, vector<4x512xf32>
    %c0_1 = arith.constant 0 : index
    %c0_2 = arith.constant 0 : index
    %c0_3 = arith.constant 0 : index
    %1 = vector.load %arg1[%c0_1, %c0_2, %c0_3] : memref<16x512x128xf32, #tpu.memory_space<vmem>>, vector<1x512x128xf32>
    %2 = vector.shape_cast %1 : vector<1x512x128xf32> to vector<512x128xf32>
    %cst = arith.constant dense<0.000000e+00> : vector<4x128xf32>
    %3 = tpu.matmul %0, %2, %cst {dimension_numbers = #tpu.dot_dimension_numbers<[1], [0], [0], [1], [0, 0, 1, 1], [], []>} : vector<4x512xf32>, vector<512x128xf32>, vector<4x128xf32> -> vector<4x128xf32>
    %c0_4 = arith.constant 0 : index
    %c0_5 = arith.constant 0 : index
    %4 = vector.load %arg13[%c0_4, %c0_5] : memref<64x128xf32, #tpu.memory_space<vmem>>, vector<4x128xf32>
    tpu.vector_store %arg13[%c0_4, %c0_5], %3 {strides = array<i32>} : memref<64x128xf32, #tpu.memory_space<vmem>>, vector<4x128xf32>,
    %c1 = arith.constant 1 : index
    %c0_6 = arith.constant 0 : index
    %c0_7 = arith.constant 0 : index
    %5 = vector.load %arg1[%c1, %c0_6, %c0_7] : memref<16x512x128xf32, #tpu.memory_space<vmem>>, vector<1x512x128xf32>
    %6 = vector.shape_cast %5 : vector<1x512x128xf32> to vector<512x128xf32>
    %cst_8 = arith.constant dense<0.000000e+00> : vector<4x128xf32>
    %7 = tpu.matmul %0, %6, %cst_8 {dimension_numbers = #tpu.dot_dimension_numbers<[1], [0], [0], [1], [0, 0, 1, 1], [], []>} : vector<4x512xf32>, vector<512x128xf32>, vector<4x128xf32> -> vector<4x128xf32>
    %c4 = arith.constant 4 : index
    %c0_9 = arith.constant 0 : index
    %8 = vector.load %arg13[%c4, %c0_9] : memref<64x128xf32, #tpu.memory_space<vmem>>, vector<4x128xf32>
    tpu.vector_store %arg13[%c4, %c0_9], %7 {strides = array<i32>} : memref<64x128xf32, #tpu.memory_space<vmem>>, vector<4x128xf32>,
    %c2 = arith.constant 2 : index
    %c0_10 = arith.constant 0 : index
    %c0_11 = arith.constant 0 : index
    %9 = vector.load %arg1[%c2, %c0_10, %c0_11] : memref<16x512x128xf32, #tpu.memory_space<vmem>>, vector<1x512x128xf32>
    %10 = vector.shape_cast %9 : vector<1x512x128xf32> to vector<512x128xf32>
    %cst_12 = arith.constant dense<0.000000e+00> : vector<4x128xf32>
    %11 = tpu.matmul %0, %10, %cst_12 {dimension_numbers = #tpu.dot_dimension_numbers<[1], [0], [0], [1], [0, 0, 1, 1], [], []>} : vector<4x512xf32>, vector<512x128xf32>, vector<4x128xf32> -> vector<4x128xf32>
    %c8 = arith.constant 8 : index
    %c0_13 = arith.constant 0 : index
    %12 = vector.load %arg13[%c8, %c0_13] : memref<64x128xf32, #tpu.memory_space<vmem>>, vector<4x128xf32>
    tpu.vector_store %arg13[%c8, %c0_13], %11 {strides = array<i32>} : memref<64x128xf32, #tpu.memory_space<vmem>>, vector<4x128xf32>,
    %c3 = arith.constant 3 : index
    %c0_14 = arith.constant 0 : index
    %c0_15 = arith.constant 0 : index
    %13 = vector.load %arg1[%c3, %c0_14, %c0_15] : memref<16x512x128xf32, #tpu.memory_space<vmem>>, vector<1x512x128xf32>
    %14 = vector.shape_cast %13 : vector<1x512x128xf32> to vector<512x128xf32>
    %cst_16 = arith.constant dense<0.000000e+00> : vector<4x128xf32>
    %15 = tpu.matmul %0, %14, %cst_16 {dimension_numbers = #tpu.dot_dimension_numbers<[1], [0], [0], [1], [0, 0, 1, 1], [], []>} : vector<4x512xf32>, vector<512x128xf32>, vector<4x128xf32> -> vector<4x128xf32>
    %c12 = arith.constant 12 : index
    %c0_17 = arith.constant 0 : index
    %16 = vector.load %arg13[%c12, %c0_17] : memref<64x128xf32, #tpu.memory_space<vmem>>, vector<4x128xf32>
    tpu.vector_store %arg13[%c12, %c0_17], %15 {strides = array<i32>} : memref<64x128xf32, #tpu.memory_space<vmem>>, vector<4x128xf32>,
    %c4_18 = arith.constant 4 : index
    %c0_19 = arith.constant 0 : index
    %c0_20 = arith.constant 0 : index
    %17 = vector.load %arg1[%c4_18, %c0_19, %c0_20] : memref<16x512x128xf32, #tpu.memory_space<vmem>>, vector<1x512x128xf32>
    %18 = vector.shape_cast %17 : vector<1x512x128xf32> to vector<512x128xf32>
    %cst_21 = arith.constant dense<0.000000e+00> : vector<4x128xf32>
    %19 = tpu.matmul %0, %18, %cst_21 {dimension_numbers = #tpu.dot_dimension_numbers<[1], [0], [0], [1], [0, 0, 1, 1], [], []>} : vector<4x512xf32>, vector<512x128xf32>, vector<4x128xf32> -> vector<4x128xf32>
    %c16 = arith.constant 16 : index
    %c0_22 = arith.constant 0 : index
    %20 = vector.load %arg13[%c16, %c0_22] : memref<64x128xf32, #tpu.memory_space<vmem>>, vector<4x128xf32>
    tpu.vector_store %arg13[%c16, %c0_22], %19 {strides = array<i32>} : memref<64x128xf32, #tpu.memory_space<vmem>>, vector<4x128xf32>,
    %c5 = arith.constant 5 : index
    %c0_23 = arith.constant 0 : index
    %c0_24 = arith.constant 0 : index
    %21 = vector.load %arg1[%c5, %c0_23, %c0_24] : memref<16x512x128xf32, #tpu.memory_space<vmem>>, vector<1x512x128xf32>
    %22 = vector.shape_cast %21 : vector<1x512x128xf32> to vector<512x128xf32>
    %cst_25 = arith.constant dense<0.000000e+00> : vector<4x128xf32>
    %23 = tpu.matmul %0, %22, %cst_25 {dimension_numbers = #tpu.dot_dimension_numbers<[1], [0], [0], [1], [0, 0, 1, 1], [], []>} : vector<4x512xf32>, vector<512x128xf32>, vector<4x128xf32> -> vector<4x128xf32>
    %c20 = arith.constant 20 : index
    %c0_26 = arith.constant 0 : index
    %24 = vector.load %arg13[%c20, %c0_26] : memref<64x128xf32, #tpu.memory_space<vmem>>, vector<4x128xf32>
    tpu.vector_store %arg13[%c20, %c0_26], %23 {strides = array<i32>} : memref<64x128xf32, #tpu.memory_space<vmem>>, vector<4x128xf32>,
    %c6 = arith.constant 6 : index
    %c0_27 = arith.constant 0 : index
    %c0_28 = arith.constant 0 : index
    %25 = vector.load %arg1[%c6, %c0_27, %c0_28] : memref<16x512x128xf32, #tpu.memory_space<vmem>>, vector<1x512x128xf32>
    %26 = vector.shape_cast %25 : vector<1x512x128xf32> to vector<512x128xf32>
    %cst_29 = arith.constant dense<0.000000e+00> : vector<4x128xf32>
    %27 = tpu.matmul %0, %26, %cst_29 {dimension_numbers = #tpu.dot_dimension_numbers<[1], [0], [0], [1], [0, 0, 1, 1], [], []>} : vector<4x512xf32>, vector<512x128xf32>, vector<4x128xf32> -> vector<4x128xf32>
    %c24 = arith.constant 24 : index
    %c0_30 = arith.constant 0 : index
    %28 = vector.load %arg13[%c24, %c0_30] : memref<64x128xf32, #tpu.memory_space<vmem>>, vector<4x128xf32>
    tpu.vector_store %arg13[%c24, %c0_30], %27 {strides = array<i32>} : memref<64x128xf32, #tpu.memory_space<vmem>>, vector<4x128xf32>,
    %c7 = arith.constant 7 : index
    %c0_31 = arith.constant 0 : index
    %c0_32 = arith.constant 0 : index
    %29 = vector.load %arg1[%c7, %c0_31, %c0_32] : memref<16x512x128xf32, #tpu.memory_space<vmem>>, vector<1x512x128xf32>
    %30 = vector.shape_cast %29 : vector<1x512x128xf32> to vector<512x128xf32>
    %cst_33 = arith.constant dense<0.000000e+00> : vector<4x128xf32>
    %31 = tpu.matmul %0, %30, %cst_33 {dimension_numbers = #tpu.dot_dimension_numbers<[1], [0], [0], [1], [0, 0, 1, 1], [], []>} : vector<4x512xf32>, vector<512x128xf32>, vector<4x128xf32> -> vector<4x128xf32>
    %c28 = arith.constant 28 : index
    %c0_34 = arith.constant 0 : index
    %32 = vector.load %arg13[%c28, %c0_34] : memref<64x128xf32, #tpu.memory_space<vmem>>, vector<4x128xf32>
    tpu.vector_store %arg13[%c28, %c0_34], %31 {strides = array<i32>} : memref<64x128xf32, #tpu.memory_space<vmem>>, vector<4x128xf32>,
    %c8_35 = arith.constant 8 : index
    %c0_36 = arith.constant 0 : index
    %c0_37 = arith.constant 0 : index
    %33 = vector.load %arg1[%c8_35, %c0_36, %c0_37] : memref<16x512x128xf32, #tpu.memory_space<vmem>>, vector<1x512x128xf32>
    %34 = vector.shape_cast %33 : vector<1x512x128xf32> to vector<512x128xf32>
    %cst_38 = arith.constant dense<0.000000e+00> : vector<4x128xf32>
    %35 = tpu.matmul %0, %34, %cst_38 {dimension_numbers = #tpu.dot_dimension_numbers<[1], [0], [0], [1], [0, 0, 1, 1], [], []>} : vector<4x512xf32>, vector<512x128xf32>, vector<4x128xf32> -> vector<4x128xf32>
    %c32 = arith.constant 32 : index
    %c0_39 = arith.constant 0 : index
    %36 = vector.load %arg13[%c32, %c0_39] : memref<64x128xf32, #tpu.memory_space<vmem>>, vector<4x128xf32>
    tpu.vector_store %arg13[%c32, %c0_39], %35 {strides = array<i32>} : memref<64x128xf32, #tpu.memory_space<vmem>>, vector<4x128xf32>,
    %c9 = arith.constant 9 : index
    %c0_40 = arith.constant 0 : index
    %c0_41 = arith.constant 0 : index
    %37 = vector.load %arg1[%c9, %c0_40, %c0_41] : memref<16x512x128xf32, #tpu.memory_space<vmem>>, vector<1x512x128xf32>
    %38 = vector.shape_cast %37 : vector<1x512x128xf32> to vector<512x128xf32>
    %cst_42 = arith.constant dense<0.000000e+00> : vector<4x128xf32>
    %39 = tpu.matmul %0, %38, %cst_42 {dimension_numbers = #tpu.dot_dimension_numbers<[1], [0], [0], [1], [0, 0, 1, 1], [], []>} : vector<4x512xf32>, vector<512x128xf32>, vector<4x128xf32> -> vector<4x128xf32>
    %c36 = arith.constant 36 : index
    %c0_43 = arith.constant 0 : index
    %40 = vector.load %arg13[%c36, %c0_43] : memref<64x128xf32, #tpu.memory_space<vmem>>, vector<4x128xf32>
    tpu.vector_store %arg13[%c36, %c0_43], %39 {strides = array<i32>} : memref<64x128xf32, #tpu.memory_space<vmem>>, vector<4x128xf32>,
    %c10 = arith.constant 10 : index
    %c0_44 = arith.constant 0 : index
    %c0_45 = arith.constant 0 : index
    %41 = vector.load %arg1[%c10, %c0_44, %c0_45] : memref<16x512x128xf32, #tpu.memory_space<vmem>>, vector<1x512x128xf32>
    %42 = vector.shape_cast %41 : vector<1x512x128xf32> to vector<512x128xf32>
    %cst_46 = arith.constant dense<0.000000e+00> : vector<4x128xf32>
    %43 = tpu.matmul %0, %42, %cst_46 {dimension_numbers = #tpu.dot_dimension_numbers<[1], [0], [0], [1], [0, 0, 1, 1], [], []>} : vector<4x512xf32>, vector<512x128xf32>, vector<4x128xf32> -> vector<4x128xf32>
    %c40 = arith.constant 40 : index
    %c0_47 = arith.constant 0 : index
    %44 = vector.load %arg13[%c40, %c0_47] : memref<64x128xf32, #tpu.memory_space<vmem>>, vector<4x128xf32>
    tpu.vector_store %arg13[%c40, %c0_47], %43 {strides = array<i32>} : memref<64x128xf32, #tpu.memory_space<vmem>>, vector<4x128xf32>,
    %c11 = arith.constant 11 : index
    %c0_48 = arith.constant 0 : index
    %c0_49 = arith.constant 0 : index
    %45 = vector.load %arg1[%c11, %c0_48, %c0_49] : memref<16x512x128xf32, #tpu.memory_space<vmem>>, vector<1x512x128xf32>
    %46 = vector.shape_cast %45 : vector<1x512x128xf32> to vector<512x128xf32>
    %cst_50 = arith.constant dense<0.000000e+00> : vector<4x128xf32>
    %47 = tpu.matmul %0, %46, %cst_50 {dimension_numbers = #tpu.dot_dimension_numbers<[1], [0], [0], [1], [0, 0, 1, 1], [], []>} : vector<4x512xf32>, vector<512x128xf32>, vector<4x128xf32> -> vector<4x128xf32>
    %c44 = arith.constant 44 : index
    %c0_51 = arith.constant 0 : index
    %48 = vector.load %arg13[%c44, %c0_51] : memref<64x128xf32, #tpu.memory_space<vmem>>, vector<4x128xf32>
    tpu.vector_store %arg13[%c44, %c0_51], %47 {strides = array<i32>} : memref<64x128xf32, #tpu.memory_space<vmem>>, vector<4x128xf32>,
    %c12_52 = arith.constant 12 : index
    %c0_53 = arith.constant 0 : index
    %c0_54 = arith.constant 0 : index
    %49 = vector.load %arg1[%c12_52, %c0_53, %c0_54] : memref<16x512x128xf32, #tpu.memory_space<vmem>>, vector<1x512x128xf32>
    %50 = vector.shape_cast %49 : vector<1x512x128xf32> to vector<512x128xf32>
    %cst_55 = arith.constant dense<0.000000e+00> : vector<4x128xf32>
    %51 = tpu.matmul %0, %50, %cst_55 {dimension_numbers = #tpu.dot_dimension_numbers<[1], [0], [0], [1], [0, 0, 1, 1], [], []>} : vector<4x512xf32>, vector<512x128xf32>, vector<4x128xf32> -> vector<4x128xf32>
    %c48 = arith.constant 48 : index
    %c0_56 = arith.constant 0 : index
    %52 = vector.load %arg13[%c48, %c0_56] : memref<64x128xf32, #tpu.memory_space<vmem>>, vector<4x128xf32>
    tpu.vector_store %arg13[%c48, %c0_56], %51 {strides = array<i32>} : memref<64x128xf32, #tpu.memory_space<vmem>>, vector<4x128xf32>,
    %c13 = arith.constant 13 : index
    %c0_57 = arith.constant 0 : index
    %c0_58 = arith.constant 0 : index
    %53 = vector.load %arg1[%c13, %c0_57, %c0_58] : memref<16x512x128xf32, #tpu.memory_space<vmem>>, vector<1x512x128xf32>
    %54 = vector.shape_cast %53 : vector<1x512x128xf32> to vector<512x128xf32>
    %cst_59 = arith.constant dense<0.000000e+00> : vector<4x128xf32>
    %55 = tpu.matmul %0, %54, %cst_59 {dimension_numbers = #tpu.dot_dimension_numbers<[1], [0], [0], [1], [0, 0, 1, 1], [], []>} : vector<4x512xf32>, vector<512x128xf32>, vector<4x128xf32> -> vector<4x128xf32>
    %c52 = arith.constant 52 : index
    %c0_60 = arith.constant 0 : index
    %56 = vector.load %arg13[%c52, %c0_60] : memref<64x128xf32, #tpu.memory_space<vmem>>, vector<4x128xf32>
    tpu.vector_store %arg13[%c52, %c0_60], %55 {strides = array<i32>} : memref<64x128xf32, #tpu.memory_space<vmem>>, vector<4x128xf32>,
    %c14 = arith.constant 14 : index
    %c0_61 = arith.constant 0 : index
    %c0_62 = arith.constant 0 : index
    %57 = vector.load %arg1[%c14, %c0_61, %c0_62] : memref<16x512x128xf32, #tpu.memory_space<vmem>>, vector<1x512x128xf32>
    %58 = vector.shape_cast %57 : vector<1x512x128xf32> to vector<512x128xf32>
    %cst_63 = arith.constant dense<0.000000e+00> : vector<4x128xf32>
    %59 = tpu.matmul %0, %58, %cst_63 {dimension_numbers = #tpu.dot_dimension_numbers<[1], [0], [0], [1], [0, 0, 1, 1], [], []>} : vector<4x512xf32>, vector<512x128xf32>, vector<4x128xf32> -> vector<4x128xf32>
    %c56 = arith.constant 56 : index
    %c0_64 = arith.constant 0 : index
    %60 = vector.load %arg13[%c56, %c0_64] : memref<64x128xf32, #tpu.memory_space<vmem>>, vector<4x128xf32>
    tpu.vector_store %arg13[%c56, %c0_64], %59 {strides = array<i32>} : memref<64x128xf32, #tpu.memory_space<vmem>>, vector<4x128xf32>,
    %c15 = arith.constant 15 : index
    %c0_65 = arith.constant 0 : index
    %c0_66 = arith.constant 0 : index
    %61 = vector.load %arg1[%c15, %c0_65, %c0_66] : memref<16x512x128xf32, #tpu.memory_space<vmem>>, vector<1x512x128xf32>
    %62 = vector.shape_cast %61 : vector<1x512x128xf32> to vector<512x128xf32>
    %cst_67 = arith.constant dense<0.000000e+00> : vector<4x128xf32>
    %63 = tpu.matmul %0, %62, %cst_67 {dimension_numbers = #tpu.dot_dimension_numbers<[1], [0], [0], [1], [0, 0, 1, 1], [], []>} : vector<4x512xf32>, vector<512x128xf32>, vector<4x128xf32> -> vector<4x128xf32>
    %c60 = arith.constant 60 : index
    %c0_68 = arith.constant 0 : index
    %64 = vector.load %arg13[%c60, %c0_68] : memref<64x128xf32, #tpu.memory_space<vmem>>, vector<4x128xf32>
    tpu.vector_store %arg13[%c60, %c0_68], %63 {strides = array<i32>} : memref<64x128xf32, #tpu.memory_space<vmem>>, vector<4x128xf32>,
    %c0_69 = arith.constant 0 : index
    %c0_70 = arith.constant 0 : index
    %65 = vector.load %arg2[%c0_69, %c0_70] : memref<8x64xf32, #tpu.memory_space<vmem>>, vector<8x64xf32>
    %c0_71 = arith.constant 0 : index
    %c0_72 = arith.constant 0 : index
    %66 = vector.load %arg13[%c0_71, %c0_72] : memref<64x128xf32, #tpu.memory_space<vmem>>, vector<64x128xf32>
    %cst_73 = arith.constant dense<0.000000e+00> : vector<8x128xf32>
    %67 = tpu.matmul %65, %66, %cst_73 {dimension_numbers = #tpu.dot_dimension_numbers<[1], [0], [0], [1], [0, 0, 1, 1], [], []>} : vector<8x64xf32>, vector<64x128xf32>, vector<8x128xf32> -> vector<8x128xf32>
    %cst_74 = arith.constant dense<0.000000e+00> : vector<8xf32>
    %68 = vector.multi_reduction <add>, %67, %cst_74 [1] : vector<8x128xf32> to vector<8xf32>
    %69 = vector.shape_cast %68 : vector<8xf32> to vector<8x1xf32>
    %cst_75 = arith.constant 7.812500e-03 : f32
    %70 = vector.broadcast %cst_75 : f32 to vector<8x1xf32>
    %71 = arith.mulf %69, %70 : vector<8x1xf32>
    %72 = vector.broadcast %71 : vector<8x1xf32> to vector<8x128xf32>
    %73 = arith.subf %67, %72 : vector<8x128xf32>
    %74 = arith.mulf %73, %73 : vector<8x128xf32>
    %cst_76 = arith.constant dense<0.000000e+00> : vector<8xf32>
    %75 = vector.multi_reduction <add>, %74, %cst_76 [1] : vector<8x128xf32> to vector<8xf32>
    %76 = vector.shape_cast %75 : vector<8xf32> to vector<8x1xf32>
    %cst_77 = arith.constant 7.812500e-03 : f32
    %77 = vector.broadcast %cst_77 : f32 to vector<8x1xf32>
    %78 = arith.mulf %76, %77 : vector<8x1xf32>
    %c0_78 = arith.constant 0 : index
    %c0_79 = arith.constant 0 : index
    %79 = vector.load %arg3[%c0_78, %c0_79] : memref<8x1xf32, #tpu.memory_space<vmem>>, vector<8x1xf32>
    %cst_80 = arith.constant 9.99999974E-6 : f32
    %80 = vector.broadcast %cst_80 : f32 to vector<8x1xf32>
    %81 = arith.addf %78, %80 : vector<8x1xf32>
    %82 = math.rsqrt %81 : vector<8x1xf32>
    %83 = arith.mulf %79, %82 : vector<8x1xf32>
    %84 = vector.broadcast %83 : vector<8x1xf32> to vector<8x128xf32>
    %85 = arith.mulf %73, %84 : vector<8x128xf32>
    %c0_81 = arith.constant 0 : index
    %c0_82 = arith.constant 0 : index
    %86 = vector.load %arg4[%c0_81, %c0_82] : memref<8x1xf32, #tpu.memory_space<vmem>>, vector<8x1xf32>
    %87 = vector.broadcast %86 : vector<8x1xf32> to vector<8x128xf32>
    %88 = arith.addf %85, %87 : vector<8x128xf32>
    %cst_83 = arith.constant 0.000000e+00 : f32
    %89 = vector.broadcast %cst_83 : f32 to vector<8x128xf32>
    %90 = arith.cmpf oge, %88, %89 : vector<8x128xf32>
    %cst_84 = arith.constant 2.000000e-01 : f32
    %91 = vector.broadcast %cst_84 : f32 to vector<8x128xf32>
    %92 = arith.mulf %91, %88 : vector<8x128xf32>
    %93 = arith.select %90, %88, %92 : vector<8x128xi1>, vector<8x128xf32>
    %c0_85 = arith.constant 0 : index
    %c0_86 = arith.constant 0 : index
    %c0_87 = arith.constant 0 : index
    %94 = vector.load %arg5[%c0_85, %c0_86, %c0_87] : memref<16x128x32xf32, #tpu.memory_space<vmem>>, vector<1x128x32xf32>
    %95 = vector.shape_cast %94 : vector<1x128x32xf32> to vector<128x32xf32>
    %cst_88 = arith.constant dense<0.000000e+00> : vector<8x32xf32>
    %96 = tpu.matmul %93, %95, %cst_88 {dimension_numbers = #tpu.dot_dimension_numbers<[1], [0], [0], [1], [0, 0, 1, 1], [], []>} : vector<8x128xf32>, vector<128x32xf32>, vector<8x32xf32> -> vector<8x32xf32>
    %c0_89 = arith.constant 0 : index
    %c0_90 = arith.constant 0 : index
    %97 = vector.load %arg14[%c0_89, %c0_90] : memref<128x32xf32, #tpu.memory_space<vmem>>, vector<8x32xf32>
    tpu.vector_store %arg14[%c0_89, %c0_90], %96 {strides = array<i32>} : memref<128x32xf32, #tpu.memory_space<vmem>>, vector<8x32xf32>,
    %c1_91 = arith.constant 1 : index
    %c0_92 = arith.constant 0 : index
    %c0_93 = arith.constant 0 : index
    %98 = vector.load %arg5[%c1_91, %c0_92, %c0_93] : memref<16x128x32xf32, #tpu.memory_space<vmem>>, vector<1x128x32xf32>
    %99 = vector.shape_cast %98 : vector<1x128x32xf32> to vector<128x32xf32>
    %cst_94 = arith.constant dense<0.000000e+00> : vector<8x32xf32>
    %100 = tpu.matmul %93, %99, %cst_94 {dimension_numbers = #tpu.dot_dimension_numbers<[1], [0], [0], [1], [0, 0, 1, 1], [], []>} : vector<8x128xf32>, vector<128x32xf32>, vector<8x32xf32> -> vector<8x32xf32>
    %c8_95 = arith.constant 8 : index
    %c0_96 = arith.constant 0 : index
    %101 = vector.load %arg14[%c8_95, %c0_96] : memref<128x32xf32, #tpu.memory_space<vmem>>, vector<8x32xf32>
    tpu.vector_store %arg14[%c8_95, %c0_96], %100 {strides = array<i32>} : memref<128x32xf32, #tpu.memory_space<vmem>>, vector<8x32xf32>,
    %c2_97 = arith.constant 2 : index
    %c0_98 = arith.constant 0 : index
    %c0_99 = arith.constant 0 : index
    %102 = vector.load %arg5[%c2_97, %c0_98, %c0_99] : memref<16x128x32xf32, #tpu.memory_space<vmem>>, vector<1x128x32xf32>
    %103 = vector.shape_cast %102 : vector<1x128x32xf32> to vector<128x32xf32>
    %cst_100 = arith.constant dense<0.000000e+00> : vector<8x32xf32>
    %104 = tpu.matmul %93, %103, %cst_100 {dimension_numbers = #tpu.dot_dimension_numbers<[1], [0], [0], [1], [0, 0, 1, 1], [], []>} : vector<8x128xf32>, vector<128x32xf32>, vector<8x32xf32> -> vector<8x32xf32>
    %c16_101 = arith.constant 16 : index
    %c0_102 = arith.constant 0 : index
    %105 = vector.load %arg14[%c16_101, %c0_102] : memref<128x32xf32, #tpu.memory_space<vmem>>, vector<8x32xf32>
    tpu.vector_store %arg14[%c16_101, %c0_102], %104 {strides = array<i32>} : memref<128x32xf32, #tpu.memory_space<vmem>>, vector<8x32xf32>,
    %c3_103 = arith.constant 3 : index
    %c0_104 = arith.constant 0 : index
    %c0_105 = arith.constant 0 : index
    %106 = vector.load %arg5[%c3_103, %c0_104, %c0_105] : memref<16x128x32xf32, #tpu.memory_space<vmem>>, vector<1x128x32xf32>
    %107 = vector.shape_cast %106 : vector<1x128x32xf32> to vector<128x32xf32>
    %cst_106 = arith.constant dense<0.000000e+00> : vector<8x32xf32>
    %108 = tpu.matmul %93, %107, %cst_106 {dimension_numbers = #tpu.dot_dimension_numbers<[1], [0], [0], [1], [0, 0, 1, 1], [], []>} : vector<8x128xf32>, vector<128x32xf32>, vector<8x32xf32> -> vector<8x32xf32>
    %c24_107 = arith.constant 24 : index
    %c0_108 = arith.constant 0 : index
    %109 = vector.load %arg14[%c24_107, %c0_108] : memref<128x32xf32, #tpu.memory_space<vmem>>, vector<8x32xf32>
    tpu.vector_store %arg14[%c24_107, %c0_108], %108 {strides = array<i32>} : memref<128x32xf32, #tpu.memory_space<vmem>>, vector<8x32xf32>,
    %c4_109 = arith.constant 4 : index
    %c0_110 = arith.constant 0 : index
    %c0_111 = arith.constant 0 : index
    %110 = vector.load %arg5[%c4_109, %c0_110, %c0_111] : memref<16x128x32xf32, #tpu.memory_space<vmem>>, vector<1x128x32xf32>
    %111 = vector.shape_cast %110 : vector<1x128x32xf32> to vector<128x32xf32>
    %cst_112 = arith.constant dense<0.000000e+00> : vector<8x32xf32>
    %112 = tpu.matmul %93, %111, %cst_112 {dimension_numbers = #tpu.dot_dimension_numbers<[1], [0], [0], [1], [0, 0, 1, 1], [], []>} : vector<8x128xf32>, vector<128x32xf32>, vector<8x32xf32> -> vector<8x32xf32>
    %c32_113 = arith.constant 32 : index
    %c0_114 = arith.constant 0 : index
    %113 = vector.load %arg14[%c32_113, %c0_114] : memref<128x32xf32, #tpu.memory_space<vmem>>, vector<8x32xf32>
    tpu.vector_store %arg14[%c32_113, %c0_114], %112 {strides = array<i32>} : memref<128x32xf32, #tpu.memory_space<vmem>>, vector<8x32xf32>,
    %c5_115 = arith.constant 5 : index
    %c0_116 = arith.constant 0 : index
    %c0_117 = arith.constant 0 : index
    %114 = vector.load %arg5[%c5_115, %c0_116, %c0_117] : memref<16x128x32xf32, #tpu.memory_space<vmem>>, vector<1x128x32xf32>
    %115 = vector.shape_cast %114 : vector<1x128x32xf32> to vector<128x32xf32>
    %cst_118 = arith.constant dense<0.000000e+00> : vector<8x32xf32>
    %116 = tpu.matmul %93, %115, %cst_118 {dimension_numbers = #tpu.dot_dimension_numbers<[1], [0], [0], [1], [0, 0, 1, 1], [], []>} : vector<8x128xf32>, vector<128x32xf32>, vector<8x32xf32> -> vector<8x32xf32>
    %c40_119 = arith.constant 40 : index
    %c0_120 = arith.constant 0 : index
    %117 = vector.load %arg14[%c40_119, %c0_120] : memref<128x32xf32, #tpu.memory_space<vmem>>, vector<8x32xf32>
    tpu.vector_store %arg14[%c40_119, %c0_120], %116 {strides = array<i32>} : memref<128x32xf32, #tpu.memory_space<vmem>>, vector<8x32xf32>,
    %c6_121 = arith.constant 6 : index
    %c0_122 = arith.constant 0 : index
    %c0_123 = arith.constant 0 : index
    %118 = vector.load %arg5[%c6_121, %c0_122, %c0_123] : memref<16x128x32xf32, #tpu.memory_space<vmem>>, vector<1x128x32xf32>
    %119 = vector.shape_cast %118 : vector<1x128x32xf32> to vector<128x32xf32>
    %cst_124 = arith.constant dense<0.000000e+00> : vector<8x32xf32>
    %120 = tpu.matmul %93, %119, %cst_124 {dimension_numbers = #tpu.dot_dimension_numbers<[1], [0], [0], [1], [0, 0, 1, 1], [], []>} : vector<8x128xf32>, vector<128x32xf32>, vector<8x32xf32> -> vector<8x32xf32>
    %c48_125 = arith.constant 48 : index
    %c0_126 = arith.constant 0 : index
    %121 = vector.load %arg14[%c48_125, %c0_126] : memref<128x32xf32, #tpu.memory_space<vmem>>, vector<8x32xf32>
    tpu.vector_store %arg14[%c48_125, %c0_126], %120 {strides = array<i32>} : memref<128x32xf32, #tpu.memory_space<vmem>>, vector<8x32xf32>,
    %c7_127 = arith.constant 7 : index
    %c0_128 = arith.constant 0 : index
    %c0_129 = arith.constant 0 : index
    %122 = vector.load %arg5[%c7_127, %c0_128, %c0_129] : memref<16x128x32xf32, #tpu.memory_space<vmem>>, vector<1x128x32xf32>
    %123 = vector.shape_cast %122 : vector<1x128x32xf32> to vector<128x32xf32>
    %cst_130 = arith.constant dense<0.000000e+00> : vector<8x32xf32>
    %124 = tpu.matmul %93, %123, %cst_130 {dimension_numbers = #tpu.dot_dimension_numbers<[1], [0], [0], [1], [0, 0, 1, 1], [], []>} : vector<8x128xf32>, vector<128x32xf32>, vector<8x32xf32> -> vector<8x32xf32>
    %c56_131 = arith.constant 56 : index
    %c0_132 = arith.constant 0 : index
    %125 = vector.load %arg14[%c56_131, %c0_132] : memref<128x32xf32, #tpu.memory_space<vmem>>, vector<8x32xf32>
    tpu.vector_store %arg14[%c56_131, %c0_132], %124 {strides = array<i32>} : memref<128x32xf32, #tpu.memory_space<vmem>>, vector<8x32xf32>,
    %c8_133 = arith.constant 8 : index
    %c0_134 = arith.constant 0 : index
    %c0_135 = arith.constant 0 : index
    %126 = vector.load %arg5[%c8_133, %c0_134, %c0_135] : memref<16x128x32xf32, #tpu.memory_space<vmem>>, vector<1x128x32xf32>
    %127 = vector.shape_cast %126 : vector<1x128x32xf32> to vector<128x32xf32>
    %cst_136 = arith.constant dense<0.000000e+00> : vector<8x32xf32>
    %128 = tpu.matmul %93, %127, %cst_136 {dimension_numbers = #tpu.dot_dimension_numbers<[1], [0], [0], [1], [0, 0, 1, 1], [], []>} : vector<8x128xf32>, vector<128x32xf32>, vector<8x32xf32> -> vector<8x32xf32>
    %c64 = arith.constant 64 : index
    %c0_137 = arith.constant 0 : index
    %129 = vector.load %arg14[%c64, %c0_137] : memref<128x32xf32, #tpu.memory_space<vmem>>, vector<8x32xf32>
    tpu.vector_store %arg14[%c64, %c0_137], %128 {strides = array<i32>} : memref<128x32xf32, #tpu.memory_space<vmem>>, vector<8x32xf32>,
    %c9_138 = arith.constant 9 : index
    %c0_139 = arith.constant 0 : index
    %c0_140 = arith.constant 0 : index
    %130 = vector.load %arg5[%c9_138, %c0_139, %c0_140] : memref<16x128x32xf32, #tpu.memory_space<vmem>>, vector<1x128x32xf32>
    %131 = vector.shape_cast %130 : vector<1x128x32xf32> to vector<128x32xf32>
    %cst_141 = arith.constant dense<0.000000e+00> : vector<8x32xf32>
    %132 = tpu.matmul %93, %131, %cst_141 {dimension_numbers = #tpu.dot_dimension_numbers<[1], [0], [0], [1], [0, 0, 1, 1], [], []>} : vector<8x128xf32>, vector<128x32xf32>, vector<8x32xf32> -> vector<8x32xf32>
    %c72 = arith.constant 72 : index
    %c0_142 = arith.constant 0 : index
    %133 = vector.load %arg14[%c72, %c0_142] : memref<128x32xf32, #tpu.memory_space<vmem>>, vector<8x32xf32>
    tpu.vector_store %arg14[%c72, %c0_142], %132 {strides = array<i32>} : memref<128x32xf32, #tpu.memory_space<vmem>>, vector<8x32xf32>,
    %c10_143 = arith.constant 10 : index
    %c0_144 = arith.constant 0 : index
    %c0_145 = arith.constant 0 : index
    %134 = vector.load %arg5[%c10_143, %c0_144, %c0_145] : memref<16x128x32xf32, #tpu.memory_space<vmem>>, vector<1x128x32xf32>
    %135 = vector.shape_cast %134 : vector<1x128x32xf32> to vector<128x32xf32>
    %cst_146 = arith.constant dense<0.000000e+00> : vector<8x32xf32>
    %136 = tpu.matmul %93, %135, %cst_146 {dimension_numbers = #tpu.dot_dimension_numbers<[1], [0], [0], [1], [0, 0, 1, 1], [], []>} : vector<8x128xf32>, vector<128x32xf32>, vector<8x32xf32> -> vector<8x32xf32>
    %c80 = arith.constant 80 : index
    %c0_147 = arith.constant 0 : index
    %137 = vector.load %arg14[%c80, %c0_147] : memref<128x32xf32, #tpu.memory_space<vmem>>, vector<8x32xf32>
    tpu.vector_store %arg14[%c80, %c0_147], %136 {strides = array<i32>} : memref<128x32xf32, #tpu.memory_space<vmem>>, vector<8x32xf32>,
    %c11_148 = arith.constant 11 : index
    %c0_149 = arith.constant 0 : index
    %c0_150 = arith.constant 0 : index
    %138 = vector.load %arg5[%c11_148, %c0_149, %c0_150] : memref<16x128x32xf32, #tpu.memory_space<vmem>>, vector<1x128x32xf32>
    %139 = vector.shape_cast %138 : vector<1x128x32xf32> to vector<128x32xf32>
    %cst_151 = arith.constant dense<0.000000e+00> : vector<8x32xf32>
    %140 = tpu.matmul %93, %139, %cst_151 {dimension_numbers = #tpu.dot_dimension_numbers<[1], [0], [0], [1], [0, 0, 1, 1], [], []>} : vector<8x128xf32>, vector<128x32xf32>, vector<8x32xf32> -> vector<8x32xf32>
    %c88 = arith.constant 88 : index
    %c0_152 = arith.constant 0 : index
    %141 = vector.load %arg14[%c88, %c0_152] : memref<128x32xf32, #tpu.memory_space<vmem>>, vector<8x32xf32>
    tpu.vector_store %arg14[%c88, %c0_152], %140 {strides = array<i32>} : memref<128x32xf32, #tpu.memory_space<vmem>>, vector<8x32xf32>,
    %c12_153 = arith.constant 12 : index
    %c0_154 = arith.constant 0 : index
    %c0_155 = arith.constant 0 : index
    %142 = vector.load %arg5[%c12_153, %c0_154, %c0_155] : memref<16x128x32xf32, #tpu.memory_space<vmem>>, vector<1x128x32xf32>
    %143 = vector.shape_cast %142 : vector<1x128x32xf32> to vector<128x32xf32>
    %cst_156 = arith.constant dense<0.000000e+00> : vector<8x32xf32>
    %144 = tpu.matmul %93, %143, %cst_156 {dimension_numbers = #tpu.dot_dimension_numbers<[1], [0], [0], [1], [0, 0, 1, 1], [], []>} : vector<8x128xf32>, vector<128x32xf32>, vector<8x32xf32> -> vector<8x32xf32>
    %c96 = arith.constant 96 : index
    %c0_157 = arith.constant 0 : index
    %145 = vector.load %arg14[%c96, %c0_157] : memref<128x32xf32, #tpu.memory_space<vmem>>, vector<8x32xf32>
    tpu.vector_store %arg14[%c96, %c0_157], %144 {strides = array<i32>} : memref<128x32xf32, #tpu.memory_space<vmem>>, vector<8x32xf32>,
    %c13_158 = arith.constant 13 : index
    %c0_159 = arith.constant 0 : index
    %c0_160 = arith.constant 0 : index
    %146 = vector.load %arg5[%c13_158, %c0_159, %c0_160] : memref<16x128x32xf32, #tpu.memory_space<vmem>>, vector<1x128x32xf32>
    %147 = vector.shape_cast %146 : vector<1x128x32xf32> to vector<128x32xf32>
    %cst_161 = arith.constant dense<0.000000e+00> : vector<8x32xf32>
    %148 = tpu.matmul %93, %147, %cst_161 {dimension_numbers = #tpu.dot_dimension_numbers<[1], [0], [0], [1], [0, 0, 1, 1], [], []>} : vector<8x128xf32>, vector<128x32xf32>, vector<8x32xf32> -> vector<8x32xf32>
    %c104 = arith.constant 104 : index
    %c0_162 = arith.constant 0 : index
    %149 = vector.load %arg14[%c104, %c0_162] : memref<128x32xf32, #tpu.memory_space<vmem>>, vector<8x32xf32>
    tpu.vector_store %arg14[%c104, %c0_162], %148 {strides = array<i32>} : memref<128x32xf32, #tpu.memory_space<vmem>>, vector<8x32xf32>,
    %c14_163 = arith.constant 14 : index
    %c0_164 = arith.constant 0 : index
    %c0_165 = arith.constant 0 : index
    %150 = vector.load %arg5[%c14_163, %c0_164, %c0_165] : memref<16x128x32xf32, #tpu.memory_space<vmem>>, vector<1x128x32xf32>
    %151 = vector.shape_cast %150 : vector<1x128x32xf32> to vector<128x32xf32>
    %cst_166 = arith.constant dense<0.000000e+00> : vector<8x32xf32>
    %152 = tpu.matmul %93, %151, %cst_166 {dimension_numbers = #tpu.dot_dimension_numbers<[1], [0], [0], [1], [0, 0, 1, 1], [], []>} : vector<8x128xf32>, vector<128x32xf32>, vector<8x32xf32> -> vector<8x32xf32>
    %c112 = arith.constant 112 : index
    %c0_167 = arith.constant 0 : index
    %153 = vector.load %arg14[%c112, %c0_167] : memref<128x32xf32, #tpu.memory_space<vmem>>, vector<8x32xf32>
    tpu.vector_store %arg14[%c112, %c0_167], %152 {strides = array<i32>} : memref<128x32xf32, #tpu.memory_space<vmem>>, vector<8x32xf32>,
    %c15_168 = arith.constant 15 : index
    %c0_169 = arith.constant 0 : index
    %c0_170 = arith.constant 0 : index
    %154 = vector.load %arg5[%c15_168, %c0_169, %c0_170] : memref<16x128x32xf32, #tpu.memory_space<vmem>>, vector<1x128x32xf32>
    %155 = vector.shape_cast %154 : vector<1x128x32xf32> to vector<128x32xf32>
    %cst_171 = arith.constant dense<0.000000e+00> : vector<8x32xf32>
    %156 = tpu.matmul %93, %155, %cst_171 {dimension_numbers = #tpu.dot_dimension_numbers<[1], [0], [0], [1], [0, 0, 1, 1], [], []>} : vector<8x128xf32>, vector<128x32xf32>, vector<8x32xf32> -> vector<8x32xf32>
    %c120 = arith.constant 120 : index
    %c0_172 = arith.constant 0 : index
    %157 = vector.load %arg14[%c120, %c0_172] : memref<128x32xf32, #tpu.memory_space<vmem>>, vector<8x32xf32>
    tpu.vector_store %arg14[%c120, %c0_172], %156 {strides = array<i32>} : memref<128x32xf32, #tpu.memory_space<vmem>>, vector<8x32xf32>,
    %c0_173 = arith.constant 0 : index
    %c0_174 = arith.constant 0 : index
    %158 = vector.load %arg6[%c0_173, %c0_174] : memref<16x128xf32, #tpu.memory_space<vmem>>, vector<16x128xf32>
    %c0_175 = arith.constant 0 : index
    %c0_176 = arith.constant 0 : index
    %159 = vector.load %arg14[%c0_175, %c0_176] : memref<128x32xf32, #tpu.memory_space<vmem>>, vector<128x32xf32>
    %cst_177 = arith.constant dense<0.000000e+00> : vector<16x32xf32>
    %160 = tpu.matmul %158, %159, %cst_177 {dimension_numbers = #tpu.dot_dimension_numbers<[1], [0], [0], [1], [0, 0, 1, 1], [], []>} : vector<16x128xf32>, vector<128x32xf32>, vector<16x32xf32> -> vector<16x32xf32>
    %cst_178 = arith.constant dense<0.000000e+00> : vector<16xf32>
    %161 = vector.multi_reduction <add>, %160, %cst_178 [1] : vector<16x32xf32> to vector<16xf32>
    %162 = vector.shape_cast %161 : vector<16xf32> to vector<16x1xf32>
    %cst_179 = arith.constant 3.125000e-02 : f32
    %163 = vector.broadcast %cst_179 : f32 to vector<16x1xf32>
    %164 = arith.mulf %162, %163 : vector<16x1xf32>
    %165 = vector.broadcast %164 : vector<16x1xf32> to vector<16x32xf32>
    %166 = arith.subf %160, %165 : vector<16x32xf32>
    %167 = arith.mulf %166, %166 : vector<16x32xf32>
    %cst_180 = arith.constant dense<0.000000e+00> : vector<16xf32>
    %168 = vector.multi_reduction <add>, %167, %cst_180 [1] : vector<16x32xf32> to vector<16xf32>
    %169 = vector.shape_cast %168 : vector<16xf32> to vector<16x1xf32>
    %cst_181 = arith.constant 3.125000e-02 : f32
    %170 = vector.broadcast %cst_181 : f32 to vector<16x1xf32>
    %171 = arith.mulf %169, %170 : vector<16x1xf32>
    %c0_182 = arith.constant 0 : index
    %c0_183 = arith.constant 0 : index
    %172 = vector.load %arg7[%c0_182, %c0_183] : memref<16x1xf32, #tpu.memory_space<vmem>>, vector<16x1xf32>
    %cst_184 = arith.constant 9.99999974E-6 : f32
    %173 = vector.broadcast %cst_184 : f32 to vector<16x1xf32>
    %174 = arith.addf %171, %173 : vector<16x1xf32>
    %175 = math.rsqrt %174 : vector<16x1xf32>
    %176 = arith.mulf %172, %175 : vector<16x1xf32>
    %177 = vector.broadcast %176 : vector<16x1xf32> to vector<16x32xf32>
    %178 = arith.mulf %166, %177 : vector<16x32xf32>
    %c0_185 = arith.constant 0 : index
    %c0_186 = arith.constant 0 : index
    %179 = vector.load %arg8[%c0_185, %c0_186] : memref<16x1xf32, #tpu.memory_space<vmem>>, vector<16x1xf32>
    %180 = vector.broadcast %179 : vector<16x1xf32> to vector<16x32xf32>
    %181 = arith.addf %178, %180 : vector<16x32xf32>
    %cst_187 = arith.constant 0.000000e+00 : f32
    %182 = vector.broadcast %cst_187 : f32 to vector<16x32xf32>
    %183 = arith.cmpf oge, %181, %182 : vector<16x32xf32>
    %cst_188 = arith.constant 2.000000e-01 : f32
    %184 = vector.broadcast %cst_188 : f32 to vector<16x32xf32>
    %185 = arith.mulf %184, %181 : vector<16x32xf32>
    %186 = arith.select %183, %181, %185 : vector<16x32xi1>, vector<16x32xf32>
    %187 = vector.extract_strided_slice %186 {offsets = [0, 0], sizes = [1, 16], strides = [1, 1]} : vector<16x32xf32> to vector<1x16xf32>
    %c0_189 = arith.constant 0 : index
    %c0_190 = arith.constant 0 : index
    %188 = vector.load %arg15[%c0_189, %c0_190] : memref<2x256xf32, #tpu.memory_space<vmem>>, vector<1x16xf32>
    tpu.vector_store %arg15[%c0_189, %c0_190], %187 {strides = array<i32>} : memref<2x256xf32, #tpu.memory_space<vmem>>, vector<1x16xf32>,
    %189 = vector.extract_strided_slice %186 {offsets = [0, 16], sizes = [1, 16], strides = [1, 1]} : vector<16x32xf32> to vector<1x16xf32>
    %c1_191 = arith.constant 1 : index
    %c0_192 = arith.constant 0 : index
    %190 = vector.load %arg15[%c1_191, %c0_192] : memref<2x256xf32, #tpu.memory_space<vmem>>, vector<1x16xf32>
    tpu.vector_store %arg15[%c1_191, %c0_192], %189 {strides = array<i32>} : memref<2x256xf32, #tpu.memory_space<vmem>>, vector<1x16xf32>,
    %191 = vector.extract_strided_slice %186 {offsets = [1, 0], sizes = [1, 16], strides = [1, 1]} : vector<16x32xf32> to vector<1x16xf32>
    %c0_193 = arith.constant 0 : index
    %c16_194 = arith.constant 16 : index
    %192 = vector.load %arg15[%c0_193, %c16_194] : memref<2x256xf32, #tpu.memory_space<vmem>>, vector<1x16xf32>
    tpu.vector_store %arg15[%c0_193, %c16_194], %191 {strides = array<i32>} : memref<2x256xf32, #tpu.memory_space<vmem>>, vector<1x16xf32>,
    %193 = vector.extract_strided_slice %186 {offsets = [1, 16], sizes = [1, 16], strides = [1, 1]} : vector<16x32xf32> to vector<1x16xf32>
    %c1_195 = arith.constant 1 : index
    %c16_196 = arith.constant 16 : index
    %194 = vector.load %arg15[%c1_195, %c16_196] : memref<2x256xf32, #tpu.memory_space<vmem>>, vector<1x16xf32>
    tpu.vector_store %arg15[%c1_195, %c16_196], %193 {strides = array<i32>} : memref<2x256xf32, #tpu.memory_space<vmem>>, vector<1x16xf32>,
    %195 = vector.extract_strided_slice %186 {offsets = [2, 0], sizes = [1, 16], strides = [1, 1]} : vector<16x32xf32> to vector<1x16xf32>
    %c0_197 = arith.constant 0 : index
    %c32_198 = arith.constant 32 : index
    %196 = vector.load %arg15[%c0_197, %c32_198] : memref<2x256xf32, #tpu.memory_space<vmem>>, vector<1x16xf32>
    tpu.vector_store %arg15[%c0_197, %c32_198], %195 {strides = array<i32>} : memref<2x256xf32, #tpu.memory_space<vmem>>, vector<1x16xf32>,
    %197 = vector.extract_strided_slice %186 {offsets = [2, 16], sizes = [1, 16], strides = [1, 1]} : vector<16x32xf32> to vector<1x16xf32>
    %c1_199 = arith.constant 1 : index
    %c32_200 = arith.constant 32 : index
    %198 = vector.load %arg15[%c1_199, %c32_200] : memref<2x256xf32, #tpu.memory_space<vmem>>, vector<1x16xf32>
    tpu.vector_store %arg15[%c1_199, %c32_200], %197 {strides = array<i32>} : memref<2x256xf32, #tpu.memory_space<vmem>>, vector<1x16xf32>,
    %199 = vector.extract_strided_slice %186 {offsets = [3, 0], sizes = [1, 16], strides = [1, 1]} : vector<16x32xf32> to vector<1x16xf32>
    %c0_201 = arith.constant 0 : index
    %c48_202 = arith.constant 48 : index
    %200 = vector.load %arg15[%c0_201, %c48_202] : memref<2x256xf32, #tpu.memory_space<vmem>>, vector<1x16xf32>
    tpu.vector_store %arg15[%c0_201, %c48_202], %199 {strides = array<i32>} : memref<2x256xf32, #tpu.memory_space<vmem>>, vector<1x16xf32>,
    %201 = vector.extract_strided_slice %186 {offsets = [3, 16], sizes = [1, 16], strides = [1, 1]} : vector<16x32xf32> to vector<1x16xf32>
    %c1_203 = arith.constant 1 : index
    %c48_204 = arith.constant 48 : index
    %202 = vector.load %arg15[%c1_203, %c48_204] : memref<2x256xf32, #tpu.memory_space<vmem>>, vector<1x16xf32>
    tpu.vector_store %arg15[%c1_203, %c48_204], %201 {strides = array<i32>} : memref<2x256xf32, #tpu.memory_space<vmem>>, vector<1x16xf32>,
    %203 = vector.extract_strided_slice %186 {offsets = [4, 0], sizes = [1, 16], strides = [1, 1]} : vector<16x32xf32> to vector<1x16xf32>
    %c0_205 = arith.constant 0 : index
    %c64_206 = arith.constant 64 : index
    %204 = vector.load %arg15[%c0_205, %c64_206] : memref<2x256xf32, #tpu.memory_space<vmem>>, vector<1x16xf32>
    tpu.vector_store %arg15[%c0_205, %c64_206], %203 {strides = array<i32>} : memref<2x256xf32, #tpu.memory_space<vmem>>, vector<1x16xf32>,
    %205 = vector.extract_strided_slice %186 {offsets = [4, 16], sizes = [1, 16], strides = [1, 1]} : vector<16x32xf32> to vector<1x16xf32>
    %c1_207 = arith.constant 1 : index
    %c64_208 = arith.constant 64 : index
    %206 = vector.load %arg15[%c1_207, %c64_208] : memref<2x256xf32, #tpu.memory_space<vmem>>, vector<1x16xf32>
    tpu.vector_store %arg15[%c1_207, %c64_208], %205 {strides = array<i32>} : memref<2x256xf32, #tpu.memory_space<vmem>>, vector<1x16xf32>,
    %207 = vector.extract_strided_slice %186 {offsets = [5, 0], sizes = [1, 16], strides = [1, 1]} : vector<16x32xf32> to vector<1x16xf32>
    %c0_209 = arith.constant 0 : index
    %c80_210 = arith.constant 80 : index
    %208 = vector.load %arg15[%c0_209, %c80_210] : memref<2x256xf32, #tpu.memory_space<vmem>>, vector<1x16xf32>
    tpu.vector_store %arg15[%c0_209, %c80_210], %207 {strides = array<i32>} : memref<2x256xf32, #tpu.memory_space<vmem>>, vector<1x16xf32>,
    %209 = vector.extract_strided_slice %186 {offsets = [5, 16], sizes = [1, 16], strides = [1, 1]} : vector<16x32xf32> to vector<1x16xf32>
    %c1_211 = arith.constant 1 : index
    %c80_212 = arith.constant 80 : index
    %210 = vector.load %arg15[%c1_211, %c80_212] : memref<2x256xf32, #tpu.memory_space<vmem>>, vector<1x16xf32>
    tpu.vector_store %arg15[%c1_211, %c80_212], %209 {strides = array<i32>} : memref<2x256xf32, #tpu.memory_space<vmem>>, vector<1x16xf32>,
    %211 = vector.extract_strided_slice %186 {offsets = [6, 0], sizes = [1, 16], strides = [1, 1]} : vector<16x32xf32> to vector<1x16xf32>
    %c0_213 = arith.constant 0 : index
    %c96_214 = arith.constant 96 : index
    %212 = vector.load %arg15[%c0_213, %c96_214] : memref<2x256xf32, #tpu.memory_space<vmem>>, vector<1x16xf32>
    tpu.vector_store %arg15[%c0_213, %c96_214], %211 {strides = array<i32>} : memref<2x256xf32, #tpu.memory_space<vmem>>, vector<1x16xf32>,
    %213 = vector.extract_strided_slice %186 {offsets = [6, 16], sizes = [1, 16], strides = [1, 1]} : vector<16x32xf32> to vector<1x16xf32>
    %c1_215 = arith.constant 1 : index
    %c96_216 = arith.constant 96 : index
    %214 = vector.load %arg15[%c1_215, %c96_216] : memref<2x256xf32, #tpu.memory_space<vmem>>, vector<1x16xf32>
    tpu.vector_store %arg15[%c1_215, %c96_216], %213 {strides = array<i32>} : memref<2x256xf32, #tpu.memory_space<vmem>>, vector<1x16xf32>,
    %215 = vector.extract_strided_slice %186 {offsets = [7, 0], sizes = [1, 16], strides = [1, 1]} : vector<16x32xf32> to vector<1x16xf32>
    %c0_217 = arith.constant 0 : index
    %c112_218 = arith.constant 112 : index
    %216 = vector.load %arg15[%c0_217, %c112_218] : memref<2x256xf32, #tpu.memory_space<vmem>>, vector<1x16xf32>
    tpu.vector_store %arg15[%c0_217, %c112_218], %215 {strides = array<i32>} : memref<2x256xf32, #tpu.memory_space<vmem>>, vector<1x16xf32>,
    %217 = vector.extract_strided_slice %186 {offsets = [7, 16], sizes = [1, 16], strides = [1, 1]} : vector<16x32xf32> to vector<1x16xf32>
    %c1_219 = arith.constant 1 : index
    %c112_220 = arith.constant 112 : index
    %218 = vector.load %arg15[%c1_219, %c112_220] : memref<2x256xf32, #tpu.memory_space<vmem>>, vector<1x16xf32>
    tpu.vector_store %arg15[%c1_219, %c112_220], %217 {strides = array<i32>} : memref<2x256xf32, #tpu.memory_space<vmem>>, vector<1x16xf32>,
    %219 = vector.extract_strided_slice %186 {offsets = [8, 0], sizes = [1, 16], strides = [1, 1]} : vector<16x32xf32> to vector<1x16xf32>
    %c0_221 = arith.constant 0 : index
    %c128 = arith.constant 128 : index
    %220 = vector.load %arg15[%c0_221, %c128] : memref<2x256xf32, #tpu.memory_space<vmem>>, vector<1x16xf32>
    tpu.vector_store %arg15[%c0_221, %c128], %219 {strides = array<i32>} : memref<2x256xf32, #tpu.memory_space<vmem>>, vector<1x16xf32>,
    %221 = vector.extract_strided_slice %186 {offsets = [8, 16], sizes = [1, 16], strides = [1, 1]} : vector<16x32xf32> to vector<1x16xf32>
    %c1_222 = arith.constant 1 : index
    %c128_223 = arith.constant 128 : index
    %222 = vector.load %arg15[%c1_222, %c128_223] : memref<2x256xf32, #tpu.memory_space<vmem>>, vector<1x16xf32>
    tpu.vector_store %arg15[%c1_222, %c128_223], %221 {strides = array<i32>} : memref<2x256xf32, #tpu.memory_space<vmem>>, vector<1x16xf32>,
    %223 = vector.extract_strided_slice %186 {offsets = [9, 0], sizes = [1, 16], strides = [1, 1]} : vector<16x32xf32> to vector<1x16xf32>
    %c0_224 = arith.constant 0 : index
    %c144 = arith.constant 144 : index
    %224 = vector.load %arg15[%c0_224, %c144] : memref<2x256xf32, #tpu.memory_space<vmem>>, vector<1x16xf32>
    tpu.vector_store %arg15[%c0_224, %c144], %223 {strides = array<i32>} : memref<2x256xf32, #tpu.memory_space<vmem>>, vector<1x16xf32>,
    %225 = vector.extract_strided_slice %186 {offsets = [9, 16], sizes = [1, 16], strides = [1, 1]} : vector<16x32xf32> to vector<1x16xf32>
    %c1_225 = arith.constant 1 : index
    %c144_226 = arith.constant 144 : index
    %226 = vector.load %arg15[%c1_225, %c144_226] : memref<2x256xf32, #tpu.memory_space<vmem>>, vector<1x16xf32>
    tpu.vector_store %arg15[%c1_225, %c144_226], %225 {strides = array<i32>} : memref<2x256xf32, #tpu.memory_space<vmem>>, vector<1x16xf32>,
    %227 = vector.extract_strided_slice %186 {offsets = [10, 0], sizes = [1, 16], strides = [1, 1]} : vector<16x32xf32> to vector<1x16xf32>
    %c0_227 = arith.constant 0 : index
    %c160 = arith.constant 160 : index
    %228 = vector.load %arg15[%c0_227, %c160] : memref<2x256xf32, #tpu.memory_space<vmem>>, vector<1x16xf32>
    tpu.vector_store %arg15[%c0_227, %c160], %227 {strides = array<i32>} : memref<2x256xf32, #tpu.memory_space<vmem>>, vector<1x16xf32>,
    %229 = vector.extract_strided_slice %186 {offsets = [10, 16], sizes = [1, 16], strides = [1, 1]} : vector<16x32xf32> to vector<1x16xf32>
    %c1_228 = arith.constant 1 : index
    %c160_229 = arith.constant 160 : index
    %230 = vector.load %arg15[%c1_228, %c160_229] : memref<2x256xf32, #tpu.memory_space<vmem>>, vector<1x16xf32>
    tpu.vector_store %arg15[%c1_228, %c160_229], %229 {strides = array<i32>} : memref<2x256xf32, #tpu.memory_space<vmem>>, vector<1x16xf32>,
    %231 = vector.extract_strided_slice %186 {offsets = [11, 0], sizes = [1, 16], strides = [1, 1]} : vector<16x32xf32> to vector<1x16xf32>
    %c0_230 = arith.constant 0 : index
    %c176 = arith.constant 176 : index
    %232 = vector.load %arg15[%c0_230, %c176] : memref<2x256xf32, #tpu.memory_space<vmem>>, vector<1x16xf32>
    tpu.vector_store %arg15[%c0_230, %c176], %231 {strides = array<i32>} : memref<2x256xf32, #tpu.memory_space<vmem>>, vector<1x16xf32>,
    %233 = vector.extract_strided_slice %186 {offsets = [11, 16], sizes = [1, 16], strides = [1, 1]} : vector<16x32xf32> to vector<1x16xf32>
    %c1_231 = arith.constant 1 : index
    %c176_232 = arith.constant 176 : index
    %234 = vector.load %arg15[%c1_231, %c176_232] : memref<2x256xf32, #tpu.memory_space<vmem>>, vector<1x16xf32>
    tpu.vector_store %arg15[%c1_231, %c176_232], %233 {strides = array<i32>} : memref<2x256xf32, #tpu.memory_space<vmem>>, vector<1x16xf32>,
    %235 = vector.extract_strided_slice %186 {offsets = [12, 0], sizes = [1, 16], strides = [1, 1]} : vector<16x32xf32> to vector<1x16xf32>
    %c0_233 = arith.constant 0 : index
    %c192 = arith.constant 192 : index
    %236 = vector.load %arg15[%c0_233, %c192] : memref<2x256xf32, #tpu.memory_space<vmem>>, vector<1x16xf32>
    tpu.vector_store %arg15[%c0_233, %c192], %235 {strides = array<i32>} : memref<2x256xf32, #tpu.memory_space<vmem>>, vector<1x16xf32>,
    %237 = vector.extract_strided_slice %186 {offsets = [12, 16], sizes = [1, 16], strides = [1, 1]} : vector<16x32xf32> to vector<1x16xf32>
    %c1_234 = arith.constant 1 : index
    %c192_235 = arith.constant 192 : index
    %238 = vector.load %arg15[%c1_234, %c192_235] : memref<2x256xf32, #tpu.memory_space<vmem>>, vector<1x16xf32>
    tpu.vector_store %arg15[%c1_234, %c192_235], %237 {strides = array<i32>} : memref<2x256xf32, #tpu.memory_space<vmem>>, vector<1x16xf32>,
    %239 = vector.extract_strided_slice %186 {offsets = [13, 0], sizes = [1, 16], strides = [1, 1]} : vector<16x32xf32> to vector<1x16xf32>
    %c0_236 = arith.constant 0 : index
    %c208 = arith.constant 208 : index
    %240 = vector.load %arg15[%c0_236, %c208] : memref<2x256xf32, #tpu.memory_space<vmem>>, vector<1x16xf32>
    tpu.vector_store %arg15[%c0_236, %c208], %239 {strides = array<i32>} : memref<2x256xf32, #tpu.memory_space<vmem>>, vector<1x16xf32>,
    %241 = vector.extract_strided_slice %186 {offsets = [13, 16], sizes = [1, 16], strides = [1, 1]} : vector<16x32xf32> to vector<1x16xf32>
    %c1_237 = arith.constant 1 : index
    %c208_238 = arith.constant 208 : index
    %242 = vector.load %arg15[%c1_237, %c208_238] : memref<2x256xf32, #tpu.memory_space<vmem>>, vector<1x16xf32>
    tpu.vector_store %arg15[%c1_237, %c208_238], %241 {strides = array<i32>} : memref<2x256xf32, #tpu.memory_space<vmem>>, vector<1x16xf32>,
    %243 = vector.extract_strided_slice %186 {offsets = [14, 0], sizes = [1, 16], strides = [1, 1]} : vector<16x32xf32> to vector<1x16xf32>
    %c0_239 = arith.constant 0 : index
    %c224 = arith.constant 224 : index
    %244 = vector.load %arg15[%c0_239, %c224] : memref<2x256xf32, #tpu.memory_space<vmem>>, vector<1x16xf32>
    tpu.vector_store %arg15[%c0_239, %c224], %243 {strides = array<i32>} : memref<2x256xf32, #tpu.memory_space<vmem>>, vector<1x16xf32>,
    %245 = vector.extract_strided_slice %186 {offsets = [14, 16], sizes = [1, 16], strides = [1, 1]} : vector<16x32xf32> to vector<1x16xf32>
    %c1_240 = arith.constant 1 : index
    %c224_241 = arith.constant 224 : index
    %246 = vector.load %arg15[%c1_240, %c224_241] : memref<2x256xf32, #tpu.memory_space<vmem>>, vector<1x16xf32>
    tpu.vector_store %arg15[%c1_240, %c224_241], %245 {strides = array<i32>} : memref<2x256xf32, #tpu.memory_space<vmem>>, vector<1x16xf32>,
    %247 = vector.extract_strided_slice %186 {offsets = [15, 0], sizes = [1, 16], strides = [1, 1]} : vector<16x32xf32> to vector<1x16xf32>
    %c0_242 = arith.constant 0 : index
    %c240 = arith.constant 240 : index
    %248 = vector.load %arg15[%c0_242, %c240] : memref<2x256xf32, #tpu.memory_space<vmem>>, vector<1x16xf32>
    tpu.vector_store %arg15[%c0_242, %c240], %247 {strides = array<i32>} : memref<2x256xf32, #tpu.memory_space<vmem>>, vector<1x16xf32>,
    %249 = vector.extract_strided_slice %186 {offsets = [15, 16], sizes = [1, 16], strides = [1, 1]} : vector<16x32xf32> to vector<1x16xf32>
    %c1_243 = arith.constant 1 : index
    %c240_244 = arith.constant 240 : index
    %250 = vector.load %arg15[%c1_243, %c240_244] : memref<2x256xf32, #tpu.memory_space<vmem>>, vector<1x16xf32>
    tpu.vector_store %arg15[%c1_243, %c240_244], %249 {strides = array<i32>} : memref<2x256xf32, #tpu.memory_space<vmem>>, vector<1x16xf32>,
    %c0_245 = arith.constant 0 : index
    %c0_246 = arith.constant 0 : index
    %251 = vector.load %arg15[%c0_245, %c0_246] : memref<2x256xf32, #tpu.memory_space<vmem>>, vector<2x256xf32>
    %c0_247 = arith.constant 0 : index
    %c0_248 = arith.constant 0 : index
    %252 = vector.load %arg9[%c0_247, %c0_248] : memref<256x32xf32, #tpu.memory_space<vmem>>, vector<256x32xf32>
    %cst_249 = arith.constant dense<0.000000e+00> : vector<2x32xf32>
    %253 = tpu.matmul %251, %252, %cst_249 {dimension_numbers = #tpu.dot_dimension_numbers<[1], [0], [0], [1], [0, 0, 1, 1], [], []>} : vector<2x256xf32>, vector<256x32xf32>, vector<2x32xf32> -> vector<2x32xf32>
    %cst_250 = arith.constant dense<0.000000e+00> : vector<32xf32>
    %254 = vector.multi_reduction <add>, %253, %cst_250 [0] : vector<2x32xf32> to vector<32xf32>
    %255 = vector.shape_cast %254 : vector<32xf32> to vector<1x32xf32>
    %cst_251 = arith.constant 5.000000e-01 : f32
    %256 = vector.broadcast %cst_251 : f32 to vector<1x32xf32>
    %257 = arith.mulf %255, %256 : vector<1x32xf32>
    %258 = vector.broadcast %257 : vector<1x32xf32> to vector<2x32xf32>
    %259 = arith.subf %253, %258 : vector<2x32xf32>
    %260 = arith.mulf %259, %259 : vector<2x32xf32>
    %cst_252 = arith.constant dense<0.000000e+00> : vector<32xf32>
    %261 = vector.multi_reduction <add>, %260, %cst_252 [0] : vector<2x32xf32> to vector<32xf32>
    %262 = vector.shape_cast %261 : vector<32xf32> to vector<1x32xf32>
    %cst_253 = arith.constant 5.000000e-01 : f32
    %263 = vector.broadcast %cst_253 : f32 to vector<1x32xf32>
    %264 = arith.mulf %262, %263 : vector<1x32xf32>
    %c0_254 = arith.constant 0 : index
    %c0_255 = arith.constant 0 : index
    %265 = vector.load %arg10[%c0_254, %c0_255] : memref<1x32xf32, #tpu.memory_space<vmem>>, vector<1x32xf32>
    %cst_256 = arith.constant 9.99999974E-6 : f32
    %266 = vector.broadcast %cst_256 : f32 to vector<1x32xf32>
    %267 = arith.addf %264, %266 : vector<1x32xf32>
    %268 = math.rsqrt %267 : vector<1x32xf32>
    %269 = arith.mulf %265, %268 : vector<1x32xf32>
    %270 = vector.broadcast %269 : vector<1x32xf32> to vector<2x32xf32>
    %271 = arith.mulf %259, %270 : vector<2x32xf32>
    %c0_257 = arith.constant 0 : index
    %c0_258 = arith.constant 0 : index
    %272 = vector.load %arg11[%c0_257, %c0_258] : memref<1x32xf32, #tpu.memory_space<vmem>>, vector<1x32xf32>
    %273 = vector.broadcast %272 : vector<1x32xf32> to vector<2x32xf32>
    %274 = arith.addf %271, %273 : vector<2x32xf32>
    %cst_259 = arith.constant 0.000000e+00 : f32
    %275 = vector.broadcast %cst_259 : f32 to vector<2x32xf32>
    %276 = arith.maximumf %274, %275 : vector<2x32xf32>
    %c0_260 = arith.constant 0 : index
    %c0_261 = arith.constant 0 : index
    %277 = vector.load %arg12[%c0_260, %c0_261] : memref<2x32xf32, #tpu.memory_space<vmem>>, vector<2x32xf32>
    tpu.vector_store %arg12[%c0_260, %c0_261], %276 {strides = array<i32>} : memref<2x32xf32, #tpu.memory_space<vmem>>, vector<2x32xf32>,
    return
  }
}

</mosaic_0001>

<bundles_post_ra>
// kernel: encoder_forward.1
= control target key start
LH: loop header
LB: loop body
LE: loop exit
PB: predicated region body
PF: predicated region fallthrough
CT: control target
= control target key end

     0   :  { %17 = vsyncpa [#allocation6], 0  ;;  %s5547_s0 = inlined_call_operand.vmem [shape: f32[4,512], index: 0, kind: input, shape index: {}]   ;;  %s5548_s1 = inlined_call_operand.hbm [shape: f32[16,512,128], index: 1, kind: input, shape index: {}]   ;;  %s5549_s2 = inlined_call_operand.hbm [shape: f32[8,64], index: 2, kind: input, shape index: {}]   ;;  %s5550_s3 = inlined_call_operand.vmem [shape: f32[8,1], index: 3, kind: input, shape index: {}]   ;;  %s5551_s4 = inlined_call_operand.vmem [shape: f32[8,1], index: 4, kind: input, shape index: {}]   ;;  %s5552_s5 = inlined_call_operand.vmem [shape: f32[16,128,32], index: 5, kind: input, shape index: {}]   ;;  %s5553_s6 = inlined_call_operand.hbm [shape: f32[16,128], index: 6, kind: input, shape index: {}]   ;;  %s5554_s7 = inlined_call_operand.vmem [shape: f32[16,1], index: 7, kind: input, shape index: {}]   ;;  %s5555_s8 = inlined_call_operand.vmem [shape: f32[16,1], index: 8, kind: input, shape index: {}]   ;;  %s5556_s9 = inlined_call_operand.vmem [shape: f32[256,32], index: 9, kind: input, shape index: {}]   ;;  %s5557_s10 = inlined_call_operand.hbm [shape: f32[1,32], index: 10, kind: input, shape index: {}]   ;;  %s5558_s11 = inlined_call_operand.hbm [shape: f32[1,32], index: 11, kind: input, shape index: {}]   ;;  %s5559_s12 = inlined_call_operand.hbm [shape: f32[2,32], index: 12, kind: output, shape index: {}]  }
   0x1   :  { %18 = vsyncpa [#allocation9], 0 }
   0x2   :  { %19 = vsyncpa [#allocation12], 0  ;;  %s41_s23 = sshll.u32 %s5549_s2, 4  ;;  %s42_s23 = int_to_ptr.hbm [resolvable:$true] %s41_s23 }
   0x3   :  { %20 = vsyncpa [#allocation7], 0  ;;  %s4228_s24 = smov [#allocation8]   ;;  %s77_s28 = sshll.u32 %s5557_s10, 4  ;;  %s78_s28 = int_to_ptr.hbm [resolvable:$true] %s77_s28 }
   0x4   :  { %s43_s25 = sshll.u32 %s4228_s24, 4  ;;  %s4229_s29 = smov [#allocation11]   ;;  %s44_s25 = int_to_ptr.vmem [resolvable:$true] %s43_s25 }
   0x5   :  { %46 = dma.hbm_to_vmem [thread:$0]  %s42_s23, 128, %s44_s25, [#allocation9]  }
   0x6   :  { %s79_s30 = sshll.u32 %s4229_s29, 4  ;;  %s27_s15 = sshll.u32 %s5548_s1, 4  ;;  %s80_s30 = int_to_ptr.vmem [resolvable:$true] %s79_s30  ;;  %s28_s15 = int_to_ptr.hbm [resolvable:$true] %s27_s15 }
   0x7   :  { %82 = dma.hbm_to_vmem [thread:$0]  %s78_s28, 16, %s80_s30, [#allocation12]  }
   0x8   :  { %s4230_s2 = smov [#allocation5]   ;;  %s57_s19 = sshll.u32 %s5553_s6, 4  ;;  %s58_s19 = int_to_ptr.hbm [resolvable:$true] %s57_s19 }
   0x9   :  { %s29_s16 = sshll.u32 %s4230_s2, 4  ;;  %s4231_s20 = smov 128   ;;  %s30_s16 = int_to_ptr.vmem [resolvable:$true] %s29_s16 }
   0xa   :  { %s4232_s10 = smov 8   ;;  %s4233_s21 = smov [#allocation10]  }
   0xb   :  { %35 = dma.hbm_to_vmem [thread:$0]  %s28_s15, 131072, %s30_s16, [#allocation6], %s4231_s20, %s4231_s20, %s4232_s10  }
   0xc   :  { %s59_s22 = sshll.u32 %s4233_s21, 4  ;;  %s88_s1 = sshll.u32 %s5558_s11, 4  ;;  %s60_s22 = int_to_ptr.vmem [resolvable:$true] %s59_s22  ;;  %s89_s1 = int_to_ptr.hbm [resolvable:$true] %s88_s1 }
   0xd   :  { %65 = dma.hbm_to_vmem [thread:$0]  %s58_s19, 256, %s60_s22, [#allocation9], %s4231_s20, %s4231_s20, %s4232_s10  }
   0xe   :  { %s4234_s25 = smov [#allocation13]  }
   0xf   :  { %s90_s26 = sshll.u32 %s4234_s25, 4  ;;  %s91_s26 = int_to_ptr.vmem [resolvable:$true] %s90_s26 }
  0x10   :  { %93 = dma.hbm_to_vmem [thread:$0]  %s89_s1, 16, %s91_s26, [#allocation12]  }
  0x11   :  { %4220 = dma.done.wait [#allocation6], 131072  }
  0x12   :  { %4221 = vsyncadd [#allocation6], 4294836224 }
  0x13   :  { %4222 = dma.done.wait [#allocation9], 384  }
  0x14   :  { %4223 = vsyncadd [#allocation9], 4294966912 }
  0x15   :  { %4224 = dma.done.wait [#allocation12], 32  }
  0x16   :  { %4225 = vsyncadd [#allocation12], 4294967264  ;;  %v163_v0 = vld [vmem:[#allocation5 + $0x178] sm:$0xff]  ;;  %v162_v1 = vld [vmem:[#allocation5 + $0x170] sm:$0xff]  ;;  %vm2638_vm0 = vcmask 523264   ;;  %vm2735_vm5 = vcmask 261120  }
  0x17   :  { %v179_v2 = vld [vmem:[#allocation5 + $0x1f8] sm:$0xff]  ;;  %233 = vmatpush.msra.mxu2 %v163_v0  ;;  %v161_v5 = vld [vmem:[#allocation5 + $0x168] sm:$0xff]  ;;  %v178_v6 = vld [vmem:[#allocation5 + $0x1f0] sm:$0xff]  ;;  %vm3426_vm13 = vcmask 122880   ;;  %s4236_s19 = smov 112   ;;  %s4239_s20 = smov 48  }
  0x18   :  { %253 = vmatpush.msra.mxu3 %v179_v2  ;;  %v131_v3 = vld [vmem:[#allocation5 + $0x78] sm:$0xff]  ;;  %v130_v7 = vld [vmem:[#allocation5 + $0x70] sm:$0xff]  ;;  %v177_v9 = vld [vmem:[#allocation5 + $0x1e8] sm:$0xff]  ;;  %s4240_s10 = smov 64   ;;  %s4241_s21 = smov 80   ;;  %vm3438_vm15 = vcmask 254080  }
  0x19   :  { %v147_v4 = vld [vmem:[#allocation5 + $0xf8] sm:$0xff]  ;;  %193 = vmatpush.msra.mxu0 %v131_v3  ;;  %v146_v8 = vld [vmem:[#allocation5 + $0xf0] sm:$0xff]  ;;  %234 = vmatpush.msra.mxu2 %v162_v1  ;;  %v129_v10 = vld [vmem:[#allocation5 + $0x68] sm:$0xff]  ;;  %s4242_s22 = smov 96   ;;  %s3783_s28 = sshll.u32 %s5559_s12, 4  ;;  %s3784_s28 = int_to_ptr.hbm [resolvable:$true] %s3783_s28 }
  0x1a   :  { %213 = vmatpush.msra.mxu1 %v147_v4  ;;  %254 = vmatpush.msra.mxu3 %v178_v6  ;;  %v160_v11 = vld [vmem:[#allocation5 + $0x160] sm:$0xff]  ;;  %v145_v12 = vld [vmem:[#allocation5 + $0xe8] sm:$0xff]  ;;  %v159_v16 = vld [vmem:[#allocation5 + $0x158] sm:$0xff] }
  0x1b   :  { %194 = vmatpush.msra.mxu0 %v130_v7  ;;  %v176_v13 = vld [vmem:[#allocation5 + $0x1e0] sm:$0xff]  ;;  %235 = vmatpush.msra.mxu2 %v161_v5  ;;  %v175_v17 = vld [vmem:[#allocation5 + $0x1d8] sm:$0xff]  ;;  %v158_v20 = vld [vmem:[#allocation5 + $0x150] sm:$0xff] }
  0x1c   :  { %214 = vmatpush.msra.mxu1 %v146_v8  ;;  %255 = vmatpush.msra.mxu3 %v177_v9  ;;  %v128_v14 = vld [vmem:[#allocation5 + $0x60] sm:$0xff]  ;;  %v127_v18 = vld [vmem:[#allocation5 + $0x58] sm:$0xff]  ;;  %v174_v21 = vld [vmem:[#allocation5 + $0x1d0] sm:$0xff] }
  0x1d   :  { %v144_v15 = vld [vmem:[#allocation5 + $0xe0] sm:$0xff]  ;;  %195 = vmatpush.msra.mxu0 %v129_v10  ;;  %236 = vmatpush.msra.mxu2 %v160_v11  ;;  %v143_v19 = vld [vmem:[#allocation5 + $0xd8] sm:$0xff]  ;;  %v126_v22 = vld [vmem:[#allocation5 + $0x50] sm:$0xff] }
  0x1e   :  { %215 = vmatpush.msra.mxu1 %v145_v12  ;;  %256 = vmatpush.msra.mxu3 %v176_v13  ;;  %v142_v23 = vld [vmem:[#allocation5 + $0xd0] sm:$0xff]  ;;  %v157_v24 = vld [vmem:[#allocation5 + $0x148] sm:$0xff]  ;;  %v156_v28 = vld [vmem:[#allocation5 + $0x140] sm:$0xff] }
  0x1f   :  { %196 = vmatpush.msra.mxu0 %v128_v14  ;;  %237 = vmatpush.msra.mxu2 %v159_v16  ;;  %v173_v25 = vld [vmem:[#allocation5 + $0x1c8] sm:$0xff]  ;;  %v172_v29 = vld [vmem:[#allocation5 + $0x1c0] sm:$0xff]  ;;  %v155_v32 = vld [vmem:[#allocation5 + $0x138] sm:$0xff] }
  0x20   :  { %216 = vmatpush.msra.mxu1 %v144_v15  ;;  %257 = vmatpush.msra.mxu3 %v175_v17  ;;  %v125_v26 = vld [vmem:[#allocation5 + $0x48] sm:$0xff]  ;;  %v124_v30 = vld [vmem:[#allocation5 + $0x40] sm:$0xff]  ;;  %v171_v33 = vld [vmem:[#allocation5 + $0x1b8] sm:$0xff] }
  0x21   :  { %197 = vmatpush.msra.mxu0 %v127_v18  ;;  %238 = vmatpush.msra.mxu2 %v158_v20  ;;  %v141_v27 = vld [vmem:[#allocation5 + $0xc8] sm:$0xff]  ;;  %v140_v31 = vld [vmem:[#allocation5 + $0xc0] sm:$0xff]  ;;  %v123_v34 = vld [vmem:[#allocation5 + $0x38] sm:$0xff] }
  0x22   :  { %217 = vmatpush.msra.mxu1 %v143_v19  ;;  %258 = vmatpush.msra.mxu3 %v174_v21  ;;  %v139_v35 = vld [vmem:[#allocation5 + $0xb8] sm:$0xff]  ;;  %v154_v36 = vld [vmem:[#allocation5 + $0x130] sm:$0xff]  ;;  %v153_v40 = vld [vmem:[#allocation5 + $0x128] sm:$0xff] }
  0x23   :  { %198 = vmatpush.msra.mxu0 %v126_v22  ;;  %239 = vmatpush.msra.mxu2 %v157_v24  ;;  %v170_v37 = vld [vmem:[#allocation5 + $0x1b0] sm:$0xff]  ;;  %v169_v41 = vld [vmem:[#allocation5 + $0x1a8] sm:$0xff]  ;;  %v152_v44 = vld [vmem:[#allocation5 + $0x120] sm:$0xff] }
  0x24   :  { %218 = vmatpush.msra.mxu1 %v142_v23  ;;  %259 = vmatpush.msra.mxu3 %v173_v25  ;;  %v122_v38 = vld [vmem:[#allocation5 + $0x30] sm:$0xff]  ;;  %v121_v42 = vld [vmem:[#allocation5 + $0x28] sm:$0xff]  ;;  %v168_v45 = vld [vmem:[#allocation5 + $0x1a0] sm:$0xff] }
  0x25   :  { %199 = vmatpush.msra.mxu0 %v125_v26  ;;  %240 = vmatpush.msra.mxu2 %v156_v28  ;;  %v138_v39 = vld [vmem:[#allocation5 + $0xb0] sm:$0xff]  ;;  %v137_v43 = vld [vmem:[#allocation5 + $0xa8] sm:$0xff]  ;;  %v120_v46 = vld [vmem:[#allocation5 + $0x20] sm:$0xff] }
  0x26   :  { %219 = vmatpush.msra.mxu1 %v141_v27  ;;  %260 = vmatpush.msra.mxu3 %v172_v29  ;;  %v136_v47 = vld [vmem:[#allocation5 + $0xa0] sm:$0xff]  ;;  %v151_v48 = vld [vmem:[#allocation5 + $0x118] sm:$0xff]  ;;  %v150_v52 = vld [vmem:[#allocation5 + $0x110] sm:$0xff] }
  0x27   :  { %200 = vmatpush.msra.mxu0 %v124_v30  ;;  %241 = vmatpush.msra.mxu2 %v155_v32  ;;  %v167_v49 = vld [vmem:[#allocation5 + $0x198] sm:$0xff]  ;;  %v166_v53 = vld [vmem:[#allocation5 + $0x190] sm:$0xff]  ;;  %v149_v56 = vld [vmem:[#allocation5 + $0x108] sm:$0xff] }
  0x28   :  { %220 = vmatpush.msra.mxu1 %v140_v31  ;;  %261 = vmatpush.msra.mxu3 %v171_v33  ;;  %v119_v50 = vld [vmem:[#allocation5 + $0x18] sm:$0xff]  ;;  %v118_v54 = vld [vmem:[#allocation5 + $0x10] sm:$0xff]  ;;  %v165_v57 = vld [vmem:[#allocation5 + $0x188] sm:$0xff] }
  0x29   :  { %201 = vmatpush.msra.mxu0 %v123_v34  ;;  %242 = vmatpush.msra.mxu2 %v154_v36  ;;  %v135_v51 = vld [vmem:[#allocation5 + $0x98] sm:$0xff]  ;;  %v134_v55 = vld [vmem:[#allocation5 + $0x90] sm:$0xff]  ;;  %v117_v58 = vld [vmem:[#allocation5 + $0x8] sm:$0xff] }
  0x2a   :  { %221 = vmatpush.msra.mxu1 %v139_v35  ;;  %262 = vmatpush.msra.mxu3 %v170_v37  ;;  %v133_v59 = vld [vmem:[#allocation5 + $0x88] sm:$0xff]  ;;  %v148_v60 = vld [vmem:[#allocation5 + $0x100] sm:$0xff]  ;;  %v322_v62 = vld [vmem:[#allocation5 + $0x378] sm:$0xff] }
  0x2b   :  { %202 = vmatpush.msra.mxu0 %v122_v38  ;;  %243 = vmatpush.msra.mxu2 %v153_v40  ;;  %v164_v61 = vld [vmem:[#allocation5 + $0x180] sm:$0xff]  ;;  %v338_v63 = vld [vmem:[#allocation5 + $0x3f8] sm:$0xff]  ;;  %v321_v2 = vld [vmem:[#allocation5 + $0x370] sm:$0xff] }
  0x2c   :  { %222 = vmatpush.msra.mxu1 %v138_v39  ;;  %263 = vmatpush.msra.mxu3 %v169_v41  ;;  %v116_v0 = vld [vmem:[#allocation5] sm:$0xff]  ;;  %v290_v3 = vld [vmem:[#allocation5 + $0x278] sm:$0xff]  ;;  %v337_v5 = vld [vmem:[#allocation5 + $0x3f0] sm:$0xff] }
  0x2d   :  { %203 = vmatpush.msra.mxu0 %v121_v42  ;;  %244 = vmatpush.msra.mxu2 %v152_v44  ;;  %v132_v1 = vld [vmem:[#allocation5 + $0x80] sm:$0xff]  ;;  %v306_v4 = vld [vmem:[#allocation5 + $0x2f8] sm:$0xff]  ;;  %v320_v6 = vld [vmem:[#allocation5 + $0x368] sm:$0xff] }
  0x2e   :  { %223 = vmatpush.msra.mxu1 %v137_v43  ;;  %264 = vmatpush.msra.mxu3 %v168_v45  ;;  %v289_v7 = vld [vmem:[#allocation5 + $0x270] sm:$0xff]  ;;  %v336_v9 = vld [vmem:[#allocation5 + $0x3e8] sm:$0xff]  ;;  %v319_v10 = vld [vmem:[#allocation5 + $0x360] sm:$0xff] }
  0x2f   :  { %204 = vmatpush.msra.mxu0 %v120_v46  ;;  %245 = vmatpush.msra.mxu2 %v151_v48  ;;  %v305_v8 = vld [vmem:[#allocation5 + $0x2f0] sm:$0xff]  ;;  %v288_v11 = vld [vmem:[#allocation5 + $0x268] sm:$0xff]  ;;  %v4327_v12 = vld [vmem:[%s5547_s0 + $0x8] sm:$0xff] }
  0x30   :  { %224 = vmatpush.msra.mxu1 %v136_v47  ;;  %265 = vmatpush.msra.mxu3 %v167_v49  ;;  %v304_v13 = vld [vmem:[#allocation5 + $0x2e8] sm:$0xff]  ;;  %v335_v14 = vld [vmem:[#allocation5 + $0x3e0] sm:$0xff]  ;;  %184 = vst [vmem:[#allocation1 + $0x10] ss:$2 sm:$0xff] %v4327_v12  ;;  %v318_v15 = vld [vmem:[#allocation5 + $0x358] sm:$0xff] }
  0x31   :  { %205 = vmatpush.msra.mxu0 %v119_v50  ;;  %246 = vmatpush.msra.mxu2 %v150_v52  ;;  %v287_v16 = vld [vmem:[#allocation5 + $0x260] sm:$0xff]  ;;  %v334_v18 = vld [vmem:[#allocation5 + $0x3d8] sm:$0xff]  ;;  %v317_v20 = vld [vmem:[#allocation5 + $0x350] sm:$0xff] }
  0x32   :  { %225 = vmatpush.msra.mxu1 %v135_v51  ;;  %266 = vmatpush.msra.mxu3 %v166_v53  ;;  %v303_v17 = vld [vmem:[#allocation5 + $0x2e0] sm:$0xff]  ;;  %v4333_v19 = vld [vmem:[%s5547_s0] sm:$0xff]  ;;  %v316_v24 = vld [vmem:[#allocation5 + $0x348] sm:$0xff] }
  0x33   :  { %206 = vmatpush.msra.mxu0 %v118_v54  ;;  %247 = vmatpush.msra.mxu2 %v149_v56  ;;  %v286_v21 = vld [vmem:[#allocation5 + $0x258] sm:$0xff]  ;;  %182 = vst [vmem:[#allocation1] ss:$2 sm:$0xff] %v4333_v19  ;;  %v333_v23 = vld [vmem:[#allocation5 + $0x3d0] sm:$0xff]  ;;  %v315_v27 = vld [vmem:[#allocation5 + $0x340] sm:$0xff] }
  0x34   :  { %226 = vmatpush.msra.mxu1 %v134_v55  ;;  %267 = vmatpush.msra.mxu3 %v165_v57  ;;  %v302_v22 = vld [vmem:[#allocation5 + $0x2d8] sm:$0xff]  ;;  %v285_v25 = vld [vmem:[#allocation5 + $0x250] sm:$0xff]  ;;  %v332_v28 = vld [vmem:[#allocation5 + $0x3c8] sm:$0xff] }
  0x35   :  { %207 = vmatpush.msra.mxu0 %v117_v58  ;;  %248 = vmatpush.msra.mxu2 %v148_v60  ;;  %v301_v26 = vld [vmem:[#allocation5 + $0x2d0] sm:$0xff]  ;;  %v284_v29 = vld [vmem:[#allocation5 + $0x248] sm:$0xff]  ;;  %v314_v33 = vld [vmem:[#allocation5 + $0x338] sm:$0xff] }
  0x36   :  { %227 = vmatpush.msra.mxu1 %v133_v59  ;;  %268 = vmatpush.msra.mxu3 %v164_v61  ;;  %v300_v32 = vld [vmem:[#allocation5 + $0x2c8] sm:$0xff]  ;;  %v331_v34 = vld [vmem:[#allocation5 + $0x3c0] sm:$0xff]  ;;  %v330_v37 = vld [vmem:[#allocation5 + $0x3b8] sm:$0xff] }
  0x37   :  { %390 = vmatpush.msrb.mxu2 %v322_v62  ;;  %208 = vmatpush.msra.mxu0 %v116_v0  ;;  %v187_v30 = vld.sshfl [vmem:[#allocation1 + $0x10] sm:$0xff pattern:$0x75316420]  ;;  %v188_v31 = vld.sshfl [vmem:[#allocation1 + $0x18] sm:$0xff pattern:$0x75316420] }
  0x38   :  { %410 = vmatpush.msrb.mxu3 %v338_v63  ;;  %228 = vmatpush.msra.mxu1 %v132_v1  ;;  %341 = vst [vmem:[#allocation1 + $0x10] ss:$2 sm:$0xff] %v4327_v12  ;;  %v283_v35 = vld [vmem:[#allocation5 + $0x240] sm:$0xff]  ;;  %v313_v40 = vld [vmem:[#allocation5 + $0x330] sm:$0xff]  ;;  %v282_v41 = vld [vmem:[#allocation5 + $0x238] sm:$0xff] }
  0x39   :  { %391 = vmatpush.msrb.mxu2 %v321_v2  ;;  %350 = vmatpush.msrb.mxu0 %v290_v3  ;;  %v299_v36 = vld [vmem:[#allocation5 + $0x2c0] sm:$0xff]  ;;  %v298_v42 = vld [vmem:[#allocation5 + $0x2b8] sm:$0xff]  ;;  %v329_v43 = vld [vmem:[#allocation5 + $0x3b0] sm:$0xff] }
  0x3a   :  { %370 = vmatpush.msrb.mxu1 %v306_v4  ;;  %411 = vmatpush.msrb.mxu3 %v337_v5  ;;  %v185_v38 = vld.sshfl [vmem:[#allocation1] sm:$0xff pattern:$0x75316420]  ;;  %v186_v39 = vld.sshfl [vmem:[#allocation1 + $0x8] sm:$0xff pattern:$0x75316420] }
  0x3b   :  { %392 = vmatpush.msrb.mxu2 %v320_v6  ;;  %351 = vmatpush.msrb.mxu0 %v289_v7  ;;  %339 = vst [vmem:[#allocation1] ss:$2 sm:$0xff] %v4333_v19  ;;  %v312_v44 = vld [vmem:[#allocation5 + $0x328] sm:$0xff]  ;;  %v281_v45 = vld [vmem:[#allocation5 + $0x230] sm:$0xff]  ;;  %v311_v47 = vld [vmem:[#allocation5 + $0x320] sm:$0xff] }
  0x3c   :  { %371 = vmatpush.msrb.mxu1 %v305_v8  ;;  %412 = vmatpush.msrb.mxu3 %v336_v9  ;;  %v297_v46 = vld [vmem:[#allocation5 + $0x2b0] sm:$0xff]  ;;  %v328_v48 = vld [vmem:[#allocation5 + $0x3a8] sm:$0xff]  ;;  %v310_v53 = vld [vmem:[#allocation5 + $0x318] sm:$0xff] }
  0x3d   :  { %393 = vmatpush.msrb.mxu2 %v319_v10  ;;  %352 = vmatpush.msrb.mxu0 %v288_v11  ;;  %v280_v49 = vld [vmem:[#allocation5 + $0x228] sm:$0xff]  ;;  %v327_v54 = vld [vmem:[#allocation5 + $0x3a0] sm:$0xff]  ;;  %v309_v59 = vld [vmem:[#allocation5 + $0x310] sm:$0xff] }
  0x3e   :  { %372 = vmatpush.msrb.mxu1 %v304_v13  ;;  %413 = vmatpush.msrb.mxu3 %v335_v14  ;;  %v296_v52 = vld [vmem:[#allocation5 + $0x2a8] sm:$0xff]  ;;  %v279_v55 = vld [vmem:[#allocation5 + $0x220] sm:$0xff]  ;;  %v326_v60 = vld [vmem:[#allocation5 + $0x398] sm:$0xff] }
  0x3f   :  { %394 = vmatpush.msrb.mxu2 %v318_v15  ;;  %353 = vmatpush.msrb.mxu0 %v287_v16  ;;  %v344_v50 = vld.sshfl [vmem:[#allocation1 + $0x10] sm:$0xff pattern:$0x75316420]  ;;  %v345_v51 = vld.sshfl [vmem:[#allocation1 + $0x18] sm:$0xff pattern:$0x75316420] }
  0x40   :  { %373 = vmatpush.msrb.mxu1 %v303_v17  ;;  %414 = vmatpush.msrb.mxu3 %v334_v18  ;;  %498 = vst [vmem:[#allocation1 + $0x10] ss:$2 sm:$0xff] %v4327_v12  ;;  %v295_v58 = vld [vmem:[#allocation5 + $0x2a0] sm:$0xff]  ;;  %v278_v61 = vld [vmem:[#allocation5 + $0x218] sm:$0xff]  ;;  %v308_v63 = vld [vmem:[#allocation5 + $0x308] sm:$0xff] }
  0x41   :  { %395 = vmatpush.msrb.mxu2 %v317_v20  ;;  %354 = vmatpush.msrb.mxu0 %v286_v21  ;;  %v294_v62 = vld [vmem:[#allocation5 + $0x298] sm:$0xff]  ;;  %v325_v0 = vld [vmem:[#allocation5 + $0x390] sm:$0xff]  ;;  %v307_v3 = vld [vmem:[#allocation5 + $0x300] sm:$0xff] }
  0x42   :  { %374 = vmatpush.msrb.mxu1 %v302_v22  ;;  %415 = vmatpush.msrb.mxu3 %v333_v23  ;;  %v342_v56 = vld.sshfl [vmem:[#allocation1] sm:$0xff pattern:$0x75316420]  ;;  %v343_v57 = vld.sshfl [vmem:[#allocation1 + $0x8] sm:$0xff pattern:$0x75316420] }
  0x43   :  { %396 = vmatpush.msrb.mxu2 %v316_v24  ;;  %355 = vmatpush.msrb.mxu0 %v285_v25  ;;  %496 = vst [vmem:[#allocation1] ss:$2 sm:$0xff] %v4333_v19  ;;  %v277_v1 = vld [vmem:[#allocation5 + $0x210] sm:$0xff]  ;;  %v324_v4 = vld [vmem:[#allocation5 + $0x388] sm:$0xff]  ;;  %v479_v5 = vld [vmem:[#allocation5 + $0x578] sm:$0xff] }
  0x44   :  { %375 = vmatpush.msrb.mxu1 %v301_v26  ;;  %416 = vmatpush.msrb.mxu3 %v332_v28  ;;  %v293_v2 = vld [vmem:[#allocation5 + $0x290] sm:$0xff]  ;;  %v276_v6 = vld [vmem:[#allocation5 + $0x208] sm:$0xff]  ;;  %v323_v8 = vld [vmem:[#allocation5 + $0x380] sm:$0xff] }
  0x45   :  { %397 = vmatpush.msrb.mxu2 %v315_v27  ;;  %356 = vmatpush.msrb.mxu0 %v284_v29  ;;  %v292_v7 = vld [vmem:[#allocation5 + $0x288] sm:$0xff]  ;;  %v478_v9 = vld [vmem:[#allocation5 + $0x570] sm:$0xff]  ;;  %v495_v10 = vld [vmem:[#allocation5 + $0x5f8] sm:$0xff] }
  0x46   :  { %376 = vmatpush.msrb.mxu1 %v300_v32  ;;  %417 = vmatpush.msrb.mxu3 %v331_v34  ;;  %v275_v11 = vld [vmem:[#allocation5 + $0x200] sm:$0xff]  ;;  %v447_v14 = vld [vmem:[#allocation5 + $0x478] sm:$0xff]  ;;  %v477_v16 = vld [vmem:[#allocation5 + $0x568] sm:$0xff] }
  0x47   :  { %398 = vmatpush.msrb.mxu2 %v314_v33  ;;  %357 = vmatpush.msrb.mxu0 %v283_v35  ;;  %v291_v13 = vld [vmem:[#allocation5 + $0x280] sm:$0xff]  ;;  %v463_v15 = vld [vmem:[#allocation5 + $0x4f8] sm:$0xff]  ;;  %v494_v17 = vld [vmem:[#allocation5 + $0x5f0] sm:$0xff] }
  0x48   :  { %377 = vmatpush.msrb.mxu1 %v299_v36  ;;  %418 = vmatpush.msrb.mxu3 %v330_v37  ;;  %v446_v18 = vld [vmem:[#allocation5 + $0x470] sm:$0xff]  ;;  %v476_v21 = vld [vmem:[#allocation5 + $0x560] sm:$0xff]  ;;  %v493_v22 = vld [vmem:[#allocation5 + $0x5e8] sm:$0xff] }
  0x49   :  { %399 = vmatpush.msrb.mxu2 %v313_v40  ;;  %358 = vmatpush.msrb.mxu0 %v282_v41  ;;  %v462_v20 = vld [vmem:[#allocation5 + $0x4f0] sm:$0xff]  ;;  %v445_v23 = vld [vmem:[#allocation5 + $0x468] sm:$0xff]  ;;  %v475_v25 = vld [vmem:[#allocation5 + $0x558] sm:$0xff] }
  0x4a   :  { %378 = vmatpush.msrb.mxu1 %v298_v42  ;;  %419 = vmatpush.msrb.mxu3 %v329_v43  ;;  %v461_v24 = vld [vmem:[#allocation5 + $0x4e8] sm:$0xff]  ;;  %v492_v26 = vld [vmem:[#allocation5 + $0x5e0] sm:$0xff]  ;;  %v474_v29 = vld [vmem:[#allocation5 + $0x550] sm:$0xff] }
  0x4b   :  { %400 = vmatpush.msrb.mxu2 %v312_v44  ;;  %359 = vmatpush.msrb.mxu0 %v281_v45  ;;  %v444_v27 = vld [vmem:[#allocation5 + $0x460] sm:$0xff]  ;;  %v459_v32 = vld [vmem:[#allocation5 + $0x4d8] sm:$0xff]  ;;  %v473_v33 = vld [vmem:[#allocation5 + $0x548] sm:$0xff] }
  0x4c   :  { %379 = vmatpush.msrb.mxu1 %v297_v46  ;;  %420 = vmatpush.msrb.mxu3 %v328_v48  ;;  %v460_v28 = vld [vmem:[#allocation5 + $0x4e0] sm:$0xff]  ;;  %v490_v34 = vld [vmem:[#allocation5 + $0x5d0] sm:$0xff]  ;;  %v457_v40 = vld [vmem:[#allocation5 + $0x4c8] sm:$0xff] }
  0x4d   :  { %401 = vmatpush.msrb.mxu2 %v311_v47  ;;  %360 = vmatpush.msrb.mxu0 %v280_v49  ;;  %v442_v35 = vld [vmem:[#allocation5 + $0x450] sm:$0xff]  ;;  %v472_v37 = vld [vmem:[#allocation5 + $0x540] sm:$0xff]  ;;  %v471_v41 = vld [vmem:[#allocation5 + $0x538] sm:$0xff] }
  0x4e   :  { %249 = vmatmul.f32.vlgmr.msra.gmra.mxu2 %v187_v30  ;;  %380 = vmatpush.msrb.mxu1 %v296_v52  ;;  %v491_v30 = vld [vmem:[#allocation5 + $0x5d8] sm:$0xff]  ;;  %v458_v36 = vld [vmem:[#allocation5 + $0x4d0] sm:$0xff]  ;;  %v488_v42 = vld [vmem:[#allocation5 + $0x5c0] sm:$0xff] }
  0x4f   :  { %402 = vmatpush.msrb.mxu2 %v310_v53  ;;  %421 = vmatpush.msrb.mxu3 %v327_v54  ;;  %v440_v43 = vld [vmem:[#allocation5 + $0x440] sm:$0xff]  ;;  %v470_v45 = vld [vmem:[#allocation5 + $0x530] sm:$0xff]  ;;  %v487_v46 = vld [vmem:[#allocation5 + $0x5b8] sm:$0xff] }
  0x50   :  { %269 = vmatmul.f32.vlgmr.msra.gmra.mxu3 %v188_v31  ;;  %361 = vmatpush.msrb.mxu0 %v279_v55  ;;  %v443_v31 = vld [vmem:[#allocation5 + $0x458] sm:$0xff]  ;;  %v456_v44 = vld [vmem:[#allocation5 + $0x4c0] sm:$0xff]  ;;  %v469_v49 = vld [vmem:[#allocation5 + $0x528] sm:$0xff] }
  0x51   :  { %381 = vmatpush.msrb.mxu1 %v295_v58  ;;  %403 = vmatpush.msrb.mxu2 %v309_v59  ;;  %v439_v47 = vld [vmem:[#allocation5 + $0x438] sm:$0xff]  ;;  %v454_v52 = vld [vmem:[#allocation5 + $0x4b0] sm:$0xff]  ;;  %v468_v53 = vld [vmem:[#allocation5 + $0x520] sm:$0xff] }
  0x52   :  { %422 = vmatpush.msrb.mxu3 %v326_v60  ;;  %209 = vmatmul.f32.vlgmr.msra.gmra.mxu0 %v185_v38  ;;  %v489_v38 = vld [vmem:[#allocation5 + $0x5c8] sm:$0xff]  ;;  %v455_v48 = vld [vmem:[#allocation5 + $0x4b8] sm:$0xff]  ;;  %v484_v58 = vld [vmem:[#allocation5 + $0x5a0] sm:$0xff] }
  0x53   :  { %229 = vmatmul.f32.vlgmr.msra.gmra.mxu1 %v186_v39  ;;  %362 = vmatpush.msrb.mxu0 %v278_v61  ;;  %v441_v39 = vld [vmem:[#allocation5 + $0x448] sm:$0xff]  ;;  %v436_v59 = vld [vmem:[#allocation5 + $0x420] sm:$0xff]  ;;  %v466_v61 = vld [vmem:[#allocation5 + $0x510] sm:$0xff] }
  0x54   :  { %382 = vmatpush.msrb.mxu1 %v294_v62  ;;  %404 = vmatpush.msrb.mxu2 %v308_v63  ;;  %v485_v54 = vld [vmem:[#allocation5 + $0x5a8] sm:$0xff]  ;;  %v452_v60 = vld [vmem:[#allocation5 + $0x4a0] sm:$0xff]  ;;  %v483_v63 = vld [vmem:[#allocation5 + $0x598] sm:$0xff] }
  0x55   :  { %423 = vmatpush.msrb.mxu3 %v325_v0  ;;  %363 = vmatpush.msrb.mxu0 %v277_v1  ;;  %v437_v55 = vld [vmem:[#allocation5 + $0x428] sm:$0xff]  ;;  %v435_v0 = vld [vmem:[#allocation5 + $0x418] sm:$0xff] }
  0x56   :  { %383 = vmatpush.msrb.mxu1 %v293_v2  ;;  %405 = vmatpush.msrb.mxu2 %v307_v3  ;;  %v4340_v62 = vld.sshfl [vmem:[#allocation1 + $0x10] sm:$0xff pattern:$0x75316420]  ;;  %v451_v1 = vld [vmem:[#allocation5 + $0x498] sm:$0xff] }
  0x57   :  { %424 = vmatpush.msrb.mxu3 %v324_v4  ;;  %406 = vmatmul.f32.vlgmr.msrb.gmra.mxu2 %v344_v50  ;;  %v486_v50 = vld [vmem:[#allocation5 + $0x5b0] sm:$0xff]  ;;  %v465_v2 = vld [vmem:[#allocation5 + $0x508] sm:$0xff] }
  0x58   :  { %547 = vmatpush.msra.mxu2 %v479_v5  ;;  %364 = vmatpush.msrb.mxu0 %v276_v6  ;;  %v4342_v3 = vld.sshfl [vmem:[#allocation1 + $0x18] sm:$0xff pattern:$0x75316420] }
  0x59   :  { %384 = vmatpush.msrb.mxu1 %v292_v7  ;;  %425 = vmatpush.msrb.mxu3 %v323_v8  ;;  %v482_v4 = vld [vmem:[#allocation5 + $0x590] sm:$0xff]  ;;  %655 = vst [vmem:[#allocation1 + $0x10] ss:$2 sm:$0xff] %v4327_v12  ;;  %v464_v7 = vld [vmem:[#allocation5 + $0x500] sm:$0xff]  ;;  %v481_v8 = vld [vmem:[#allocation5 + $0x588] sm:$0xff] }
  0x5a   :  { %426 = vmatmul.f32.vlgmr.msrb.gmra.mxu3 %v345_v51  ;;  %548 = vmatpush.msra.mxu2 %v478_v9  ;;  %v438_v51 = vld [vmem:[#allocation5 + $0x430] sm:$0xff]  ;;  %v636_v9 = vld [vmem:[#allocation5 + $0x778] sm:$0xff] }
  0x5b   :  { %567 = vmatpush.msra.mxu3 %v495_v10  ;;  %365 = vmatpush.msrb.mxu0 %v275_v11  ;;  %v434_v5 = vld [vmem:[#allocation5 + $0x410] sm:$0xff]  ;;  %v4347_v11 = vld.sshfl [vmem:[#allocation1 + $0x8] sm:$0xff pattern:$0x75316420] }
  0x5c   :  { %385 = vmatpush.msrb.mxu1 %v291_v13  ;;  %366 = vmatmul.f32.vlgmr.msrb.gmra.mxu0 %v342_v56  ;;  %v453_v56 = vld [vmem:[#allocation5 + $0x4a8] sm:$0xff]  ;;  %v450_v6 = vld [vmem:[#allocation5 + $0x490] sm:$0xff] }
  0x5d   :  { %386 = vmatmul.f32.vlgmr.msrb.gmra.mxu1 %v343_v57  ;;  %507 = vmatpush.msra.mxu0 %v447_v14  ;;  %v467_v57 = vld [vmem:[#allocation5 + $0x518] sm:$0xff]  ;;  %v433_v13 = vld [vmem:[#allocation5 + $0x408] sm:$0xff] }
  0x5e   :  { %527 = vmatpush.msra.mxu1 %v463_v15  ;;  %549 = vmatpush.msra.mxu2 %v477_v16  ;;  %v4345_v10 = vld.sshfl [vmem:[#allocation1] sm:$0xff pattern:$0x75316420]  ;;  %v449_v14 = vld [vmem:[#allocation5 + $0x488] sm:$0xff]  ;;  %v480_v15 = vld [vmem:[#allocation5 + $0x580] sm:$0xff] }
  0x5f   :  { %568 = vmatpush.msra.mxu3 %v494_v17  ;;  %508 = vmatpush.msra.mxu0 %v446_v18  ;;  %653 = vst [vmem:[#allocation1] ss:$2 sm:$0xff] %v4333_v19  ;;  %v635_v16 = vld [vmem:[#allocation5 + $0x770] sm:$0xff]  ;;  %v652_v17 = vld [vmem:[#allocation5 + $0x7f8] sm:$0xff]  ;;  %v432_v18 = vld [vmem:[#allocation5 + $0x400] sm:$0xff] }
  0x60   :  { %528 = vmatpush.msra.mxu1 %v462_v20  ;;  %550 = vmatpush.msra.mxu2 %v476_v21  ;;  %v448_v20 = vld [vmem:[#allocation5 + $0x480] sm:$0xff]  ;;  %v604_v21 = vld [vmem:[#allocation5 + $0x678] sm:$0xff] }
  0x61   :  { %569 = vmatpush.msra.mxu3 %v493_v22  ;;  %509 = vmatpush.msra.mxu0 %v445_v23  ;;  %v620_v22 = vld [vmem:[#allocation5 + $0x6f8] sm:$0xff]  ;;  %v634_v23 = vld [vmem:[#allocation5 + $0x768] sm:$0xff] }
  0x62   :  { %529 = vmatpush.msra.mxu1 %v461_v24  ;;  %551 = vmatpush.msra.mxu2 %v475_v25  ;;  %v651_v24 = vld [vmem:[#allocation5 + $0x7f0] sm:$0xff] }
  0x63   :  { %570 = vmatpush.msra.mxu3 %v492_v26  ;;  %510 = vmatpush.msra.mxu0 %v444_v27  ;;  %v603_v25 = vld [vmem:[#allocation5 + $0x670] sm:$0xff]  ;;  %v633_v27 = vld [vmem:[#allocation5 + $0x760] sm:$0xff] }
  0x64   :  { %530 = vmatpush.msra.mxu1 %v460_v28  ;;  %552 = vmatpush.msra.mxu2 %v474_v29  ;;  %v619_v26 = vld [vmem:[#allocation5 + $0x6f0] sm:$0xff]  ;;  %v4350_v28 = vld.sshfl [vmem:[#allocation1 + $0x10] sm:$0xff pattern:$0x75316420] }
  0x65   :  { %571 = vmatpush.msra.mxu3 %v491_v30  ;;  %511 = vmatpush.msra.mxu0 %v443_v31  ;;  %v4352_v29 = vld.sshfl [vmem:[#allocation1 + $0x18] sm:$0xff pattern:$0x75316420] }
  0x66   :  { %531 = vmatpush.msra.mxu1 %v459_v32  ;;  %553 = vmatpush.msra.mxu2 %v473_v33  ;;  %v650_v30 = vld [vmem:[#allocation5 + $0x7e8] sm:$0xff]  ;;  %812 = vst [vmem:[#allocation1 + $0x10] ss:$2 sm:$0xff] %v4327_v12  ;;  %v632_v33 = vld [vmem:[#allocation5 + $0x758] sm:$0xff] }
  0x67   :  { %572 = vmatpush.msra.mxu3 %v490_v34  ;;  %512 = vmatpush.msra.mxu0 %v442_v35  ;;  %v602_v31 = vld [vmem:[#allocation5 + $0x668] sm:$0xff]  ;;  %v649_v34 = vld [vmem:[#allocation5 + $0x7e0] sm:$0xff] }
  0x68   :  { %532 = vmatpush.msra.mxu1 %v458_v36  ;;  %554 = vmatpush.msra.mxu2 %v472_v37  ;;  %v618_v32 = vld [vmem:[#allocation5 + $0x6e8] sm:$0xff]  ;;  %v601_v35 = vld [vmem:[#allocation5 + $0x660] sm:$0xff]  ;;  %v4355_v36 = vld.sshfl [vmem:[#allocation1] sm:$0xff pattern:$0x75316420] }
  0x69   :  { %573 = vmatpush.msra.mxu3 %v489_v38  ;;  %513 = vmatpush.msra.mxu0 %v441_v39  ;;  %v4357_v37 = vld.sshfl [vmem:[#allocation1 + $0x8] sm:$0xff pattern:$0x75316420]  ;;  %v631_v39 = vld [vmem:[#allocation5 + $0x750] sm:$0xff] }
  0x6a   :  { %533 = vmatpush.msra.mxu1 %v457_v40  ;;  %555 = vmatpush.msra.mxu2 %v471_v41  ;;  %v617_v38 = vld [vmem:[#allocation5 + $0x6e0] sm:$0xff]  ;;  %810 = vst [vmem:[#allocation1] ss:$2 sm:$0xff] %v4333_v19  ;;  %v648_v40 = vld [vmem:[#allocation5 + $0x7d8] sm:$0xff] }
  0x6b   :  { %574 = vmatpush.msra.mxu3 %v488_v42  ;;  %514 = vmatpush.msra.mxu0 %v440_v43  ;;  %v600_v41 = vld [vmem:[#allocation5 + $0x658] sm:$0xff]  ;;  %v630_v43 = vld [vmem:[#allocation5 + $0x748] sm:$0xff] }
  0x6c   :  { %534 = vmatpush.msra.mxu1 %v456_v44  ;;  %556 = vmatpush.msra.mxu2 %v470_v45  ;;  %v616_v42 = vld [vmem:[#allocation5 + $0x6d8] sm:$0xff]  ;;  %v647_v44 = vld [vmem:[#allocation5 + $0x7d0] sm:$0xff] }
  0x6d   :  { %575 = vmatpush.msra.mxu3 %v487_v46  ;;  %515 = vmatpush.msra.mxu0 %v439_v47  ;;  %v599_v45 = vld [vmem:[#allocation5 + $0x650] sm:$0xff]  ;;  %v629_v47 = vld [vmem:[#allocation5 + $0x740] sm:$0xff] }
  0x6e   :  { %535 = vmatpush.msra.mxu1 %v455_v48  ;;  %557 = vmatpush.msra.mxu2 %v469_v49  ;;  %v615_v46 = vld [vmem:[#allocation5 + $0x6d0] sm:$0xff]  ;;  %v646_v48 = vld [vmem:[#allocation5 + $0x7c8] sm:$0xff] }
  0x6f   :  { %576 = vmatpush.msra.mxu3 %v486_v50  ;;  %516 = vmatpush.msra.mxu0 %v438_v51  ;;  %v598_v49 = vld [vmem:[#allocation5 + $0x648] sm:$0xff]  ;;  %v628_v51 = vld [vmem:[#allocation5 + $0x738] sm:$0xff] }
  0x70   :  { %536 = vmatpush.msra.mxu1 %v454_v52  ;;  %558 = vmatpush.msra.mxu2 %v468_v53  ;;  %v614_v50 = vld [vmem:[#allocation5 + $0x6c8] sm:$0xff]  ;;  %v645_v52 = vld [vmem:[#allocation5 + $0x7c0] sm:$0xff] }
  0x71   :  { %577 = vmatpush.msra.mxu3 %v485_v54  ;;  %517 = vmatpush.msra.mxu0 %v437_v55  ;;  %v597_v53 = vld [vmem:[#allocation5 + $0x640] sm:$0xff]  ;;  %v627_v55 = vld [vmem:[#allocation5 + $0x730] sm:$0xff] }
  0x72   :  { %537 = vmatpush.msra.mxu1 %v453_v56  ;;  %559 = vmatpush.msra.mxu2 %v467_v57  ;;  %v613_v54 = vld [vmem:[#allocation5 + $0x6c0] sm:$0xff]  ;;  %v644_v56 = vld [vmem:[#allocation5 + $0x7b8] sm:$0xff] }
  0x73   :  { %578 = vmatpush.msra.mxu3 %v484_v58  ;;  %518 = vmatpush.msra.mxu0 %v436_v59  ;;  %v596_v57 = vld [vmem:[#allocation5 + $0x638] sm:$0xff]  ;;  %v626_v59 = vld [vmem:[#allocation5 + $0x728] sm:$0xff] }
  0x74   :  { %538 = vmatpush.msra.mxu1 %v452_v60  ;;  %560 = vmatpush.msra.mxu2 %v466_v61  ;;  %v612_v58 = vld [vmem:[#allocation5 + $0x6b8] sm:$0xff]  ;;  %v643_v60 = vld [vmem:[#allocation5 + $0x7b0] sm:$0xff] }
  0x75   :  { %579 = vmatpush.msra.mxu3 %v483_v63  ;;  %519 = vmatpush.msra.mxu0 %v435_v0  ;;  %v595_v61 = vld [vmem:[#allocation5 + $0x630] sm:$0xff]  ;;  %v625_v0 = vld [vmem:[#allocation5 + $0x720] sm:$0xff] }
  0x76   :  { %539 = vmatpush.msra.mxu1 %v451_v1  ;;  %561 = vmatpush.msra.mxu2 %v465_v2  ;;  %v611_v63 = vld [vmem:[#allocation5 + $0x6b0] sm:$0xff]  ;;  %v642_v1 = vld [vmem:[#allocation5 + $0x7a8] sm:$0xff] }
  0x77   :  { %580 = vmatpush.msra.mxu3 %v482_v4  ;;  %520 = vmatpush.msra.mxu0 %v434_v5  ;;  %v594_v2 = vld [vmem:[#allocation5 + $0x628] sm:$0xff]  ;;  %v624_v5 = vld [vmem:[#allocation5 + $0x718] sm:$0xff] }
  0x78   :  { %540 = vmatpush.msra.mxu1 %v450_v6  ;;  %562 = vmatpush.msra.mxu2 %v464_v7  ;;  %v610_v4 = vld [vmem:[#allocation5 + $0x6a8] sm:$0xff]  ;;  %v641_v6 = vld [vmem:[#allocation5 + $0x7a0] sm:$0xff] }
  0x79   :  { %581 = vmatpush.msra.mxu3 %v481_v8  ;;  %521 = vmatpush.msra.mxu0 %v433_v13  ;;  %v593_v7 = vld [vmem:[#allocation5 + $0x620] sm:$0xff]  ;;  %v640_v13 = vld [vmem:[#allocation5 + $0x798] sm:$0xff] }
  0x7a   :  { %704 = vmatpush.msrb.mxu2 %v636_v9  ;;  %541 = vmatpush.msra.mxu1 %v449_v14  ;;  %v609_v8 = vld [vmem:[#allocation5 + $0x6a0] sm:$0xff]  ;;  %v623_v9 = vld [vmem:[#allocation5 + $0x710] sm:$0xff]  ;;  %v592_v14 = vld [vmem:[#allocation5 + $0x618] sm:$0xff] }
  0x7b   :  { %582 = vmatpush.msra.mxu3 %v480_v15  ;;  %522 = vmatpush.msra.mxu0 %v432_v18  ;;  %v608_v15 = vld [vmem:[#allocation5 + $0x698] sm:$0xff]  ;;  %v607_v18 = vld [vmem:[#allocation5 + $0x690] sm:$0xff] }
  0x7c   :  { %705 = vmatpush.msrb.mxu2 %v635_v16  ;;  %542 = vmatpush.msra.mxu1 %v448_v20  ;;  %v622_v16 = vld [vmem:[#allocation5 + $0x708] sm:$0xff]  ;;  %v621_v20 = vld [vmem:[#allocation5 + $0x700] sm:$0xff] }
  0x7d   :  { %724 = vmatpush.msrb.mxu3 %v652_v17  ;;  %664 = vmatpush.msrb.mxu0 %v604_v21  ;;  %v591_v17 = vld [vmem:[#allocation5 + $0x610] sm:$0xff]  ;;  %v638_v21 = vld [vmem:[#allocation5 + $0x788] sm:$0xff] }
  0x7e   :  { %684 = vmatpush.msrb.mxu1 %v620_v22  ;;  %706 = vmatpush.msrb.mxu2 %v634_v23  ;;  %v590_v22 = vld [vmem:[#allocation5 + $0x608] sm:$0xff] }
  0x7f   :  { %725 = vmatpush.msrb.mxu3 %v651_v24  ;;  %665 = vmatpush.msrb.mxu0 %v603_v25  ;;  %v606_v23 = vld [vmem:[#allocation5 + $0x688] sm:$0xff]  ;;  %v637_v24 = vld [vmem:[#allocation5 + $0x780] sm:$0xff] }
  0x80   :  { %685 = vmatpush.msrb.mxu1 %v619_v26  ;;  %707 = vmatpush.msrb.mxu2 %v633_v27  ;;  %v589_v25 = vld [vmem:[#allocation5 + $0x600] sm:$0xff]  ;;  %v761_v27 = vld [vmem:[#allocation5 + $0x878] sm:$0xff] }
  0x81   :  { %726 = vmatpush.msrb.mxu3 %v650_v30  ;;  %666 = vmatpush.msrb.mxu0 %v602_v31  ;;  %v605_v26 = vld [vmem:[#allocation5 + $0x680] sm:$0xff]  ;;  %v777_v30 = vld [vmem:[#allocation5 + $0x8f8] sm:$0xff]  ;;  %v791_v31 = vld [vmem:[#allocation5 + $0x968] sm:$0xff] }
  0x82   :  { %686 = vmatpush.msrb.mxu1 %v618_v32  ;;  %708 = vmatpush.msrb.mxu2 %v632_v33  ;;  %v760_v32 = vld [vmem:[#allocation5 + $0x870] sm:$0xff] }
  0x83   :  { %727 = vmatpush.msrb.mxu3 %v649_v34  ;;  %667 = vmatpush.msrb.mxu0 %v601_v35  ;;  %v776_v33 = vld [vmem:[#allocation5 + $0x8f0] sm:$0xff]  ;;  %v790_v34 = vld [vmem:[#allocation5 + $0x960] sm:$0xff]  ;;  %v807_v35 = vld [vmem:[#allocation5 + $0x9e8] sm:$0xff] }
  0x84   :  { %687 = vmatpush.msrb.mxu1 %v617_v38  ;;  %709 = vmatpush.msrb.mxu2 %v631_v39  ;;  %v775_v38 = vld [vmem:[#allocation5 + $0x8e8] sm:$0xff]  ;;  %v789_v39 = vld [vmem:[#allocation5 + $0x958] sm:$0xff] }
  0x85   :  { %728 = vmatpush.msrb.mxu3 %v648_v40  ;;  %668 = vmatpush.msrb.mxu0 %v600_v41  ;;  %v806_v40 = vld [vmem:[#allocation5 + $0x9e0] sm:$0xff] }
  0x86   :  { %688 = vmatpush.msrb.mxu1 %v616_v42  ;;  %710 = vmatpush.msrb.mxu2 %v630_v43  ;;  %v758_v41 = vld [vmem:[#allocation5 + $0x860] sm:$0xff]  ;;  %v788_v42 = vld [vmem:[#allocation5 + $0x950] sm:$0xff]  ;;  %v757_v43 = vld [vmem:[#allocation5 + $0x858] sm:$0xff] }
  0x87   :  { %729 = vmatpush.msrb.mxu3 %v647_v44  ;;  %669 = vmatpush.msrb.mxu0 %v599_v45  ;;  %v773_v44 = vld [vmem:[#allocation5 + $0x8d8] sm:$0xff]  ;;  %v787_v45 = vld [vmem:[#allocation5 + $0x948] sm:$0xff] }
  0x88   :  { %689 = vmatpush.msrb.mxu1 %v615_v46  ;;  %711 = vmatpush.msrb.mxu2 %v629_v47  ;;  %v804_v46 = vld [vmem:[#allocation5 + $0x9d0] sm:$0xff] }
  0x89   :  { %730 = vmatpush.msrb.mxu3 %v646_v48  ;;  %670 = vmatpush.msrb.mxu0 %v598_v49  ;;  %v756_v47 = vld [vmem:[#allocation5 + $0x850] sm:$0xff]  ;;  %v786_v49 = vld [vmem:[#allocation5 + $0x940] sm:$0xff] }
  0x8a   :  { %690 = vmatpush.msrb.mxu1 %v614_v50  ;;  %712 = vmatpush.msrb.mxu2 %v628_v51  ;;  %v772_v48 = vld [vmem:[#allocation5 + $0x8d0] sm:$0xff]  ;;  %v803_v50 = vld [vmem:[#allocation5 + $0x9c8] sm:$0xff] }
  0x8b   :  { %731 = vmatpush.msrb.mxu3 %v645_v52  ;;  %671 = vmatpush.msrb.mxu0 %v597_v53  ;;  %v755_v51 = vld [vmem:[#allocation5 + $0x848] sm:$0xff]  ;;  %v785_v53 = vld [vmem:[#allocation5 + $0x938] sm:$0xff] }
  0x8c   :  { %691 = vmatpush.msrb.mxu1 %v613_v54  ;;  %713 = vmatpush.msrb.mxu2 %v627_v55  ;;  %v771_v52 = vld [vmem:[#allocation5 + $0x8c8] sm:$0xff]  ;;  %v802_v54 = vld [vmem:[#allocation5 + $0x9c0] sm:$0xff] }
  0x8d   :  { %732 = vmatpush.msrb.mxu3 %v644_v56  ;;  %672 = vmatpush.msrb.mxu0 %v596_v57  ;;  %v754_v55 = vld [vmem:[#allocation5 + $0x840] sm:$0xff]  ;;  %v784_v57 = vld [vmem:[#allocation5 + $0x930] sm:$0xff] }
  0x8e   :  { %692 = vmatpush.msrb.mxu1 %v612_v58  ;;  %714 = vmatpush.msrb.mxu2 %v626_v59  ;;  %v770_v56 = vld [vmem:[#allocation5 + $0x8c0] sm:$0xff]  ;;  %v801_v58 = vld [vmem:[#allocation5 + $0x9b8] sm:$0xff] }
  0x8f   :  { %733 = vmatpush.msrb.mxu3 %v643_v60  ;;  %673 = vmatpush.msrb.mxu0 %v595_v61  ;;  %v753_v59 = vld [vmem:[#allocation5 + $0x838] sm:$0xff]  ;;  %v783_v61 = vld [vmem:[#allocation5 + $0x928] sm:$0xff] }
  0x90   :  { %693 = vmatpush.msrb.mxu1 %v611_v63  ;;  %715 = vmatpush.msrb.mxu2 %v625_v0  ;;  %v769_v60 = vld [vmem:[#allocation5 + $0x8b8] sm:$0xff]  ;;  %v800_v63 = vld [vmem:[#allocation5 + $0x9b0] sm:$0xff] }
  0x91   :  { %734 = vmatpush.msrb.mxu3 %v642_v1  ;;  %563 = vmatmul.f32.vlgmr.msra.gmra.mxu2 %v4340_v62  ;;  %v639_v62 = vld [vmem:[#allocation5 + $0x790] sm:$0xff] }
  0x92   :  { %674 = vmatpush.msrb.mxu0 %v594_v2  ;;  %694 = vmatpush.msrb.mxu1 %v610_v4  ;;  %v752_v0 = vld [vmem:[#allocation5 + $0x830] sm:$0xff]  ;;  %v782_v2 = vld [vmem:[#allocation5 + $0x920] sm:$0xff]  ;;  %v799_v4 = vld [vmem:[#allocation5 + $0x9a8] sm:$0xff] }
  0x93   :  { %716 = vmatpush.msrb.mxu2 %v624_v5  ;;  %735 = vmatpush.msrb.mxu3 %v641_v6  ;;  %v768_v1 = vld [vmem:[#allocation5 + $0x8b0] sm:$0xff]  ;;  %v751_v5 = vld [vmem:[#allocation5 + $0x828] sm:$0xff] }
  0x94   :  { %583 = vmatmul.f32.vlgmr.msra.gmra.mxu3 %v4342_v3  ;;  %675 = vmatpush.msrb.mxu0 %v593_v7  ;;  %v793_v3 = vld [vmem:[#allocation5 + $0x978] sm:$0xff]  ;;  %v767_v6 = vld [vmem:[#allocation5 + $0x8a8] sm:$0xff] }
  0x95   :  { %695 = vmatpush.msrb.mxu1 %v609_v8  ;;  %717 = vmatpush.msrb.mxu2 %v623_v9  ;;  %v781_v7 = vld [vmem:[#allocation5 + $0x918] sm:$0xff]  ;;  %v798_v8 = vld [vmem:[#allocation5 + $0x9a0] sm:$0xff] }
  0x96   :  { %736 = vmatpush.msrb.mxu3 %v640_v13  ;;  %523 = vmatmul.f32.vlgmr.msra.gmra.mxu0 %v4345_v10  ;;  %v792_v10 = vld [vmem:[#allocation5 + $0x970] sm:$0xff]  ;;  %v750_v9 = vld [vmem:[#allocation5 + $0x820] sm:$0xff] }
  0x97   :  { %543 = vmatmul.f32.vlgmr.msra.gmra.mxu1 %v4347_v11  ;;  %676 = vmatpush.msrb.mxu0 %v592_v14  ;;  %v809_v11 = vld [vmem:[#allocation5 + $0x9f8] sm:$0xff]  ;;  %v766_v13 = vld [vmem:[#allocation5 + $0x8a0] sm:$0xff]  ;;  %v780_v14 = vld [vmem:[#allocation5 + $0x910] sm:$0xff] }
  0x98   :  { %696 = vmatpush.msrb.mxu1 %v608_v15  ;;  %718 = vmatpush.msrb.mxu2 %v622_v16  ;;  %v4368_v15 = vld.sshfl [vmem:[#allocation1 + $0x10] sm:$0xff pattern:$0x75316420]  ;;  %v797_v16 = vld [vmem:[#allocation5 + $0x998] sm:$0xff] }
  0x99   :  { %737 = vmatpush.msrb.mxu3 %v639_v62  ;;  %677 = vmatpush.msrb.mxu0 %v591_v17  ;;  %v749_v62 = vld [vmem:[#allocation5 + $0x818] sm:$0xff] }
  0x9a   :  { %697 = vmatpush.msrb.mxu1 %v607_v18  ;;  %719 = vmatpush.msrb.mxu2 %v621_v20  ;;  %v765_v17 = vld [vmem:[#allocation5 + $0x898] sm:$0xff]  ;;  %v779_v18 = vld [vmem:[#allocation5 + $0x908] sm:$0xff] }
  0x9b   :  { %738 = vmatpush.msrb.mxu3 %v638_v21  ;;  %720 = vmatmul.f32.vlgmr.msrb.gmra.mxu2 %v4350_v28  ;;  %v808_v28 = vld [vmem:[#allocation5 + $0x9f0] sm:$0xff] }
  0x9c   :  { %861 = vmatpush.msra.mxu2 %v793_v3  ;;  %678 = vmatpush.msrb.mxu0 %v590_v22  ;;  %v4370_v20 = vld.sshfl [vmem:[#allocation1 + $0x18] sm:$0xff pattern:$0x75316420] }
  0x9d   :  { %698 = vmatpush.msrb.mxu1 %v606_v23  ;;  %739 = vmatpush.msrb.mxu3 %v637_v24  ;;  %v796_v21 = vld [vmem:[#allocation5 + $0x990] sm:$0xff]  ;;  %969 = vst [vmem:[#allocation1 + $0x10] ss:$2 sm:$0xff] %v4327_v12  ;;  %v778_v23 = vld [vmem:[#allocation5 + $0x900] sm:$0xff]  ;;  %v795_v24 = vld [vmem:[#allocation5 + $0x988] sm:$0xff] }
  0x9e   :  { %740 = vmatmul.f32.vlgmr.msrb.gmra.mxu3 %v4352_v29  ;;  %862 = vmatpush.msra.mxu2 %v792_v10  ;;  %v759_v29 = vld [vmem:[#allocation5 + $0x868] sm:$0xff]  ;;  %v748_v3 = vld [vmem:[#allocation5 + $0x810] sm:$0xff]  ;;  %v950_v10 = vld [vmem:[#allocation5 + $0xb78] sm:$0xff] }
  0x9f   :  { %881 = vmatpush.msra.mxu3 %v809_v11  ;;  %679 = vmatpush.msrb.mxu0 %v589_v25  ;;  %v764_v22 = vld [vmem:[#allocation5 + $0x890] sm:$0xff]  ;;  %v4375_v25 = vld.sshfl [vmem:[#allocation1 + $0x8] sm:$0xff pattern:$0x75316420] }
  0xa0   :  { %699 = vmatpush.msrb.mxu1 %v605_v26  ;;  %680 = vmatmul.f32.vlgmr.msrb.gmra.mxu0 %v4355_v36  ;;  %v774_v36 = vld [vmem:[#allocation5 + $0x8e0] sm:$0xff]  ;;  %v4373_v11 = vld.sshfl [vmem:[#allocation1] sm:$0xff pattern:$0x75316420]  ;;  %v747_v26 = vld [vmem:[#allocation5 + $0x808] sm:$0xff] }
  0xa1   :  { %700 = vmatmul.f32.vlgmr.msrb.gmra.mxu1 %v4357_v37  ;;  %821 = vmatpush.msra.mxu0 %v761_v27  ;;  %v805_v37 = vld [vmem:[#allocation5 + $0x9d8] sm:$0xff]  ;;  %v763_v27 = vld [vmem:[#allocation5 + $0x888] sm:$0xff]  ;;  %967 = vst [vmem:[#allocation1] ss:$2 sm:$0xff] %v4333_v19 }
  0xa2   :  { %841 = vmatpush.msra.mxu1 %v777_v30  ;;  %863 = vmatpush.msra.mxu2 %v791_v31  ;;  %v794_v30 = vld [vmem:[#allocation5 + $0x980] sm:$0xff]  ;;  %v949_v31 = vld [vmem:[#allocation5 + $0xb70] sm:$0xff] }
  0xa3   :  { %882 = vmatpush.msra.mxu3 %v808_v28  ;;  %822 = vmatpush.msra.mxu0 %v760_v32  ;;  %v966_v28 = vld [vmem:[#allocation5 + $0xbf8] sm:$0xff]  ;;  %v746_v32 = vld [vmem:[#allocation5 + $0x800] sm:$0xff] }
  0xa4   :  { %842 = vmatpush.msra.mxu1 %v776_v33  ;;  %864 = vmatpush.msra.mxu2 %v790_v34  ;;  %v762_v33 = vld [vmem:[#allocation5 + $0x880] sm:$0xff]  ;;  %v918_v34 = vld [vmem:[#allocation5 + $0xa78] sm:$0xff] }
  0xa5   :  { %883 = vmatpush.msra.mxu3 %v807_v35  ;;  %823 = vmatpush.msra.mxu0 %v759_v29  ;;  %v934_v35 = vld [vmem:[#allocation5 + $0xaf8] sm:$0xff]  ;;  %v948_v29 = vld [vmem:[#allocation5 + $0xb68] sm:$0xff] }
  0xa6   :  { %843 = vmatpush.msra.mxu1 %v775_v38  ;;  %865 = vmatpush.msra.mxu2 %v789_v39  ;;  %v965_v38 = vld [vmem:[#allocation5 + $0xbf0] sm:$0xff] }
  0xa7   :  { %884 = vmatpush.msra.mxu3 %v806_v40  ;;  %824 = vmatpush.msra.mxu0 %v758_v41  ;;  %v917_v39 = vld [vmem:[#allocation5 + $0xa70] sm:$0xff]  ;;  %v947_v41 = vld [vmem:[#allocation5 + $0xb60] sm:$0xff] }
  0xa8   :  { %844 = vmatpush.msra.mxu1 %v774_v36  ;;  %866 = vmatpush.msra.mxu2 %v788_v42  ;;  %v933_v40 = vld [vmem:[#allocation5 + $0xaf0] sm:$0xff]  ;;  %v4378_v36 = vld.sshfl [vmem:[#allocation1 + $0x10] sm:$0xff pattern:$0x75316420] }
  0xa9   :  { %885 = vmatpush.msra.mxu3 %v805_v37  ;;  %825 = vmatpush.msra.mxu0 %v757_v43  ;;  %v4380_v42 = vld.sshfl [vmem:[#allocation1 + $0x18] sm:$0xff pattern:$0x75316420] }
  0xaa   :  { %845 = vmatpush.msra.mxu1 %v773_v44  ;;  %867 = vmatpush.msra.mxu2 %v787_v45  ;;  %v964_v37 = vld [vmem:[#allocation5 + $0xbe8] sm:$0xff]  ;;  %1126 = vst [vmem:[#allocation1 + $0x10] ss:$2 sm:$0xff] %v4327_v12  ;;  %v946_v45 = vld [vmem:[#allocation5 + $0xb58] sm:$0xff] }
  0xab   :  { %886 = vmatpush.msra.mxu3 %v804_v46  ;;  %826 = vmatpush.msra.mxu0 %v756_v47  ;;  %v916_v43 = vld [vmem:[#allocation5 + $0xa68] sm:$0xff]  ;;  %v963_v46 = vld [vmem:[#allocation5 + $0xbe0] sm:$0xff] }
  0xac   :  { %846 = vmatpush.msra.mxu1 %v772_v48  ;;  %868 = vmatpush.msra.mxu2 %v786_v49  ;;  %v932_v44 = vld [vmem:[#allocation5 + $0xae8] sm:$0xff]  ;;  %v915_v47 = vld [vmem:[#allocation5 + $0xa60] sm:$0xff]  ;;  %v4383_v48 = vld.sshfl [vmem:[#allocation1] sm:$0xff pattern:$0x75316420] }
  0xad   :  { %887 = vmatpush.msra.mxu3 %v803_v50  ;;  %827 = vmatpush.msra.mxu0 %v755_v51  ;;  %v4385_v49 = vld.sshfl [vmem:[#allocation1 + $0x8] sm:$0xff pattern:$0x75316420]  ;;  %v945_v51 = vld [vmem:[#allocation5 + $0xb50] sm:$0xff] }
  0xae   :  { %847 = vmatpush.msra.mxu1 %v771_v52  ;;  %869 = vmatpush.msra.mxu2 %v785_v53  ;;  %v931_v50 = vld [vmem:[#allocation5 + $0xae0] sm:$0xff]  ;;  %1124 = vst [vmem:[#allocation1] ss:$2 sm:$0xff] %v4333_v19  ;;  %v962_v52 = vld [vmem:[#allocation5 + $0xbd8] sm:$0xff] }
  0xaf   :  { %888 = vmatpush.msra.mxu3 %v802_v54  ;;  %828 = vmatpush.msra.mxu0 %v754_v55  ;;  %v914_v53 = vld [vmem:[#allocation5 + $0xa58] sm:$0xff]  ;;  %v944_v55 = vld [vmem:[#allocation5 + $0xb48] sm:$0xff] }
  0xb0   :  { %848 = vmatpush.msra.mxu1 %v770_v56  ;;  %870 = vmatpush.msra.mxu2 %v784_v57  ;;  %v930_v54 = vld [vmem:[#allocation5 + $0xad8] sm:$0xff]  ;;  %v961_v56 = vld [vmem:[#allocation5 + $0xbd0] sm:$0xff] }
  0xb1   :  { %889 = vmatpush.msra.mxu3 %v801_v58  ;;  %829 = vmatpush.msra.mxu0 %v753_v59  ;;  %v913_v57 = vld [vmem:[#allocation5 + $0xa50] sm:$0xff]  ;;  %v943_v59 = vld [vmem:[#allocation5 + $0xb40] sm:$0xff] }
  0xb2   :  { %849 = vmatpush.msra.mxu1 %v769_v60  ;;  %871 = vmatpush.msra.mxu2 %v783_v61  ;;  %v929_v58 = vld [vmem:[#allocation5 + $0xad0] sm:$0xff]  ;;  %v960_v60 = vld [vmem:[#allocation5 + $0xbc8] sm:$0xff] }
  0xb3   :  { %890 = vmatpush.msra.mxu3 %v800_v63  ;;  %830 = vmatpush.msra.mxu0 %v752_v0  ;;  %v912_v61 = vld [vmem:[#allocation5 + $0xa48] sm:$0xff]  ;;  %v942_v0 = vld [vmem:[#allocation5 + $0xb38] sm:$0xff] }
  0xb4   :  { %850 = vmatpush.msra.mxu1 %v768_v1  ;;  %872 = vmatpush.msra.mxu2 %v782_v2  ;;  %v928_v63 = vld [vmem:[#allocation5 + $0xac8] sm:$0xff]  ;;  %v959_v1 = vld [vmem:[#allocation5 + $0xbc0] sm:$0xff] }
  0xb5   :  { %891 = vmatpush.msra.mxu3 %v799_v4  ;;  %831 = vmatpush.msra.mxu0 %v751_v5  ;;  %v911_v2 = vld [vmem:[#allocation5 + $0xa40] sm:$0xff]  ;;  %v941_v5 = vld [vmem:[#allocation5 + $0xb30] sm:$0xff] }
  0xb6   :  { %851 = vmatpush.msra.mxu1 %v767_v6  ;;  %873 = vmatpush.msra.mxu2 %v781_v7  ;;  %v927_v4 = vld [vmem:[#allocation5 + $0xac0] sm:$0xff]  ;;  %v958_v6 = vld [vmem:[#allocation5 + $0xbb8] sm:$0xff] }
  0xb7   :  { %892 = vmatpush.msra.mxu3 %v798_v8  ;;  %832 = vmatpush.msra.mxu0 %v750_v9  ;;  %v910_v7 = vld [vmem:[#allocation5 + $0xa38] sm:$0xff]  ;;  %v940_v9 = vld [vmem:[#allocation5 + $0xb28] sm:$0xff] }
  0xb8   :  { %852 = vmatpush.msra.mxu1 %v766_v13  ;;  %874 = vmatpush.msra.mxu2 %v780_v14  ;;  %v926_v8 = vld [vmem:[#allocation5 + $0xab8] sm:$0xff]  ;;  %v957_v14 = vld [vmem:[#allocation5 + $0xbb0] sm:$0xff] }
  0xb9   :  { %893 = vmatpush.msra.mxu3 %v797_v16  ;;  %833 = vmatpush.msra.mxu0 %v749_v62  ;;  %v909_v16 = vld [vmem:[#allocation5 + $0xa30] sm:$0xff] }
  0xba   :  { %853 = vmatpush.msra.mxu1 %v765_v17  ;;  %875 = vmatpush.msra.mxu2 %v779_v18  ;;  %v925_v17 = vld [vmem:[#allocation5 + $0xab0] sm:$0xff]  ;;  %v939_v18 = vld [vmem:[#allocation5 + $0xb20] sm:$0xff] }
  0xbb   :  { %894 = vmatpush.msra.mxu3 %v796_v21  ;;  %834 = vmatpush.msra.mxu0 %v748_v3 }
  0xbc   :  { %854 = vmatpush.msra.mxu1 %v764_v22  ;;  %876 = vmatpush.msra.mxu2 %v778_v23  ;;  %v956_v22 = vld [vmem:[#allocation5 + $0xba8] sm:$0xff] }
  0xbd   :  { %895 = vmatpush.msra.mxu3 %v795_v24  ;;  %835 = vmatpush.msra.mxu0 %v747_v26  ;;  %v908_v23 = vld [vmem:[#allocation5 + $0xa28] sm:$0xff] }
  0xbe   :  { %1018 = vmatpush.msrb.mxu2 %v950_v10  ;;  %855 = vmatpush.msra.mxu1 %v763_v27  ;;  %v924_v24 = vld [vmem:[#allocation5 + $0xaa8] sm:$0xff]  ;;  %v938_v27 = vld [vmem:[#allocation5 + $0xb18] sm:$0xff] }
  0xbf   :  { %896 = vmatpush.msra.mxu3 %v794_v30  ;;  %836 = vmatpush.msra.mxu0 %v746_v32  ;;  %v955_v30 = vld [vmem:[#allocation5 + $0xba0] sm:$0xff] }
  0xc0   :  { %1019 = vmatpush.msrb.mxu2 %v949_v31  ;;  %856 = vmatpush.msra.mxu1 %v762_v33  ;;  %v907_v31 = vld [vmem:[#allocation5 + $0xa20] sm:$0xff]  ;;  %v937_v33 = vld [vmem:[#allocation5 + $0xb10] sm:$0xff] }
  0xc1   :  { %1038 = vmatpush.msrb.mxu3 %v966_v28  ;;  %978 = vmatpush.msrb.mxu0 %v918_v34  ;;  %v923_v32 = vld [vmem:[#allocation5 + $0xaa0] sm:$0xff]  ;;  %v954_v34 = vld [vmem:[#allocation5 + $0xb98] sm:$0xff] }
  0xc2   :  { %998 = vmatpush.msrb.mxu1 %v934_v35  ;;  %1020 = vmatpush.msrb.mxu2 %v948_v29  ;;  %v906_v35 = vld [vmem:[#allocation5 + $0xa18] sm:$0xff] }
  0xc3   :  { %1039 = vmatpush.msrb.mxu3 %v965_v38  ;;  %979 = vmatpush.msrb.mxu0 %v917_v39  ;;  %v922_v29 = vld [vmem:[#allocation5 + $0xa98] sm:$0xff]  ;;  %v936_v38 = vld [vmem:[#allocation5 + $0xb08] sm:$0xff] }
  0xc4   :  { %999 = vmatpush.msrb.mxu1 %v933_v40  ;;  %1021 = vmatpush.msrb.mxu2 %v947_v41  ;;  %v905_v40 = vld [vmem:[#allocation5 + $0xa10] sm:$0xff] }
  0xc5   :  { %1040 = vmatpush.msrb.mxu3 %v964_v37  ;;  %980 = vmatpush.msrb.mxu0 %v916_v43  ;;  %v921_v43 = vld [vmem:[#allocation5 + $0xa90] sm:$0xff] }
  0xc6   :  { %1000 = vmatpush.msrb.mxu1 %v932_v44  ;;  %1022 = vmatpush.msrb.mxu2 %v946_v45  ;;  %v935_v44 = vld [vmem:[#allocation5 + $0xb00] sm:$0xff]  ;;  %v952_v45 = vld [vmem:[#allocation5 + $0xb88] sm:$0xff] }
  0xc7   :  { %1041 = vmatpush.msrb.mxu3 %v963_v46  ;;  %981 = vmatpush.msrb.mxu0 %v915_v47  ;;  %v1107_v46 = vld [vmem:[#allocation5 + $0xd78] sm:$0xff]  ;;  %v904_v47 = vld [vmem:[#allocation5 + $0xa08] sm:$0xff] }
  0xc8   :  { %1001 = vmatpush.msrb.mxu1 %v931_v50  ;;  %1023 = vmatpush.msrb.mxu2 %v945_v51 }
  0xc9   :  { %1042 = vmatpush.msrb.mxu3 %v962_v52  ;;  %982 = vmatpush.msrb.mxu0 %v914_v53  ;;  %v951_v52 = vld [vmem:[#allocation5 + $0xb80] sm:$0xff] }
  0xca   :  { %1002 = vmatpush.msrb.mxu1 %v930_v54  ;;  %1024 = vmatpush.msrb.mxu2 %v944_v55  ;;  %v1123_v54 = vld [vmem:[#allocation5 + $0xdf8] sm:$0xff]  ;;  %v903_v55 = vld [vmem:[#allocation5 + $0xa00] sm:$0xff] }
  0xcb   :  { %1043 = vmatpush.msrb.mxu3 %v961_v56  ;;  %983 = vmatpush.msrb.mxu0 %v913_v57  ;;  %v919_v56 = vld [vmem:[#allocation5 + $0xa80] sm:$0xff]  ;;  %v1075_v57 = vld [vmem:[#allocation5 + $0xc78] sm:$0xff] }
  0xcc   :  { %1003 = vmatpush.msrb.mxu1 %v929_v58  ;;  %1025 = vmatpush.msrb.mxu2 %v943_v59  ;;  %v1091_v58 = vld [vmem:[#allocation5 + $0xcf8] sm:$0xff]  ;;  %v1105_v59 = vld [vmem:[#allocation5 + $0xd68] sm:$0xff] }
  0xcd   :  { %1044 = vmatpush.msrb.mxu3 %v960_v60  ;;  %984 = vmatpush.msrb.mxu0 %v912_v61  ;;  %v1074_v60 = vld [vmem:[#allocation5 + $0xc70] sm:$0xff] }
  0xce   :  { %1004 = vmatpush.msrb.mxu1 %v928_v63  ;;  %1026 = vmatpush.msrb.mxu2 %v942_v0  ;;  %v1090_v61 = vld [vmem:[#allocation5 + $0xcf0] sm:$0xff]  ;;  %v1104_v63 = vld [vmem:[#allocation5 + $0xd60] sm:$0xff]  ;;  %v1121_v0 = vld [vmem:[#allocation5 + $0xde8] sm:$0xff] }
  0xcf   :  { %1045 = vmatpush.msrb.mxu3 %v959_v1  ;;  %985 = vmatpush.msrb.mxu0 %v911_v2  ;;  %v210_v13 = vpop.f32.mrf.mxu0  ;;  %v1089_v1 = vld [vmem:[#allocation5 + $0xce8] sm:$0xff]  ;;  %v1103_v2 = vld [vmem:[#allocation5 + $0xd58] sm:$0xff] }
  0xd0   :  { %1005 = vmatpush.msrb.mxu1 %v927_v4  ;;  %1027 = vmatpush.msrb.mxu2 %v941_v5  ;;  %v230_v62 = vpop.f32.mrf.mxu1  ;;  %v1120_v4 = vld [vmem:[#allocation5 + $0xde0] sm:$0xff] }
  0xd1   :  { %1046 = vmatpush.msrb.mxu3 %v958_v6  ;;  %986 = vmatpush.msrb.mxu0 %v910_v7  ;;  %v231_v21 = vadd.f32 %v230_v62, %v210_v13  ;;  %v250_v3 = vpop.f32.mrf.mxu2  ;;  %v1072_v5 = vld [vmem:[#allocation5 + $0xc60] sm:$0xff]  ;;  %v1102_v6 = vld [vmem:[#allocation5 + $0xd50] sm:$0xff]  ;;  %v1071_v7 = vld [vmem:[#allocation5 + $0xc58] sm:$0xff] }
  0xd2   :  { %1006 = vmatpush.msrb.mxu1 %v926_v8  ;;  %1028 = vmatpush.msrb.mxu2 %v940_v9  ;;  %v1087_v8 = vld [vmem:[#allocation5 + $0xcd8] sm:$0xff]  ;;  %v1101_v9 = vld [vmem:[#allocation5 + $0xd48] sm:$0xff]  ;;  %v1118_v13 = vld [vmem:[#allocation5 + $0xdd0] sm:$0xff] }
  0xd3   :  { %1047 = vmatpush.msrb.mxu3 %v957_v14  ;;  %987 = vmatpush.msrb.mxu0 %v909_v16  ;;  %v251_v10 = vadd.f32 %v250_v3, %v231_v21  ;;  %v270_v26 = vpop.f32.mrf.mxu3  ;;  %v1070_v14 = vld [vmem:[#allocation5 + $0xc50] sm:$0xff]  ;;  %v1100_v62 = vld [vmem:[#allocation5 + $0xd40] sm:$0xff]  ;;  %v1085_v21 = vld [vmem:[#allocation5 + $0xcc8] sm:$0xff] }
  0xd4   :  { %1007 = vmatpush.msrb.mxu1 %v925_v17  ;;  %1029 = vmatpush.msrb.mxu2 %v939_v18  ;;  %v1086_v16 = vld [vmem:[#allocation5 + $0xcd0] sm:$0xff]  ;;  %v1117_v17 = vld [vmem:[#allocation5 + $0xdc8] sm:$0xff]  ;;  %v1099_v3 = vld [vmem:[#allocation5 + $0xd38] sm:$0xff] }
  0xd5   :  { %1048 = vmatpush.msrb.mxu3 %v956_v22  ;;  %877 = vmatmul.f32.vlgmr.msra.gmra.mxu2 %v4368_v15  ;;  %v271_v28 = vadd.f32 %v270_v26, %v251_v10  ;;  %v953_v15 = vld [vmem:[#allocation5 + $0xb90] sm:$0xff]  ;;  %v1069_v18 = vld [vmem:[#allocation5 + $0xc48] sm:$0xff]  ;;  %v1116_v22 = vld [vmem:[#allocation5 + $0xdc0] sm:$0xff] }
  0xd6   :  { %988 = vmatpush.msrb.mxu0 %v908_v23  ;;  %1008 = vmatpush.msrb.mxu1 %v924_v24  ;;  %v1068_v23 = vld [vmem:[#allocation5 + $0xc40] sm:$0xff]  ;;  %v1098_v10 = vld [vmem:[#allocation5 + $0xd30] sm:$0xff]  ;;  %v1115_v26 = vld [vmem:[#allocation5 + $0xdb8] sm:$0xff] }
  0xd7   :  { %1030 = vmatpush.msrb.mxu2 %v938_v27  ;;  %1049 = vmatpush.msrb.mxu3 %v955_v30  ;;  %273 = vst [vmem:[#allocation2] sm:$0xf] %v271_v28  ;;  %v1084_v24 = vld [vmem:[#allocation5 + $0xcc0] sm:$0xff]  ;;  %v1067_v27 = vld [vmem:[#allocation5 + $0xc38] sm:$0xff]  ;;  %v1114_v28 = vld [vmem:[#allocation5 + $0xdb0] sm:$0xff] }
  0xd8   :  { %897 = vmatmul.f32.vlgmr.msra.gmra.mxu3 %v4370_v20  ;;  %989 = vmatpush.msrb.mxu0 %v907_v31  ;;  %v1083_v30 = vld [vmem:[#allocation5 + $0xcb8] sm:$0xff]  ;;  %v1097_v31 = vld [vmem:[#allocation5 + $0xd28] sm:$0xff] }
  0xd9   :  { %1009 = vmatpush.msrb.mxu1 %v923_v32  ;;  %1031 = vmatpush.msrb.mxu2 %v937_v33  ;;  %v367_v39 = vpop.f32.mrf.mxu0  ;;  %v1066_v32 = vld [vmem:[#allocation5 + $0xc30] sm:$0xff] }
  0xda   :  { %1050 = vmatpush.msrb.mxu3 %v954_v34  ;;  %837 = vmatmul.f32.vlgmr.msra.gmra.mxu0 %v4373_v11  ;;  %v387_v41 = vpop.f32.mrf.mxu1  ;;  %v407_v37 = vpop.f32.mrf.mxu2  ;;  %v920_v11 = vld [vmem:[#allocation5 + $0xa88] sm:$0xff]  ;;  %v1082_v33 = vld [vmem:[#allocation5 + $0xcb0] sm:$0xff]  ;;  %v1096_v34 = vld [vmem:[#allocation5 + $0xd20] sm:$0xff] }
  0xdb   :  { %857 = vmatmul.f32.vlgmr.msra.gmra.mxu1 %v4375_v25  ;;  %990 = vmatpush.msrb.mxu0 %v906_v35  ;;  %v388_v20 = vadd.f32 %v387_v41, %v367_v39  ;;  %v1106_v25 = vld [vmem:[#allocation5 + $0xd70] sm:$0xff]  ;;  %v1113_v35 = vld [vmem:[#allocation5 + $0xda8] sm:$0xff]  ;;  %v1095_v39 = vld [vmem:[#allocation5 + $0xd18] sm:$0xff] }
  0xdc   :  { %1010 = vmatpush.msrb.mxu1 %v922_v29  ;;  %1032 = vmatpush.msrb.mxu2 %v936_v38  ;;  %v1065_v29 = vld [vmem:[#allocation5 + $0xc28] sm:$0xff]  ;;  %v1080_v41 = vld [vmem:[#allocation5 + $0xca0] sm:$0xff] }
  0xdd   :  { %1051 = vmatpush.msrb.mxu3 %v953_v15  ;;  %991 = vmatpush.msrb.mxu0 %v905_v40  ;;  %v408_v50 = vadd.f32 %v407_v37, %v388_v20  ;;  %v427_v51 = vpop.f32.mrf.mxu3  ;;  %v1081_v38 = vld [vmem:[#allocation5 + $0xca8] sm:$0xff]  ;;  %v1112_v15 = vld [vmem:[#allocation5 + $0xda0] sm:$0xff]  ;;  %v1094_v37 = vld [vmem:[#allocation5 + $0xd10] sm:$0xff] }
  0xde   :  { %1011 = vmatpush.msrb.mxu1 %v921_v43  ;;  %1033 = vmatpush.msrb.mxu2 %v935_v44  ;;  %v1064_v40 = vld [vmem:[#allocation5 + $0xc20] sm:$0xff]  ;;  %v1111_v44 = vld [vmem:[#allocation5 + $0xd98] sm:$0xff] }
  0xdf   :  { %1052 = vmatpush.msrb.mxu3 %v952_v45  ;;  %1034 = vmatmul.f32.vlgmr.msrb.gmra.mxu2 %v4378_v36  ;;  %v428_v53 = vadd.f32 %v427_v51, %v408_v50  ;;  %v1122_v36 = vld [vmem:[#allocation5 + $0xdf0] sm:$0xff]  ;;  %v4396_v43 = vld.sshfl [vmem:[#allocation1 + $0x10] sm:$0xff pattern:$0x75316420]  ;;  %v1063_v20 = vld [vmem:[#allocation5 + $0xc18] sm:$0xff] }
  0xe0   :  { %1175 = vmatpush.msra.mxu2 %v1107_v46  ;;  %992 = vmatpush.msrb.mxu0 %v904_v47  ;;  %v1079_v45 = vld [vmem:[#allocation5 + $0xc98] sm:$0xff]  ;;  %v1093_v46 = vld [vmem:[#allocation5 + $0xd08] sm:$0xff]  ;;  %v1110_v50 = vld [vmem:[#allocation5 + $0xd90] sm:$0xff] }
  0xe1   :  { %1012 = vmatpush.msrb.mxu1 %v920_v11  ;;  %1053 = vmatpush.msrb.mxu3 %v951_v52  ;;  %430 = vst [vmem:[#allocation2 + $0x4] sm:$0xf] %v428_v53  ;;  %v4398_v47 = vld.sshfl [vmem:[#allocation1 + $0x18] sm:$0xff pattern:$0x75316420]  ;;  %v1092_v52 = vld [vmem:[#allocation5 + $0xd00] sm:$0xff] }
  0xe2   :  { %1054 = vmatmul.f32.vlgmr.msrb.gmra.mxu3 %v4380_v42  ;;  %1176 = vmatpush.msra.mxu2 %v1106_v25  ;;  %v1073_v42 = vld [vmem:[#allocation5 + $0xc68] sm:$0xff]  ;;  %v1062_v51 = vld [vmem:[#allocation5 + $0xc10] sm:$0xff]  ;;  %1283 = vst [vmem:[#allocation1 + $0x10] ss:$2 sm:$0xff] %v4327_v12  ;;  %v1264_v53 = vld [vmem:[#allocation5 + $0xf78] sm:$0xff] }
  0xe3   :  { %1195 = vmatpush.msra.mxu3 %v1123_v54  ;;  %993 = vmatpush.msrb.mxu0 %v903_v55  ;;  %v1078_v11 = vld [vmem:[#allocation5 + $0xc90] sm:$0xff]  ;;  %v1109_v25 = vld [vmem:[#allocation5 + $0xd88] sm:$0xff]  ;;  %v4403_v55 = vld.sshfl [vmem:[#allocation1 + $0x8] sm:$0xff pattern:$0x75316420] }
  0xe4   :  { %1013 = vmatpush.msrb.mxu1 %v919_v56  ;;  %994 = vmatmul.f32.vlgmr.msrb.gmra.mxu0 %v4383_v48  ;;  %v1088_v48 = vld [vmem:[#allocation5 + $0xce0] sm:$0xff]  ;;  %v4401_v54 = vld.sshfl [vmem:[#allocation1] sm:$0xff pattern:$0x75316420]  ;;  %v1061_v56 = vld [vmem:[#allocation5 + $0xc08] sm:$0xff] }
  0xe5   :  { %1014 = vmatmul.f32.vlgmr.msrb.gmra.mxu1 %v4385_v49  ;;  %1135 = vmatpush.msra.mxu0 %v1075_v57  ;;  %v1119_v49 = vld [vmem:[#allocation5 + $0xdd8] sm:$0xff]  ;;  %v1077_v57 = vld [vmem:[#allocation5 + $0xc88] sm:$0xff]  ;;  %1281 = vst [vmem:[#allocation1] ss:$2 sm:$0xff] %v4333_v19 }
  0xe6   :  { %1155 = vmatpush.msra.mxu1 %v1091_v58  ;;  %1177 = vmatpush.msra.mxu2 %v1105_v59  ;;  %v1108_v58 = vld [vmem:[#allocation5 + $0xd80] sm:$0xff]  ;;  %v1263_v59 = vld [vmem:[#allocation5 + $0xf70] sm:$0xff] }
  0xe7   :  { %1196 = vmatpush.msra.mxu3 %v1122_v36  ;;  %1136 = vmatpush.msra.mxu0 %v1074_v60  ;;  %v1280_v36 = vld [vmem:[#allocation5 + $0xff8] sm:$0xff]  ;;  %v1060_v60 = vld [vmem:[#allocation5 + $0xc00] sm:$0xff] }
  0xe8   :  { %1156 = vmatpush.msra.mxu1 %v1090_v61  ;;  %1178 = vmatpush.msra.mxu2 %v1104_v63  ;;  %v1076_v61 = vld [vmem:[#allocation5 + $0xc80] sm:$0xff]  ;;  %v1232_v63 = vld [vmem:[#allocation5 + $0xe78] sm:$0xff] }
  0xe9   :  { %1197 = vmatpush.msra.mxu3 %v1121_v0  ;;  %1137 = vmatpush.msra.mxu0 %v1073_v42  ;;  %v1248_v0 = vld [vmem:[#allocation5 + $0xef8] sm:$0xff]  ;;  %v1262_v42 = vld [vmem:[#allocation5 + $0xf68] sm:$0xff] }
  0xea   :  { %1157 = vmatpush.msra.mxu1 %v1089_v1  ;;  %1179 = vmatpush.msra.mxu2 %v1103_v2  ;;  %v1279_v1 = vld [vmem:[#allocation5 + $0xff0] sm:$0xff] }
  0xeb   :  { %1198 = vmatpush.msra.mxu3 %v1120_v4  ;;  %1138 = vmatpush.msra.mxu0 %v1072_v5  ;;  %v1231_v2 = vld [vmem:[#allocation5 + $0xe70] sm:$0xff]  ;;  %v1261_v5 = vld [vmem:[#allocation5 + $0xf60] sm:$0xff] }
  0xec   :  { %1158 = vmatpush.msra.mxu1 %v1088_v48  ;;  %1180 = vmatpush.msra.mxu2 %v1102_v6  ;;  %v1247_v4 = vld [vmem:[#allocation5 + $0xef0] sm:$0xff]  ;;  %v4406_v48 = vld.sshfl [vmem:[#allocation1 + $0x10] sm:$0xff pattern:$0x75316420] }
  0xed   :  { %1199 = vmatpush.msra.mxu3 %v1119_v49  ;;  %1139 = vmatpush.msra.mxu0 %v1071_v7  ;;  %v4408_v6 = vld.sshfl [vmem:[#allocation1 + $0x18] sm:$0xff pattern:$0x75316420] }
  0xee   :  { %1159 = vmatpush.msra.mxu1 %v1087_v8  ;;  %1181 = vmatpush.msra.mxu2 %v1101_v9  ;;  %v1278_v49 = vld [vmem:[#allocation5 + $0xfe8] sm:$0xff]  ;;  %1440 = vst [vmem:[#allocation1 + $0x10] ss:$2 sm:$0xff] %v4327_v12  ;;  %v1260_v9 = vld [vmem:[#allocation5 + $0xf58] sm:$0xff] }
  0xef   :  { %1200 = vmatpush.msra.mxu3 %v1118_v13  ;;  %1140 = vmatpush.msra.mxu0 %v1070_v14  ;;  %v1230_v7 = vld [vmem:[#allocation5 + $0xe68] sm:$0xff]  ;;  %v1277_v13 = vld [vmem:[#allocation5 + $0xfe0] sm:$0xff] }
  0xf0   :  { %1160 = vmatpush.msra.mxu1 %v1086_v16  ;;  %1182 = vmatpush.msra.mxu2 %v1100_v62  ;;  %v1246_v8 = vld [vmem:[#allocation5 + $0xee8] sm:$0xff]  ;;  %v1229_v14 = vld [vmem:[#allocation5 + $0xe60] sm:$0xff]  ;;  %v4411_v16 = vld.sshfl [vmem:[#allocation1] sm:$0xff pattern:$0x75316420] }
  0xf1   :  { %1201 = vmatpush.msra.mxu3 %v1117_v17  ;;  %1141 = vmatpush.msra.mxu0 %v1069_v18  ;;  %v4413_v62 = vld.sshfl [vmem:[#allocation1 + $0x8] sm:$0xff pattern:$0x75316420]  ;;  %v1259_v18 = vld [vmem:[#allocation5 + $0xf50] sm:$0xff] }
  0xf2   :  { %1161 = vmatpush.msra.mxu1 %v1085_v21  ;;  %1183 = vmatpush.msra.mxu2 %v1099_v3  ;;  %v1245_v17 = vld [vmem:[#allocation5 + $0xee0] sm:$0xff]  ;;  %1438 = vst [vmem:[#allocation1] ss:$2 sm:$0xff] %v4333_v19  ;;  %v1276_v21 = vld [vmem:[#allocation5 + $0xfd8] sm:$0xff] }
  0xf3   :  { %1202 = vmatpush.msra.mxu3 %v1116_v22  ;;  %1142 = vmatpush.msra.mxu0 %v1068_v23  ;;  %v1228_v3 = vld [vmem:[#allocation5 + $0xe58] sm:$0xff]  ;;  %v1258_v23 = vld [vmem:[#allocation5 + $0xf48] sm:$0xff] }
  0xf4   :  { %1162 = vmatpush.msra.mxu1 %v1084_v24  ;;  %1184 = vmatpush.msra.mxu2 %v1098_v10  ;;  %v1244_v22 = vld [vmem:[#allocation5 + $0xed8] sm:$0xff]  ;;  %v1275_v24 = vld [vmem:[#allocation5 + $0xfd0] sm:$0xff] }
  0xf5   :  { %1203 = vmatpush.msra.mxu3 %v1115_v26  ;;  %1143 = vmatpush.msra.mxu0 %v1067_v27  ;;  %v1227_v10 = vld [vmem:[#allocation5 + $0xe50] sm:$0xff]  ;;  %v1257_v27 = vld [vmem:[#allocation5 + $0xf40] sm:$0xff] }
  0xf6   :  { %1163 = vmatpush.msra.mxu1 %v1083_v30  ;;  %1185 = vmatpush.msra.mxu2 %v1097_v31  ;;  %v1243_v26 = vld [vmem:[#allocation5 + $0xed0] sm:$0xff]  ;;  %v1274_v30 = vld [vmem:[#allocation5 + $0xfc8] sm:$0xff] }
  0xf7   :  { %1204 = vmatpush.msra.mxu3 %v1114_v28  ;;  %1144 = vmatpush.msra.mxu0 %v1066_v32  ;;  %v1226_v31 = vld [vmem:[#allocation5 + $0xe48] sm:$0xff]  ;;  %v1256_v32 = vld [vmem:[#allocation5 + $0xf38] sm:$0xff] }
  0xf8   :  { %1164 = vmatpush.msra.mxu1 %v1082_v33  ;;  %1186 = vmatpush.msra.mxu2 %v1096_v34  ;;  %v1242_v28 = vld [vmem:[#allocation5 + $0xec8] sm:$0xff]  ;;  %v1273_v33 = vld [vmem:[#allocation5 + $0xfc0] sm:$0xff] }
  0xf9   :  { %1205 = vmatpush.msra.mxu3 %v1113_v35  ;;  %1145 = vmatpush.msra.mxu0 %v1065_v29  ;;  %v1225_v34 = vld [vmem:[#allocation5 + $0xe40] sm:$0xff]  ;;  %v1255_v29 = vld [vmem:[#allocation5 + $0xf30] sm:$0xff] }
  0xfa   :  { %1165 = vmatpush.msra.mxu1 %v1081_v38  ;;  %1187 = vmatpush.msra.mxu2 %v1095_v39  ;;  %v1241_v35 = vld [vmem:[#allocation5 + $0xec0] sm:$0xff]  ;;  %v1272_v38 = vld [vmem:[#allocation5 + $0xfb8] sm:$0xff] }
  0xfb   :  { %1206 = vmatpush.msra.mxu3 %v1112_v15  ;;  %1146 = vmatpush.msra.mxu0 %v1064_v40  ;;  %v1224_v39 = vld [vmem:[#allocation5 + $0xe38] sm:$0xff]  ;;  %v1254_v40 = vld [vmem:[#allocation5 + $0xf28] sm:$0xff] }
  0xfc   :  { %1166 = vmatpush.msra.mxu1 %v1080_v41  ;;  %1188 = vmatpush.msra.mxu2 %v1094_v37  ;;  %v1240_v15 = vld [vmem:[#allocation5 + $0xeb8] sm:$0xff]  ;;  %v1271_v37 = vld [vmem:[#allocation5 + $0xfb0] sm:$0xff] }
  0xfd   :  { %1207 = vmatpush.msra.mxu3 %v1111_v44  ;;  %1147 = vmatpush.msra.mxu0 %v1063_v20  ;;  %v1223_v44 = vld [vmem:[#allocation5 + $0xe30] sm:$0xff] }
  0xfe   :  { %1167 = vmatpush.msra.mxu1 %v1079_v45  ;;  %1189 = vmatpush.msra.mxu2 %v1093_v46  ;;  %v1239_v46 = vld [vmem:[#allocation5 + $0xeb0] sm:$0xff] }
  0xff   :  { %1208 = vmatpush.msra.mxu3 %v1110_v50  ;;  %1148 = vmatpush.msra.mxu0 %v1062_v51  ;;  %v1253_v50 = vld [vmem:[#allocation5 + $0xf20] sm:$0xff] }
 0x100   :  { %1168 = vmatpush.msra.mxu1 %v1078_v11  ;;  %1190 = vmatpush.msra.mxu2 %v1092_v52  ;;  %v1270_v11 = vld [vmem:[#allocation5 + $0xfa8] sm:$0xff] }
 0x101   :  { %1209 = vmatpush.msra.mxu3 %v1109_v25  ;;  %1149 = vmatpush.msra.mxu0 %v1061_v56  ;;  %v1222_v52 = vld [vmem:[#allocation5 + $0xe28] sm:$0xff] }
 0x102   :  { %1332 = vmatpush.msrb.mxu2 %v1264_v53  ;;  %1169 = vmatpush.msra.mxu1 %v1077_v57  ;;  %v1238_v25 = vld [vmem:[#allocation5 + $0xea8] sm:$0xff]  ;;  %v1252_v57 = vld [vmem:[#allocation5 + $0xf18] sm:$0xff] }
 0x103   :  { %1210 = vmatpush.msra.mxu3 %v1108_v58  ;;  %1150 = vmatpush.msra.mxu0 %v1060_v60  ;;  %v1269_v58 = vld [vmem:[#allocation5 + $0xfa0] sm:$0xff] }
 0x104   :  { %1333 = vmatpush.msrb.mxu2 %v1263_v59  ;;  %1170 = vmatpush.msra.mxu1 %v1076_v61  ;;  %v1221_v59 = vld [vmem:[#allocation5 + $0xe20] sm:$0xff]  ;;  %v1251_v61 = vld [vmem:[#allocation5 + $0xf10] sm:$0xff] }
 0x105   :  { %1352 = vmatpush.msrb.mxu3 %v1280_v36  ;;  %1292 = vmatpush.msrb.mxu0 %v1232_v63  ;;  %v1237_v60 = vld [vmem:[#allocation5 + $0xea0] sm:$0xff]  ;;  %v1268_v63 = vld [vmem:[#allocation5 + $0xf98] sm:$0xff] }
 0x106   :  { %1312 = vmatpush.msrb.mxu1 %v1248_v0  ;;  %1334 = vmatpush.msrb.mxu2 %v1262_v42  ;;  %v1220_v0 = vld [vmem:[#allocation5 + $0xe18] sm:$0xff] }
 0x107   :  { %1353 = vmatpush.msrb.mxu3 %v1279_v1  ;;  %1293 = vmatpush.msrb.mxu0 %v1231_v2  ;;  %v1236_v42 = vld [vmem:[#allocation5 + $0xe98] sm:$0xff]  ;;  %v1250_v1 = vld [vmem:[#allocation5 + $0xf08] sm:$0xff] }
 0x108   :  { %1313 = vmatpush.msrb.mxu1 %v1247_v4  ;;  %1335 = vmatpush.msrb.mxu2 %v1261_v5  ;;  %v1219_v4 = vld [vmem:[#allocation5 + $0xe10] sm:$0xff] }
 0x109   :  { %1354 = vmatpush.msrb.mxu3 %v1278_v49  ;;  %1294 = vmatpush.msrb.mxu0 %v1230_v7  ;;  %v1235_v7 = vld [vmem:[#allocation5 + $0xe90] sm:$0xff] }
 0x10a   :  { %1314 = vmatpush.msrb.mxu1 %v1246_v8  ;;  %1336 = vmatpush.msrb.mxu2 %v1260_v9  ;;  %v1249_v8 = vld [vmem:[#allocation5 + $0xf00] sm:$0xff]  ;;  %v1266_v9 = vld [vmem:[#allocation5 + $0xf88] sm:$0xff] }
 0x10b   :  { %1355 = vmatpush.msrb.mxu3 %v1277_v13  ;;  %1295 = vmatpush.msrb.mxu0 %v1229_v14  ;;  %v1421_v13 = vld [vmem:[#allocation5 + $0x1178] sm:$0xff]  ;;  %v1218_v14 = vld [vmem:[#allocation5 + $0xe08] sm:$0xff] }
 0x10c   :  { %1315 = vmatpush.msrb.mxu1 %v1245_v17  ;;  %1337 = vmatpush.msrb.mxu2 %v1259_v18 }
 0x10d   :  { %1356 = vmatpush.msrb.mxu3 %v1276_v21  ;;  %1296 = vmatpush.msrb.mxu0 %v1228_v3  ;;  %v1265_v21 = vld [vmem:[#allocation5 + $0xf80] sm:$0xff] }
 0x10e   :  { %1316 = vmatpush.msrb.mxu1 %v1244_v22  ;;  %1338 = vmatpush.msrb.mxu2 %v1258_v23  ;;  %v1437_v22 = vld [vmem:[#allocation5 + $0x11f8] sm:$0xff]  ;;  %v1217_v23 = vld [vmem:[#allocation5 + $0xe00] sm:$0xff] }
 0x10f   :  { %1357 = vmatpush.msrb.mxu3 %v1275_v24  ;;  %1297 = vmatpush.msrb.mxu0 %v1227_v10  ;;  %v1233_v24 = vld [vmem:[#allocation5 + $0xe80] sm:$0xff]  ;;  %v1389_v10 = vld [vmem:[#allocation5 + $0x1078] sm:$0xff] }
 0x110   :  { %1317 = vmatpush.msrb.mxu1 %v1243_v26  ;;  %1339 = vmatpush.msrb.mxu2 %v1257_v27  ;;  %v1405_v26 = vld [vmem:[#allocation5 + $0x10f8] sm:$0xff]  ;;  %v1419_v27 = vld [vmem:[#allocation5 + $0x1168] sm:$0xff] }
 0x111   :  { %1358 = vmatpush.msrb.mxu3 %v1274_v30  ;;  %1298 = vmatpush.msrb.mxu0 %v1226_v31  ;;  %v1388_v30 = vld [vmem:[#allocation5 + $0x1070] sm:$0xff] }
 0x112   :  { %1318 = vmatpush.msrb.mxu1 %v1242_v28  ;;  %1340 = vmatpush.msrb.mxu2 %v1256_v32  ;;  %v1404_v31 = vld [vmem:[#allocation5 + $0x10f0] sm:$0xff]  ;;  %v1418_v28 = vld [vmem:[#allocation5 + $0x1160] sm:$0xff]  ;;  %v1435_v32 = vld [vmem:[#allocation5 + $0x11e8] sm:$0xff] }
 0x113   :  { %1359 = vmatpush.msrb.mxu3 %v1273_v33  ;;  %1299 = vmatpush.msrb.mxu0 %v1225_v34  ;;  %v524_v41 = vpop.f32.mrf.mxu0  ;;  %v1403_v33 = vld [vmem:[#allocation5 + $0x10e8] sm:$0xff]  ;;  %v1417_v34 = vld [vmem:[#allocation5 + $0x1158] sm:$0xff] }
 0x114   :  { %1319 = vmatpush.msrb.mxu1 %v1241_v35  ;;  %1341 = vmatpush.msrb.mxu2 %v1255_v29  ;;  %v544_v20 = vpop.f32.mrf.mxu1  ;;  %v564_v45 = vpop.f32.mrf.mxu2  ;;  %v1434_v35 = vld [vmem:[#allocation5 + $0x11e0] sm:$0xff] }
 0x115   :  { %1360 = vmatpush.msrb.mxu3 %v1272_v38  ;;  %1300 = vmatpush.msrb.mxu0 %v1224_v39  ;;  %v545_v51 = vadd.f32 %v544_v20, %v524_v41  ;;  %v1386_v29 = vld [vmem:[#allocation5 + $0x1060] sm:$0xff]  ;;  %v1416_v38 = vld [vmem:[#allocation5 + $0x1150] sm:$0xff]  ;;  %v1385_v39 = vld [vmem:[#allocation5 + $0x1058] sm:$0xff] }
 0x116   :  { %1320 = vmatpush.msrb.mxu1 %v1240_v15  ;;  %1342 = vmatpush.msrb.mxu2 %v1254_v40  ;;  %v1401_v15 = vld [vmem:[#allocation5 + $0x10d8] sm:$0xff]  ;;  %v1415_v40 = vld [vmem:[#allocation5 + $0x1148] sm:$0xff]  ;;  %v1432_v41 = vld [vmem:[#allocation5 + $0x11d0] sm:$0xff] }
 0x117   :  { %1361 = vmatpush.msrb.mxu3 %v1271_v37  ;;  %1301 = vmatpush.msrb.mxu0 %v1223_v44  ;;  %v565_v53 = vadd.f32 %v564_v45, %v545_v51  ;;  %v584_v56 = vpop.f32.mrf.mxu3  ;;  %v1384_v37 = vld [vmem:[#allocation5 + $0x1050] sm:$0xff]  ;;  %v1414_v20 = vld [vmem:[#allocation5 + $0x1140] sm:$0xff]  ;;  %v1431_v45 = vld [vmem:[#allocation5 + $0x11c8] sm:$0xff] }
 0x118   :  { %1321 = vmatpush.msrb.mxu1 %v1239_v46  ;;  %1343 = vmatpush.msrb.mxu2 %v1253_v50  ;;  %v1400_v44 = vld [vmem:[#allocation5 + $0x10d0] sm:$0xff]  ;;  %v1383_v46 = vld [vmem:[#allocation5 + $0x1048] sm:$0xff]  ;;  %v1413_v51 = vld [vmem:[#allocation5 + $0x1138] sm:$0xff] }
 0x119   :  { %1362 = vmatpush.msrb.mxu3 %v1270_v11  ;;  %1191 = vmatmul.f32.vlgmr.msra.gmra.mxu2 %v4396_v43  ;;  %v585_v36 = vadd.f32 %v584_v56, %v565_v53  ;;  %v1267_v43 = vld [vmem:[#allocation5 + $0xf90] sm:$0xff]  ;;  %v1399_v50 = vld [vmem:[#allocation5 + $0x10c8] sm:$0xff]  ;;  %v1430_v11 = vld [vmem:[#allocation5 + $0x11c0] sm:$0xff] }
 0x11a   :  { %1302 = vmatpush.msrb.mxu0 %v1222_v52  ;;  %1322 = vmatpush.msrb.mxu1 %v1238_v25  ;;  %v1382_v52 = vld [vmem:[#allocation5 + $0x1040] sm:$0xff]  ;;  %v1412_v53 = vld [vmem:[#allocation5 + $0x1130] sm:$0xff]  ;;  %v1429_v56 = vld [vmem:[#allocation5 + $0x11b8] sm:$0xff] }
 0x11b   :  { %1344 = vmatpush.msrb.mxu2 %v1252_v57  ;;  %1363 = vmatpush.msrb.mxu3 %v1269_v58  ;;  %587 = vst [vmem:[#allocation2 + $0x8] sm:$0xf] %v585_v36  ;;  %v1398_v25 = vld [vmem:[#allocation5 + $0x10c0] sm:$0xff]  ;;  %v1381_v57 = vld [vmem:[#allocation5 + $0x1038] sm:$0xff]  ;;  %v1428_v36 = vld [vmem:[#allocation5 + $0x11b0] sm:$0xff] }
 0x11c   :  { %1211 = vmatmul.f32.vlgmr.msra.gmra.mxu3 %v4398_v47  ;;  %1303 = vmatpush.msrb.mxu0 %v1221_v59  ;;  %v1397_v58 = vld [vmem:[#allocation5 + $0x10b8] sm:$0xff]  ;;  %v1411_v59 = vld [vmem:[#allocation5 + $0x1128] sm:$0xff] }
 0x11d   :  { %1323 = vmatpush.msrb.mxu1 %v1237_v60  ;;  %1345 = vmatpush.msrb.mxu2 %v1251_v61  ;;  %v681_v2 = vpop.f32.mrf.mxu0  ;;  %v1380_v60 = vld [vmem:[#allocation5 + $0x1030] sm:$0xff] }
 0x11e   :  { %1364 = vmatpush.msrb.mxu3 %v1268_v63  ;;  %1151 = vmatmul.f32.vlgmr.msra.gmra.mxu0 %v4401_v54  ;;  %v701_v5 = vpop.f32.mrf.mxu1  ;;  %v721_v49 = vpop.f32.mrf.mxu2  ;;  %v1234_v54 = vld [vmem:[#allocation5 + $0xe88] sm:$0xff]  ;;  %v1396_v61 = vld [vmem:[#allocation5 + $0x10b0] sm:$0xff]  ;;  %v1410_v63 = vld [vmem:[#allocation5 + $0x1120] sm:$0xff] }
 0x11f   :  { %1171 = vmatmul.f32.vlgmr.msra.gmra.mxu1 %v4403_v55  ;;  %1304 = vmatpush.msrb.mxu0 %v1220_v0  ;;  %v702_v47 = vadd.f32 %v701_v5, %v681_v2  ;;  %v1420_v55 = vld [vmem:[#allocation5 + $0x1170] sm:$0xff]  ;;  %v1427_v0 = vld [vmem:[#allocation5 + $0x11a8] sm:$0xff]  ;;  %v1409_v2 = vld [vmem:[#allocation5 + $0x1118] sm:$0xff] }
 0x120   :  { %1324 = vmatpush.msrb.mxu1 %v1236_v42  ;;  %1346 = vmatpush.msrb.mxu2 %v1250_v1  ;;  %v1379_v42 = vld [vmem:[#allocation5 + $0x1028] sm:$0xff]  ;;  %v1394_v5 = vld [vmem:[#allocation5 + $0x10a0] sm:$0xff] }
 0x121   :  { %1365 = vmatpush.msrb.mxu3 %v1267_v43  ;;  %1305 = vmatpush.msrb.mxu0 %v1219_v4  ;;  %v722_v17 = vadd.f32 %v721_v49, %v702_v47  ;;  %v741_v18 = vpop.f32.mrf.mxu3  ;;  %v1395_v1 = vld [vmem:[#allocation5 + $0x10a8] sm:$0xff]  ;;  %v1426_v43 = vld [vmem:[#allocation5 + $0x11a0] sm:$0xff]  ;;  %v1408_v49 = vld [vmem:[#allocation5 + $0x1110] sm:$0xff] }
 0x122   :  { %1325 = vmatpush.msrb.mxu1 %v1235_v7  ;;  %1347 = vmatpush.msrb.mxu2 %v1249_v8  ;;  %v1378_v4 = vld [vmem:[#allocation5 + $0x1020] sm:$0xff]  ;;  %v1425_v8 = vld [vmem:[#allocation5 + $0x1198] sm:$0xff] }
 0x123   :  { %1366 = vmatpush.msrb.mxu3 %v1266_v9  ;;  %1348 = vmatmul.f32.vlgmr.msrb.gmra.mxu2 %v4406_v48  ;;  %v742_v3 = vadd.f32 %v741_v18, %v722_v17  ;;  %v1436_v48 = vld [vmem:[#allocation5 + $0x11f0] sm:$0xff]  ;;  %v4424_v7 = vld.sshfl [vmem:[#allocation1 + $0x10] sm:$0xff pattern:$0x75316420]  ;;  %v1377_v47 = vld [vmem:[#allocation5 + $0x1018] sm:$0xff] }
 0x124   :  { %1489 = vmatpush.msra.mxu2 %v1421_v13  ;;  %1306 = vmatpush.msrb.mxu0 %v1218_v14  ;;  %v1393_v9 = vld [vmem:[#allocation5 + $0x1098] sm:$0xff]  ;;  %v1407_v13 = vld [vmem:[#allocation5 + $0x1108] sm:$0xff]  ;;  %v1424_v17 = vld [vmem:[#allocation5 + $0x1190] sm:$0xff] }
 0x125   :  { %1326 = vmatpush.msrb.mxu1 %v1234_v54  ;;  %1367 = vmatpush.msrb.mxu3 %v1265_v21  ;;  %744 = vst [vmem:[#allocation2 + $0xc] sm:$0xf] %v742_v3  ;;  %v4426_v14 = vld.sshfl [vmem:[#allocation1 + $0x18] sm:$0xff pattern:$0x75316420]  ;;  %v1406_v21 = vld [vmem:[#allocation5 + $0x1100] sm:$0xff] }
 0x126   :  { %1368 = vmatmul.f32.vlgmr.msrb.gmra.mxu3 %v4408_v6  ;;  %1490 = vmatpush.msra.mxu2 %v1420_v55  ;;  %v1387_v6 = vld [vmem:[#allocation5 + $0x1068] sm:$0xff]  ;;  %v1376_v18 = vld [vmem:[#allocation5 + $0x1010] sm:$0xff]  ;;  %1597 = vst [vmem:[#allocation1 + $0x10] ss:$2 sm:$0xff] %v4327_v12  ;;  %v1578_v3 = vld [vmem:[#allocation5 + $0x1378] sm:$0xff] }
 0x127   :  { %1509 = vmatpush.msra.mxu3 %v1437_v22  ;;  %1307 = vmatpush.msrb.mxu0 %v1217_v23  ;;  %v1392_v54 = vld [vmem:[#allocation5 + $0x1090] sm:$0xff]  ;;  %v1423_v55 = vld [vmem:[#allocation5 + $0x1188] sm:$0xff]  ;;  %v4431_v23 = vld.sshfl [vmem:[#allocation1 + $0x8] sm:$0xff pattern:$0x75316420] }
 0x128   :  { %1327 = vmatpush.msrb.mxu1 %v1233_v24  ;;  %1308 = vmatmul.f32.vlgmr.msrb.gmra.mxu0 %v4411_v16  ;;  %v1402_v16 = vld [vmem:[#allocation5 + $0x10e0] sm:$0xff]  ;;  %v4429_v22 = vld.sshfl [vmem:[#allocation1] sm:$0xff pattern:$0x75316420]  ;;  %v1375_v24 = vld [vmem:[#allocation5 + $0x1008] sm:$0xff] }
 0x129   :  { %1328 = vmatmul.f32.vlgmr.msrb.gmra.mxu1 %v4413_v62  ;;  %1449 = vmatpush.msra.mxu0 %v1389_v10  ;;  %v1433_v62 = vld [vmem:[#allocation5 + $0x11d8] sm:$0xff]  ;;  %v1391_v10 = vld [vmem:[#allocation5 + $0x1088] sm:$0xff]  ;;  %1595 = vst [vmem:[#allocation1] ss:$2 sm:$0xff] %v4333_v19 }
 0x12a   :  { %1469 = vmatpush.msra.mxu1 %v1405_v26  ;;  %1491 = vmatpush.msra.mxu2 %v1419_v27  ;;  %v1422_v26 = vld [vmem:[#allocation5 + $0x1180] sm:$0xff]  ;;  %v1577_v27 = vld [vmem:[#allocation5 + $0x1370] sm:$0xff] }
 0x12b   :  { %1510 = vmatpush.msra.mxu3 %v1436_v48  ;;  %1450 = vmatpush.msra.mxu0 %v1388_v30  ;;  %v1594_v48 = vld [vmem:[#allocation5 + $0x13f8] sm:$0xff]  ;;  %v1374_v30 = vld [vmem:[#allocation5 + $0x1000] sm:$0xff] }
 0x12c   :  { %1470 = vmatpush.msra.mxu1 %v1404_v31  ;;  %1492 = vmatpush.msra.mxu2 %v1418_v28  ;;  %v1390_v31 = vld [vmem:[#allocation5 + $0x1080] sm:$0xff]  ;;  %v1546_v28 = vld [vmem:[#allocation5 + $0x1278] sm:$0xff] }
 0x12d   :  { %1511 = vmatpush.msra.mxu3 %v1435_v32  ;;  %1451 = vmatpush.msra.mxu0 %v1387_v6  ;;  %v1562_v32 = vld [vmem:[#allocation5 + $0x12f8] sm:$0xff]  ;;  %v1576_v6 = vld [vmem:[#allocation5 + $0x1368] sm:$0xff] }
 0x12e   :  { %1471 = vmatpush.msra.mxu1 %v1403_v33  ;;  %1493 = vmatpush.msra.mxu2 %v1417_v34  ;;  %v1593_v33 = vld [vmem:[#allocation5 + $0x13f0] sm:$0xff] }
 0x12f   :  { %1512 = vmatpush.msra.mxu3 %v1434_v35  ;;  %1452 = vmatpush.msra.mxu0 %v1386_v29  ;;  %v1545_v34 = vld [vmem:[#allocation5 + $0x1270] sm:$0xff]  ;;  %v1575_v29 = vld [vmem:[#allocation5 + $0x1360] sm:$0xff] }
 0x130   :  { %1472 = vmatpush.msra.mxu1 %v1402_v16  ;;  %1494 = vmatpush.msra.mxu2 %v1416_v38  ;;  %v1561_v35 = vld [vmem:[#allocation5 + $0x12f0] sm:$0xff]  ;;  %v4434_v16 = vld.sshfl [vmem:[#allocation1 + $0x10] sm:$0xff pattern:$0x75316420] }
 0x131   :  { %1513 = vmatpush.msra.mxu3 %v1433_v62  ;;  %1453 = vmatpush.msra.mxu0 %v1385_v39  ;;  %v4436_v38 = vld.sshfl [vmem:[#allocation1 + $0x18] sm:$0xff pattern:$0x75316420] }
 0x132   :  { %1473 = vmatpush.msra.mxu1 %v1401_v15  ;;  %1495 = vmatpush.msra.mxu2 %v1415_v40  ;;  %v1592_v62 = vld [vmem:[#allocation5 + $0x13e8] sm:$0xff]  ;;  %1754 = vst [vmem:[#allocation1 + $0x10] ss:$2 sm:$0xff] %v4327_v12  ;;  %v1574_v40 = vld [vmem:[#allocation5 + $0x1358] sm:$0xff] }
 0x133   :  { %1514 = vmatpush.msra.mxu3 %v1432_v41  ;;  %1454 = vmatpush.msra.mxu0 %v1384_v37  ;;  %v1544_v39 = vld [vmem:[#allocation5 + $0x1268] sm:$0xff]  ;;  %v1591_v41 = vld [vmem:[#allocation5 + $0x13e0] sm:$0xff] }
 0x134   :  { %1474 = vmatpush.msra.mxu1 %v1400_v44  ;;  %1496 = vmatpush.msra.mxu2 %v1414_v20  ;;  %v1560_v15 = vld [vmem:[#allocation5 + $0x12e8] sm:$0xff]  ;;  %v1543_v37 = vld [vmem:[#allocation5 + $0x1260] sm:$0xff]  ;;  %v4439_v44 = vld.sshfl [vmem:[#allocation1] sm:$0xff pattern:$0x75316420] }
 0x135   :  { %1515 = vmatpush.msra.mxu3 %v1431_v45  ;;  %1455 = vmatpush.msra.mxu0 %v1383_v46  ;;  %v4441_v20 = vld.sshfl [vmem:[#allocation1 + $0x8] sm:$0xff pattern:$0x75316420]  ;;  %v1573_v46 = vld [vmem:[#allocation5 + $0x1350] sm:$0xff] }
 0x136   :  { %1475 = vmatpush.msra.mxu1 %v1399_v50  ;;  %1497 = vmatpush.msra.mxu2 %v1413_v51  ;;  %v1559_v45 = vld [vmem:[#allocation5 + $0x12e0] sm:$0xff]  ;;  %1752 = vst [vmem:[#allocation1] ss:$2 sm:$0xff] %v4333_v19  ;;  %v1590_v50 = vld [vmem:[#allocation5 + $0x13d8] sm:$0xff] }
 0x137   :  { %1516 = vmatpush.msra.mxu3 %v1430_v11  ;;  %1456 = vmatpush.msra.mxu0 %v1382_v52  ;;  %v1542_v51 = vld [vmem:[#allocation5 + $0x1258] sm:$0xff]  ;;  %v1572_v52 = vld [vmem:[#allocation5 + $0x1348] sm:$0xff] }
 0x138   :  { %1476 = vmatpush.msra.mxu1 %v1398_v25  ;;  %1498 = vmatpush.msra.mxu2 %v1412_v53  ;;  %v1558_v11 = vld [vmem:[#allocation5 + $0x12d8] sm:$0xff]  ;;  %v1589_v25 = vld [vmem:[#allocation5 + $0x13d0] sm:$0xff] }
 0x139   :  { %1517 = vmatpush.msra.mxu3 %v1429_v56  ;;  %1457 = vmatpush.msra.mxu0 %v1381_v57  ;;  %v1541_v53 = vld [vmem:[#allocation5 + $0x1250] sm:$0xff]  ;;  %v1571_v57 = vld [vmem:[#allocation5 + $0x1340] sm:$0xff] }
 0x13a   :  { %1477 = vmatpush.msra.mxu1 %v1397_v58  ;;  %1499 = vmatpush.msra.mxu2 %v1411_v59  ;;  %v1557_v56 = vld [vmem:[#allocation5 + $0x12d0] sm:$0xff]  ;;  %v1588_v58 = vld [vmem:[#allocation5 + $0x13c8] sm:$0xff] }
 0x13b   :  { %1518 = vmatpush.msra.mxu3 %v1428_v36  ;;  %1458 = vmatpush.msra.mxu0 %v1380_v60  ;;  %v1540_v59 = vld [vmem:[#allocation5 + $0x1248] sm:$0xff]  ;;  %v1570_v60 = vld [vmem:[#allocation5 + $0x1338] sm:$0xff] }
 0x13c   :  { %1478 = vmatpush.msra.mxu1 %v1396_v61  ;;  %1500 = vmatpush.msra.mxu2 %v1410_v63  ;;  %v1556_v36 = vld [vmem:[#allocation5 + $0x12c8] sm:$0xff]  ;;  %v1587_v61 = vld [vmem:[#allocation5 + $0x13c0] sm:$0xff] }
 0x13d   :  { %1519 = vmatpush.msra.mxu3 %v1427_v0  ;;  %1459 = vmatpush.msra.mxu0 %v1379_v42  ;;  %v1539_v63 = vld [vmem:[#allocation5 + $0x1240] sm:$0xff]  ;;  %v1569_v42 = vld [vmem:[#allocation5 + $0x1330] sm:$0xff] }
 0x13e   :  { %1479 = vmatpush.msra.mxu1 %v1395_v1  ;;  %1501 = vmatpush.msra.mxu2 %v1409_v2  ;;  %v1555_v0 = vld [vmem:[#allocation5 + $0x12c0] sm:$0xff]  ;;  %v1586_v1 = vld [vmem:[#allocation5 + $0x13b8] sm:$0xff] }
 0x13f   :  { %1520 = vmatpush.msra.mxu3 %v1426_v43  ;;  %1460 = vmatpush.msra.mxu0 %v1378_v4  ;;  %v1538_v2 = vld [vmem:[#allocation5 + $0x1238] sm:$0xff]  ;;  %v1568_v4 = vld [vmem:[#allocation5 + $0x1328] sm:$0xff] }
 0x140   :  { %1480 = vmatpush.msra.mxu1 %v1394_v5  ;;  %1502 = vmatpush.msra.mxu2 %v1408_v49  ;;  %v1554_v43 = vld [vmem:[#allocation5 + $0x12b8] sm:$0xff]  ;;  %v1585_v49 = vld [vmem:[#allocation5 + $0x13b0] sm:$0xff] }
 0x141   :  { %1521 = vmatpush.msra.mxu3 %v1425_v8  ;;  %1461 = vmatpush.msra.mxu0 %v1377_v47  ;;  %v1537_v8 = vld [vmem:[#allocation5 + $0x1230] sm:$0xff] }
 0x142   :  { %1481 = vmatpush.msra.mxu1 %v1393_v9  ;;  %1503 = vmatpush.msra.mxu2 %v1407_v13  ;;  %v1553_v13 = vld [vmem:[#allocation5 + $0x12b0] sm:$0xff] }
 0x143   :  { %1522 = vmatpush.msra.mxu3 %v1424_v17  ;;  %1462 = vmatpush.msra.mxu0 %v1376_v18  ;;  %v1567_v17 = vld [vmem:[#allocation5 + $0x1320] sm:$0xff] }
 0x144   :  { %1482 = vmatpush.msra.mxu1 %v1392_v54  ;;  %1504 = vmatpush.msra.mxu2 %v1406_v21  ;;  %v1584_v54 = vld [vmem:[#allocation5 + $0x13a8] sm:$0xff] }
 0x145   :  { %1523 = vmatpush.msra.mxu3 %v1423_v55  ;;  %1463 = vmatpush.msra.mxu0 %v1375_v24  ;;  %v1536_v21 = vld [vmem:[#allocation5 + $0x1228] sm:$0xff] }
 0x146   :  { %1646 = vmatpush.msrb.mxu2 %v1578_v3  ;;  %1483 = vmatpush.msra.mxu1 %v1391_v10  ;;  %v1552_v55 = vld [vmem:[#allocation5 + $0x12a8] sm:$0xff]  ;;  %v1566_v10 = vld [vmem:[#allocation5 + $0x1318] sm:$0xff] }
 0x147   :  { %1524 = vmatpush.msra.mxu3 %v1422_v26  ;;  %1464 = vmatpush.msra.mxu0 %v1374_v30  ;;  %v1583_v26 = vld [vmem:[#allocation5 + $0x13a0] sm:$0xff] }
 0x148   :  { %1647 = vmatpush.msrb.mxu2 %v1577_v27  ;;  %1484 = vmatpush.msra.mxu1 %v1390_v31  ;;  %v1535_v27 = vld [vmem:[#allocation5 + $0x1220] sm:$0xff]  ;;  %v1565_v31 = vld [vmem:[#allocation5 + $0x1310] sm:$0xff] }
 0x149   :  { %1666 = vmatpush.msrb.mxu3 %v1594_v48  ;;  %1606 = vmatpush.msrb.mxu0 %v1546_v28  ;;  %v1551_v30 = vld [vmem:[#allocation5 + $0x12a0] sm:$0xff]  ;;  %v1582_v28 = vld [vmem:[#allocation5 + $0x1398] sm:$0xff] }
 0x14a   :  { %1626 = vmatpush.msrb.mxu1 %v1562_v32  ;;  %1648 = vmatpush.msrb.mxu2 %v1576_v6  ;;  %v1534_v32 = vld [vmem:[#allocation5 + $0x1218] sm:$0xff] }
 0x14b   :  { %1667 = vmatpush.msrb.mxu3 %v1593_v33  ;;  %1607 = vmatpush.msrb.mxu0 %v1545_v34  ;;  %v1550_v6 = vld [vmem:[#allocation5 + $0x1298] sm:$0xff]  ;;  %v1564_v33 = vld [vmem:[#allocation5 + $0x1308] sm:$0xff] }
 0x14c   :  { %1627 = vmatpush.msrb.mxu1 %v1561_v35  ;;  %1649 = vmatpush.msrb.mxu2 %v1575_v29  ;;  %v1533_v35 = vld [vmem:[#allocation5 + $0x1210] sm:$0xff] }
 0x14d   :  { %1668 = vmatpush.msrb.mxu3 %v1592_v62  ;;  %1608 = vmatpush.msrb.mxu0 %v1544_v39  ;;  %v1549_v39 = vld [vmem:[#allocation5 + $0x1290] sm:$0xff] }
 0x14e   :  { %1628 = vmatpush.msrb.mxu1 %v1560_v15  ;;  %1650 = vmatpush.msrb.mxu2 %v1574_v40  ;;  %v1563_v15 = vld [vmem:[#allocation5 + $0x1300] sm:$0xff]  ;;  %v1580_v40 = vld [vmem:[#allocation5 + $0x1388] sm:$0xff] }
 0x14f   :  { %1669 = vmatpush.msrb.mxu3 %v1591_v41  ;;  %1609 = vmatpush.msrb.mxu0 %v1543_v37  ;;  %v1735_v41 = vld [vmem:[#allocation5 + $0x1578] sm:$0xff]  ;;  %v1532_v37 = vld [vmem:[#allocation5 + $0x1208] sm:$0xff] }
 0x150   :  { %1629 = vmatpush.msrb.mxu1 %v1559_v45  ;;  %1651 = vmatpush.msrb.mxu2 %v1573_v46 }
 0x151   :  { %1670 = vmatpush.msrb.mxu3 %v1590_v50  ;;  %1610 = vmatpush.msrb.mxu0 %v1542_v51  ;;  %v1579_v50 = vld [vmem:[#allocation5 + $0x1380] sm:$0xff] }
 0x152   :  { %1630 = vmatpush.msrb.mxu1 %v1558_v11  ;;  %1652 = vmatpush.msrb.mxu2 %v1572_v52  ;;  %v1751_v11 = vld [vmem:[#allocation5 + $0x15f8] sm:$0xff]  ;;  %v1531_v52 = vld [vmem:[#allocation5 + $0x1200] sm:$0xff] }
 0x153   :  { %1671 = vmatpush.msrb.mxu3 %v1589_v25  ;;  %1611 = vmatpush.msrb.mxu0 %v1541_v53  ;;  %v1547_v25 = vld [vmem:[#allocation5 + $0x1280] sm:$0xff]  ;;  %v1703_v53 = vld [vmem:[#allocation5 + $0x1478] sm:$0xff] }
 0x154   :  { %1631 = vmatpush.msrb.mxu1 %v1557_v56  ;;  %1653 = vmatpush.msrb.mxu2 %v1571_v57  ;;  %v1719_v56 = vld [vmem:[#allocation5 + $0x14f8] sm:$0xff]  ;;  %v1733_v57 = vld [vmem:[#allocation5 + $0x1568] sm:$0xff] }
 0x155   :  { %1672 = vmatpush.msrb.mxu3 %v1588_v58  ;;  %1612 = vmatpush.msrb.mxu0 %v1540_v59  ;;  %v1702_v58 = vld [vmem:[#allocation5 + $0x1470] sm:$0xff] }
 0x156   :  { %1632 = vmatpush.msrb.mxu1 %v1556_v36  ;;  %1654 = vmatpush.msrb.mxu2 %v1570_v60  ;;  %v1718_v59 = vld [vmem:[#allocation5 + $0x14f0] sm:$0xff]  ;;  %v1732_v36 = vld [vmem:[#allocation5 + $0x1560] sm:$0xff]  ;;  %v1749_v60 = vld [vmem:[#allocation5 + $0x15e8] sm:$0xff] }
 0x157   :  { %1673 = vmatpush.msrb.mxu3 %v1587_v61  ;;  %1613 = vmatpush.msrb.mxu0 %v1539_v63  ;;  %v838_v5 = vpop.f32.mrf.mxu0  ;;  %v1717_v61 = vld [vmem:[#allocation5 + $0x14e8] sm:$0xff]  ;;  %v1731_v63 = vld [vmem:[#allocation5 + $0x1558] sm:$0xff] }
 0x158   :  { %1633 = vmatpush.msrb.mxu1 %v1555_v0  ;;  %1655 = vmatpush.msrb.mxu2 %v1569_v42  ;;  %v858_v47 = vpop.f32.mrf.mxu1  ;;  %v878_v9 = vpop.f32.mrf.mxu2  ;;  %v1748_v0 = vld [vmem:[#allocation5 + $0x15e0] sm:$0xff] }
 0x159   :  { %1674 = vmatpush.msrb.mxu3 %v1586_v1  ;;  %1614 = vmatpush.msrb.mxu0 %v1538_v2  ;;  %v859_v18 = vadd.f32 %v858_v47, %v838_v5  ;;  %v1700_v42 = vld [vmem:[#allocation5 + $0x1460] sm:$0xff]  ;;  %v1730_v1 = vld [vmem:[#allocation5 + $0x1550] sm:$0xff]  ;;  %v1699_v2 = vld [vmem:[#allocation5 + $0x1458] sm:$0xff] }
 0x15a   :  { %1634 = vmatpush.msrb.mxu1 %v1554_v43  ;;  %1656 = vmatpush.msrb.mxu2 %v1568_v4  ;;  %v1715_v43 = vld [vmem:[#allocation5 + $0x14d8] sm:$0xff]  ;;  %v1729_v4 = vld [vmem:[#allocation5 + $0x1548] sm:$0xff]  ;;  %v1746_v5 = vld [vmem:[#allocation5 + $0x15d0] sm:$0xff] }
 0x15b   :  { %1675 = vmatpush.msrb.mxu3 %v1585_v49  ;;  %1615 = vmatpush.msrb.mxu0 %v1537_v8  ;;  %v879_v3 = vadd.f32 %v878_v9, %v859_v18  ;;  %v898_v24 = vpop.f32.mrf.mxu3  ;;  %v1698_v49 = vld [vmem:[#allocation5 + $0x1450] sm:$0xff]  ;;  %v1728_v47 = vld [vmem:[#allocation5 + $0x1540] sm:$0xff]  ;;  %v1745_v9 = vld [vmem:[#allocation5 + $0x15c8] sm:$0xff] }
 0x15c   :  { %1635 = vmatpush.msrb.mxu1 %v1553_v13  ;;  %1657 = vmatpush.msrb.mxu2 %v1567_v17  ;;  %v1714_v8 = vld [vmem:[#allocation5 + $0x14d0] sm:$0xff]  ;;  %v1697_v13 = vld [vmem:[#allocation5 + $0x1448] sm:$0xff]  ;;  %v1727_v18 = vld [vmem:[#allocation5 + $0x1538] sm:$0xff] }
 0x15d   :  { %1676 = vmatpush.msrb.mxu3 %v1584_v54  ;;  %1505 = vmatmul.f32.vlgmr.msra.gmra.mxu2 %v4424_v7  ;;  %v899_v48 = vadd.f32 %v898_v24, %v879_v3  ;;  %v1581_v7 = vld [vmem:[#allocation5 + $0x1390] sm:$0xff]  ;;  %v1713_v17 = vld [vmem:[#allocation5 + $0x14c8] sm:$0xff]  ;;  %v1744_v54 = vld [vmem:[#allocation5 + $0x15c0] sm:$0xff] }
 0x15e   :  { %1616 = vmatpush.msrb.mxu0 %v1536_v21  ;;  %1636 = vmatpush.msrb.mxu1 %v1552_v55  ;;  %v1696_v21 = vld [vmem:[#allocation5 + $0x1440] sm:$0xff]  ;;  %v1726_v3 = vld [vmem:[#allocation5 + $0x1530] sm:$0xff]  ;;  %v1743_v24 = vld [vmem:[#allocation5 + $0x15b8] sm:$0xff] }
 0x15f   :  { %1658 = vmatpush.msrb.mxu2 %v1566_v10  ;;  %1677 = vmatpush.msrb.mxu3 %v1583_v26  ;;  %901 = vst [vmem:[#allocation2 + $0x10] sm:$0xf] %v899_v48  ;;  %v1712_v55 = vld [vmem:[#allocation5 + $0x14c0] sm:$0xff]  ;;  %v1695_v10 = vld [vmem:[#allocation5 + $0x1438] sm:$0xff]  ;;  %v1742_v48 = vld [vmem:[#allocation5 + $0x15b0] sm:$0xff] }
 0x160   :  { %1525 = vmatmul.f32.vlgmr.msra.gmra.mxu3 %v4426_v14  ;;  %1617 = vmatpush.msrb.mxu0 %v1535_v27  ;;  %v1711_v26 = vld [vmem:[#allocation5 + $0x14b8] sm:$0xff]  ;;  %v1725_v27 = vld [vmem:[#allocation5 + $0x1528] sm:$0xff] }
 0x161   :  { %1637 = vmatpush.msrb.mxu1 %v1551_v30  ;;  %1659 = vmatpush.msrb.mxu2 %v1565_v31  ;;  %v995_v34 = vpop.f32.mrf.mxu0  ;;  %v1694_v30 = vld [vmem:[#allocation5 + $0x1430] sm:$0xff] }
 0x162   :  { %1678 = vmatpush.msrb.mxu3 %v1582_v28  ;;  %1465 = vmatmul.f32.vlgmr.msra.gmra.mxu0 %v4429_v22  ;;  %v1015_v29 = vpop.f32.mrf.mxu1  ;;  %v1035_v62 = vpop.f32.mrf.mxu2  ;;  %v1548_v22 = vld [vmem:[#allocation5 + $0x1288] sm:$0xff]  ;;  %v1710_v31 = vld [vmem:[#allocation5 + $0x14b0] sm:$0xff]  ;;  %v1724_v28 = vld [vmem:[#allocation5 + $0x1520] sm:$0xff] }
 0x163   :  { %1485 = vmatmul.f32.vlgmr.msra.gmra.mxu1 %v4431_v23  ;;  %1618 = vmatpush.msrb.mxu0 %v1534_v32  ;;  %v1016_v14 = vadd.f32 %v1015_v29, %v995_v34  ;;  %v1734_v23 = vld [vmem:[#allocation5 + $0x1570] sm:$0xff]  ;;  %v1741_v32 = vld [vmem:[#allocation5 + $0x15a8] sm:$0xff]  ;;  %v1723_v34 = vld [vmem:[#allocation5 + $0x1518] sm:$0xff] }
 0x164   :  { %1638 = vmatpush.msrb.mxu1 %v1550_v6  ;;  %1660 = vmatpush.msrb.mxu2 %v1564_v33  ;;  %v1693_v6 = vld [vmem:[#allocation5 + $0x1428] sm:$0xff]  ;;  %v1708_v29 = vld [vmem:[#allocation5 + $0x14a0] sm:$0xff] }
 0x165   :  { %1679 = vmatpush.msrb.mxu3 %v1581_v7  ;;  %1619 = vmatpush.msrb.mxu0 %v1533_v35  ;;  %v1036_v45 = vadd.f32 %v1035_v62, %v1016_v14  ;;  %v1055_v46 = vpop.f32.mrf.mxu3  ;;  %v1709_v33 = vld [vmem:[#allocation5 + $0x14a8] sm:$0xff]  ;;  %v1740_v7 = vld [vmem:[#allocation5 + $0x15a0] sm:$0xff]  ;;  %v1722_v62 = vld [vmem:[#allocation5 + $0x1510] sm:$0xff] }
 0x166   :  { %1639 = vmatpush.msrb.mxu1 %v1549_v39  ;;  %1661 = vmatpush.msrb.mxu2 %v1563_v15  ;;  %v1692_v35 = vld [vmem:[#allocation5 + $0x1420] sm:$0xff]  ;;  %v1739_v15 = vld [vmem:[#allocation5 + $0x1598] sm:$0xff] }
 0x167   :  { %1680 = vmatpush.msrb.mxu3 %v1580_v40  ;;  %1662 = vmatmul.f32.vlgmr.msrb.gmra.mxu2 %v4434_v16  ;;  %v1056_v51 = vadd.f32 %v1055_v46, %v1036_v45  ;;  %v1750_v16 = vld [vmem:[#allocation5 + $0x15f0] sm:$0xff]  ;;  %v4452_v39 = vld.sshfl [vmem:[#allocation1 + $0x10] sm:$0xff pattern:$0x75316420]  ;;  %v1691_v14 = vld [vmem:[#allocation5 + $0x1418] sm:$0xff] }
 0x168   :  { %1803 = vmatpush.msra.mxu2 %v1735_v41  ;;  %1620 = vmatpush.msrb.mxu0 %v1532_v37  ;;  %v1707_v40 = vld [vmem:[#allocation5 + $0x1498] sm:$0xff]  ;;  %v1721_v41 = vld [vmem:[#allocation5 + $0x1508] sm:$0xff]  ;;  %v1738_v45 = vld [vmem:[#allocation5 + $0x1590] sm:$0xff] }
 0x169   :  { %1640 = vmatpush.msrb.mxu1 %v1548_v22  ;;  %1681 = vmatpush.msrb.mxu3 %v1579_v50  ;;  %1058 = vst [vmem:[#allocation2 + $0x14] sm:$0xf] %v1056_v51  ;;  %v4454_v37 = vld.sshfl [vmem:[#allocation1 + $0x18] sm:$0xff pattern:$0x75316420]  ;;  %v1720_v50 = vld [vmem:[#allocation5 + $0x1500] sm:$0xff] }
 0x16a   :  { %1682 = vmatmul.f32.vlgmr.msrb.gmra.mxu3 %v4436_v38  ;;  %1804 = vmatpush.msra.mxu2 %v1734_v23  ;;  %v1701_v38 = vld [vmem:[#allocation5 + $0x1468] sm:$0xff]  ;;  %v1690_v46 = vld [vmem:[#allocation5 + $0x1410] sm:$0xff]  ;;  %1911 = vst [vmem:[#allocation1 + $0x10] ss:$2 sm:$0xff] %v4327_v12  ;;  %v1892_v51 = vld [vmem:[#allocation5 + $0x1778] sm:$0xff] }
 0x16b   :  { %1823 = vmatpush.msra.mxu3 %v1751_v11  ;;  %1621 = vmatpush.msrb.mxu0 %v1531_v52  ;;  %v1706_v22 = vld [vmem:[#allocation5 + $0x1490] sm:$0xff]  ;;  %v1737_v23 = vld [vmem:[#allocation5 + $0x1588] sm:$0xff]  ;;  %v4459_v52 = vld.sshfl [vmem:[#allocation1 + $0x8] sm:$0xff pattern:$0x75316420] }
 0x16c   :  { %1641 = vmatpush.msrb.mxu1 %v1547_v25  ;;  %1622 = vmatmul.f32.vlgmr.msrb.gmra.mxu0 %v4439_v44  ;;  %v1716_v44 = vld [vmem:[#allocation5 + $0x14e0] sm:$0xff]  ;;  %v4457_v11 = vld.sshfl [vmem:[#allocation1] sm:$0xff pattern:$0x75316420]  ;;  %v1689_v25 = vld [vmem:[#allocation5 + $0x1408] sm:$0xff] }
 0x16d   :  { %1642 = vmatmul.f32.vlgmr.msrb.gmra.mxu1 %v4441_v20  ;;  %1763 = vmatpush.msra.mxu0 %v1703_v53  ;;  %v1747_v20 = vld [vmem:[#allocation5 + $0x15d8] sm:$0xff]  ;;  %v1705_v53 = vld [vmem:[#allocation5 + $0x1488] sm:$0xff]  ;;  %1909 = vst [vmem:[#allocation1] ss:$2 sm:$0xff] %v4333_v19 }
 0x16e   :  { %1783 = vmatpush.msra.mxu1 %v1719_v56  ;;  %1805 = vmatpush.msra.mxu2 %v1733_v57  ;;  %v1736_v56 = vld [vmem:[#allocation5 + $0x1580] sm:$0xff]  ;;  %v1891_v57 = vld [vmem:[#allocation5 + $0x1770] sm:$0xff] }
 0x16f   :  { %1824 = vmatpush.msra.mxu3 %v1750_v16  ;;  %1764 = vmatpush.msra.mxu0 %v1702_v58  ;;  %v1908_v16 = vld [vmem:[#allocation5 + $0x17f8] sm:$0xff]  ;;  %v1688_v58 = vld [vmem:[#allocation5 + $0x1400] sm:$0xff] }
 0x170   :  { %1784 = vmatpush.msra.mxu1 %v1718_v59  ;;  %1806 = vmatpush.msra.mxu2 %v1732_v36  ;;  %v1704_v59 = vld [vmem:[#allocation5 + $0x1480] sm:$0xff]  ;;  %v1860_v36 = vld [vmem:[#allocation5 + $0x1678] sm:$0xff] }
 0x171   :  { %1825 = vmatpush.msra.mxu3 %v1749_v60  ;;  %1765 = vmatpush.msra.mxu0 %v1701_v38  ;;  %v1876_v60 = vld [vmem:[#allocation5 + $0x16f8] sm:$0xff]  ;;  %v1890_v38 = vld [vmem:[#allocation5 + $0x1768] sm:$0xff] }
 0x172   :  { %1785 = vmatpush.msra.mxu1 %v1717_v61  ;;  %1807 = vmatpush.msra.mxu2 %v1731_v63  ;;  %v1907_v61 = vld [vmem:[#allocation5 + $0x17f0] sm:$0xff] }
 0x173   :  { %1826 = vmatpush.msra.mxu3 %v1748_v0  ;;  %1766 = vmatpush.msra.mxu0 %v1700_v42  ;;  %v1859_v63 = vld [vmem:[#allocation5 + $0x1670] sm:$0xff]  ;;  %v1889_v42 = vld [vmem:[#allocation5 + $0x1760] sm:$0xff] }
 0x174   :  { %1786 = vmatpush.msra.mxu1 %v1716_v44  ;;  %1808 = vmatpush.msra.mxu2 %v1730_v1  ;;  %v1875_v0 = vld [vmem:[#allocation5 + $0x16f0] sm:$0xff]  ;;  %v4462_v44 = vld.sshfl [vmem:[#allocation1 + $0x10] sm:$0xff pattern:$0x75316420] }
 0x175   :  { %1827 = vmatpush.msra.mxu3 %v1747_v20  ;;  %1767 = vmatpush.msra.mxu0 %v1699_v2  ;;  %v4464_v1 = vld.sshfl [vmem:[#allocation1 + $0x18] sm:$0xff pattern:$0x75316420] }
 0x176   :  { %1787 = vmatpush.msra.mxu1 %v1715_v43  ;;  %1809 = vmatpush.msra.mxu2 %v1729_v4  ;;  %v1906_v20 = vld [vmem:[#allocation5 + $0x17e8] sm:$0xff]  ;;  %2068 = vst [vmem:[#allocation1 + $0x10] ss:$2 sm:$0xff] %v4327_v12  ;;  %v1888_v4 = vld [vmem:[#allocation5 + $0x1758] sm:$0xff] }
 0x177   :  { %1828 = vmatpush.msra.mxu3 %v1746_v5  ;;  %1768 = vmatpush.msra.mxu0 %v1698_v49  ;;  %v1858_v2 = vld [vmem:[#allocation5 + $0x1668] sm:$0xff]  ;;  %v1905_v5 = vld [vmem:[#allocation5 + $0x17e0] sm:$0xff] }
 0x178   :  { %1788 = vmatpush.msra.mxu1 %v1714_v8  ;;  %1810 = vmatpush.msra.mxu2 %v1728_v47  ;;  %v1874_v43 = vld [vmem:[#allocation5 + $0x16e8] sm:$0xff]  ;;  %v1857_v49 = vld [vmem:[#allocation5 + $0x1660] sm:$0xff]  ;;  %v4467_v8 = vld.sshfl [vmem:[#allocation1] sm:$0xff pattern:$0x75316420] }
 0x179   :  { %1829 = vmatpush.msra.mxu3 %v1745_v9  ;;  %1769 = vmatpush.msra.mxu0 %v1697_v13  ;;  %v4469_v47 = vld.sshfl [vmem:[#allocation1 + $0x8] sm:$0xff pattern:$0x75316420]  ;;  %v1887_v13 = vld [vmem:[#allocation5 + $0x1750] sm:$0xff] }
 0x17a   :  { %1789 = vmatpush.msra.mxu1 %v1713_v17  ;;  %1811 = vmatpush.msra.mxu2 %v1727_v18  ;;  %v1873_v9 = vld [vmem:[#allocation5 + $0x16e0] sm:$0xff]  ;;  %2066 = vst [vmem:[#allocation1] ss:$2 sm:$0xff] %v4333_v19  ;;  %v1904_v17 = vld [vmem:[#allocation5 + $0x17d8] sm:$0xff] }
 0x17b   :  { %1830 = vmatpush.msra.mxu3 %v1744_v54  ;;  %1770 = vmatpush.msra.mxu0 %v1696_v21  ;;  %v1856_v18 = vld [vmem:[#allocation5 + $0x1658] sm:$0xff]  ;;  %v1886_v21 = vld [vmem:[#allocation5 + $0x1748] sm:$0xff] }
 0x17c   :  { %1790 = vmatpush.msra.mxu1 %v1712_v55  ;;  %1812 = vmatpush.msra.mxu2 %v1726_v3  ;;  %v1872_v54 = vld [vmem:[#allocation5 + $0x16d8] sm:$0xff]  ;;  %v1903_v55 = vld [vmem:[#allocation5 + $0x17d0] sm:$0xff] }
 0x17d   :  { %1831 = vmatpush.msra.mxu3 %v1743_v24  ;;  %1771 = vmatpush.msra.mxu0 %v1695_v10  ;;  %v1855_v3 = vld [vmem:[#allocation5 + $0x1650] sm:$0xff]  ;;  %v1885_v10 = vld [vmem:[#allocation5 + $0x1740] sm:$0xff] }
 0x17e   :  { %1791 = vmatpush.msra.mxu1 %v1711_v26  ;;  %1813 = vmatpush.msra.mxu2 %v1725_v27  ;;  %v1871_v24 = vld [vmem:[#allocation5 + $0x16d0] sm:$0xff]  ;;  %v1902_v26 = vld [vmem:[#allocation5 + $0x17c8] sm:$0xff] }
 0x17f   :  { %1832 = vmatpush.msra.mxu3 %v1742_v48  ;;  %1772 = vmatpush.msra.mxu0 %v1694_v30  ;;  %v1854_v27 = vld [vmem:[#allocation5 + $0x1648] sm:$0xff]  ;;  %v1884_v30 = vld [vmem:[#allocation5 + $0x1738] sm:$0xff] }
 0x180   :  { %1792 = vmatpush.msra.mxu1 %v1710_v31  ;;  %1814 = vmatpush.msra.mxu2 %v1724_v28  ;;  %v1870_v48 = vld [vmem:[#allocation5 + $0x16c8] sm:$0xff]  ;;  %v1901_v31 = vld [vmem:[#allocation5 + $0x17c0] sm:$0xff] }
 0x181   :  { %1833 = vmatpush.msra.mxu3 %v1741_v32  ;;  %1773 = vmatpush.msra.mxu0 %v1693_v6  ;;  %v1853_v28 = vld [vmem:[#allocation5 + $0x1640] sm:$0xff]  ;;  %v1883_v6 = vld [vmem:[#allocation5 + $0x1730] sm:$0xff] }
 0x182   :  { %1793 = vmatpush.msra.mxu1 %v1709_v33  ;;  %1815 = vmatpush.msra.mxu2 %v1723_v34  ;;  %v1869_v32 = vld [vmem:[#allocation5 + $0x16c0] sm:$0xff]  ;;  %v1900_v33 = vld [vmem:[#allocation5 + $0x17b8] sm:$0xff] }
 0x183   :  { %1834 = vmatpush.msra.mxu3 %v1740_v7  ;;  %1774 = vmatpush.msra.mxu0 %v1692_v35  ;;  %v1852_v34 = vld [vmem:[#allocation5 + $0x1638] sm:$0xff]  ;;  %v1882_v35 = vld [vmem:[#allocation5 + $0x1728] sm:$0xff] }
 0x184   :  { %1794 = vmatpush.msra.mxu1 %v1708_v29  ;;  %1816 = vmatpush.msra.mxu2 %v1722_v62  ;;  %v1868_v7 = vld [vmem:[#allocation5 + $0x16b8] sm:$0xff]  ;;  %v1899_v62 = vld [vmem:[#allocation5 + $0x17b0] sm:$0xff] }
 0x185   :  { %1835 = vmatpush.msra.mxu3 %v1739_v15  ;;  %1775 = vmatpush.msra.mxu0 %v1691_v14  ;;  %v1851_v15 = vld [vmem:[#allocation5 + $0x1630] sm:$0xff] }
 0x186   :  { %1795 = vmatpush.msra.mxu1 %v1707_v40  ;;  %1817 = vmatpush.msra.mxu2 %v1721_v41  ;;  %v1867_v41 = vld [vmem:[#allocation5 + $0x16b0] sm:$0xff] }
 0x187   :  { %1836 = vmatpush.msra.mxu3 %v1738_v45  ;;  %1776 = vmatpush.msra.mxu0 %v1690_v46  ;;  %v1881_v45 = vld [vmem:[#allocation5 + $0x1720] sm:$0xff] }
 0x188   :  { %1796 = vmatpush.msra.mxu1 %v1706_v22  ;;  %1818 = vmatpush.msra.mxu2 %v1720_v50  ;;  %v1898_v22 = vld [vmem:[#allocation5 + $0x17a8] sm:$0xff] }
 0x189   :  { %1837 = vmatpush.msra.mxu3 %v1737_v23  ;;  %1777 = vmatpush.msra.mxu0 %v1689_v25  ;;  %v1850_v50 = vld [vmem:[#allocation5 + $0x1628] sm:$0xff] }
 0x18a   :  { %1960 = vmatpush.msrb.mxu2 %v1892_v51  ;;  %1797 = vmatpush.msra.mxu1 %v1705_v53  ;;  %v1866_v23 = vld [vmem:[#allocation5 + $0x16a8] sm:$0xff]  ;;  %v1880_v53 = vld [vmem:[#allocation5 + $0x1718] sm:$0xff] }
 0x18b   :  { %1838 = vmatpush.msra.mxu3 %v1736_v56  ;;  %1778 = vmatpush.msra.mxu0 %v1688_v58  ;;  %v1897_v56 = vld [vmem:[#allocation5 + $0x17a0] sm:$0xff] }
 0x18c   :  { %1961 = vmatpush.msrb.mxu2 %v1891_v57  ;;  %1798 = vmatpush.msra.mxu1 %v1704_v59  ;;  %v1849_v57 = vld [vmem:[#allocation5 + $0x1620] sm:$0xff]  ;;  %v1879_v59 = vld [vmem:[#allocation5 + $0x1710] sm:$0xff] }
 0x18d   :  { %1980 = vmatpush.msrb.mxu3 %v1908_v16  ;;  %1920 = vmatpush.msrb.mxu0 %v1860_v36  ;;  %v1865_v58 = vld [vmem:[#allocation5 + $0x16a0] sm:$0xff]  ;;  %v1896_v36 = vld [vmem:[#allocation5 + $0x1798] sm:$0xff] }
 0x18e   :  { %1940 = vmatpush.msrb.mxu1 %v1876_v60  ;;  %1962 = vmatpush.msrb.mxu2 %v1890_v38  ;;  %v1848_v60 = vld [vmem:[#allocation5 + $0x1618] sm:$0xff] }
 0x18f   :  { %1981 = vmatpush.msrb.mxu3 %v1907_v61  ;;  %1921 = vmatpush.msrb.mxu0 %v1859_v63  ;;  %v1864_v38 = vld [vmem:[#allocation5 + $0x1698] sm:$0xff]  ;;  %v1878_v61 = vld [vmem:[#allocation5 + $0x1708] sm:$0xff] }
 0x190   :  { %1941 = vmatpush.msrb.mxu1 %v1875_v0  ;;  %1963 = vmatpush.msrb.mxu2 %v1889_v42  ;;  %v1847_v0 = vld [vmem:[#allocation5 + $0x1610] sm:$0xff] }
 0x191   :  { %1982 = vmatpush.msrb.mxu3 %v1906_v20  ;;  %1922 = vmatpush.msrb.mxu0 %v1858_v2  ;;  %v1863_v2 = vld [vmem:[#allocation5 + $0x1690] sm:$0xff] }
 0x192   :  { %1942 = vmatpush.msrb.mxu1 %v1874_v43  ;;  %1964 = vmatpush.msrb.mxu2 %v1888_v4  ;;  %v1877_v43 = vld [vmem:[#allocation5 + $0x1700] sm:$0xff]  ;;  %v1894_v4 = vld [vmem:[#allocation5 + $0x1788] sm:$0xff] }
 0x193   :  { %1983 = vmatpush.msrb.mxu3 %v1905_v5  ;;  %1923 = vmatpush.msrb.mxu0 %v1857_v49  ;;  %v2049_v5 = vld [vmem:[#allocation5 + $0x1978] sm:$0xff]  ;;  %v1846_v49 = vld [vmem:[#allocation5 + $0x1608] sm:$0xff] }
 0x194   :  { %1943 = vmatpush.msrb.mxu1 %v1873_v9  ;;  %1965 = vmatpush.msrb.mxu2 %v1887_v13 }
 0x195   :  { %1984 = vmatpush.msrb.mxu3 %v1904_v17  ;;  %1924 = vmatpush.msrb.mxu0 %v1856_v18  ;;  %v1893_v17 = vld [vmem:[#allocation5 + $0x1780] sm:$0xff] }
 0x196   :  { %1944 = vmatpush.msrb.mxu1 %v1872_v54  ;;  %1966 = vmatpush.msrb.mxu2 %v1886_v21  ;;  %v2065_v54 = vld [vmem:[#allocation5 + $0x19f8] sm:$0xff]  ;;  %v1845_v21 = vld [vmem:[#allocation5 + $0x1600] sm:$0xff] }
 0x197   :  { %1985 = vmatpush.msrb.mxu3 %v1903_v55  ;;  %1925 = vmatpush.msrb.mxu0 %v1855_v3  ;;  %v1861_v55 = vld [vmem:[#allocation5 + $0x1680] sm:$0xff]  ;;  %v2017_v3 = vld [vmem:[#allocation5 + $0x1878] sm:$0xff] }
 0x198   :  { %1945 = vmatpush.msrb.mxu1 %v1871_v24  ;;  %1967 = vmatpush.msrb.mxu2 %v1885_v10  ;;  %v2033_v24 = vld [vmem:[#allocation5 + $0x18f8] sm:$0xff]  ;;  %v2047_v10 = vld [vmem:[#allocation5 + $0x1968] sm:$0xff] }
 0x199   :  { %1986 = vmatpush.msrb.mxu3 %v1902_v26  ;;  %1926 = vmatpush.msrb.mxu0 %v1854_v27  ;;  %v2016_v26 = vld [vmem:[#allocation5 + $0x1870] sm:$0xff] }
 0x19a   :  { %1946 = vmatpush.msrb.mxu1 %v1870_v48  ;;  %1968 = vmatpush.msrb.mxu2 %v1884_v30  ;;  %v2032_v27 = vld [vmem:[#allocation5 + $0x18f0] sm:$0xff]  ;;  %v2046_v48 = vld [vmem:[#allocation5 + $0x1960] sm:$0xff]  ;;  %v2063_v30 = vld [vmem:[#allocation5 + $0x19e8] sm:$0xff] }
 0x19b   :  { %1987 = vmatpush.msrb.mxu3 %v1901_v31  ;;  %1927 = vmatpush.msrb.mxu0 %v1853_v28  ;;  %v1152_v29 = vpop.f32.mrf.mxu0  ;;  %v2031_v31 = vld [vmem:[#allocation5 + $0x18e8] sm:$0xff]  ;;  %v2045_v28 = vld [vmem:[#allocation5 + $0x1958] sm:$0xff] }
 0x19c   :  { %1947 = vmatpush.msrb.mxu1 %v1869_v32  ;;  %1969 = vmatpush.msrb.mxu2 %v1883_v6  ;;  %v1172_v14 = vpop.f32.mrf.mxu1  ;;  %v1192_v40 = vpop.f32.mrf.mxu2  ;;  %v2062_v32 = vld [vmem:[#allocation5 + $0x19e0] sm:$0xff] }
 0x19d   :  { %1988 = vmatpush.msrb.mxu3 %v1900_v33  ;;  %1928 = vmatpush.msrb.mxu0 %v1852_v34  ;;  %v1173_v46 = vadd.f32 %v1172_v14, %v1152_v29  ;;  %v2014_v6 = vld [vmem:[#allocation5 + $0x1860] sm:$0xff]  ;;  %v2044_v33 = vld [vmem:[#allocation5 + $0x1950] sm:$0xff]  ;;  %v2013_v34 = vld [vmem:[#allocation5 + $0x1858] sm:$0xff] }
 0x19e   :  { %1948 = vmatpush.msrb.mxu1 %v1868_v7  ;;  %1970 = vmatpush.msrb.mxu2 %v1882_v35  ;;  %v2029_v7 = vld [vmem:[#allocation5 + $0x18d8] sm:$0xff]  ;;  %v2043_v35 = vld [vmem:[#allocation5 + $0x1948] sm:$0xff]  ;;  %v2060_v29 = vld [vmem:[#allocation5 + $0x19d0] sm:$0xff] }
 0x19f   :  { %1989 = vmatpush.msrb.mxu3 %v1899_v62  ;;  %1929 = vmatpush.msrb.mxu0 %v1851_v15  ;;  %v1193_v51 = vadd.f32 %v1192_v40, %v1173_v46  ;;  %v1212_v25 = vpop.f32.mrf.mxu3  ;;  %v2012_v62 = vld [vmem:[#allocation5 + $0x1850] sm:$0xff]  ;;  %v2042_v14 = vld [vmem:[#allocation5 + $0x1940] sm:$0xff]  ;;  %v2059_v40 = vld [vmem:[#allocation5 + $0x19c8] sm:$0xff] }
 0x1a0   :  { %1949 = vmatpush.msrb.mxu1 %v1867_v41  ;;  %1971 = vmatpush.msrb.mxu2 %v1881_v45  ;;  %v2028_v15 = vld [vmem:[#allocation5 + $0x18d0] sm:$0xff]  ;;  %v2011_v41 = vld [vmem:[#allocation5 + $0x1848] sm:$0xff]  ;;  %v2041_v46 = vld [vmem:[#allocation5 + $0x1938] sm:$0xff] }
 0x1a1   :  { %1990 = vmatpush.msrb.mxu3 %v1898_v22  ;;  %1819 = vmatmul.f32.vlgmr.msra.gmra.mxu2 %v4452_v39  ;;  %v1213_v16 = vadd.f32 %v1212_v25, %v1193_v51  ;;  %v1895_v39 = vld [vmem:[#allocation5 + $0x1790] sm:$0xff]  ;;  %v2027_v45 = vld [vmem:[#allocation5 + $0x18c8] sm:$0xff]  ;;  %v2058_v22 = vld [vmem:[#allocation5 + $0x19c0] sm:$0xff] }
 0x1a2   :  { %1930 = vmatpush.msrb.mxu0 %v1850_v50  ;;  %1950 = vmatpush.msrb.mxu1 %v1866_v23  ;;  %v2010_v50 = vld [vmem:[#allocation5 + $0x1840] sm:$0xff]  ;;  %v2040_v51 = vld [vmem:[#allocation5 + $0x1930] sm:$0xff]  ;;  %v2057_v25 = vld [vmem:[#allocation5 + $0x19b8] sm:$0xff] }
 0x1a3   :  { %1972 = vmatpush.msrb.mxu2 %v1880_v53  ;;  %1991 = vmatpush.msrb.mxu3 %v1897_v56  ;;  %1215 = vst [vmem:[#allocation2 + $0x18] sm:$0xf] %v1213_v16  ;;  %v2026_v23 = vld [vmem:[#allocation5 + $0x18c0] sm:$0xff]  ;;  %v2009_v53 = vld [vmem:[#allocation5 + $0x1838] sm:$0xff]  ;;  %v2056_v16 = vld [vmem:[#allocation5 + $0x19b0] sm:$0xff] }
 0x1a4   :  { %1839 = vmatmul.f32.vlgmr.msra.gmra.mxu3 %v4454_v37  ;;  %1931 = vmatpush.msrb.mxu0 %v1849_v57  ;;  %v2025_v56 = vld [vmem:[#allocation5 + $0x18b8] sm:$0xff]  ;;  %v2039_v57 = vld [vmem:[#allocation5 + $0x1928] sm:$0xff] }
 0x1a5   :  { %1951 = vmatpush.msrb.mxu1 %v1865_v58  ;;  %1973 = vmatpush.msrb.mxu2 %v1879_v59  ;;  %v1309_v63 = vpop.f32.mrf.mxu0  ;;  %v2008_v58 = vld [vmem:[#allocation5 + $0x1830] sm:$0xff] }
 0x1a6   :  { %1992 = vmatpush.msrb.mxu3 %v1896_v36  ;;  %1779 = vmatmul.f32.vlgmr.msra.gmra.mxu0 %v4457_v11  ;;  %v1329_v42 = vpop.f32.mrf.mxu1  ;;  %v1349_v20 = vpop.f32.mrf.mxu2  ;;  %v1862_v11 = vld [vmem:[#allocation5 + $0x1688] sm:$0xff]  ;;  %v2024_v59 = vld [vmem:[#allocation5 + $0x18b0] sm:$0xff]  ;;  %v2038_v36 = vld [vmem:[#allocation5 + $0x1920] sm:$0xff] }
 0x1a7   :  { %1799 = vmatmul.f32.vlgmr.msra.gmra.mxu1 %v4459_v52  ;;  %1932 = vmatpush.msrb.mxu0 %v1848_v60  ;;  %v1330_v37 = vadd.f32 %v1329_v42, %v1309_v63  ;;  %v2048_v52 = vld [vmem:[#allocation5 + $0x1970] sm:$0xff]  ;;  %v2055_v60 = vld [vmem:[#allocation5 + $0x19a8] sm:$0xff]  ;;  %v2037_v63 = vld [vmem:[#allocation5 + $0x1918] sm:$0xff] }
 0x1a8   :  { %1952 = vmatpush.msrb.mxu1 %v1864_v38  ;;  %1974 = vmatpush.msrb.mxu2 %v1878_v61  ;;  %v2007_v38 = vld [vmem:[#allocation5 + $0x1828] sm:$0xff]  ;;  %v2022_v42 = vld [vmem:[#allocation5 + $0x18a0] sm:$0xff] }
 0x1a9   :  { %1993 = vmatpush.msrb.mxu3 %v1895_v39  ;;  %1933 = vmatpush.msrb.mxu0 %v1847_v0  ;;  %v1350_v9 = vadd.f32 %v1349_v20, %v1330_v37  ;;  %v1369_v13 = vpop.f32.mrf.mxu3  ;;  %v2023_v61 = vld [vmem:[#allocation5 + $0x18a8] sm:$0xff]  ;;  %v2054_v39 = vld [vmem:[#allocation5 + $0x19a0] sm:$0xff]  ;;  %v2036_v20 = vld [vmem:[#allocation5 + $0x1910] sm:$0xff] }
 0x1aa   :  { %1953 = vmatpush.msrb.mxu1 %v1863_v2  ;;  %1975 = vmatpush.msrb.mxu2 %v1877_v43  ;;  %v2006_v0 = vld [vmem:[#allocation5 + $0x1820] sm:$0xff]  ;;  %v2053_v43 = vld [vmem:[#allocation5 + $0x1998] sm:$0xff] }
 0x1ab   :  { %1994 = vmatpush.msrb.mxu3 %v1894_v4  ;;  %1976 = vmatmul.f32.vlgmr.msrb.gmra.mxu2 %v4462_v44  ;;  %v1370_v18 = vadd.f32 %v1369_v13, %v1350_v9  ;;  %v2064_v44 = vld [vmem:[#allocation5 + $0x19f0] sm:$0xff]  ;;  %v4480_v2 = vld.sshfl [vmem:[#allocation1 + $0x10] sm:$0xff pattern:$0x75316420]  ;;  %v2005_v37 = vld [vmem:[#allocation5 + $0x1818] sm:$0xff] }
 0x1ac   :  { %2117 = vmatpush.msra.mxu2 %v2049_v5  ;;  %1934 = vmatpush.msrb.mxu0 %v1846_v49  ;;  %v2021_v4 = vld [vmem:[#allocation5 + $0x1898] sm:$0xff]  ;;  %v2035_v5 = vld [vmem:[#allocation5 + $0x1908] sm:$0xff]  ;;  %v2052_v9 = vld [vmem:[#allocation5 + $0x1990] sm:$0xff] }
 0x1ad   :  { %1954 = vmatpush.msrb.mxu1 %v1862_v11  ;;  %1995 = vmatpush.msrb.mxu3 %v1893_v17  ;;  %1372 = vst [vmem:[#allocation2 + $0x1c] sm:$0xf] %v1370_v18  ;;  %v4482_v49 = vld.sshfl [vmem:[#allocation1 + $0x18] sm:$0xff pattern:$0x75316420]  ;;  %v2034_v17 = vld [vmem:[#allocation5 + $0x1900] sm:$0xff] }
 0x1ae   :  { %1996 = vmatmul.f32.vlgmr.msrb.gmra.mxu3 %v4464_v1  ;;  %2118 = vmatpush.msra.mxu2 %v2048_v52  ;;  %v2015_v1 = vld [vmem:[#allocation5 + $0x1868] sm:$0xff]  ;;  %v2004_v13 = vld [vmem:[#allocation5 + $0x1810] sm:$0xff]  ;;  %2225 = vst [vmem:[#allocation1 + $0x10] ss:$2 sm:$0xff] %v4327_v12  ;;  %v2206_v18 = vld [vmem:[#allocation5 + $0x1b78] sm:$0xff] }
 0x1af   :  { %2137 = vmatpush.msra.mxu3 %v2065_v54  ;;  %1935 = vmatpush.msrb.mxu0 %v1845_v21  ;;  %v2020_v11 = vld [vmem:[#allocation5 + $0x1890] sm:$0xff]  ;;  %v2051_v52 = vld [vmem:[#allocation5 + $0x1988] sm:$0xff]  ;;  %v4487_v21 = vld.sshfl [vmem:[#allocation1 + $0x8] sm:$0xff pattern:$0x75316420] }
 0x1b0   :  { %1955 = vmatpush.msrb.mxu1 %v1861_v55  ;;  %1936 = vmatmul.f32.vlgmr.msrb.gmra.mxu0 %v4467_v8  ;;  %v2030_v8 = vld [vmem:[#allocation5 + $0x18e0] sm:$0xff]  ;;  %v4485_v54 = vld.sshfl [vmem:[#allocation1] sm:$0xff pattern:$0x75316420]  ;;  %v2003_v55 = vld [vmem:[#allocation5 + $0x1808] sm:$0xff] }
 0x1b1   :  { %1956 = vmatmul.f32.vlgmr.msrb.gmra.mxu1 %v4469_v47  ;;  %2077 = vmatpush.msra.mxu0 %v2017_v3  ;;  %v2061_v47 = vld [vmem:[#allocation5 + $0x19d8] sm:$0xff]  ;;  %v2019_v3 = vld [vmem:[#allocation5 + $0x1888] sm:$0xff]  ;;  %2223 = vst [vmem:[#allocation1] ss:$2 sm:$0xff] %v4333_v19 }
 0x1b2   :  { %2097 = vmatpush.msra.mxu1 %v2033_v24  ;;  %2119 = vmatpush.msra.mxu2 %v2047_v10  ;;  %v2050_v24 = vld [vmem:[#allocation5 + $0x1980] sm:$0xff]  ;;  %v2205_v10 = vld [vmem:[#allocation5 + $0x1b70] sm:$0xff] }
 0x1b3   :  { %2138 = vmatpush.msra.mxu3 %v2064_v44  ;;  %2078 = vmatpush.msra.mxu0 %v2016_v26  ;;  %v2222_v44 = vld [vmem:[#allocation5 + $0x1bf8] sm:$0xff]  ;;  %v2002_v26 = vld [vmem:[#allocation5 + $0x1800] sm:$0xff] }
 0x1b4   :  { %2098 = vmatpush.msra.mxu1 %v2032_v27  ;;  %2120 = vmatpush.msra.mxu2 %v2046_v48  ;;  %v2018_v27 = vld [vmem:[#allocation5 + $0x1880] sm:$0xff]  ;;  %v2174_v48 = vld [vmem:[#allocation5 + $0x1a78] sm:$0xff] }
 0x1b5   :  { %2139 = vmatpush.msra.mxu3 %v2063_v30  ;;  %2079 = vmatpush.msra.mxu0 %v2015_v1  ;;  %v2190_v30 = vld [vmem:[#allocation5 + $0x1af8] sm:$0xff]  ;;  %v2204_v1 = vld [vmem:[#allocation5 + $0x1b68] sm:$0xff] }
 0x1b6   :  { %2099 = vmatpush.msra.mxu1 %v2031_v31  ;;  %2121 = vmatpush.msra.mxu2 %v2045_v28  ;;  %v2221_v31 = vld [vmem:[#allocation5 + $0x1bf0] sm:$0xff] }
 0x1b7   :  { %2140 = vmatpush.msra.mxu3 %v2062_v32  ;;  %2080 = vmatpush.msra.mxu0 %v2014_v6  ;;  %v2173_v28 = vld [vmem:[#allocation5 + $0x1a70] sm:$0xff]  ;;  %v2203_v6 = vld [vmem:[#allocation5 + $0x1b60] sm:$0xff] }
 0x1b8   :  { %2100 = vmatpush.msra.mxu1 %v2030_v8  ;;  %2122 = vmatpush.msra.mxu2 %v2044_v33  ;;  %v2189_v32 = vld [vmem:[#allocation5 + $0x1af0] sm:$0xff]  ;;  %v4490_v8 = vld.sshfl [vmem:[#allocation1 + $0x10] sm:$0xff pattern:$0x75316420] }
 0x1b9   :  { %2141 = vmatpush.msra.mxu3 %v2061_v47  ;;  %2081 = vmatpush.msra.mxu0 %v2013_v34  ;;  %v4492_v33 = vld.sshfl [vmem:[#allocation1 + $0x18] sm:$0xff pattern:$0x75316420] }
 0x1ba   :  { %2101 = vmatpush.msra.mxu1 %v2029_v7  ;;  %2123 = vmatpush.msra.mxu2 %v2043_v35  ;;  %v2220_v47 = vld [vmem:[#allocation5 + $0x1be8] sm:$0xff]  ;;  %2382 = vst [vmem:[#allocation1 + $0x10] ss:$2 sm:$0xff] %v4327_v12  ;;  %v2202_v35 = vld [vmem:[#allocation5 + $0x1b58] sm:$0xff] }
 0x1bb   :  { %2142 = vmatpush.msra.mxu3 %v2060_v29  ;;  %2082 = vmatpush.msra.mxu0 %v2012_v62  ;;  %v2172_v34 = vld [vmem:[#allocation5 + $0x1a68] sm:$0xff]  ;;  %v2219_v29 = vld [vmem:[#allocation5 + $0x1be0] sm:$0xff] }
 0x1bc   :  { %2102 = vmatpush.msra.mxu1 %v2028_v15  ;;  %2124 = vmatpush.msra.mxu2 %v2042_v14  ;;  %v2188_v7 = vld [vmem:[#allocation5 + $0x1ae8] sm:$0xff]  ;;  %v2171_v62 = vld [vmem:[#allocation5 + $0x1a60] sm:$0xff]  ;;  %v4495_v15 = vld.sshfl [vmem:[#allocation1] sm:$0xff pattern:$0x75316420] }
 0x1bd   :  { %2143 = vmatpush.msra.mxu3 %v2059_v40  ;;  %2083 = vmatpush.msra.mxu0 %v2011_v41  ;;  %v4497_v14 = vld.sshfl [vmem:[#allocation1 + $0x8] sm:$0xff pattern:$0x75316420]  ;;  %v2201_v41 = vld [vmem:[#allocation5 + $0x1b50] sm:$0xff] }
 0x1be   :  { %2103 = vmatpush.msra.mxu1 %v2027_v45  ;;  %2125 = vmatpush.msra.mxu2 %v2041_v46  ;;  %v2187_v40 = vld [vmem:[#allocation5 + $0x1ae0] sm:$0xff]  ;;  %2380 = vst [vmem:[#allocation1] ss:$2 sm:$0xff] %v4333_v19  ;;  %v2218_v45 = vld [vmem:[#allocation5 + $0x1bd8] sm:$0xff] }
 0x1bf   :  { %2144 = vmatpush.msra.mxu3 %v2058_v22  ;;  %2084 = vmatpush.msra.mxu0 %v2010_v50  ;;  %v2170_v46 = vld [vmem:[#allocation5 + $0x1a58] sm:$0xff]  ;;  %v2200_v50 = vld [vmem:[#allocation5 + $0x1b48] sm:$0xff] }
 0x1c0   :  { %2104 = vmatpush.msra.mxu1 %v2026_v23  ;;  %2126 = vmatpush.msra.mxu2 %v2040_v51  ;;  %v2186_v22 = vld [vmem:[#allocation5 + $0x1ad8] sm:$0xff]  ;;  %v2217_v23 = vld [vmem:[#allocation5 + $0x1bd0] sm:$0xff] }
 0x1c1   :  { %2145 = vmatpush.msra.mxu3 %v2057_v25  ;;  %2085 = vmatpush.msra.mxu0 %v2009_v53  ;;  %v2169_v51 = vld [vmem:[#allocation5 + $0x1a50] sm:$0xff]  ;;  %v2199_v53 = vld [vmem:[#allocation5 + $0x1b40] sm:$0xff] }
 0x1c2   :  { %2105 = vmatpush.msra.mxu1 %v2025_v56  ;;  %2127 = vmatpush.msra.mxu2 %v2039_v57  ;;  %v2185_v25 = vld [vmem:[#allocation5 + $0x1ad0] sm:$0xff]  ;;  %v2216_v56 = vld [vmem:[#allocation5 + $0x1bc8] sm:$0xff] }
 0x1c3   :  { %2146 = vmatpush.msra.mxu3 %v2056_v16  ;;  %2086 = vmatpush.msra.mxu0 %v2008_v58  ;;  %v2168_v57 = vld [vmem:[#allocation5 + $0x1a48] sm:$0xff]  ;;  %v2198_v58 = vld [vmem:[#allocation5 + $0x1b38] sm:$0xff] }
 0x1c4   :  { %2106 = vmatpush.msra.mxu1 %v2024_v59  ;;  %2128 = vmatpush.msra.mxu2 %v2038_v36  ;;  %v2184_v16 = vld [vmem:[#allocation5 + $0x1ac8] sm:$0xff]  ;;  %v2215_v59 = vld [vmem:[#allocation5 + $0x1bc0] sm:$0xff] }
 0x1c5   :  { %2147 = vmatpush.msra.mxu3 %v2055_v60  ;;  %2087 = vmatpush.msra.mxu0 %v2007_v38  ;;  %v2167_v36 = vld [vmem:[#allocation5 + $0x1a40] sm:$0xff]  ;;  %v2197_v38 = vld [vmem:[#allocation5 + $0x1b30] sm:$0xff] }
 0x1c6   :  { %2107 = vmatpush.msra.mxu1 %v2023_v61  ;;  %2129 = vmatpush.msra.mxu2 %v2037_v63  ;;  %v2183_v60 = vld [vmem:[#allocation5 + $0x1ac0] sm:$0xff]  ;;  %v2214_v61 = vld [vmem:[#allocation5 + $0x1bb8] sm:$0xff] }
 0x1c7   :  { %2148 = vmatpush.msra.mxu3 %v2054_v39  ;;  %2088 = vmatpush.msra.mxu0 %v2006_v0  ;;  %v2166_v63 = vld [vmem:[#allocation5 + $0x1a38] sm:$0xff]  ;;  %v2196_v0 = vld [vmem:[#allocation5 + $0x1b28] sm:$0xff] }
 0x1c8   :  { %2108 = vmatpush.msra.mxu1 %v2022_v42  ;;  %2130 = vmatpush.msra.mxu2 %v2036_v20  ;;  %v2182_v39 = vld [vmem:[#allocation5 + $0x1ab8] sm:$0xff]  ;;  %v2213_v20 = vld [vmem:[#allocation5 + $0x1bb0] sm:$0xff] }
 0x1c9   :  { %2149 = vmatpush.msra.mxu3 %v2053_v43  ;;  %2089 = vmatpush.msra.mxu0 %v2005_v37  ;;  %v2165_v43 = vld [vmem:[#allocation5 + $0x1a30] sm:$0xff] }
 0x1ca   :  { %2109 = vmatpush.msra.mxu1 %v2021_v4  ;;  %2131 = vmatpush.msra.mxu2 %v2035_v5  ;;  %v2181_v5 = vld [vmem:[#allocation5 + $0x1ab0] sm:$0xff] }
 0x1cb   :  { %2150 = vmatpush.msra.mxu3 %v2052_v9  ;;  %2090 = vmatpush.msra.mxu0 %v2004_v13  ;;  %v2195_v9 = vld [vmem:[#allocation5 + $0x1b20] sm:$0xff] }
 0x1cc   :  { %2110 = vmatpush.msra.mxu1 %v2020_v11  ;;  %2132 = vmatpush.msra.mxu2 %v2034_v17  ;;  %v2212_v11 = vld [vmem:[#allocation5 + $0x1ba8] sm:$0xff] }
 0x1cd   :  { %2151 = vmatpush.msra.mxu3 %v2051_v52  ;;  %2091 = vmatpush.msra.mxu0 %v2003_v55  ;;  %v2164_v17 = vld [vmem:[#allocation5 + $0x1a28] sm:$0xff] }
 0x1ce   :  { %2274 = vmatpush.msrb.mxu2 %v2206_v18  ;;  %2111 = vmatpush.msra.mxu1 %v2019_v3  ;;  %v2180_v52 = vld [vmem:[#allocation5 + $0x1aa8] sm:$0xff]  ;;  %v2194_v3 = vld [vmem:[#allocation5 + $0x1b18] sm:$0xff] }
 0x1cf   :  { %2152 = vmatpush.msra.mxu3 %v2050_v24  ;;  %2092 = vmatpush.msra.mxu0 %v2002_v26  ;;  %v2211_v24 = vld [vmem:[#allocation5 + $0x1ba0] sm:$0xff] }
 0x1d0   :  { %2275 = vmatpush.msrb.mxu2 %v2205_v10  ;;  %2112 = vmatpush.msra.mxu1 %v2018_v27  ;;  %v2163_v10 = vld [vmem:[#allocation5 + $0x1a20] sm:$0xff]  ;;  %v2193_v27 = vld [vmem:[#allocation5 + $0x1b10] sm:$0xff] }
 0x1d1   :  { %2294 = vmatpush.msrb.mxu3 %v2222_v44  ;;  %2234 = vmatpush.msrb.mxu0 %v2174_v48  ;;  %v2179_v26 = vld [vmem:[#allocation5 + $0x1aa0] sm:$0xff]  ;;  %v2210_v48 = vld [vmem:[#allocation5 + $0x1b98] sm:$0xff] }
 0x1d2   :  { %2254 = vmatpush.msrb.mxu1 %v2190_v30  ;;  %2276 = vmatpush.msrb.mxu2 %v2204_v1  ;;  %v2162_v30 = vld [vmem:[#allocation5 + $0x1a18] sm:$0xff] }
 0x1d3   :  { %2295 = vmatpush.msrb.mxu3 %v2221_v31  ;;  %2235 = vmatpush.msrb.mxu0 %v2173_v28  ;;  %v2178_v1 = vld [vmem:[#allocation5 + $0x1a98] sm:$0xff]  ;;  %v2192_v31 = vld [vmem:[#allocation5 + $0x1b08] sm:$0xff] }
 0x1d4   :  { %2255 = vmatpush.msrb.mxu1 %v2189_v32  ;;  %2277 = vmatpush.msrb.mxu2 %v2203_v6  ;;  %v2161_v32 = vld [vmem:[#allocation5 + $0x1a10] sm:$0xff] }
 0x1d5   :  { %2296 = vmatpush.msrb.mxu3 %v2220_v47  ;;  %2236 = vmatpush.msrb.mxu0 %v2172_v34  ;;  %v2177_v34 = vld [vmem:[#allocation5 + $0x1a90] sm:$0xff] }
 0x1d6   :  { %2256 = vmatpush.msrb.mxu1 %v2188_v7  ;;  %2278 = vmatpush.msrb.mxu2 %v2202_v35  ;;  %v2191_v7 = vld [vmem:[#allocation5 + $0x1b00] sm:$0xff]  ;;  %v2208_v35 = vld [vmem:[#allocation5 + $0x1b88] sm:$0xff] }
 0x1d7   :  { %2297 = vmatpush.msrb.mxu3 %v2219_v29  ;;  %2237 = vmatpush.msrb.mxu0 %v2171_v62  ;;  %v2363_v29 = vld [vmem:[#allocation5 + $0x1d78] sm:$0xff]  ;;  %v2160_v62 = vld [vmem:[#allocation5 + $0x1a08] sm:$0xff] }
 0x1d8   :  { %2257 = vmatpush.msrb.mxu1 %v2187_v40  ;;  %2279 = vmatpush.msrb.mxu2 %v2201_v41 }
 0x1d9   :  { %2298 = vmatpush.msrb.mxu3 %v2218_v45  ;;  %2238 = vmatpush.msrb.mxu0 %v2170_v46  ;;  %v2207_v45 = vld [vmem:[#allocation5 + $0x1b80] sm:$0xff] }
 0x1da   :  { %2258 = vmatpush.msrb.mxu1 %v2186_v22  ;;  %2280 = vmatpush.msrb.mxu2 %v2200_v50  ;;  %v2379_v22 = vld [vmem:[#allocation5 + $0x1df8] sm:$0xff]  ;;  %v2159_v50 = vld [vmem:[#allocation5 + $0x1a00] sm:$0xff] }
 0x1db   :  { %2299 = vmatpush.msrb.mxu3 %v2217_v23  ;;  %2239 = vmatpush.msrb.mxu0 %v2169_v51  ;;  %v2175_v23 = vld [vmem:[#allocation5 + $0x1a80] sm:$0xff]  ;;  %v2331_v51 = vld [vmem:[#allocation5 + $0x1c78] sm:$0xff] }
 0x1dc   :  { %2259 = vmatpush.msrb.mxu1 %v2185_v25  ;;  %2281 = vmatpush.msrb.mxu2 %v2199_v53  ;;  %v2347_v25 = vld [vmem:[#allocation5 + $0x1cf8] sm:$0xff]  ;;  %v2361_v53 = vld [vmem:[#allocation5 + $0x1d68] sm:$0xff] }
 0x1dd   :  { %2300 = vmatpush.msrb.mxu3 %v2216_v56  ;;  %2240 = vmatpush.msrb.mxu0 %v2168_v57  ;;  %v2330_v56 = vld [vmem:[#allocation5 + $0x1c70] sm:$0xff] }
 0x1de   :  { %2260 = vmatpush.msrb.mxu1 %v2184_v16  ;;  %2282 = vmatpush.msrb.mxu2 %v2198_v58  ;;  %v2346_v57 = vld [vmem:[#allocation5 + $0x1cf0] sm:$0xff]  ;;  %v2360_v16 = vld [vmem:[#allocation5 + $0x1d60] sm:$0xff]  ;;  %v2377_v58 = vld [vmem:[#allocation5 + $0x1de8] sm:$0xff] }
 0x1df   :  { %2301 = vmatpush.msrb.mxu3 %v2215_v59  ;;  %2241 = vmatpush.msrb.mxu0 %v2167_v36  ;;  %v1466_v42 = vpop.f32.mrf.mxu0  ;;  %v2345_v59 = vld [vmem:[#allocation5 + $0x1ce8] sm:$0xff]  ;;  %v2359_v36 = vld [vmem:[#allocation5 + $0x1d58] sm:$0xff] }
 0x1e0   :  { %2261 = vmatpush.msrb.mxu1 %v2183_v60  ;;  %2283 = vmatpush.msrb.mxu2 %v2197_v38  ;;  %v1486_v37 = vpop.f32.mrf.mxu1  ;;  %v1506_v4 = vpop.f32.mrf.mxu2  ;;  %v2376_v60 = vld [vmem:[#allocation5 + $0x1de0] sm:$0xff] }
 0x1e1   :  { %2302 = vmatpush.msrb.mxu3 %v2214_v61  ;;  %2242 = vmatpush.msrb.mxu0 %v2166_v63  ;;  %v1487_v13 = vadd.f32 %v1486_v37, %v1466_v42  ;;  %v2328_v38 = vld [vmem:[#allocation5 + $0x1c60] sm:$0xff]  ;;  %v2358_v61 = vld [vmem:[#allocation5 + $0x1d50] sm:$0xff]  ;;  %v2327_v63 = vld [vmem:[#allocation5 + $0x1c58] sm:$0xff] }
 0x1e2   :  { %2262 = vmatpush.msrb.mxu1 %v2182_v39  ;;  %2284 = vmatpush.msrb.mxu2 %v2196_v0  ;;  %v2343_v39 = vld [vmem:[#allocation5 + $0x1cd8] sm:$0xff]  ;;  %v2357_v0 = vld [vmem:[#allocation5 + $0x1d48] sm:$0xff]  ;;  %v2374_v42 = vld [vmem:[#allocation5 + $0x1dd0] sm:$0xff] }
 0x1e3   :  { %2303 = vmatpush.msrb.mxu3 %v2213_v20  ;;  %2243 = vmatpush.msrb.mxu0 %v2165_v43  ;;  %v1507_v18 = vadd.f32 %v1506_v4, %v1487_v13  ;;  %v1526_v55 = vpop.f32.mrf.mxu3  ;;  %v2326_v20 = vld [vmem:[#allocation5 + $0x1c50] sm:$0xff]  ;;  %v2356_v37 = vld [vmem:[#allocation5 + $0x1d40] sm:$0xff]  ;;  %v2373_v4 = vld [vmem:[#allocation5 + $0x1dc8] sm:$0xff] }
 0x1e4   :  { %2263 = vmatpush.msrb.mxu1 %v2181_v5  ;;  %2285 = vmatpush.msrb.mxu2 %v2195_v9  ;;  %v2342_v43 = vld [vmem:[#allocation5 + $0x1cd0] sm:$0xff]  ;;  %v2325_v5 = vld [vmem:[#allocation5 + $0x1c48] sm:$0xff]  ;;  %v2355_v13 = vld [vmem:[#allocation5 + $0x1d38] sm:$0xff] }
 0x1e5   :  { %2304 = vmatpush.msrb.mxu3 %v2212_v11  ;;  %2133 = vmatmul.f32.vlgmr.msra.gmra.mxu2 %v4480_v2  ;;  %v1527_v44 = vadd.f32 %v1526_v55, %v1507_v18  ;;  %v2209_v2 = vld [vmem:[#allocation5 + $0x1b90] sm:$0xff]  ;;  %v2341_v9 = vld [vmem:[#allocation5 + $0x1cc8] sm:$0xff]  ;;  %v2372_v11 = vld [vmem:[#allocation5 + $0x1dc0] sm:$0xff] }
 0x1e6   :  { %2244 = vmatpush.msrb.mxu0 %v2164_v17  ;;  %2264 = vmatpush.msrb.mxu1 %v2180_v52  ;;  %v2324_v17 = vld [vmem:[#allocation5 + $0x1c40] sm:$0xff]  ;;  %v2354_v18 = vld [vmem:[#allocation5 + $0x1d30] sm:$0xff]  ;;  %v2371_v55 = vld [vmem:[#allocation5 + $0x1db8] sm:$0xff] }
 0x1e7   :  { %2286 = vmatpush.msrb.mxu2 %v2194_v3  ;;  %2305 = vmatpush.msrb.mxu3 %v2211_v24  ;;  %1529 = vst [vmem:[#allocation2 + $0x20] sm:$0xf] %v1527_v44  ;;  %v2340_v52 = vld [vmem:[#allocation5 + $0x1cc0] sm:$0xff]  ;;  %v2323_v3 = vld [vmem:[#allocation5 + $0x1c38] sm:$0xff]  ;;  %v2370_v44 = vld [vmem:[#allocation5 + $0x1db0] sm:$0xff] }
 0x1e8   :  { %2153 = vmatmul.f32.vlgmr.msra.gmra.mxu3 %v4482_v49  ;;  %2245 = vmatpush.msrb.mxu0 %v2163_v10  ;;  %v2339_v24 = vld [vmem:[#allocation5 + $0x1cb8] sm:$0xff]  ;;  %v2353_v10 = vld [vmem:[#allocation5 + $0x1d28] sm:$0xff] }
 0x1e9   :  { %2265 = vmatpush.msrb.mxu1 %v2179_v26  ;;  %2287 = vmatpush.msrb.mxu2 %v2193_v27  ;;  %v1623_v28 = vpop.f32.mrf.mxu0  ;;  %v2322_v26 = vld [vmem:[#allocation5 + $0x1c30] sm:$0xff] }
 0x1ea   :  { %2306 = vmatpush.msrb.mxu3 %v2210_v48  ;;  %2093 = vmatmul.f32.vlgmr.msra.gmra.mxu0 %v4485_v54  ;;  %v1643_v6 = vpop.f32.mrf.mxu1  ;;  %v1663_v47 = vpop.f32.mrf.mxu2  ;;  %v2176_v54 = vld [vmem:[#allocation5 + $0x1a88] sm:$0xff]  ;;  %v2338_v27 = vld [vmem:[#allocation5 + $0x1cb0] sm:$0xff]  ;;  %v2352_v48 = vld [vmem:[#allocation5 + $0x1d20] sm:$0xff] }
 0x1eb   :  { %2113 = vmatmul.f32.vlgmr.msra.gmra.mxu1 %v4487_v21  ;;  %2246 = vmatpush.msrb.mxu0 %v2162_v30  ;;  %v1644_v49 = vadd.f32 %v1643_v6, %v1623_v28  ;;  %v2362_v21 = vld [vmem:[#allocation5 + $0x1d70] sm:$0xff]  ;;  %v2369_v30 = vld [vmem:[#allocation5 + $0x1da8] sm:$0xff]  ;;  %v2351_v28 = vld [vmem:[#allocation5 + $0x1d18] sm:$0xff] }
 0x1ec   :  { %2266 = vmatpush.msrb.mxu1 %v2178_v1  ;;  %2288 = vmatpush.msrb.mxu2 %v2192_v31  ;;  %v2321_v1 = vld [vmem:[#allocation5 + $0x1c28] sm:$0xff]  ;;  %v2336_v6 = vld [vmem:[#allocation5 + $0x1ca0] sm:$0xff] }
 0x1ed   :  { %2307 = vmatpush.msrb.mxu3 %v2209_v2  ;;  %2247 = vmatpush.msrb.mxu0 %v2161_v32  ;;  %v1664_v40 = vadd.f32 %v1663_v47, %v1644_v49  ;;  %v1683_v41 = vpop.f32.mrf.mxu3  ;;  %v2337_v31 = vld [vmem:[#allocation5 + $0x1ca8] sm:$0xff]  ;;  %v2368_v2 = vld [vmem:[#allocation5 + $0x1da0] sm:$0xff]  ;;  %v2350_v47 = vld [vmem:[#allocation5 + $0x1d10] sm:$0xff] }
 0x1ee   :  { %2267 = vmatpush.msrb.mxu1 %v2177_v34  ;;  %2289 = vmatpush.msrb.mxu2 %v2191_v7  ;;  %v2320_v32 = vld [vmem:[#allocation5 + $0x1c20] sm:$0xff]  ;;  %v2367_v7 = vld [vmem:[#allocation5 + $0x1d98] sm:$0xff] }
 0x1ef   :  { %2308 = vmatpush.msrb.mxu3 %v2208_v35  ;;  %2290 = vmatmul.f32.vlgmr.msrb.gmra.mxu2 %v4490_v8  ;;  %v1684_v46 = vadd.f32 %v1683_v41, %v1664_v40  ;;  %v2378_v8 = vld [vmem:[#allocation5 + $0x1df0] sm:$0xff]  ;;  %v4508_v34 = vld.sshfl [vmem:[#allocation1 + $0x10] sm:$0xff pattern:$0x75316420]  ;;  %v2319_v49 = vld [vmem:[#allocation5 + $0x1c18] sm:$0xff] }
 0x1f0   :  { %2431 = vmatpush.msra.mxu2 %v2363_v29  ;;  %2248 = vmatpush.msrb.mxu0 %v2160_v62  ;;  %v2335_v35 = vld [vmem:[#allocation5 + $0x1c98] sm:$0xff]  ;;  %v2349_v29 = vld [vmem:[#allocation5 + $0x1d08] sm:$0xff]  ;;  %v2366_v40 = vld [vmem:[#allocation5 + $0x1d90] sm:$0xff] }
 0x1f1   :  { %2268 = vmatpush.msrb.mxu1 %v2176_v54  ;;  %2309 = vmatpush.msrb.mxu3 %v2207_v45  ;;  %1686 = vst [vmem:[#allocation2 + $0x24] sm:$0xf] %v1684_v46  ;;  %v4510_v62 = vld.sshfl [vmem:[#allocation1 + $0x18] sm:$0xff pattern:$0x75316420]  ;;  %v2348_v45 = vld [vmem:[#allocation5 + $0x1d00] sm:$0xff] }
 0x1f2   :  { %2310 = vmatmul.f32.vlgmr.msrb.gmra.mxu3 %v4492_v33  ;;  %2432 = vmatpush.msra.mxu2 %v2362_v21  ;;  %v2329_v33 = vld [vmem:[#allocation5 + $0x1c68] sm:$0xff]  ;;  %v2318_v41 = vld [vmem:[#allocation5 + $0x1c10] sm:$0xff]  ;;  %2539 = vst [vmem:[#allocation1 + $0x10] ss:$2 sm:$0xff] %v4327_v12  ;;  %v2520_v46 = vld [vmem:[#allocation5 + $0x1f78] sm:$0xff] }
 0x1f3   :  { %2451 = vmatpush.msra.mxu3 %v2379_v22  ;;  %2249 = vmatpush.msrb.mxu0 %v2159_v50  ;;  %v2334_v54 = vld [vmem:[#allocation5 + $0x1c90] sm:$0xff]  ;;  %v2365_v21 = vld [vmem:[#allocation5 + $0x1d88] sm:$0xff]  ;;  %v4515_v50 = vld.sshfl [vmem:[#allocation1 + $0x8] sm:$0xff pattern:$0x75316420] }
 0x1f4   :  { %2269 = vmatpush.msrb.mxu1 %v2175_v23  ;;  %2250 = vmatmul.f32.vlgmr.msrb.gmra.mxu0 %v4495_v15  ;;  %v2344_v15 = vld [vmem:[#allocation5 + $0x1ce0] sm:$0xff]  ;;  %v4513_v22 = vld.sshfl [vmem:[#allocation1] sm:$0xff pattern:$0x75316420]  ;;  %v2317_v23 = vld [vmem:[#allocation5 + $0x1c08] sm:$0xff] }
 0x1f5   :  { %2270 = vmatmul.f32.vlgmr.msrb.gmra.mxu1 %v4497_v14  ;;  %2391 = vmatpush.msra.mxu0 %v2331_v51  ;;  %v2375_v14 = vld [vmem:[#allocation5 + $0x1dd8] sm:$0xff]  ;;  %v2333_v51 = vld [vmem:[#allocation5 + $0x1c88] sm:$0xff]  ;;  %2537 = vst [vmem:[#allocation1] ss:$2 sm:$0xff] %v4333_v19  ;;  %v2364_v12 = vld [vmem:[#allocation5 + $0x1d80] sm:$0xff] }
 0x1f6   :  { %2411 = vmatpush.msra.mxu1 %v2347_v25  ;;  %2433 = vmatpush.msra.mxu2 %v2361_v53  ;;  %v2519_v25 = vld [vmem:[#allocation5 + $0x1f70] sm:$0xff]  ;;  %v2536_v53 = vld [vmem:[#allocation5 + $0x1ff8] sm:$0xff] }
 0x1f7   :  { %2452 = vmatpush.msra.mxu3 %v2378_v8  ;;  %2392 = vmatpush.msra.mxu0 %v2330_v56  ;;  %v2316_v8 = vld [vmem:[#allocation5 + $0x1c00] sm:$0xff]  ;;  %v2487_v19 = vld [vmem:[#allocation5 + $0x1e70] sm:$0xff] }
 0x1f8   :  { %2412 = vmatpush.msra.mxu1 %v2346_v57  ;;  %2434 = vmatpush.msra.mxu2 %v2360_v16  ;;  %v2332_v56 = vld [vmem:[#allocation5 + $0x1c80] sm:$0xff]  ;;  %v2488_v57 = vld [vmem:[#allocation5 + $0x1e78] sm:$0xff] }
 0x1f9   :  { %2453 = vmatpush.msra.mxu3 %v2377_v58  ;;  %2393 = vmatpush.msra.mxu0 %v2329_v33  ;;  %v2504_v16 = vld [vmem:[#allocation5 + $0x1ef8] sm:$0xff]  ;;  %v2518_v58 = vld [vmem:[#allocation5 + $0x1f68] sm:$0xff]  ;;  %v2535_v33 = vld [vmem:[#allocation5 + $0x1ff0] sm:$0xff] }
 0x1fa   :  { %2413 = vmatpush.msra.mxu1 %v2345_v59  ;;  %2435 = vmatpush.msra.mxu2 %v2359_v36  ;;  %v2503_v59 = vld [vmem:[#allocation5 + $0x1ef0] sm:$0xff]  ;;  %v2517_v36 = vld [vmem:[#allocation5 + $0x1f60] sm:$0xff] }
 0x1fb   :  { %2454 = vmatpush.msra.mxu3 %v2376_v60  ;;  %2394 = vmatpush.msra.mxu0 %v2328_v38  ;;  %v2534_v60 = vld [vmem:[#allocation5 + $0x1fe8] sm:$0xff] }
 0x1fc   :  { %2414 = vmatpush.msra.mxu1 %v2344_v15  ;;  %2436 = vmatpush.msra.mxu2 %v2358_v61  ;;  %v2486_v38 = vld [vmem:[#allocation5 + $0x1e68] sm:$0xff]  ;;  %v2516_v61 = vld [vmem:[#allocation5 + $0x1f58] sm:$0xff] }
 0x1fd   :  { %2455 = vmatpush.msra.mxu3 %v2375_v14  ;;  %2395 = vmatpush.msra.mxu0 %v2327_v63  ;;  %v2502_v15 = vld [vmem:[#allocation5 + $0x1ee8] sm:$0xff]  ;;  %v2533_v14 = vld [vmem:[#allocation5 + $0x1fe0] sm:$0xff] }
 0x1fe   :  { %2415 = vmatpush.msra.mxu1 %v2343_v39  ;;  %2437 = vmatpush.msra.mxu2 %v2357_v0  ;;  %v2485_v63 = vld [vmem:[#allocation5 + $0x1e60] sm:$0xff]  ;;  %v2515_v0 = vld [vmem:[#allocation5 + $0x1f50] sm:$0xff] }
 0x1ff   :  { %2456 = vmatpush.msra.mxu3 %v2374_v42  ;;  %2396 = vmatpush.msra.mxu0 %v2326_v20  ;;  %v2501_v39 = vld [vmem:[#allocation5 + $0x1ee0] sm:$0xff]  ;;  %v2532_v42 = vld [vmem:[#allocation5 + $0x1fd8] sm:$0xff] }
 0x200   :  { %2416 = vmatpush.msra.mxu1 %v2342_v43  ;;  %2438 = vmatpush.msra.mxu2 %v2356_v37  ;;  %v2484_v20 = vld [vmem:[#allocation5 + $0x1e58] sm:$0xff]  ;;  %v2514_v37 = vld [vmem:[#allocation5 + $0x1f48] sm:$0xff] }
 0x201   :  { %2457 = vmatpush.msra.mxu3 %v2373_v4  ;;  %2397 = vmatpush.msra.mxu0 %v2325_v5  ;;  %v2500_v43 = vld [vmem:[#allocation5 + $0x1ed8] sm:$0xff]  ;;  %v2531_v4 = vld [vmem:[#allocation5 + $0x1fd0] sm:$0xff] }
 0x202   :  { %2417 = vmatpush.msra.mxu1 %v2341_v9  ;;  %2439 = vmatpush.msra.mxu2 %v2355_v13  ;;  %v2483_v5 = vld [vmem:[#allocation5 + $0x1e50] sm:$0xff]  ;;  %v2513_v13 = vld [vmem:[#allocation5 + $0x1f40] sm:$0xff] }
 0x203   :  { %2458 = vmatpush.msra.mxu3 %v2372_v11  ;;  %2398 = vmatpush.msra.mxu0 %v2324_v17  ;;  %v2499_v9 = vld [vmem:[#allocation5 + $0x1ed0] sm:$0xff]  ;;  %v2530_v11 = vld [vmem:[#allocation5 + $0x1fc8] sm:$0xff] }
 0x204   :  { %2418 = vmatpush.msra.mxu1 %v2340_v52  ;;  %2440 = vmatpush.msra.mxu2 %v2354_v18  ;;  %v2482_v17 = vld [vmem:[#allocation5 + $0x1e48] sm:$0xff]  ;;  %v2512_v18 = vld [vmem:[#allocation5 + $0x1f38] sm:$0xff] }
 0x205   :  { %2459 = vmatpush.msra.mxu3 %v2371_v55  ;;  %2399 = vmatpush.msra.mxu0 %v2323_v3  ;;  %v2498_v52 = vld [vmem:[#allocation5 + $0x1ec8] sm:$0xff]  ;;  %v2529_v55 = vld [vmem:[#allocation5 + $0x1fc0] sm:$0xff] }
 0x206   :  { %2419 = vmatpush.msra.mxu1 %v2339_v24  ;;  %2441 = vmatpush.msra.mxu2 %v2353_v10  ;;  %v2481_v3 = vld [vmem:[#allocation5 + $0x1e40] sm:$0xff]  ;;  %v2511_v10 = vld [vmem:[#allocation5 + $0x1f30] sm:$0xff] }
 0x207   :  { %2460 = vmatpush.msra.mxu3 %v2370_v44  ;;  %2400 = vmatpush.msra.mxu0 %v2322_v26  ;;  %v2497_v24 = vld [vmem:[#allocation5 + $0x1ec0] sm:$0xff]  ;;  %v2528_v44 = vld [vmem:[#allocation5 + $0x1fb8] sm:$0xff] }
 0x208   :  { %2420 = vmatpush.msra.mxu1 %v2338_v27  ;;  %2442 = vmatpush.msra.mxu2 %v2352_v48  ;;  %v2480_v26 = vld [vmem:[#allocation5 + $0x1e38] sm:$0xff]  ;;  %v2510_v48 = vld [vmem:[#allocation5 + $0x1f28] sm:$0xff] }
 0x209   :  { %2461 = vmatpush.msra.mxu3 %v2369_v30  ;;  %2401 = vmatpush.msra.mxu0 %v2321_v1  ;;  %v2496_v27 = vld [vmem:[#allocation5 + $0x1eb8] sm:$0xff]  ;;  %v2527_v1 = vld [vmem:[#allocation5 + $0x1fb0] sm:$0xff] }
 0x20a   :  { %2421 = vmatpush.msra.mxu1 %v2337_v31  ;;  %2443 = vmatpush.msra.mxu2 %v2351_v28  ;;  %v2479_v31 = vld [vmem:[#allocation5 + $0x1e30] sm:$0xff] }
 0x20b   :  { %2462 = vmatpush.msra.mxu3 %v2368_v2  ;;  %2402 = vmatpush.msra.mxu0 %v2320_v32  ;;  %v2495_v32 = vld [vmem:[#allocation5 + $0x1eb0] sm:$0xff] }
 0x20c   :  { %2422 = vmatpush.msra.mxu1 %v2336_v6  ;;  %2444 = vmatpush.msra.mxu2 %v2350_v47  ;;  %v2509_v6 = vld [vmem:[#allocation5 + $0x1f20] sm:$0xff] }
 0x20d   :  { %2463 = vmatpush.msra.mxu3 %v2367_v7  ;;  %2403 = vmatpush.msra.mxu0 %v2319_v49  ;;  %v2526_v7 = vld [vmem:[#allocation5 + $0x1fa8] sm:$0xff] }
 0x20e   :  { %2423 = vmatpush.msra.mxu1 %v2335_v35  ;;  %2445 = vmatpush.msra.mxu2 %v2349_v29  ;;  %v2478_v49 = vld [vmem:[#allocation5 + $0x1e28] sm:$0xff] }
 0x20f   :  { %2464 = vmatpush.msra.mxu3 %v2366_v40  ;;  %2404 = vmatpush.msra.mxu0 %v2318_v41  ;;  %v2494_v35 = vld [vmem:[#allocation5 + $0x1ea8] sm:$0xff]  ;;  %v2508_v41 = vld [vmem:[#allocation5 + $0x1f18] sm:$0xff] }
 0x210   :  { %2424 = vmatpush.msra.mxu1 %v2334_v54  ;;  %2446 = vmatpush.msra.mxu2 %v2348_v45  ;;  %v2525_v54 = vld [vmem:[#allocation5 + $0x1fa0] sm:$0xff] }
 0x211   :  { %2465 = vmatpush.msra.mxu3 %v2365_v21  ;;  %2405 = vmatpush.msra.mxu0 %v2317_v23  ;;  %v2477_v45 = vld [vmem:[#allocation5 + $0x1e20] sm:$0xff]  ;;  %v2507_v23 = vld [vmem:[#allocation5 + $0x1f10] sm:$0xff] }
 0x212   :  { %2588 = vmatpush.msrb.mxu2 %v2520_v46  ;;  %2425 = vmatpush.msra.mxu1 %v2333_v51  ;;  %v2493_v46 = vld [vmem:[#allocation5 + $0x1ea0] sm:$0xff]  ;;  %v2524_v51 = vld [vmem:[#allocation5 + $0x1f98] sm:$0xff] }
 0x213   :  { %2466 = vmatpush.msra.mxu3 %v2364_v12  ;;  %2406 = vmatpush.msra.mxu0 %v2316_v8  ;;  %v2476_v12 = vld [vmem:[#allocation5 + $0x1e18] sm:$0xff] }
 0x214   :  { %2589 = vmatpush.msrb.mxu2 %v2519_v25  ;;  %2426 = vmatpush.msra.mxu1 %v2332_v56  ;;  %v2492_v25 = vld [vmem:[#allocation5 + $0x1e98] sm:$0xff]  ;;  %v2475_v56 = vld [vmem:[#allocation5 + $0x1e10] sm:$0xff] }
 0x215   :  { %2608 = vmatpush.msrb.mxu3 %v2536_v53  ;;  %2548 = vmatpush.msrb.mxu0 %v2488_v57  ;;  %v2506_v53 = vld [vmem:[#allocation5 + $0x1f08] sm:$0xff] }
 0x216   :  { %2568 = vmatpush.msrb.mxu1 %v2504_v16  ;;  %2590 = vmatpush.msrb.mxu2 %v2518_v58  ;;  %v2491_v58 = vld [vmem:[#allocation5 + $0x1e90] sm:$0xff] }
 0x217   :  { %2609 = vmatpush.msrb.mxu3 %v2535_v33  ;;  %2549 = vmatpush.msrb.mxu0 %v2487_v19  ;;  %v2505_v33 = vld [vmem:[#allocation5 + $0x1f00] sm:$0xff]  ;;  %v2522_v19 = vld [vmem:[#allocation5 + $0x1f88] sm:$0xff] }
 0x218   :  { %2569 = vmatpush.msrb.mxu1 %v2503_v59  ;;  %2591 = vmatpush.msrb.mxu2 %v2517_v36  ;;  %v2542_v59 = vld.sshfl [vmem:[#allocation1 + $0x10] sm:$0xff pattern:$0x75316420] }
 0x219   :  { %2610 = vmatpush.msrb.mxu3 %v2534_v60  ;;  %2550 = vmatpush.msrb.mxu0 %v2486_v38  ;;  %v2474_v36 = vld [vmem:[#allocation5 + $0x1e08] sm:$0xff] }
 0x21a   :  { %2570 = vmatpush.msrb.mxu1 %v2502_v15  ;;  %2592 = vmatpush.msrb.mxu2 %v2516_v61  ;;  %v2490_v60 = vld [vmem:[#allocation5 + $0x1e88] sm:$0xff]  ;;  %v2521_v15 = vld [vmem:[#allocation5 + $0x1f80] sm:$0xff] }
 0x21b   :  { %2611 = vmatpush.msrb.mxu3 %v2533_v14  ;;  %2551 = vmatpush.msrb.mxu0 %v2485_v63  ;;  %v2473_v61 = vld [vmem:[#allocation5 + $0x1e00] sm:$0xff] }
 0x21c   :  { %2571 = vmatpush.msrb.mxu1 %v2501_v39  ;;  %2593 = vmatpush.msrb.mxu2 %v2515_v0  ;;  %v2489_v63 = vld [vmem:[#allocation5 + $0x1e80] sm:$0xff]  ;;  %v2540_v39 = vld.sshfl [vmem:[#allocation1] sm:$0xff pattern:$0x75316420] }
 0x21d   :  { %2612 = vmatpush.msrb.mxu3 %v2532_v42  ;;  %2552 = vmatpush.msrb.mxu0 %v2484_v20  ;;  %v2541_v0 = vld.sshfl [vmem:[#allocation1 + $0x8] sm:$0xff pattern:$0x75316420] }
 0x21e   :  { %2572 = vmatpush.msrb.mxu1 %v2500_v43  ;;  %2594 = vmatpush.msrb.mxu2 %v2514_v37 }
 0x21f   :  { %2613 = vmatpush.msrb.mxu3 %v2531_v4  ;;  %2553 = vmatpush.msrb.mxu0 %v2483_v5 }
 0x220   :  { %2573 = vmatpush.msrb.mxu1 %v2499_v9  ;;  %2595 = vmatpush.msrb.mxu2 %v2513_v13 }
 0x221   :  { %2614 = vmatpush.msrb.mxu3 %v2530_v11  ;;  %2554 = vmatpush.msrb.mxu0 %v2482_v17 }
 0x222   :  { %2574 = vmatpush.msrb.mxu1 %v2498_v52  ;;  %2596 = vmatpush.msrb.mxu2 %v2512_v18 }
 0x223   :  { %2615 = vmatpush.msrb.mxu3 %v2529_v55  ;;  %2555 = vmatpush.msrb.mxu0 %v2481_v3  ;;  %v1780_v30 = vpop.f32.mrf.mxu0 }
 0x224   :  { %2575 = vmatpush.msrb.mxu1 %v2497_v24  ;;  %2597 = vmatpush.msrb.mxu2 %v2511_v10  ;;  %v1800_v28 = vpop.f32.mrf.mxu1  ;;  %v1820_v2 = vpop.f32.mrf.mxu2 }
 0x225   :  { %2616 = vmatpush.msrb.mxu3 %v2528_v44  ;;  %2556 = vmatpush.msrb.mxu0 %v2480_v26  ;;  %v1801_v47 = vadd.f32 %v1800_v28, %v1780_v30 }
 0x226   :  { %2576 = vmatpush.msrb.mxu1 %v2496_v27  ;;  %2598 = vmatpush.msrb.mxu2 %v2510_v48 }
 0x227   :  { %2617 = vmatpush.msrb.mxu3 %v2527_v1  ;;  %2557 = vmatpush.msrb.mxu0 %v2479_v31  ;;  %v1821_v29 = vadd.f32 %v1820_v2, %v1801_v47  ;;  %v1840_v40 = vpop.f32.mrf.mxu3 }
 0x228   :  { %2577 = vmatpush.msrb.mxu1 %v2495_v32  ;;  %2599 = vmatpush.msrb.mxu2 %v2509_v6 }
 0x229   :  { %2618 = vmatpush.msrb.mxu3 %v2526_v7  ;;  %2447 = vmatmul.f32.vlgmr.msra.gmra.mxu2 %v4508_v34  ;;  %v1841_v21 = vadd.f32 %v1840_v40, %v1821_v29  ;;  %v2523_v34 = vld [vmem:[#allocation5 + $0x1f90] sm:$0xff]  ;;  %v2634_v29 = vld [vmem:[#allocation2 + $0x20] sm:$0xff] }
 0x22a   :  { %2558 = vmatpush.msrb.mxu0 %v2478_v49  ;;  %2578 = vmatpush.msrb.mxu1 %v2494_v35  ;;  %v2633_v40 = vld [vmem:[#allocation2 + $0x18] sm:$0xff] }
 0x22b   :  { %2600 = vmatpush.msrb.mxu2 %v2508_v41  ;;  %2619 = vmatpush.msrb.mxu3 %v2525_v54  ;;  %1843 = vst [vmem:[#allocation2 + $0x28] sm:$0xf] %v1841_v21  ;;  %v2632_v41 = vld [vmem:[#allocation2 + $0x10] sm:$0xff]  ;;  %v2631_v54 = vld [vmem:[#allocation2 + $0x8] sm:$0xff]  ;;  %v2630_v21 = vld [vmem:[#allocation2] sm:$0xff] }
 0x22c   :  { %2467 = vmatmul.f32.vlgmr.msra.gmra.mxu3 %v4510_v62  ;;  %2559 = vmatpush.msrb.mxu0 %v2477_v45  ;;  %v2629_v45 = vld [vmem:[#allocation8] sm:$0xff] }
 0x22d   :  { %2579 = vmatpush.msrb.mxu1 %v2493_v46  ;;  %2601 = vmatpush.msrb.mxu2 %v2507_v23  ;;  %v1937_v8 = vpop.f32.mrf.mxu0 }
 0x22e   :  { %2620 = vmatpush.msrb.mxu3 %v2524_v51  ;;  %2407 = vmatmul.f32.vlgmr.msra.gmra.mxu0 %v4513_v22  ;;  %v1957_v57 = vpop.f32.mrf.mxu1  ;;  %v1977_v16 = vpop.f32.mrf.mxu2 }
 0x22f   :  { %2427 = vmatmul.f32.vlgmr.msra.gmra.mxu1 %v4515_v50  ;;  %2560 = vmatpush.msrb.mxu0 %v2476_v12  ;;  %v1958_v62 = vadd.f32 %v1957_v57, %v1937_v8  ;;  %v2543_v50 = vld.sshfl [vmem:[#allocation1 + $0x18] sm:$0xff pattern:$0x75316420] }
 0x230   :  { %2580 = vmatpush.msrb.mxu1 %v2492_v25  ;;  %2602 = vmatpush.msrb.mxu2 %v2506_v53  ;;  %v4235_v53 = vmov 0   ;;  %v3811_v57 = vld [vmem:[%s5552_s5 + $0xf8] sm:$0xff] }
 0x231   :  { %2621 = vmatpush.msrb.mxu3 %v2523_v34  ;;  %2561 = vmatpush.msrb.mxu0 %v2475_v56  ;;  %v1978_v38 = vadd.f32 %v1977_v16, %v1958_v62  ;;  %v1997_v22 = vpop.f32.mrf.mxu3  ;;  %v2714_v56 = vld [vmem:[%s5552_s5 + $0x78] sm:$0xff]  ;;  %v3810_v62 = vld [vmem:[%s5552_s5 + $0xf0] sm:$0xff] }
 0x232   :  { %2581 = vmatpush.msrb.mxu1 %v2491_v58  ;;  %2603 = vmatpush.msrb.mxu2 %v2505_v33  ;;  %v3827_v16 = vld [vmem:[%s5552_s5 + $0x178] sm:$0xff]  ;;  %v2713_v33 = vld [vmem:[%s5552_s5 + $0x70] sm:$0xff] }
 0x233   :  { %2622 = vmatpush.msrb.mxu3 %v2522_v19  ;;  %2604 = vmatmul.f32.vlgmr.msrb.gmra.mxu2 %v2542_v59  ;;  %v1998_v14 = vadd.f32 %v1997_v22, %v1978_v38  ;;  %v3843_v58 = vld [vmem:[%s5552_s5 + $0x1f8] sm:$0xff]  ;;  %v3826_v59 = vld [vmem:[%s5552_s5 + $0x170] sm:$0xff]  ;;  %v3809_v38 = vld [vmem:[%s5552_s5 + $0xe8] sm:$0xff] }
 0x234   :  { %2562 = vmatpush.msrb.mxu0 %v2474_v36  ;;  %2582 = vmatpush.msrb.mxu1 %v2490_v60  ;;  %v3842_v36 = vld [vmem:[%s5552_s5 + $0x1f0] sm:$0xff]  ;;  %v2712_v60 = vld [vmem:[%s5552_s5 + $0x68] sm:$0xff] }
 0x235   :  { %2623 = vmatpush.msrb.mxu3 %v2521_v15  ;;  %2000 = vst [vmem:[#allocation2 + $0x2c] sm:$0xf] %v1998_v14  ;;  %4064 = vset.pattern.permute.xlu1 %v4235_v53  ;;  %v3825_v22 = vld [vmem:[%s5552_s5 + $0x168] sm:$0xff]  ;;  %v3824_v14 = vld [vmem:[%s5552_s5 + $0x160] sm:$0xff] }
 0x236   :  { %2624 = vmatmul.f32.vlgmr.msrb.gmra.mxu3 %v2543_v50  ;;  %2563 = vmatpush.msrb.mxu0 %v2473_v61  ;;  %v3841_v15 = vld [vmem:[%s5552_s5 + $0x1e8] sm:$0xff]  ;;  %v2711_v50 = vld [vmem:[%s5552_s5 + $0x60] sm:$0xff] }
 0x237   :  { %2583 = vmatpush.msrb.mxu1 %v2489_v63  ;;  %2564 = vmatmul.f32.vlgmr.msrb.gmra.mxu0 %v2540_v39  ;;  %v3808_v61 = vld [vmem:[%s5552_s5 + $0xe0] sm:$0xff]  ;;  %v2710_v39 = vld [vmem:[%s5552_s5 + $0x58] sm:$0xff] }
 0x238   :  { %2584 = vmatmul.f32.vlgmr.msrb.gmra.mxu1 %v2541_v0  ;;  %4066 = vset.pattern.permute.xlu0 %v4235_v53  ;;  %v3840_v63 = vld [vmem:[%s5552_s5 + $0x1e0] sm:$0xff]  ;;  %v3807_v0 = vld [vmem:[%s5552_s5 + $0xd8] sm:$0xff] }
 0x239   :  { %4065 = vset.pattern.permute.xlu2 %v4235_v53  ;;  %2715 = vmatpush.msra.mxu1 %v2714_v56  ;;  %v3815_v53 = vld [vmem:[%s5552_s5 + $0x118] sm:$0xff]  ;;  %v3798_v56 = vld [vmem:[%s5552_s5 + $0x90] sm:$0xff] }
 0x23a   :  { %2754 = vmatpush.msra.mxu2 %v3811_v57  ;;  %2792 = vmatpush.msra.mxu3 %v3827_v16  ;;  %v3814_v57 = vld [vmem:[%s5552_s5 + $0x110] sm:$0xff] }
 0x23b   :  { %2716 = vmatpush.msra.mxu1 %v2713_v33  ;;  %v3830_v16 = vld [vmem:[%s5552_s5 + $0x190] sm:$0xff]  ;;  %v3797_v33 = vld [vmem:[%s5552_s5 + $0x88] sm:$0xff] }
 0x23c   :  { %v2635_v35 = vld [vmem:[#allocation2 + $0x28] sm:$0xff]  ;;  %2755 = vmatpush.msra.mxu2 %v3810_v62  ;;  %2793 = vmatpush.msra.mxu3 %v3826_v59  ;;  %v3813_v62 = vld [vmem:[%s5552_s5 + $0x108] sm:$0xff]  ;;  %v2699_v59 = vld [vmem:[%s5552_s5] sm:$0xff] }
 0x23d   :  { %2717 = vmatpush.msra.mxu1 %v2712_v60  ;;  %v3796_v60 = vld [vmem:[%s5552_s5 + $0x80] sm:$0xff] }
 0x23e   :  { %2756 = vmatpush.msra.mxu2 %v3809_v38  ;;  %2794 = vmatpush.msra.mxu3 %v3825_v22  ;;  %v3812_v38 = vld [vmem:[%s5552_s5 + $0x100] sm:$0xff] }
 0x23f   :  { %2718 = vmatpush.msra.mxu1 %v2711_v50  ;;  %v3828_v22 = vld [vmem:[%s5552_s5 + $0x180] sm:$0xff]  ;;  %v3875_v50 = vld [vmem:[%s5552_s5 + $0x2f8] sm:$0xff] }
 0x240   :  { %2757 = vmatpush.msra.mxu2 %v3808_v61  ;;  %2795 = vmatpush.msra.mxu3 %v3824_v14  ;;  %v3891_v61 = vld [vmem:[%s5552_s5 + $0x378] sm:$0xff] }
 0x241   :  { %2719 = vmatpush.msra.mxu1 %v2710_v39  ;;  %v3907_v14 = vld [vmem:[%s5552_s5 + $0x3f8] sm:$0xff]  ;;  %v3874_v39 = vld [vmem:[%s5552_s5 + $0x2f0] sm:$0xff] }
 0x242   :  { %2758 = vmatpush.msra.mxu2 %v3807_v0  ;;  %v3890_v0 = vld [vmem:[%s5552_s5 + $0x370] sm:$0xff] }
 0x267   :  { %v2094_v42 = vpop.f32.mrf.mxu0 }
 0x268   :  { %v2114_v20 = vpop.f32.mrf.mxu1  ;;  %v2134_v43 = vpop.f32.mrf.mxu2 }
 0x269   :  { %v2115_v37 = vadd.f32 %v2114_v20, %v2094_v42  ;;  %v3823_v42 = vld [vmem:[%s5552_s5 + $0x158] sm:$0xff] }
 0x26a   :  { %v3839_v20 = vld [vmem:[%s5552_s5 + $0x1d8] sm:$0xff]  ;;  %2796 = vmatpush.msra.mxu3 %v3823_v42  ;;  %v3906_v42 = vld [vmem:[%s5552_s5 + $0x3f0] sm:$0xff] }
 0x26b   :  { %v2135_v4 = vadd.f32 %v2134_v43, %v2115_v37  ;;  %v2154_v5 = vpop.f32.mrf.mxu3  ;;  %v2709_v43 = vld [vmem:[%s5552_s5 + $0x50] sm:$0xff] }
 0x26c   :  { %v3806_v37 = vld [vmem:[%s5552_s5 + $0xd0] sm:$0xff]  ;;  %2720 = vmatpush.msra.mxu1 %v2709_v43  ;;  %v3873_v43 = vld [vmem:[%s5552_s5 + $0x2e8] sm:$0xff] }
 0x26d   :  { %v2155_v9 = vadd.f32 %v2154_v5, %v2135_v4  ;;  %v3822_v4 = vld [vmem:[%s5552_s5 + $0x150] sm:$0xff]  ;;  %2759 = vmatpush.msra.mxu2 %v3806_v37  ;;  %v3889_v37 = vld [vmem:[%s5552_s5 + $0x368] sm:$0xff] }
 0x26e   :  { %v3838_v5 = vld [vmem:[%s5552_s5 + $0x1d0] sm:$0xff]  ;;  %2797 = vmatpush.msra.mxu3 %v3822_v4  ;;  %v3905_v4 = vld [vmem:[%s5552_s5 + $0x3e8] sm:$0xff] }
 0x26f   :  { %2157 = vst [vmem:[#allocation2 + $0x30] sm:$0xf] %v2155_v9 }
 0x271   :  { %v2251_v13 = vpop.f32.mrf.mxu0 }
 0x272   :  { %v2271_v11 = vpop.f32.mrf.mxu1  ;;  %v2291_v17 = vpop.f32.mrf.mxu2 }
 0x273   :  { %v2272_v52 = vadd.f32 %v2271_v11, %v2251_v13  ;;  %v2708_v13 = vld [vmem:[%s5552_s5 + $0x48] sm:$0xff] }
 0x274   :  { %v3805_v11 = vld [vmem:[%s5552_s5 + $0xc8] sm:$0xff]  ;;  %2721 = vmatpush.msra.mxu1 %v2708_v13  ;;  %v3888_v13 = vld [vmem:[%s5552_s5 + $0x360] sm:$0xff] }
 0x275   :  { %v2292_v18 = vadd.f32 %v2291_v17, %v2272_v52  ;;  %v2311_v55 = vpop.f32.mrf.mxu3  ;;  %v3821_v52 = vld [vmem:[%s5552_s5 + $0x148] sm:$0xff]  ;;  %2760 = vmatpush.msra.mxu2 %v3805_v11  ;;  %v3904_v11 = vld [vmem:[%s5552_s5 + $0x3e0] sm:$0xff] }
 0x276   :  { %2798 = vmatpush.msra.mxu3 %v3821_v52  ;;  %v3871_v52 = vld [vmem:[%s5552_s5 + $0x2d8] sm:$0xff] }
 0x277   :  { %v2312_v3 = vadd.f32 %v2311_v55, %v2292_v18  ;;  %v3837_v18 = vld [vmem:[%s5552_s5 + $0x1c8] sm:$0xff]  ;;  %v2707_v55 = vld [vmem:[%s5552_s5 + $0x40] sm:$0xff] }
 0x278   :  { %2722 = vmatpush.msra.mxu1 %v2707_v55  ;;  %v3903_v55 = vld [vmem:[%s5552_s5 + $0x3d8] sm:$0xff] }
 0x279   :  { %2314 = vst [vmem:[#allocation2 + $0x34] sm:$0xf] %v2312_v3  ;;  %v3804_v3 = vld [vmem:[%s5552_s5 + $0xc0] sm:$0xff] }
 0x27a   :  { %2761 = vmatpush.msra.mxu2 %v3804_v3  ;;  %v3854_v3 = vld [vmem:[%s5552_s5 + $0x250] sm:$0xff] }
 0x280   :  { %v2636_v49 = vld [vmem:[#allocation2 + $0x30] sm:$0xff] }
 0x2ab   :  { %v2408_v24 = vpop.f32.mrf.mxu0 }
 0x2ac   :  { %v2428_v10 = vpop.f32.mrf.mxu1  ;;  %v2448_v44 = vpop.f32.mrf.mxu2 }
 0x2ad   :  { %v2429_v26 = vadd.f32 %v2428_v10, %v2408_v24  ;;  %v3820_v10 = vld [vmem:[%s5552_s5 + $0x140] sm:$0xff] }
 0x2ae   :  { %2799 = vmatpush.msra.mxu3 %v3820_v10  ;;  %v3886_v10 = vld [vmem:[%s5552_s5 + $0x350] sm:$0xff] }
 0x2af   :  { %v2449_v27 = vadd.f32 %v2448_v44, %v2429_v26  ;;  %v2468_v48 = vpop.f32.mrf.mxu3  ;;  %v3836_v44 = vld [vmem:[%s5552_s5 + $0x1c0] sm:$0xff]  ;;  %v2706_v26 = vld [vmem:[%s5552_s5 + $0x38] sm:$0xff] }
 0x2b0   :  { %2723 = vmatpush.msra.mxu1 %v2706_v26  ;;  %v3853_v26 = vld [vmem:[%s5552_s5 + $0x248] sm:$0xff] }
 0x2b1   :  { %v2469_v30 = vadd.f32 %v2468_v48, %v2449_v27  ;;  %v3803_v27 = vld [vmem:[%s5552_s5 + $0xb8] sm:$0xff] }
 0x2b2   :  { %2762 = vmatpush.msra.mxu2 %v3803_v27  ;;  %v3869_v27 = vld [vmem:[%s5552_s5 + $0x2c8] sm:$0xff] }
 0x2b3   :  { %2471 = vst [vmem:[#allocation2 + $0x38] sm:$0xf] %v2469_v30  ;;  %v3819_v30 = vld [vmem:[%s5552_s5 + $0x138] sm:$0xff] }
 0x2b4   :  { %v2565_v1 = vpop.f32.mrf.mxu0  ;;  %2800 = vmatpush.msra.mxu3 %v3819_v30  ;;  %v3901_v30 = vld [vmem:[%s5552_s5 + $0x3c8] sm:$0xff] }
 0x2b5   :  { %v2585_v31 = vpop.f32.mrf.mxu1 }
 0x2b6   :  { %v2586_v28 = vadd.f32 %v2585_v31, %v2565_v1  ;;  %v2605_v2 = vpop.f32.mrf.mxu2  ;;  %v3835_v1 = vld [vmem:[%s5552_s5 + $0x1b8] sm:$0xff]  ;;  %v2705_v31 = vld [vmem:[%s5552_s5 + $0x30] sm:$0xff] }
 0x2b7   :  { %2724 = vmatpush.msra.mxu1 %v2705_v31  ;;  %v3868_v31 = vld [vmem:[%s5552_s5 + $0x2c0] sm:$0xff] }
 0x2b8   :  { %v2606_v32 = vadd.f32 %v2605_v2, %v2586_v28  ;;  %v3802_v28 = vld [vmem:[%s5552_s5 + $0xb0] sm:$0xff] }
 0x2b9   :  { %v2625_v6 = vpop.f32.mrf.mxu3  ;;  %2763 = vmatpush.msra.mxu2 %v3802_v28  ;;  %v3884_v28 = vld [vmem:[%s5552_s5 + $0x340] sm:$0xff] }
 0x2ba   :  { %v2626_v47 = vadd.f32 %v2625_v6, %v2606_v32  ;;  %v3818_v32 = vld [vmem:[%s5552_s5 + $0x130] sm:$0xff] }
 0x2bb   :  { %v3834_v6 = vld [vmem:[%s5552_s5 + $0x1b0] sm:$0xff]  ;;  %2801 = vmatpush.msra.mxu3 %v3818_v32  ;;  %v3851_v32 = vld [vmem:[%s5552_s5 + $0x238] sm:$0xff] }
 0x2bc   :  { %2628 = vst [vmem:[#allocation2 + $0x3c] sm:$0xf] %v2626_v47  ;;  %v2704_v47 = vld [vmem:[%s5552_s5 + $0x28] sm:$0xff] }
 0x2bd   :  { %2725 = vmatpush.msra.mxu1 %v2704_v47  ;;  %v3883_v47 = vld [vmem:[%s5552_s5 + $0x338] sm:$0xff] }
 0x2c3   :  { %v2637_v7 = vld [vmem:[#allocation2 + $0x38] sm:$0xff] }
 0x2c4   :  { %2650 = vmatpush.msra.mxu0 %v2637_v7  ;;  %v3801_v7 = vld [vmem:[%s5552_s5 + $0xa8] sm:$0xff] }
 0x2c5   :  { %2764 = vmatpush.msra.mxu2 %v3801_v7  ;;  %v3899_v7 = vld [vmem:[%s5552_s5 + $0x3b8] sm:$0xff] }
 0x2c6   :  { %2651 = vmatpush.msra.mxu0 %v2636_v49  ;;  %v2670_v49 = vld [vmem:[%s5550_s3] sm:$0xff] }
 0x2c8   :  { %2652 = vmatpush.msra.mxu0 %v2635_v35 }
 0x2ca   :  { %2653 = vmatpush.msra.mxu0 %v2634_v29  ;;  %v3817_v29 = vld [vmem:[%s5552_s5 + $0x128] sm:$0xff] }
 0x2cb   :  { %2802 = vmatpush.msra.mxu3 %v3817_v29  ;;  %v3882_v29 = vld [vmem:[%s5552_s5 + $0x330] sm:$0xff] }
 0x2cc   :  { %2654 = vmatpush.msra.mxu0 %v2633_v40  ;;  %v3833_v40 = vld [vmem:[%s5552_s5 + $0x1a8] sm:$0xff] }
 0x2ce   :  { %2655 = vmatpush.msra.mxu0 %v2632_v41  ;;  %v2703_v41 = vld [vmem:[%s5552_s5 + $0x20] sm:$0xff] }
 0x2cf   :  { %2726 = vmatpush.msra.mxu1 %v2703_v41  ;;  %v3849_v41 = vld [vmem:[%s5552_s5 + $0x228] sm:$0xff] }
 0x2d0   :  { %2656 = vmatpush.msra.mxu0 %v2631_v54  ;;  %v3800_v54 = vld [vmem:[%s5552_s5 + $0xa0] sm:$0xff] }
 0x2d1   :  { %2765 = vmatpush.msra.mxu2 %v3800_v54  ;;  %v3865_v54 = vld [vmem:[%s5552_s5 + $0x2a8] sm:$0xff] }
 0x2d2   :  { %2657 = vmatpush.msra.mxu0 %v2630_v21  ;;  %v3816_v21 = vld [vmem:[%s5552_s5 + $0x120] sm:$0xff] }
 0x2d3   :  { %3795 = vmatmul.msk.f32.vlgmr.msra.gmra.mxu0 %vm2638_vm0, %v2629_v45  ;;  %2803 = vmatpush.msra.mxu3 %v3816_v21  ;;  %v3897_v21 = vld [vmem:[%s5552_s5 + $0x3a8] sm:$0xff]  ;;  %vm3448_vm0 = vcmask 385280  }
 0x2d4   :  { %2830 = vmatpush.msrb.mxu0 %v3843_v58  ;;  %v2700_v58 = vld [vmem:[%s5552_s5 + $0x8] sm:$0xff] }
 0x2d5   :  { %2804 = vmatpush.msra.mxu3 %v3815_v53  ;;  %v3847_v53 = vld [vmem:[%s5552_s5 + $0x218] sm:$0xff] }
 0x2d6   :  { %2831 = vmatpush.msrb.mxu0 %v3842_v36  ;;  %v2689_v36 = vld [vmem:[%s5551_s4] sm:$0xff]  ;;  %s4238_s4 = smov 32  }
 0x2d7   :  { %2805 = vmatpush.msra.mxu3 %v3814_v57  ;;  %v3846_v57 = vld [vmem:[%s5552_s5 + $0x210] sm:$0xff] }
 0x2d8   :  { %2832 = vmatpush.msrb.mxu0 %v3841_v15  ;;  %v3859_v15 = vld [vmem:[%s5552_s5 + $0x278] sm:$0xff] }
 0x2d9   :  { %2806 = vmatpush.msra.mxu3 %v3813_v62  ;;  %v3845_v62 = vld [vmem:[%s5552_s5 + $0x208] sm:$0xff] }
 0x2da   :  { %2833 = vmatpush.msrb.mxu0 %v3840_v63  ;;  %v3858_v63 = vld [vmem:[%s5552_s5 + $0x270] sm:$0xff] }
 0x2db   :  { %2807 = vmatpush.msra.mxu3 %v3812_v38  ;;  %v3860_v38 = vld [vmem:[%s5552_s5 + $0x280] sm:$0xff] }
 0x2dc   :  { %2834 = vmatpush.msrb.mxu0 %v3839_v20  ;;  %v3857_v20 = vld [vmem:[%s5552_s5 + $0x268] sm:$0xff] }
 0x2dd   :  { %2944 = vmatpush.msrb.mxu3 %v3891_v61 }
 0x2de   :  { %2835 = vmatpush.msrb.mxu0 %v3838_v5  ;;  %v3856_v5 = vld [vmem:[%s5552_s5 + $0x260] sm:$0xff] }
 0x2df   :  { %2945 = vmatpush.msrb.mxu3 %v3890_v0 }
 0x2e0   :  { %2836 = vmatpush.msrb.mxu0 %v3837_v18  ;;  %v3887_v18 = vld [vmem:[%s5552_s5 + $0x358] sm:$0xff] }
 0x2e1   :  { %2946 = vmatpush.msrb.mxu3 %v3889_v37  ;;  %v3922_v37 = vld [vmem:[%s5552_s5 + $0x470] sm:$0xff] }
 0x2e2   :  { %2837 = vmatpush.msrb.mxu0 %v3836_v44  ;;  %v3902_v44 = vld [vmem:[%s5552_s5 + $0x3d0] sm:$0xff] }
 0x2e3   :  { %2947 = vmatpush.msrb.mxu3 %v3888_v13  ;;  %v3921_v13 = vld [vmem:[%s5552_s5 + $0x468] sm:$0xff] }
 0x2e4   :  { %2838 = vmatpush.msrb.mxu0 %v3835_v1  ;;  %v3852_v1 = vld [vmem:[%s5552_s5 + $0x240] sm:$0xff] }
 0x2e5   :  { %2948 = vmatpush.msrb.mxu3 %v3887_v18  ;;  %v3920_v18 = vld [vmem:[%s5552_s5 + $0x460] sm:$0xff] }
 0x2e6   :  { %2839 = vmatpush.msrb.mxu0 %v3834_v6  ;;  %v3867_v6 = vld [vmem:[%s5552_s5 + $0x2b8] sm:$0xff] }
 0x2e7   :  { %2949 = vmatpush.msrb.mxu3 %v3886_v10  ;;  %v3919_v10 = vld [vmem:[%s5552_s5 + $0x458] sm:$0xff] }
 0x2e8   :  { %2840 = vmatpush.msrb.mxu0 %v3833_v40  ;;  %v3898_v40 = vld [vmem:[%s5552_s5 + $0x3b0] sm:$0xff] }
 0x350   :  { %v2659_v46 = vpop.f32.mrf.mxu0 }
 0x351   :  { %2662 = vadd.xlane.f32.xlu0 %v2659_v46 }
 0x3c4   :  { %v2663_v23 = vpop.xlane.xlu0 %2662 }
 0x3c5   :  { %v2664_v51 = vmul.f32 0.0078125, %v2663_v23  ;;  %v3832_v23 = vld [vmem:[%s5552_s5 + $0x1a0] sm:$0xff] }
 0x3c6   :  { %2841 = vmatpush.msrb.mxu0 %v3832_v23  ;;  %v3864_v23 = vld [vmem:[%s5552_s5 + $0x2a0] sm:$0xff] }
 0x3c7   :  { %v4522_v12 = vsub.f32 %v2659_v46, %v2664_v51  ;;  %v2702_v51 = vld [vmem:[%s5552_s5 + $0x18] sm:$0xff] }
 0x3c8   :  { %2727 = vmatpush.msra.mxu1 %v2702_v51  ;;  %v3880_v51 = vld [vmem:[%s5552_s5 + $0x320] sm:$0xff] }
 0x3c9   :  { %v2666_v25 = vmul.f32 %v4522_v12, %v4522_v12 }
 0x3cb   :  { %2667 = vadd.xlane.f32.xlu0 %v2666_v25  ;;  %v3799_v25 = vld [vmem:[%s5552_s5 + $0x98] sm:$0xff] }
 0x3cc   :  { %2766 = vmatpush.msra.mxu2 %v3799_v25  ;;  %v3896_v25 = vld [vmem:[%s5552_s5 + $0x3a0] sm:$0xff] }
 0x3ce   :  { %2767 = vmatpush.msra.mxu2 %v3798_v56  ;;  %v3895_v56 = vld [vmem:[%s5552_s5 + $0x398] sm:$0xff] }
 0x3d0   :  { %2768 = vmatpush.msra.mxu2 %v3797_v33  ;;  %v3894_v33 = vld [vmem:[%s5552_s5 + $0x390] sm:$0xff] }
 0x3d2   :  { %2769 = vmatpush.msra.mxu2 %v3796_v60  ;;  %v3844_v60 = vld [vmem:[%s5552_s5 + $0x200] sm:$0xff] }
 0x3d4   :  { %2906 = vmatpush.msrb.mxu2 %v3875_v50 }
 0x3d6   :  { %2907 = vmatpush.msrb.mxu2 %v3874_v39 }
 0x3d8   :  { %2908 = vmatpush.msrb.mxu2 %v3873_v43  ;;  %v3971_v43 = vld [vmem:[%s5552_s5 + $0x5f8] sm:$0xff] }
 0x43e   :  { %v2668_v8 = vpop.xlane.xlu0 %2667 }
 0x43f   :  { %v2669_v34 = vmul.f32 0.0078125, %v2668_v8  ;;  %v3831_v8 = vld [vmem:[%s5552_s5 + $0x198] sm:$0xff] }
 0x440   :  { %2842 = vmatpush.msrb.mxu0 %v3831_v8  ;;  %v3863_v8 = vld [vmem:[%s5552_s5 + $0x298] sm:$0xff] }
 0x441   :  { %v4544_v19 = vadd.f32 1e-05, %v2669_v34  ;;  %v2701_v34 = vld [vmem:[%s5552_s5 + $0x10] sm:$0xff] }
 0x442   :  { %2728 = vmatpush.msra.mxu1 %v2701_v34  ;;  %2843 = vmatpush.msrb.mxu0 %v3830_v16  ;;  %v3879_v34 = vld [vmem:[%s5552_s5 + $0x318] sm:$0xff]  ;;  %v3862_v16 = vld [vmem:[%s5552_s5 + $0x290] sm:$0xff] }
 0x443   :  { %4068 = vrsqrt.f32 %v4544_v19  ;;  %vm2678_vm2 = vweird.f32 %v4544_v19 }
 0x444   :  { %2729 = vmatpush.msra.mxu1 %v2700_v58  ;;  %v3878_v58 = vld [vmem:[%s5552_s5 + $0x310] sm:$0xff] }
 0x446   :  { %2730 = vmatpush.msra.mxu1 %v2699_v59  ;;  %v3877_v59 = vld [vmem:[%s5552_s5 + $0x308] sm:$0xff] }
 0x448   :  { %2868 = vmatpush.msrb.mxu1 %v3859_v15  ;;  %v3892_v15 = vld [vmem:[%s5552_s5 + $0x380] sm:$0xff] }
 0x449   :  { %v4069_v9 = vpop.eup %4068 }
 0x44a   :  { %v2673_v17 = vmul.f32 %v4069_v9, %v4544_v19  ;;  %vm2679_vm1 = vweird.f32 %v4069_v9  ;;  %v3829_v19 = vld [vmem:[%s5552_s5 + $0x188] sm:$0xff]  ;;  %2869 = vmatpush.msrb.mxu1 %v3858_v63 }
 0x44b   :  { %vm2680_vm3 = vmor %vm2678_vm2, %vm2679_vm1  ;;  %2844 = vmatpush.msrb.mxu0 %v3829_v19  ;;  %v3861_v19 = vld [vmem:[%s5552_s5 + $0x288] sm:$0xff]  ;;  %vm3465_vm1 = vcmask 516480   ;;  %vm3482_vm2 = vcmask 647680  }
 0x44c   :  { %v2674_v24 = vmul.f32 %v4069_v9, %v2673_v17  ;;  %2870 = vmatpush.msrb.mxu1 %v3857_v20  ;;  %v3855_v17 = vld [vmem:[%s5552_s5 + $0x258] sm:$0xff] }
 0x44d   :  { %2845 = vmatpush.msrb.mxu0 %v3828_v22  ;;  %v3876_v22 = vld [vmem:[%s5552_s5 + $0x300] sm:$0xff]  ;;  %v3939_v20 = vld [vmem:[%s5552_s5 + $0x4f8] sm:$0xff] }
 0x44e   :  { %v2675_v48 = vmul.f32 0.5, %v2674_v24  ;;  %2871 = vmatpush.msrb.mxu1 %v3856_v5  ;;  %v3870_v24 = vld [vmem:[%s5552_s5 + $0x2d0] sm:$0xff] }
 0x44f   :  { %2982 = vmatpush.msra.mxu0 %v3907_v14  ;;  %v3954_v5 = vld [vmem:[%s5552_s5 + $0x570] sm:$0xff] }
 0x450   :  { %v2676_v2 = vsub.f32 1.5, %v2675_v48  ;;  %2872 = vmatpush.msrb.mxu1 %v3855_v17  ;;  %v3885_v48 = vld [vmem:[%s5552_s5 + $0x348] sm:$0xff] }
 0x451   :  { %2983 = vmatpush.msra.mxu0 %v3906_v42  ;;  %2950 = vmatpush.msrb.mxu3 %v3885_v48  ;;  %v3923_v42 = vld [vmem:[%s5552_s5 + $0x478] sm:$0xff]  ;;  %v3953_v17 = vld [vmem:[%s5552_s5 + $0x568] sm:$0xff]  ;;  %v3918_v48 = vld [vmem:[%s5552_s5 + $0x450] sm:$0xff] }
 0x452   :  { %v2677_v35 = vmul.f32 %v4069_v9, %v2676_v2  ;;  %2873 = vmatpush.msrb.mxu1 %v3854_v3  ;;  %v3900_v2 = vld [vmem:[%s5552_s5 + $0x3c0] sm:$0xff] }
 0x453   :  { %2984 = vmatpush.msra.mxu0 %v3905_v4  ;;  %2951 = vmatpush.msrb.mxu3 %v3884_v28  ;;  %v3938_v4 = vld [vmem:[%s5552_s5 + $0x4f0] sm:$0xff]  ;;  %v3952_v3 = vld [vmem:[%s5552_s5 + $0x560] sm:$0xff]  ;;  %v3917_v28 = vld [vmem:[%s5552_s5 + $0x448] sm:$0xff] }
 0x454   :  { %v2681_v45 = vsel %vm2680_vm3, %v4069_v9, %v2677_v35  ;;  %v3872_v9 = vld [vmem:[%s5552_s5 + $0x2e0] sm:$0xff]  ;;  %2874 = vmatpush.msrb.mxu1 %v3853_v26  ;;  %v3866_v35 = vld [vmem:[%s5552_s5 + $0x2b0] sm:$0xff]  ;;  %v3951_v26 = vld [vmem:[%s5552_s5 + $0x558] sm:$0xff]  ;;  %vm3499_vm3 = vcmask 778880  }
 0x455   :  { %v2682_v46 = vmul.f32 %v2681_v45, %v2670_v49  ;;  %2909 = vmatpush.msrb.mxu2 %v3872_v9  ;;  %2985 = vmatpush.msra.mxu0 %v3904_v11  ;;  %v3850_v49 = vld [vmem:[%s5552_s5 + $0x230] sm:$0xff]  ;;  %v3881_v45 = vld [vmem:[%s5552_s5 + $0x328] sm:$0xff] }
 0x456   :  { %2875 = vmatpush.msrb.mxu1 %v3852_v1  ;;  %2952 = vmatpush.msrb.mxu3 %v3883_v47  ;;  %v3970_v9 = vld [vmem:[%s5552_s5 + $0x5f0] sm:$0xff]  ;;  %v3937_v11 = vld [vmem:[%s5552_s5 + $0x4e8] sm:$0xff]  ;;  %v3916_v47 = vld [vmem:[%s5552_s5 + $0x440] sm:$0xff] }
 0x457   :  { %2685 = vperm.xlu1 %4064, %v2682_v46   ;;  %2910 = vmatpush.msrb.mxu2 %v3871_v52  ;;  %v3848_v46 = vld [vmem:[%s5552_s5 + $0x220] sm:$0xff]  ;;  %v3969_v52 = vld [vmem:[%s5552_s5 + $0x5e8] sm:$0xff]  ;;  %v3950_v1 = vld [vmem:[%s5552_s5 + $0x550] sm:$0xff] }
 0x458   :  { %2986 = vmatpush.msra.mxu0 %v3903_v55  ;;  %2876 = vmatpush.msrb.mxu1 %v3851_v32  ;;  %v3936_v55 = vld [vmem:[%s5552_s5 + $0x4e0] sm:$0xff]  ;;  %v3949_v32 = vld [vmem:[%s5552_s5 + $0x548] sm:$0xff] }
 0x459   :  { %2911 = vmatpush.msrb.mxu2 %v3870_v24  ;;  %2953 = vmatpush.msrb.mxu3 %v3882_v29  ;;  %v3968_v24 = vld [vmem:[%s5552_s5 + $0x5e0] sm:$0xff]  ;;  %v3915_v29 = vld [vmem:[%s5552_s5 + $0x438] sm:$0xff] }
 0x45a   :  { %2987 = vmatpush.msra.mxu0 %v3902_v44  ;;  %2877 = vmatpush.msrb.mxu1 %v3850_v49  ;;  %v3935_v44 = vld [vmem:[%s5552_s5 + $0x4d8] sm:$0xff]  ;;  %v3948_v49 = vld [vmem:[%s5552_s5 + $0x540] sm:$0xff] }
 0x45b   :  { %2912 = vmatpush.msrb.mxu2 %v3869_v27  ;;  %2954 = vmatpush.msrb.mxu3 %v3881_v45  ;;  %v3967_v27 = vld [vmem:[%s5552_s5 + $0x5d8] sm:$0xff]  ;;  %v3914_v45 = vld [vmem:[%s5552_s5 + $0x430] sm:$0xff] }
 0x45c   :  { %2988 = vmatpush.msra.mxu0 %v3901_v30  ;;  %2878 = vmatpush.msrb.mxu1 %v3849_v41  ;;  %v3934_v30 = vld [vmem:[%s5552_s5 + $0x4d0] sm:$0xff]  ;;  %v3947_v41 = vld [vmem:[%s5552_s5 + $0x538] sm:$0xff] }
 0x45d   :  { %2913 = vmatpush.msrb.mxu2 %v3868_v31  ;;  %2955 = vmatpush.msrb.mxu3 %v3880_v51  ;;  %v3966_v31 = vld [vmem:[%s5552_s5 + $0x5d0] sm:$0xff]  ;;  %v3913_v51 = vld [vmem:[%s5552_s5 + $0x428] sm:$0xff] }
 0x45e   :  { %2989 = vmatpush.msra.mxu0 %v3900_v2  ;;  %2879 = vmatpush.msrb.mxu1 %v3848_v46  ;;  %v3933_v2 = vld [vmem:[%s5552_s5 + $0x4c8] sm:$0xff]  ;;  %v3946_v46 = vld [vmem:[%s5552_s5 + $0x530] sm:$0xff] }
 0x45f   :  { %2692 = vperm.xlu1 %4064, %v2689_v36   ;;  %2914 = vmatpush.msrb.mxu2 %v3867_v6  ;;  %v3893_v36 = vld [vmem:[%s5552_s5 + $0x388] sm:$0xff] }
 0x460   :  { %2990 = vmatpush.msra.mxu0 %v3899_v7  ;;  %2880 = vmatpush.msrb.mxu1 %v3847_v53  ;;  %v3965_v6 = vld [vmem:[%s5552_s5 + $0x5c8] sm:$0xff]  ;;  %v3932_v7 = vld [vmem:[%s5552_s5 + $0x4c0] sm:$0xff] }
 0x461   :  { %2915 = vmatpush.msrb.mxu2 %v3866_v35  ;;  %2956 = vmatpush.msrb.mxu3 %v3879_v34  ;;  %v3964_v35 = vld [vmem:[%s5552_s5 + $0x5c0] sm:$0xff]  ;;  %v3945_v53 = vld [vmem:[%s5552_s5 + $0x528] sm:$0xff] }
 0x462   :  { %2991 = vmatpush.msra.mxu0 %v3898_v40  ;;  %2881 = vmatpush.msrb.mxu1 %v3846_v57  ;;  %v3931_v40 = vld [vmem:[%s5552_s5 + $0x4b8] sm:$0xff]  ;;  %v3912_v34 = vld [vmem:[%s5552_s5 + $0x420] sm:$0xff] }
 0x463   :  { %2916 = vmatpush.msrb.mxu2 %v3865_v54  ;;  %2957 = vmatpush.msrb.mxu3 %v3878_v58  ;;  %v3963_v54 = vld [vmem:[%s5552_s5 + $0x5b8] sm:$0xff]  ;;  %v3944_v57 = vld [vmem:[%s5552_s5 + $0x520] sm:$0xff] }
 0x464   :  { %2992 = vmatpush.msra.mxu0 %v3897_v21  ;;  %2882 = vmatpush.msrb.mxu1 %v3845_v62  ;;  %v3930_v21 = vld [vmem:[%s5552_s5 + $0x4b0] sm:$0xff]  ;;  %v3911_v58 = vld [vmem:[%s5552_s5 + $0x418] sm:$0xff] }
 0x465   :  { %2917 = vmatpush.msrb.mxu2 %v3864_v23  ;;  %2958 = vmatpush.msrb.mxu3 %v3877_v59  ;;  %v3962_v23 = vld [vmem:[%s5552_s5 + $0x5b0] sm:$0xff]  ;;  %v3943_v62 = vld [vmem:[%s5552_s5 + $0x518] sm:$0xff] }
 0x466   :  { %2993 = vmatpush.msra.mxu0 %v3896_v25  ;;  %2883 = vmatpush.msrb.mxu1 %v3844_v60  ;;  %v3929_v25 = vld [vmem:[%s5552_s5 + $0x4a8] sm:$0xff]  ;;  %v3910_v59 = vld [vmem:[%s5552_s5 + $0x410] sm:$0xff] }
 0x467   :  { %2918 = vmatpush.msrb.mxu2 %v3863_v8  ;;  %2959 = vmatpush.msrb.mxu3 %v3876_v22  ;;  %v3961_v8 = vld [vmem:[%s5552_s5 + $0x5a8] sm:$0xff]  ;;  %v3942_v60 = vld [vmem:[%s5552_s5 + $0x510] sm:$0xff] }
 0x468   :  { %2994 = vmatpush.msra.mxu0 %v3895_v56  ;;  %v3928_v56 = vld [vmem:[%s5552_s5 + $0x4a0] sm:$0xff]  ;;  %v3909_v22 = vld [vmem:[%s5552_s5 + $0x408] sm:$0xff] }
 0x469   :  { %2919 = vmatpush.msrb.mxu2 %v3862_v16  ;;  %v3960_v16 = vld [vmem:[%s5552_s5 + $0x5a0] sm:$0xff] }
 0x46a   :  { %2995 = vmatpush.msra.mxu0 %v3894_v33  ;;  %v3927_v33 = vld [vmem:[%s5552_s5 + $0x498] sm:$0xff] }
 0x46b   :  { %2920 = vmatpush.msrb.mxu2 %v3861_v19  ;;  %v3959_v19 = vld [vmem:[%s5552_s5 + $0x598] sm:$0xff] }
 0x46c   :  { %2996 = vmatpush.msra.mxu0 %v3893_v36  ;;  %v3926_v36 = vld [vmem:[%s5552_s5 + $0x490] sm:$0xff] }
 0x46d   :  { %2921 = vmatpush.msrb.mxu2 %v3860_v38  ;;  %v3958_v38 = vld [vmem:[%s5552_s5 + $0x590] sm:$0xff] }
 0x46e   :  { %2997 = vmatpush.msra.mxu0 %v3892_v15  ;;  %v3925_v15 = vld [vmem:[%s5552_s5 + $0x488] sm:$0xff] }
 0x4c9   :  { %v2686_v50 = vpop.permute.xlu1 %2685 }
 0x4ca   :  { %v2688_v61 = vmul.f32 %v2686_v50, %v4522_v12  ;;  %v3955_v12 = vld [vmem:[%s5552_s5 + $0x578] sm:$0xff]  ;;  %v3941_v50 = vld [vmem:[%s5552_s5 + $0x508] sm:$0xff] }
 0x4d1   :  { %v2693_v14 = vpop.permute.xlu1 %2692 }
 0x4d2   :  { %v2695_v63 = vadd.f32 %v2693_v14, %v2688_v61  ;;  %v3957_v61 = vld [vmem:[%s5552_s5 + $0x588] sm:$0xff]  ;;  %v3908_v14 = vld [vmem:[%s5552_s5 + $0x400] sm:$0xff] }
 0x4d4   :  { %vm2696_vm4 = vcmp.ge.f32.partialorder %v2695_v63, 0.0  ;;  %v2697_v39 = vmul.f32 0.2, %v2695_v63 }
 0x4d6   :  { %v4923_v0 = vsel %vm2696_vm4, %v2695_v63, %v2697_v39  ;;  %v3924_v63 = vld [vmem:[%s5552_s5 + $0x480] sm:$0xff]  ;;  %vm3516_vm4 = vcmask 910080  }
 0x4d7   :  { %2731 = vmatmul.f32.vlgmr.msra.gmra.mxu1 %v4923_v0  ;;  %2770 = vmatmul.f32.vlgmr.msra.gmra.mxu2 %v4923_v0  ;;  %v3940_v39 = vld [vmem:[%s5552_s5 + $0x500] sm:$0xff] }
 0x4d8   :  { %2808 = vmatmul.f32.vlgmr.msra.gmra.mxu3 %v4923_v0  ;;  %2846 = vmatmul.f32.vlgmr.msrb.gmra.mxu0 %v4923_v0 }
 0x4d9   :  { %3020 = vmatpush.msra.mxu1 %v3923_v42  ;;  %3058 = vmatpush.msra.mxu2 %v3939_v20  ;;  %v3956_v42 = vld [vmem:[%s5552_s5 + $0x580] sm:$0xff]  ;;  %v3987_v20 = vld [vmem:[%s5552_s5 + $0x678] sm:$0xff] }
 0x4da   :  { %3096 = vmatpush.msra.mxu3 %v3955_v12  ;;  %3134 = vmatpush.msrb.mxu0 %v3971_v43  ;;  %v4003_v12 = vld [vmem:[%s5552_s5 + $0x6f8] sm:$0xff] }
 0x4db   :  { %3021 = vmatpush.msra.mxu1 %v3922_v37  ;;  %3059 = vmatpush.msra.mxu2 %v3938_v4  ;;  %v4019_v43 = vld [vmem:[%s5552_s5 + $0x778] sm:$0xff]  ;;  %v3986_v4 = vld [vmem:[%s5552_s5 + $0x670] sm:$0xff] }
 0x4dc   :  { %3097 = vmatpush.msra.mxu3 %v3954_v5  ;;  %3135 = vmatpush.msrb.mxu0 %v3970_v9  ;;  %v4035_v37 = vld [vmem:[%s5552_s5 + $0x7f8] sm:$0xff]  ;;  %v4002_v5 = vld [vmem:[%s5552_s5 + $0x6f0] sm:$0xff] }
 0x4dd   :  { %3022 = vmatpush.msra.mxu1 %v3921_v13  ;;  %3060 = vmatpush.msra.mxu2 %v3937_v11  ;;  %v4018_v9 = vld [vmem:[%s5552_s5 + $0x770] sm:$0xff]  ;;  %v3985_v11 = vld [vmem:[%s5552_s5 + $0x668] sm:$0xff] }
 0x4de   :  { %3098 = vmatpush.msra.mxu3 %v3953_v17  ;;  %3136 = vmatpush.msrb.mxu0 %v3969_v52  ;;  %v4034_v13 = vld [vmem:[%s5552_s5 + $0x7f0] sm:$0xff]  ;;  %v4001_v17 = vld [vmem:[%s5552_s5 + $0x6e8] sm:$0xff] }
 0x4df   :  { %3023 = vmatpush.msra.mxu1 %v3920_v18  ;;  %3061 = vmatpush.msra.mxu2 %v3936_v55  ;;  %v4017_v52 = vld [vmem:[%s5552_s5 + $0x768] sm:$0xff]  ;;  %v3984_v55 = vld [vmem:[%s5552_s5 + $0x660] sm:$0xff] }
 0x4e0   :  { %3099 = vmatpush.msra.mxu3 %v3952_v3  ;;  %3137 = vmatpush.msrb.mxu0 %v3968_v24  ;;  %v4033_v18 = vld [vmem:[%s5552_s5 + $0x7e8] sm:$0xff]  ;;  %v4000_v3 = vld [vmem:[%s5552_s5 + $0x6e0] sm:$0xff] }
 0x4e1   :  { %2884 = vmatmul.f32.vlgmr.msrb.gmra.mxu1 %v4923_v0  ;;  %2922 = vmatmul.f32.vlgmr.msrb.gmra.mxu2 %v4923_v0  ;;  %v4016_v24 = vld [vmem:[%s5552_s5 + $0x760] sm:$0xff] }
 0x4e2   :  { %2960 = vmatmul.f32.vlgmr.msrb.gmra.mxu3 %v4923_v0  ;;  %2998 = vmatmul.f32.vlgmr.msra.gmra.mxu0 %v4923_v0 }
 0x4e3   :  { %3024 = vmatpush.msra.mxu1 %v3919_v10  ;;  %3062 = vmatpush.msra.mxu2 %v3935_v44  ;;  %v4032_v10 = vld [vmem:[%s5552_s5 + $0x7e0] sm:$0xff]  ;;  %v3983_v44 = vld [vmem:[%s5552_s5 + $0x658] sm:$0xff] }
 0x4e4   :  { %3100 = vmatpush.msra.mxu3 %v3951_v26  ;;  %3138 = vmatpush.msrb.mxu0 %v3967_v27  ;;  %v3999_v26 = vld [vmem:[%s5552_s5 + $0x6d8] sm:$0xff] }
 0x4e5   :  { %3025 = vmatpush.msra.mxu1 %v3918_v48  ;;  %3063 = vmatpush.msra.mxu2 %v3934_v30  ;;  %v4015_v27 = vld [vmem:[%s5552_s5 + $0x758] sm:$0xff]  ;;  %v3982_v30 = vld [vmem:[%s5552_s5 + $0x650] sm:$0xff] }
 0x4e6   :  { %3101 = vmatpush.msra.mxu3 %v3950_v1  ;;  %3139 = vmatpush.msrb.mxu0 %v3966_v31  ;;  %v4031_v48 = vld [vmem:[%s5552_s5 + $0x7d8] sm:$0xff]  ;;  %v3998_v1 = vld [vmem:[%s5552_s5 + $0x6d0] sm:$0xff] }
 0x4e7   :  { %3026 = vmatpush.msra.mxu1 %v3917_v28  ;;  %3064 = vmatpush.msra.mxu2 %v3933_v2  ;;  %v4014_v31 = vld [vmem:[%s5552_s5 + $0x750] sm:$0xff]  ;;  %v3981_v2 = vld [vmem:[%s5552_s5 + $0x648] sm:$0xff] }
 0x4e8   :  { %3102 = vmatpush.msra.mxu3 %v3949_v32  ;;  %3140 = vmatpush.msrb.mxu0 %v3965_v6  ;;  %v4030_v28 = vld [vmem:[%s5552_s5 + $0x7d0] sm:$0xff]  ;;  %v3997_v32 = vld [vmem:[%s5552_s5 + $0x6c8] sm:$0xff] }
 0x4e9   :  { %3027 = vmatpush.msra.mxu1 %v3916_v47  ;;  %3065 = vmatpush.msra.mxu2 %v3932_v7  ;;  %v4013_v6 = vld [vmem:[%s5552_s5 + $0x748] sm:$0xff]  ;;  %v3980_v7 = vld [vmem:[%s5552_s5 + $0x640] sm:$0xff] }
 0x4ea   :  { %3103 = vmatpush.msra.mxu3 %v3948_v49  ;;  %3141 = vmatpush.msrb.mxu0 %v3964_v35  ;;  %v4029_v47 = vld [vmem:[%s5552_s5 + $0x7c8] sm:$0xff]  ;;  %v3996_v49 = vld [vmem:[%s5552_s5 + $0x6c0] sm:$0xff] }
 0x4eb   :  { %3028 = vmatpush.msra.mxu1 %v3915_v29  ;;  %3066 = vmatpush.msra.mxu2 %v3931_v40  ;;  %v4012_v35 = vld [vmem:[%s5552_s5 + $0x740] sm:$0xff]  ;;  %v3979_v40 = vld [vmem:[%s5552_s5 + $0x638] sm:$0xff] }
 0x4ec   :  { %3104 = vmatpush.msra.mxu3 %v3947_v41  ;;  %3142 = vmatpush.msrb.mxu0 %v3963_v54  ;;  %v4028_v29 = vld [vmem:[%s5552_s5 + $0x7c0] sm:$0xff]  ;;  %v3995_v41 = vld [vmem:[%s5552_s5 + $0x6b8] sm:$0xff] }
 0x4ed   :  { %3029 = vmatpush.msra.mxu1 %v3914_v45  ;;  %3067 = vmatpush.msra.mxu2 %v3930_v21  ;;  %v4011_v54 = vld [vmem:[%s5552_s5 + $0x738] sm:$0xff]  ;;  %v3978_v21 = vld [vmem:[%s5552_s5 + $0x630] sm:$0xff] }
 0x4ee   :  { %3105 = vmatpush.msra.mxu3 %v3946_v46  ;;  %3143 = vmatpush.msrb.mxu0 %v3962_v23  ;;  %v4027_v45 = vld [vmem:[%s5552_s5 + $0x7b8] sm:$0xff]  ;;  %v3994_v46 = vld [vmem:[%s5552_s5 + $0x6b0] sm:$0xff] }
 0x4ef   :  { %3030 = vmatpush.msra.mxu1 %v3913_v51  ;;  %3068 = vmatpush.msra.mxu2 %v3929_v25  ;;  %v4010_v23 = vld [vmem:[%s5552_s5 + $0x730] sm:$0xff]  ;;  %v3977_v25 = vld [vmem:[%s5552_s5 + $0x628] sm:$0xff] }
 0x4f0   :  { %3106 = vmatpush.msra.mxu3 %v3945_v53  ;;  %3144 = vmatpush.msrb.mxu0 %v3961_v8  ;;  %v4026_v51 = vld [vmem:[%s5552_s5 + $0x7b0] sm:$0xff]  ;;  %v3993_v53 = vld [vmem:[%s5552_s5 + $0x6a8] sm:$0xff] }
 0x4f1   :  { %3031 = vmatpush.msra.mxu1 %v3912_v34  ;;  %3069 = vmatpush.msra.mxu2 %v3928_v56  ;;  %v4009_v8 = vld [vmem:[%s5552_s5 + $0x728] sm:$0xff]  ;;  %v3976_v56 = vld [vmem:[%s5552_s5 + $0x620] sm:$0xff] }
 0x4f2   :  { %3107 = vmatpush.msra.mxu3 %v3944_v57  ;;  %3145 = vmatpush.msrb.mxu0 %v3960_v16  ;;  %v4025_v34 = vld [vmem:[%s5552_s5 + $0x7a8] sm:$0xff]  ;;  %v3992_v57 = vld [vmem:[%s5552_s5 + $0x6a0] sm:$0xff] }
 0x4f3   :  { %3032 = vmatpush.msra.mxu1 %v3911_v58  ;;  %3070 = vmatpush.msra.mxu2 %v3927_v33  ;;  %v4008_v16 = vld [vmem:[%s5552_s5 + $0x720] sm:$0xff]  ;;  %v3975_v33 = vld [vmem:[%s5552_s5 + $0x618] sm:$0xff] }
 0x4f4   :  { %3108 = vmatpush.msra.mxu3 %v3943_v62  ;;  %3146 = vmatpush.msrb.mxu0 %v3959_v19  ;;  %v4024_v58 = vld [vmem:[%s5552_s5 + $0x7a0] sm:$0xff]  ;;  %v3991_v62 = vld [vmem:[%s5552_s5 + $0x698] sm:$0xff] }
 0x4f5   :  { %3033 = vmatpush.msra.mxu1 %v3910_v59  ;;  %3071 = vmatpush.msra.mxu2 %v3926_v36  ;;  %v4007_v19 = vld [vmem:[%s5552_s5 + $0x718] sm:$0xff]  ;;  %v3974_v36 = vld [vmem:[%s5552_s5 + $0x610] sm:$0xff] }
 0x4f6   :  { %3109 = vmatpush.msra.mxu3 %v3942_v60  ;;  %3147 = vmatpush.msrb.mxu0 %v3958_v38  ;;  %v4023_v59 = vld [vmem:[%s5552_s5 + $0x798] sm:$0xff]  ;;  %v3990_v60 = vld [vmem:[%s5552_s5 + $0x690] sm:$0xff] }
 0x4f7   :  { %3034 = vmatpush.msra.mxu1 %v3909_v22  ;;  %3072 = vmatpush.msra.mxu2 %v3925_v15  ;;  %v4006_v38 = vld [vmem:[%s5552_s5 + $0x710] sm:$0xff]  ;;  %v3973_v15 = vld [vmem:[%s5552_s5 + $0x608] sm:$0xff] }
 0x4f8   :  { %3110 = vmatpush.msra.mxu3 %v3941_v50  ;;  %3148 = vmatpush.msrb.mxu0 %v3957_v61  ;;  %v4022_v22 = vld [vmem:[%s5552_s5 + $0x790] sm:$0xff]  ;;  %v3989_v50 = vld [vmem:[%s5552_s5 + $0x688] sm:$0xff] }
 0x4f9   :  { %3035 = vmatpush.msra.mxu1 %v3908_v14  ;;  %3073 = vmatpush.msra.mxu2 %v3924_v63  ;;  %v4005_v61 = vld [vmem:[%s5552_s5 + $0x708] sm:$0xff]  ;;  %v3972_v63 = vld [vmem:[%s5552_s5 + $0x600] sm:$0xff] }
 0x4fa   :  { %3111 = vmatpush.msra.mxu3 %v3940_v39  ;;  %3149 = vmatpush.msrb.mxu0 %v3956_v42  ;;  %v4021_v14 = vld [vmem:[%s5552_s5 + $0x788] sm:$0xff]  ;;  %v3988_v39 = vld [vmem:[%s5552_s5 + $0x680] sm:$0xff] }
 0x4fb   :  { %3036 = vmatmul.f32.vlgmr.msra.gmra.mxu1 %v4923_v0  ;;  %3074 = vmatmul.f32.vlgmr.msra.gmra.mxu2 %v4923_v0  ;;  %v4004_v42 = vld [vmem:[%s5552_s5 + $0x700] sm:$0xff] }
 0x4fc   :  { %3112 = vmatmul.f32.vlgmr.msra.gmra.mxu3 %v4923_v0  ;;  %3150 = vmatmul.f32.vlgmr.msrb.gmra.mxu0 %v4923_v0 }
 0x4fd   :  { %3172 = vmatpush.msrb.mxu1 %v3987_v20  ;;  %3210 = vmatpush.msrb.mxu2 %v4003_v12  ;;  %v4020_v20 = vld [vmem:[%s5552_s5 + $0x780] sm:$0xff] }
 0x4fe   :  { %3248 = vmatpush.msrb.mxu3 %v4019_v43  ;;  %3286 = vmatpush.msra.mxu0 %v4035_v37 }
 0x4ff   :  { %3173 = vmatpush.msrb.mxu1 %v3986_v4  ;;  %3211 = vmatpush.msrb.mxu2 %v4002_v5 }
 0x500   :  { %3249 = vmatpush.msrb.mxu3 %v4018_v9  ;;  %3287 = vmatpush.msra.mxu0 %v4034_v13 }
 0x501   :  { %3174 = vmatpush.msrb.mxu1 %v3985_v11  ;;  %3212 = vmatpush.msrb.mxu2 %v4001_v17 }
 0x502   :  { %3250 = vmatpush.msrb.mxu3 %v4017_v52  ;;  %3288 = vmatpush.msra.mxu0 %v4033_v18 }
 0x503   :  { %3175 = vmatpush.msrb.mxu1 %v3984_v55  ;;  %3213 = vmatpush.msrb.mxu2 %v4000_v3 }
 0x504   :  { %3251 = vmatpush.msrb.mxu3 %v4016_v24  ;;  %3289 = vmatpush.msra.mxu0 %v4032_v10 }
 0x505   :  { %3176 = vmatpush.msrb.mxu1 %v3983_v44  ;;  %3214 = vmatpush.msrb.mxu2 %v3999_v26 }
 0x506   :  { %3252 = vmatpush.msrb.mxu3 %v4015_v27  ;;  %3290 = vmatpush.msra.mxu0 %v4031_v48 }
 0x507   :  { %3177 = vmatpush.msrb.mxu1 %v3982_v30  ;;  %3215 = vmatpush.msrb.mxu2 %v3998_v1 }
 0x508   :  { %3253 = vmatpush.msrb.mxu3 %v4014_v31  ;;  %3291 = vmatpush.msra.mxu0 %v4030_v28 }
 0x509   :  { %3178 = vmatpush.msrb.mxu1 %v3981_v2  ;;  %3216 = vmatpush.msrb.mxu2 %v3997_v32 }
 0x50a   :  { %3254 = vmatpush.msrb.mxu3 %v4013_v6  ;;  %3292 = vmatpush.msra.mxu0 %v4029_v47 }
 0x50b   :  { %3179 = vmatpush.msrb.mxu1 %v3980_v7  ;;  %3217 = vmatpush.msrb.mxu2 %v3996_v49 }
 0x50c   :  { %3255 = vmatpush.msrb.mxu3 %v4012_v35  ;;  %3293 = vmatpush.msra.mxu0 %v4028_v29  ;;  %v3307_v29 = vld [vmem:[#allocation10] sm:$0xff] }
 0x50d   :  { %3180 = vmatpush.msrb.mxu1 %v3979_v40  ;;  %3218 = vmatpush.msrb.mxu2 %v3995_v41  ;;  %v3308_v41 = vld [vmem:[#allocation10 + $0x8] sm:$0xff] }
 0x50e   :  { %3256 = vmatpush.msrb.mxu3 %v4011_v54  ;;  %3294 = vmatpush.msra.mxu0 %v4027_v45 }
 0x50f   :  { %3181 = vmatpush.msrb.mxu1 %v3978_v21  ;;  %3219 = vmatpush.msrb.mxu2 %v3994_v46 }
 0x510   :  { %3257 = vmatpush.msrb.mxu3 %v4010_v23  ;;  %3295 = vmatpush.msra.mxu0 %v4026_v51 }
 0x511   :  { %3182 = vmatpush.msrb.mxu1 %v3977_v25  ;;  %3220 = vmatpush.msrb.mxu2 %v3993_v53 }
 0x512   :  { %3258 = vmatpush.msrb.mxu3 %v4009_v8  ;;  %3296 = vmatpush.msra.mxu0 %v4025_v34 }
 0x513   :  { %3183 = vmatpush.msrb.mxu1 %v3976_v56  ;;  %3221 = vmatpush.msrb.mxu2 %v3992_v57 }
 0x514   :  { %3259 = vmatpush.msrb.mxu3 %v4008_v16  ;;  %3297 = vmatpush.msra.mxu0 %v4024_v58 }
 0x515   :  { %3184 = vmatpush.msrb.mxu1 %v3975_v33  ;;  %3222 = vmatpush.msrb.mxu2 %v3991_v62 }
 0x516   :  { %3260 = vmatpush.msrb.mxu3 %v4007_v19  ;;  %3298 = vmatpush.msra.mxu0 %v4023_v59  ;;  %v3407_v19 = vld [vmem:[%s5555_s8 + $0x8] sm:$0xff]  ;;  %v3406_v59 = vld [vmem:[%s5555_s8] sm:$0xff] }
 0x517   :  { %3185 = vmatpush.msrb.mxu1 %v3974_v36  ;;  %3223 = vmatpush.msrb.mxu2 %v3990_v60 }
 0x518   :  { %3261 = vmatpush.msrb.mxu3 %v4006_v38  ;;  %3299 = vmatpush.msra.mxu0 %v4022_v22 }
 0x519   :  { %3186 = vmatpush.msrb.mxu1 %v3973_v15  ;;  %3224 = vmatpush.msrb.mxu2 %v3989_v50 }
 0x51a   :  { %3262 = vmatpush.msrb.mxu3 %v4005_v61  ;;  %3300 = vmatpush.msra.mxu0 %v4021_v14 }
 0x51b   :  { %3187 = vmatpush.msrb.mxu1 %v3972_v63  ;;  %3225 = vmatpush.msrb.mxu2 %v3988_v39 }
 0x51c   :  { %3263 = vmatpush.msrb.mxu3 %v4004_v42  ;;  %3301 = vmatpush.msra.mxu0 %v4020_v20  ;;  %v3368_v20 = vld [vmem:[%s5554_s7] sm:$0xff] }
 0x51d   :  { %3188 = vmatmul.f32.vlgmr.msrb.gmra.mxu1 %v4923_v0  ;;  %3226 = vmatmul.f32.vlgmr.msrb.gmra.mxu2 %v4923_v0 }
 0x51e   :  { %3264 = vmatmul.f32.vlgmr.msrb.gmra.mxu3 %v4923_v0  ;;  %3302 = vmatmul.f32.vlgmr.msra.gmra.mxu0 %v4923_v0 }
 0x554   :  { %v2732_v12 = vpop.f32.mrf.mxu1 }
 0x555   :  { %2736 = vst.msk [vmem:[#allocation3] sm:$0xff] %vm2735_vm5, %v2732_v12  ;;  %v2847_v43 = vpop.f32.mrf.mxu0 }
 0x556   :  { %2850 = vst.msk [vmem:[#allocation3 + $0x18] sm:$0xff] %vm2735_vm5, %v2847_v43 }
 0x55a   :  { %v2771_v37 = vpop.f32.mrf.mxu2 }
 0x55b   :  { %2774 = vst.msk [vmem:[#allocation3 + $0x8] sm:$0xff] %vm2735_vm5, %v2771_v37  ;;  %v2809_v4 = vpop.f32.mrf.mxu3 }
 0x55c   :  { %2812 = vst.msk [vmem:[#allocation3 + $0x10] sm:$0xff] %vm2735_vm5, %v2809_v4  ;;  %v3309_v40 = vld [vmem:[#allocation3] sm:$0xff] }
 0x55d   :  { %v3312_v7 = vld [vmem:[#allocation3 + $0x18] sm:$0xff] }
 0x55e   :  { %v2885_v5 = vpop.f32.mrf.mxu1 }
 0x55f   :  { %2888 = vst.msk [vmem:[#allocation3 + $0x20] sm:$0xff] %vm2735_vm5, %v2885_v5  ;;  %v2999_v9 = vpop.f32.mrf.mxu0 }
 0x560   :  { %3002 = vst.msk [vmem:[#allocation3 + $0x38] sm:$0xff] %vm2735_vm5, %v2999_v9 }
 0x562   :  { %v3310_v35 = vld [vmem:[#allocation3 + $0x8] sm:$0xff] }
 0x563   :  { %v3311_v49 = vld [vmem:[#allocation3 + $0x10] sm:$0xff] }
 0x564   :  { %v2923_v0 = vpop.f32.mrf.mxu2 }
 0x565   :  { %2926 = vst.msk [vmem:[#allocation3 + $0x28] sm:$0xff] %vm2735_vm5, %v2923_v0  ;;  %v2961_v13 = vpop.f32.mrf.mxu3  ;;  %v3369_v0 = vld [vmem:[%s5554_s7 + $0x8] sm:$0xff]  ;;  %s4237_s7 = smov 16  }
 0x566   :  { %2964 = vst.msk [vmem:[#allocation3 + $0x30] sm:$0xff] %vm2735_vm5, %v2961_v13  ;;  %v3313_v47 = vld [vmem:[#allocation3 + $0x20] sm:$0xff] }
 0x567   :  { %v3316_v2 = vld [vmem:[#allocation3 + $0x38] sm:$0xff] }
 0x56c   :  { %v3314_v6 = vld [vmem:[#allocation3 + $0x28] sm:$0xff] }
 0x56d   :  { %v3315_v32 = vld [vmem:[#allocation3 + $0x30] sm:$0xff] }
 0x578   :  { %v3037_v11 = vpop.f32.mrf.mxu1 }
 0x579   :  { %3040 = vst.msk [vmem:[#allocation3 + $0x40] sm:$0xff] %vm2735_vm5, %v3037_v11  ;;  %v3151_v17 = vpop.f32.mrf.mxu0 }
 0x57a   :  { %3154 = vst.msk [vmem:[#allocation3 + $0x58] sm:$0xff] %vm2735_vm5, %v3151_v17 }
 0x57e   :  { %v3075_v52 = vpop.f32.mrf.mxu2 }
 0x57f   :  { %3078 = vst.msk [vmem:[#allocation3 + $0x48] sm:$0xff] %vm2735_vm5, %v3075_v52  ;;  %v3113_v18 = vpop.f32.mrf.mxu3 }
 0x580   :  { %3116 = vst.msk [vmem:[#allocation3 + $0x50] sm:$0xff] %vm2735_vm5, %v3113_v18  ;;  %v3317_v28 = vld [vmem:[#allocation3 + $0x40] sm:$0xff] }
 0x581   :  { %v3320_v30 = vld [vmem:[#allocation3 + $0x58] sm:$0xff] }
 0x586   :  { %v3318_v31 = vld [vmem:[#allocation3 + $0x48] sm:$0xff] }
 0x587   :  { %v3319_v1 = vld [vmem:[#allocation3 + $0x50] sm:$0xff] }
 0x59a   :  { %v3189_v55 = vpop.f32.mrf.mxu1 }
 0x59b   :  { %3192 = vst.msk [vmem:[#allocation3 + $0x60] sm:$0xff] %vm2735_vm5, %v3189_v55  ;;  %v3303_v3 = vpop.f32.mrf.mxu0 }
 0x59c   :  { %3306 = vst.msk [vmem:[#allocation3 + $0x78] sm:$0xff] %vm2735_vm5, %v3303_v3 }
 0x5a0   :  { %v3227_v24 = vpop.f32.mrf.mxu2 }
 0x5a1   :  { %3230 = vst.msk [vmem:[#allocation3 + $0x68] sm:$0xff] %vm2735_vm5, %v3227_v24  ;;  %v3265_v10 = vpop.f32.mrf.mxu3 }
 0x5a2   :  { %3268 = vst.msk [vmem:[#allocation3 + $0x70] sm:$0xff] %vm2735_vm5, %v3265_v10  ;;  %v3321_v48 = vld [vmem:[#allocation3 + $0x60] sm:$0xff] }
 0x5a3   :  { %v3324_v44 = vld [vmem:[#allocation3 + $0x78] sm:$0xff] }
 0x5a4   :  { %3325 = vmatpush.msra.mxu1 %v3324_v44 }
 0x5a8   :  { %v3322_v27 = vld [vmem:[#allocation3 + $0x68] sm:$0xff] }
 0x5a9   :  { %v3323_v26 = vld [vmem:[#allocation3 + $0x70] sm:$0xff] }
 0x5aa   :  { %3326 = vmatpush.msra.mxu1 %v3323_v26 }
 0x5ac   :  { %3327 = vmatpush.msra.mxu1 %v3322_v27 }
 0x5ae   :  { %3328 = vmatpush.msra.mxu1 %v3321_v48 }
 0x5b0   :  { %3329 = vmatpush.msra.mxu1 %v3320_v30 }
 0x5b2   :  { %3330 = vmatpush.msra.mxu1 %v3319_v1 }
 0x5b4   :  { %3331 = vmatpush.msra.mxu1 %v3318_v31 }
 0x5b6   :  { %3332 = vmatpush.msra.mxu1 %v3317_v28 }
 0x5b8   :  { %3333 = vmatpush.msra.mxu1 %v3316_v2 }
 0x5ba   :  { %3334 = vmatpush.msra.mxu1 %v3315_v32 }
 0x5bc   :  { %3335 = vmatpush.msra.mxu1 %v3314_v6 }
 0x5be   :  { %3336 = vmatpush.msra.mxu1 %v3313_v47 }
 0x5c0   :  { %3337 = vmatpush.msra.mxu1 %v3312_v7 }
 0x5c2   :  { %3338 = vmatpush.msra.mxu1 %v3311_v49 }
 0x5c4   :  { %3339 = vmatpush.msra.mxu1 %v3310_v35 }
 0x5c6   :  { %3340 = vmatpush.msra.mxu1 %v3309_v40 }
 0x5c7   :  { %3341 = vmatmul.f32.vlgmr.msra.gmra.mxu1 %v3307_v29 }
 0x5cf   :  { %3344 = vmatmul.f32.gmra.mxu1 %v3308_v41 }
 0x644   :  { %v3342_v54 = vpop.f32.mrf.mxu1 }
 0x645   :  { %v3348_v45 = vsel %vm2735_vm5, %v3342_v54, 0.0 }
 0x646   :  { %3349 = vadd.xlane.f32.xlu2 %v3348_v45 }
 0x64c   :  { %v3345_v21 = vpop.f32.mrf.mxu1 }
 0x64d   :  { %v3351_v46 = vsel %vm2735_vm5, %v3345_v21, 0.0 }
 0x64e   :  { %3352 = vadd.xlane.f32.xlu0 %v3351_v46 }
 0x6b9   :  { %v3350_v23 = vpop.xlane.xlu2 %3349 }
 0x6ba   :  { %v3354_v51 = vmul.f32 0.03125, %v3350_v23 }
 0x6bc   :  { %v3356_v25 = vsub.f32 %v3342_v54, %v3354_v51 }
 0x6be   :  { %v3358_v53 = vmul.f32 %v3356_v25, %v3356_v25 }
 0x6c0   :  { %v3360_v8 = vsel %vm2735_vm5, %v3358_v53, 0.0 }
 0x6c1   :  { %3361 = vadd.xlane.f32.xlu2 %v3360_v8  ;;  %v3353_v34 = vpop.xlane.xlu0 %3352 }
 0x6c2   :  { %v3355_v56 = vmul.f32 0.03125, %v3353_v34 }
 0x6c4   :  { %v3357_v57 = vsub.f32 %v3345_v21, %v3355_v56 }
 0x6c6   :  { %v3359_v16 = vmul.f32 %v3357_v57, %v3357_v57 }
 0x6c8   :  { %v3363_v58 = vsel %vm2735_vm5, %v3359_v16, 0.0  ;;  %vm3533_vm5 = vcmask 1041280  }
 0x6c9   :  { %3364 = vadd.xlane.f32.xlu0 %v3363_v58 }
 0x6d9   :  { %3410 = vperm.xlu2 %4065, %v3406_v59  }
 0x6dd   :  { %3415 = vperm.xlu0 %4066, %v3407_v19  }
 0x734   :  { %v3362_v33 = vpop.xlane.xlu2 %3361 }
 0x735   :  { %v3366_v62 = vmul.f32 0.03125, %v3362_v33 }
 0x737   :  { %v3370_v36 = vadd.f32 1e-05, %v3366_v62 }
 0x739   :  { %4070 = vrsqrt.f32 %v3370_v36  ;;  %vm3378_vm7 = vweird.f32 %v3370_v36 }
 0x73c   :  { %v3365_v60 = vpop.xlane.xlu0 %3364  ;;  %v3411_v18 = vpop.permute.xlu2 %3410 }
 0x73d   :  { %v3367_v38 = vmul.f32 0.03125, %v3365_v60 }
 0x73f   :  { %v4071_v22 = vpop.eup %4070  ;;  %v3371_v15 = vadd.f32 1e-05, %v3367_v38 }
 0x740   :  { %v3373_v50 = vmul.f32 %v4071_v22, %v3370_v36  ;;  %vm3379_vm6 = vweird.f32 %v4071_v22 }
 0x741   :  { %4072 = vrsqrt.f32 %v3371_v15  ;;  %vm3380_vm8 = vmor %vm3378_vm7, %vm3379_vm6  ;;  %vm3388_vm10 = vweird.f32 %v3371_v15  ;;  %vm3733_vm6 = vcmask 254976  }
 0x742   :  { %v3374_v61 = vmul.f32 %v4071_v22, %v3373_v50 }
 0x744   :  { %v3375_v14 = vmul.f32 0.5, %v3374_v61 }
 0x746   :  { %v3376_v63 = vsub.f32 1.5, %v3375_v14 }
 0x747   :  { %v4073_v39 = vpop.eup %4072 }
 0x748   :  { %v3383_v42 = vmul.f32 %v4073_v39, %v3371_v15  ;;  %v3377_v12 = vmul.f32 %v4071_v22, %v3376_v63  ;;  %vm3389_vm9 = vweird.f32 %v4073_v39 }
 0x749   :  { %vm3390_vm11 = vmor %vm3388_vm10, %vm3389_vm9 }
 0x74a   :  { %v3384_v43 = vmul.f32 %v4073_v39, %v3383_v42  ;;  %v3381_v37 = vsel %vm3380_vm8, %v4071_v22, %v3377_v12 }
 0x74b   :  { %v3392_v4 = vmul.f32 %v3381_v37, %v3368_v20 }
 0x74c   :  { %v3385_v5 = vmul.f32 0.5, %v3384_v43 }
 0x74d   :  { %3396 = vperm.xlu1 %4064, %v3392_v4  }
 0x74e   :  { %v3386_v9 = vsub.f32 1.5, %v3385_v5 }
 0x74f   :  { %v3416_v26 = vpop.permute.xlu0 %3415 }
 0x750   :  { %v3387_v13 = vmul.f32 %v4073_v39, %v3386_v9 }
 0x752   :  { %v3391_v11 = vsel %vm3390_vm11, %v4073_v39, %v3387_v13 }
 0x753   :  { %v3393_v17 = vmul.f32 %v3391_v11, %v3369_v0 }
 0x755   :  { %3401 = vperm.xlu1 %4064, %v3393_v17  }
 0x7bf   :  { %v3397_v52 = vpop.permute.xlu1 %3396 }
 0x7c0   :  { %v3404_v55 = vmul.f32 %v3397_v52, %v3356_v25 }
 0x7c2   :  { %v3418_v3 = vadd.f32 %v3411_v18, %v3404_v55 }
 0x7c4   :  { %vm3420_vm12 = vcmp.ge.f32.partialorder %v3418_v3, 0.0  ;;  %v3422_v24 = vmul.f32 0.2, %v3418_v3 }
 0x7c6   :  { %v3424_v10 = vsel %vm3420_vm12, %v3418_v3, %v3422_v24 }
 0x7c7   :  { %3442 = vst.sshfl [vmem:[#allocation1] sm:$0xff pattern:$0x73625140] %v3424_v10  ;;  %3429 = vrot.lane.b32.xlu1 %v3424_v10, %s4236_s19  ;;  %v3402_v44 = vpop.permute.xlu1 %3401  ;;  %v3433_v27 = vrot.slane %v3424_v10, 7 }
 0x7c8   :  { %v3405_v48 = vmul.f32 %v3402_v44, %v3357_v57  ;;  %3427 = vst.msk [vmem:[#allocation4] sm:$0x1] %vm3426_vm13, %v3424_v10 }
 0x7c9   :  { %v5359_v30 = vrot.slane %v3433_v27, 2 }
 0x7ca   :  { %v3419_v1 = vadd.f32 %v3416_v26, %v3405_v48  ;;  %v3670_v48 = vld [vmem:[%s5556_s9 + $0x78] sm:$0xff] }
 0x7cb   :  { %3435 = vrot.lane.b32.xlu2 %v5359_v30, %s4237_s7  ;;  %3693 = vmatpush.msra.mxu2 %v3670_v48 }
 0x7cc   :  { %vm3421_vm14 = vcmp.ge.f32.partialorder %v3419_v1, 0.0  ;;  %v3423_v31 = vmul.f32 0.2, %v3419_v1 }
 0x7ce   :  { %v3444_v28 = vld [vmem:[#allocation1 + $0x1] ss:$4 sm:$0xff]  ;;  %v5363_v2 = vsel %vm3421_vm14, %v3419_v1, %v3423_v31 }
 0x7cf   :  { %3450 = vst.sshfl [vmem:[#allocation1] sm:$0xff pattern:$0x73625140] %v3424_v10  ;;  %3546 = vrot.lane.b32.xlu1 %v5363_v2, %s4236_s19  ;;  %v3550_v32 = vrot.slane %v5363_v2, 7  ;;  %v3669_v1 = vld [vmem:[%s5556_s9 + $0x70] sm:$0xff] }
 0x7d0   :  { %3544 = vst.msk [vmem:[#allocation4 + $0x2] sm:$0x1] %vm3426_vm13, %v5363_v2  ;;  %v3685_v31 = vld [vmem:[%s5556_s9 + $0xf0] sm:$0xff]  ;;  %3694 = vmatpush.msra.mxu2 %v3669_v1 }
 0x7d1   :  { %v5371_v6 = vrot.slane %v3550_v32, 2  ;;  %v3667_v32 = vld [vmem:[%s5556_s9 + $0x60] sm:$0xff] }
 0x7d3   :  { %3445 = vrot.lane.b32.xlu2 %v3444_v28, %s4238_s4  ;;  %v3668_v28 = vld [vmem:[%s5556_s9 + $0x68] sm:$0xff] }
 0x7d4   :  { %3695 = vmatpush.msra.mxu2 %v3668_v28 }
 0x7d6   :  { %v3452_v47 = vld [vmem:[#allocation1 + $0x1] ss:$4 sm:$0xff]  ;;  %3696 = vmatpush.msra.mxu2 %v3667_v32 }
 0x7d7   :  { %3457 = vst.sshfl [vmem:[#allocation1] sm:$0xff pattern:$0x73625140] %v3424_v10  ;;  %3552 = vrot.lane.b32.xlu1 %v5371_v6, %s4237_s7 }
 0x7de   :  { %v3459_v7 = vld [vmem:[#allocation1 + $0x1] ss:$4 sm:$0xff] }
 0x7df   :  { %3467 = vst.sshfl [vmem:[#allocation1] sm:$0xff pattern:$0x73625140] %v3424_v10  ;;  %3453 = vrot.lane.b32.xlu1 %v3452_v47, %s4237_s7  ;;  %v4036_v49 = vrot.slane %v3459_v7, 9  ;;  %v3666_v47 = vld [vmem:[%s5556_s9 + $0x58] sm:$0xff] }
 0x7e0   :  { %v3682_v7 = vld [vmem:[%s5556_s9 + $0xd8] sm:$0xff]  ;;  %3697 = vmatpush.msra.mxu2 %v3666_v47 }
 0x7e1   :  { %3462 = vrot.lane.b32.xlu2 %v4036_v49, %s4239_s20 }
 0x7e6   :  { %v3469_v35 = vld [vmem:[#allocation1 + $0x1] ss:$4 sm:$0xff] }
 0x7e7   :  { %3476 = vst.sshfl [vmem:[#allocation1] sm:$0xff pattern:$0x73625140] %v3424_v10  ;;  %v4037_v29 = vrot.slane %v3469_v35, 9  ;;  %v3665_v35 = vld [vmem:[%s5556_s9 + $0x50] sm:$0xff] }
 0x7e8   :  { %3698 = vmatpush.msra.mxu2 %v3665_v35 }
 0x7e9   :  { %3472 = vrot.lane.b32.xlu0 %v4037_v29, %s4238_s4  ;;  %v3681_v29 = vld [vmem:[%s5556_s9 + $0xd0] sm:$0xff] }
 0x7ee   :  { %v3478_v40 = vld [vmem:[#allocation1 + $0x2] ss:$4 sm:$0xff] }
 0x7ef   :  { %3484 = vst.sshfl [vmem:[#allocation1] sm:$0xff pattern:$0x73625140] %v3424_v10 }
 0x7f1   :  { %3479 = vrot.lane.b32.xlu0 %v3478_v40, %s4240_s10  ;;  %v3664_v40 = vld [vmem:[%s5556_s9 + $0x48] sm:$0xff] }
 0x7f2   :  { %3699 = vmatpush.msra.mxu2 %v3664_v40 }
 0x7f6   :  { %v3486_v41 = vld [vmem:[#allocation1 + $0x2] ss:$4 sm:$0xff] }
 0x7f7   :  { %3491 = vst.sshfl [vmem:[#allocation1] sm:$0xff pattern:$0x73625140] %v3424_v10  ;;  %3487 = vrot.lane.b32.xlu1 %v3486_v41, %s4239_s20  ;;  %v3680_v41 = vld [vmem:[%s5556_s9 + $0xc8] sm:$0xff] }
 0x7fe   :  { %v3493_v54 = vld [vmem:[#allocation1 + $0x2] ss:$4 sm:$0xff] }
 0x7ff   :  { %3501 = vst.sshfl [vmem:[#allocation1] sm:$0xff pattern:$0x73625140] %v3424_v10  ;;  %v4038_v45 = vrot.slane %v3493_v54, 9  ;;  %v3663_v54 = vld [vmem:[%s5556_s9 + $0x40] sm:$0xff] }
 0x800   :  { %3700 = vmatpush.msra.mxu2 %v3663_v54 }
 0x801   :  { %3496 = vrot.lane.b32.xlu1 %v4038_v45, %s4241_s21  ;;  %v3679_v45 = vld [vmem:[%s5556_s9 + $0xc0] sm:$0xff] }
 0x806   :  { %v3503_v21 = vld [vmem:[#allocation1 + $0x2] ss:$4 sm:$0xff] }
 0x807   :  { %3510 = vst.sshfl [vmem:[#allocation1] sm:$0xff pattern:$0x73625140] %v3424_v10  ;;  %v4039_v46 = vrot.slane %v3503_v21, 9 }
 0x809   :  { %3506 = vrot.lane.b32.xlu2 %v4039_v46, %s4240_s10 }
 0x80e   :  { %v3512_v23 = vld [vmem:[#allocation1 + $0x3] ss:$4 sm:$0xff] }
 0x80f   :  { %3518 = vst.sshfl [vmem:[#allocation1] sm:$0xff pattern:$0x73625140] %v3424_v10 }
 0x811   :  { %3513 = vrot.lane.b32.xlu2 %v3512_v23, %s4242_s22  ;;  %v3662_v23 = vld [vmem:[%s5556_s9 + $0x38] sm:$0xff] }
 0x812   :  { %3701 = vmatpush.msra.mxu2 %v3662_v23 }
 0x816   :  { %v3520_v51 = vld [vmem:[#allocation1 + $0x3] ss:$4 sm:$0xff] }
 0x817   :  { %3521 = vrot.lane.b32.xlu0 %v3520_v51, %s4241_s21  ;;  %3525 = vst.sshfl [vmem:[#allocation1] sm:$0xff pattern:$0x73625140] %v3424_v10  ;;  %v3678_v51 = vld [vmem:[%s5556_s9 + $0xb8] sm:$0xff] }
 0x81e   :  { %v3527_v25 = vld [vmem:[#allocation1 + $0x3] ss:$4 sm:$0xff] }
 0x81f   :  { %v4040_v53 = vrot.slane %v3527_v25, 9  ;;  %3535 = vst.sshfl [vmem:[#allocation1] sm:$0xff pattern:$0x73625140] %v3424_v10  ;;  %v3661_v25 = vld [vmem:[%s5556_s9 + $0x30] sm:$0xff] }
 0x820   :  { %3702 = vmatpush.msra.mxu2 %v3661_v25 }
 0x821   :  { %3530 = vrot.lane.b32.xlu0 %v4040_v53, %s4236_s19  ;;  %v3677_v53 = vld [vmem:[%s5556_s9 + $0xb0] sm:$0xff] }
 0x825   :  { %v3436_v8 = vpop.permute.xlu2 %3435 }
 0x826   :  { %3439 = vst.msk [vmem:[#allocation4] sm:$0x1] %vm3438_vm15, %v3436_v8  ;;  %v5386_v34 = vld [vmem:[#allocation1 + $0x3] ss:$4 sm:$0xff] }
 0x827   :  { %3558 = vst.sshfl [vmem:[#allocation1] sm:$0xff pattern:$0x73625140] %v5363_v2  ;;  %v4041_v0 = vrot.slane %v5386_v34, 9  ;;  %v3660_v8 = vld [vmem:[%s5556_s9 + $0x28] sm:$0xff] }
 0x828   :  { %v3676_v34 = vld [vmem:[%s5556_s9 + $0xa8] sm:$0xff]  ;;  %3703 = vmatpush.msra.mxu2 %v3660_v8 }
 0x82d   :  { %v3446_v56 = vpop.permute.xlu2 %3445 }
 0x82e   :  { %3449 = vst.msk [vmem:[#allocation4] sm:$0x1] %vm3448_vm0, %v3446_v56  ;;  %v3560_v57 = vld [vmem:[#allocation1 + $0x1] ss:$4 sm:$0xff] }
 0x82f   :  { %3561 = vrot.lane.b32.xlu2 %v3560_v57, %s4238_s4  ;;  %3565 = vst.sshfl [vmem:[#allocation1] sm:$0xff pattern:$0x73625140] %v5363_v2  ;;  %v3659_v57 = vld [vmem:[%s5556_s9 + $0x20] sm:$0xff] }
 0x830   :  { %3704 = vmatpush.msra.mxu2 %v3659_v57 }
 0x836   :  { %v3567_v16 = vld [vmem:[#allocation1 + $0x1] ss:$4 sm:$0xff] }
 0x837   :  { %3568 = vrot.lane.b32.xlu1 %v3567_v16, %s4237_s7  ;;  %3572 = vst.sshfl [vmem:[#allocation1] sm:$0xff pattern:$0x73625140] %v5363_v2  ;;  %v3675_v16 = vld [vmem:[%s5556_s9 + $0xa0] sm:$0xff] }
 0x839   :  { %v3430_v58 = vpop.permute.xlu1 %3429 }
 0x83a   :  { %3432 = vst.msk [vmem:[#allocation4 + $0x1] sm:$0x1] %vm3426_vm13, %v3430_v58 }
 0x83b   :  { %3441 = vst.msk [vmem:[#allocation4 + $0x1] sm:$0x1] %vm3438_vm15, %v5359_v30  ;;  %v3463_v33 = vpop.permute.xlu2 %3462  ;;  %v3686_v30 = vld [vmem:[%s5556_s9 + $0xf8] sm:$0xff] }
 0x83c   :  { %3466 = vst.msk [vmem:[#allocation4] sm:$0x1] %vm3465_vm1, %v3463_v33  ;;  %3713 = vmatpush.msra.mxu3 %v3686_v30  ;;  %v3658_v33 = vld [vmem:[%s5556_s9 + $0x18] sm:$0xff] }
 0x83d   :  { %3705 = vmatpush.msra.mxu2 %v3658_v33 }
 0x83e   :  { %v3574_v62 = vld [vmem:[#allocation1 + $0x1] ss:$4 sm:$0xff]  ;;  %3714 = vmatpush.msra.mxu3 %v3685_v31 }
 0x83f   :  { %v4042_v19 = vrot.slane %v3574_v62, 9  ;;  %3581 = vst.sshfl [vmem:[#allocation1] sm:$0xff pattern:$0x73625140] %v5363_v2  ;;  %v3674_v62 = vld [vmem:[%s5556_s9 + $0x98] sm:$0xff] }
 0x841   :  { %v3547_v59 = vpop.permute.xlu1 %3546  ;;  %3577 = vrot.lane.b32.xlu1 %v4042_v19, %s4239_s20  ;;  %v3657_v19 = vld [vmem:[%s5556_s9 + $0x10] sm:$0xff] }
 0x842   :  { %3549 = vst.msk [vmem:[#allocation4 + $0x3] sm:$0x1] %vm3426_vm13, %v3547_v59  ;;  %v3673_v59 = vld [vmem:[%s5556_s9 + $0x90] sm:$0xff]  ;;  %3706 = vmatpush.msra.mxu2 %v3657_v19 }
 0x843   :  { %3557 = vst.msk [vmem:[#allocation4 + $0x3] sm:$0x1] %vm3438_vm15, %v5371_v6  ;;  %v3683_v6 = vld [vmem:[%s5556_s9 + $0xe0] sm:$0xff] }
 0x846   :  { %v3583_v36 = vld [vmem:[#allocation1 + $0x1] ss:$4 sm:$0xff] }
 0x847   :  { %v4043_v60 = vrot.slane %v3583_v36, 9  ;;  %3590 = vst.sshfl [vmem:[#allocation1] sm:$0xff pattern:$0x73625140] %v5363_v2  ;;  %v3656_v36 = vld [vmem:[%s5556_s9 + $0x8] sm:$0xff] }
 0x848   :  { %3707 = vmatpush.msra.mxu2 %v3656_v36 }
 0x849   :  { %3586 = vrot.lane.b32.xlu2 %v4043_v60, %s4238_s4  ;;  %v3553_v38 = vpop.permute.xlu1 %3552  ;;  %v3672_v60 = vld [vmem:[%s5556_s9 + $0x88] sm:$0xff] }
 0x84a   :  { %3555 = vst.msk [vmem:[#allocation4 + $0x2] sm:$0x1] %vm3438_vm15, %v3553_v38  ;;  %v3655_v38 = vld [vmem:[%s5556_s9] sm:$0xff] }
 0x84b   :  { %3708 = vmatpush.msra.mxu2 %v3655_v38 }
 0x84e   :  { %v3592_v22 = vld [vmem:[#allocation1 + $0x2] ss:$4 sm:$0xff] }
 0x84f   :  { %3597 = vst.sshfl [vmem:[#allocation1] sm:$0xff pattern:$0x73625140] %v5363_v2 }
 0x851   :  { %3593 = vrot.lane.b32.xlu2 %v3592_v22, %s4240_s10  ;;  %v3454_v15 = vpop.permute.xlu1 %3453  ;;  %v3671_v22 = vld [vmem:[%s5556_s9 + $0x80] sm:$0xff] }
 0x852   :  { %3456 = vst.msk [vmem:[#allocation4 + $0x1] sm:$0x1] %vm3448_vm0, %v3454_v15 }
 0x856   :  { %v3599_v50 = vld [vmem:[#allocation1 + $0x2] ss:$4 sm:$0xff] }
 0x857   :  { %3600 = vrot.lane.b32.xlu0 %v3599_v50, %s4239_s20  ;;  %3604 = vst.sshfl [vmem:[#allocation1] sm:$0xff pattern:$0x73625140] %v5363_v2 }
 0x85b   :  { %v3473_v61 = vpop.permute.xlu0 %3472 }
 0x85c   :  { %3475 = vst.msk [vmem:[#allocation4 + $0x1] sm:$0x1] %vm3465_vm1, %v3473_v61 }
 0x85e   :  { %v3606_v14 = vld [vmem:[#allocation1 + $0x2] ss:$4 sm:$0xff] }
 0x85f   :  { %v4044_v63 = vrot.slane %v3606_v14, 9  ;;  %3613 = vst.sshfl [vmem:[#allocation1] sm:$0xff pattern:$0x73625140] %v5363_v2 }
 0x861   :  { %3609 = vrot.lane.b32.xlu0 %v4044_v63, %s4241_s21 }
 0x863   :  { %v3480_v39 = vpop.permute.xlu0 %3479  ;;  %v3507_v43 = vpop.permute.xlu2 %3506 }
 0x864   :  { %3483 = vst.msk [vmem:[#allocation4] sm:$0x1] %vm3482_vm2, %v3480_v39 }
 0x866   :  { %v3615_v42 = vld [vmem:[#allocation1 + $0x2] ss:$4 sm:$0xff] }
 0x867   :  { %v4045_v20 = vrot.slane %v3615_v42, 9  ;;  %3622 = vst.sshfl [vmem:[#allocation1] sm:$0xff pattern:$0x73625140] %v5363_v2 }
 0x869   :  { %3618 = vrot.lane.b32.xlu1 %v4045_v20, %s4240_s10  ;;  %v3488_v12 = vpop.permute.xlu1 %3487 }
 0x86a   :  { %3490 = vst.msk [vmem:[#allocation4 + $0x1] sm:$0x1] %vm3482_vm2, %v3488_v12 }
 0x86b   :  { %3509 = vst.msk [vmem:[#allocation4 + $0x1] sm:$0x1] %vm3499_vm3, %v3507_v43  ;;  %v3514_v5 = vpop.permute.xlu2 %3513 }
 0x86e   :  { %v3624_v37 = vld [vmem:[#allocation1 + $0x3] ss:$4 sm:$0xff] }
 0x86f   :  { %3629 = vst.sshfl [vmem:[#allocation1] sm:$0xff pattern:$0x73625140] %v5363_v2 }
 0x871   :  { %3625 = vrot.lane.b32.xlu1 %v3624_v37, %s4242_s22 }
 0x873   :  { %v3497_v4 = vpop.permute.xlu1 %3496 }
 0x874   :  { %3500 = vst.msk [vmem:[#allocation4] sm:$0x1] %vm3499_vm3, %v3497_v4 }
 0x875   :  { %3517 = vst.msk [vmem:[#allocation4] sm:$0x1] %vm3516_vm4, %v3514_v5 }
 0x876   :  { %v3631_v9 = vld [vmem:[#allocation1 + $0x3] ss:$4 sm:$0xff] }
 0x877   :  { %3632 = vrot.lane.b32.xlu2 %v3631_v9, %s4241_s21  ;;  %3636 = vst.sshfl [vmem:[#allocation1] sm:$0xff pattern:$0x73625140] %v5363_v2 }
 0x879   :  { %3540 = vrot.lane.b32.xlu1 %v4041_v0, %s4242_s22 }
 0x87e   :  { %v3638_v13 = vld [vmem:[#allocation1 + $0x3] ss:$4 sm:$0xff] }
 0x87f   :  { %v4046_v11 = vrot.slane %v3638_v13, 9  ;;  %3645 = vst.sshfl [vmem:[#allocation1] sm:$0xff pattern:$0x73625140] %v5363_v2  ;;  %v3684_v2 = vld [vmem:[%s5556_s9 + $0xe8] sm:$0xff]  ;;  %s4243_s9 = smov [#allocation14]  }
 0x880   :  { %3715 = vmatpush.msra.mxu3 %v3684_v2  ;;  %v3752_v2 = vld [vmem:[#allocation11] sm:$0x1]  ;;  %s3781_s6 = sshll.u32 %s4243_s9, 4  ;;  %s3782_s6 = int_to_ptr.vmem [resolvable:$true] %s3781_s6 }
 0x881   :  { %3641 = vrot.lane.b32.xlu2 %v4046_v11, %s4236_s19 }
 0x882   :  { %3716 = vmatpush.msra.mxu3 %v3683_v6 }
 0x884   :  { %3717 = vmatpush.msra.mxu3 %v3682_v7 }
 0x886   :  { %v3647_v17 = vld [vmem:[#allocation1 + $0x3] ss:$4 sm:$0xff]  ;;  %3718 = vmatpush.msra.mxu3 %v3681_v29 }
 0x887   :  { %v4047_v52 = vrot.slane %v3647_v17, 9 }
 0x888   :  { %3719 = vmatpush.msra.mxu3 %v3680_v41 }
 0x889   :  { %v3562_v18 = vpop.permute.xlu2 %3561  ;;  %3650 = vrot.lane.b32.xlu0 %v4047_v52, %s4242_s22  ;;  %v3522_v55 = vpop.permute.xlu0 %3521 }
 0x88a   :  { %3564 = vst.msk [vmem:[#allocation4 + $0x2] sm:$0x1] %vm3448_vm0, %v3562_v18  ;;  %3720 = vmatpush.msra.mxu3 %v3679_v45 }
 0x88b   :  { %3524 = vst.msk [vmem:[#allocation4 + $0x1] sm:$0x1] %vm3516_vm4, %v3522_v55 }
 0x88c   :  { %3721 = vmatpush.msra.mxu3 %v3678_v51 }
 0x88e   :  { %3722 = vmatpush.msra.mxu3 %v3677_v53 }
 0x890   :  { %3723 = vmatpush.msra.mxu3 %v3676_v34 }
 0x892   :  { %3724 = vmatpush.msra.mxu3 %v3675_v16 }
 0x893   :  { %v3531_v3 = vpop.permute.xlu0 %3530 }
 0x894   :  { %3534 = vst.msk [vmem:[#allocation4] sm:$0x1] %vm3533_vm5, %v3531_v3  ;;  %3725 = vmatpush.msra.mxu3 %v3674_v62 }
 0x896   :  { %3726 = vmatpush.msra.mxu3 %v3673_v59 }
 0x898   :  { %3727 = vmatpush.msra.mxu3 %v3672_v60 }
 0x89a   :  { %3728 = vmatpush.msra.mxu3 %v3671_v22 }
 0x8a3   :  { %v3587_v10 = vpop.permute.xlu2 %3586 }
 0x8a9   :  { %v3569_v24 = vpop.permute.xlu1 %3568 }
 0x8aa   :  { %3571 = vst.msk [vmem:[#allocation4 + $0x3] sm:$0x1] %vm3448_vm0, %v3569_v24 }
 0x8ab   :  { %3589 = vst.msk [vmem:[#allocation4 + $0x3] sm:$0x1] %vm3465_vm1, %v3587_v10  ;;  %v3594_v26 = vpop.permute.xlu2 %3593 }
 0x8b3   :  { %v3578_v44 = vpop.permute.xlu1 %3577 }
 0x8b4   :  { %3580 = vst.msk [vmem:[#allocation4 + $0x2] sm:$0x1] %vm3465_vm1, %v3578_v44 }
 0x8b5   :  { %3596 = vst.msk [vmem:[#allocation4 + $0x2] sm:$0x1] %vm3482_vm2, %v3594_v26 }
 0x8c9   :  { %v3601_v27 = vpop.permute.xlu0 %3600 }
 0x8ca   :  { %3603 = vst.msk [vmem:[#allocation4 + $0x3] sm:$0x1] %vm3482_vm2, %v3601_v27 }
 0x8d1   :  { %v3633_v46 = vpop.permute.xlu2 %3632 }
 0x8d3   :  { %v3610_v49 = vpop.permute.xlu0 %3609 }
 0x8d4   :  { %3612 = vst.msk [vmem:[#allocation4 + $0x2] sm:$0x1] %vm3499_vm3, %v3610_v49  ;;  %v4067_v49 = vld [vmem:[#allocation13] ss:$0 sm:$0xff] }
 0x8db   :  { %v3619_v21 = vpop.permute.xlu1 %3618  ;;  %v3642_v58 = vpop.permute.xlu2 %3641 }
 0x8dc   :  { %3621 = vst.msk [vmem:[#allocation4 + $0x3] sm:$0x1] %vm3499_vm3, %v3619_v21 }
 0x8dd   :  { %3635 = vst.msk [vmem:[#allocation4 + $0x3] sm:$0x1] %vm3516_vm4, %v3633_v46 }
 0x8e3   :  { %v3626_v56 = vpop.permute.xlu1 %3625 }
 0x8e4   :  { %3628 = vst.msk [vmem:[#allocation4 + $0x2] sm:$0x1] %vm3516_vm4, %v3626_v56 }
 0x8e5   :  { %3644 = vst.msk [vmem:[#allocation4 + $0x2] sm:$0x1] %vm3533_vm5, %v3642_v58 }
 0x8eb   :  { %v3541_v15 = vpop.permute.xlu1 %3540 }
 0x8ec   :  { %3543 = vst.msk [vmem:[#allocation4 + $0x1] sm:$0x1] %vm3533_vm5, %v3541_v15 }
 0x8fb   :  { %v3651_v50 = vpop.permute.xlu0 %3650 }
 0x8fc   :  { %3653 = vst.msk [vmem:[#allocation4 + $0x3] sm:$0x1] %vm3533_vm5, %v3651_v50 }
 0x903   :  { %v3654_v61 = vld [vmem:[#allocation4] sm:$0xf] }
 0x904   :  { %3688 = vst [vmem:[#allocation1] ss:$4 sm:$0xff] %v3654_v61 }
 0x90b   :  { %v3689_v14 = vld.sshfl [vmem:[#allocation1] sm:$0xff pattern:$0x73625140]  ;;  %v3690_v63 = vld.sshfl [vmem:[#allocation1 + $0x8] sm:$0xff pattern:$0x73625140] }
 0x90c   :  { %3709 = vmatmul.f32.vlgmr.msra.gmra.mxu2 %v3689_v14  ;;  %3729 = vmatmul.f32.vlgmr.msra.gmra.mxu3 %v3690_v63 }
 0x98f   :  { %v3710_v39 = vpop.f32.mrf.mxu2  ;;  %v3730_v42 = vpop.f32.mrf.mxu3 }
 0x990   :  { %v3731_v20 = vadd.f32 %v3730_v42, %v3710_v39 }
 0x992   :  { %v3734_v12 = vsel %vm3733_vm6, %v3731_v20, 0.0 }
 0x993   :  { %v3735_v43 = vrot.slane %v3734_v12, 4 }
 0x995   :  { %v3736_v37 = vadd.f32 %v3735_v43, %v3734_v12 }
 0x997   :  { %v3737_v4 = vrot.slane %v3736_v37, 2 }
 0x999   :  { %v3738_v5 = vadd.f32 %v3737_v4, %v3736_v37 }
 0x99b   :  { %v3739_v9 = vrot.slane %v3738_v5, 1 }
 0x99d   :  { %v3740_v0 = vadd.f32 %v3739_v9, %v3738_v5 }
 0x99f   :  { %v3741_v13 = vmul.f32 0.5, %v3740_v0 }
 0x9a1   :  { %v3742_v11 = vsub.f32 %v3731_v20, %v3741_v13 }
 0x9a3   :  { %v3743_v17 = vmul.f32 %v3742_v11, %v3742_v11 }
 0x9a5   :  { %v3744_v52 = vsel %vm3733_vm6, %v3743_v17, 0.0 }
 0x9a6   :  { %v3745_v18 = vrot.slane %v3744_v52, 4 }
 0x9a8   :  { %v3746_v55 = vadd.f32 %v3745_v18, %v3744_v52 }
 0x9aa   :  { %v3747_v3 = vrot.slane %v3746_v55, 2 }
 0x9ac   :  { %v3748_v24 = vadd.f32 %v3747_v3, %v3746_v55 }
 0x9ae   :  { %v3749_v10 = vrot.slane %v3748_v24, 1 }
 0x9b0   :  { %v3750_v44 = vadd.f32 %v3749_v10, %v3748_v24 }
 0x9b2   :  { %v3751_v26 = vmul.f32 0.5, %v3750_v44 }
 0x9b4   :  { %v3753_v27 = vadd.f32 1e-05, %v3751_v26 }
 0x9b6   :  { %4074 = vrsqrt.f32 %v3753_v27  ;;  %vm3760_vm8 = vweird.f32 %v3753_v27 }
 0x9bc   :  { %v4075_v48 = vpop.eup %4074 }
 0x9bd   :  { %v3755_v30 = vmul.f32 %v4075_v48, %v3753_v27  ;;  %vm3761_vm7 = vweird.f32 %v4075_v48 }
 0x9be   :  { %vm3762_vm9 = vmor %vm3760_vm8, %vm3761_vm7 }
 0x9bf   :  { %v3756_v1 = vmul.f32 %v4075_v48, %v3755_v30 }
 0x9c1   :  { %v3757_v31 = vmul.f32 0.5, %v3756_v1 }
 0x9c3   :  { %v3758_v28 = vsub.f32 1.5, %v3757_v31 }
 0x9c5   :  { %v3759_v32 = vmul.f32 %v4075_v48, %v3758_v28 }
 0x9c7   :  { %v3763_v6 = vsel %vm3762_vm9, %v4075_v48, %v3759_v32 }
 0x9c8   :  { %v3764_v47 = vmul.f32 %v3763_v6, %v3752_v2 }
 0x9ca   :  { %v3766_v7 = vperm.slane %v3764_v47, 0 }
 0x9cc   :  { %v3768_v35 = vmul.f32 %v3766_v7, %v3742_v11 }
 0x9ce   :  { %v3773_v29 = vadd.f32 %v4067_v49, %v3768_v35 }
 0x9d0   :  { %v3774_v40 = vmax.f32 %v3773_v29, 0.0 }
 0x9d2   :  { %3775 = vst.msk [vmem:[#allocation14] sm:$0x3] %vm3733_vm6, %v3774_v40 }
 0x9d3   :  { %3786 = dma.vmem_to_hbm [thread:$0]  %s3782_s6, 32, %s3784_s28, [#allocation7]  }
 0x9d4   :  { %4226 = dma.done.wait [#allocation7], 32  }
 0x9d5   :  { %4227 = vsyncadd [#allocation7], 4294967264 }
 0x9d6   :  { %3791 = vsyncpa [#allocation6], 1 }
 0x9d7   :  { %3792 = vsyncpa [#allocation9], 1 }
 0x9d8   :  { %3793 = vsyncpa [#allocation12], 1 }
 0x9d9   :  { %3794 = vsyncpa [#allocation7], 1 }

</bundles_post_ra>
